<compile_context>
chip_gen: v6e
topology: v6e:2x2x1
jax: 0.10.0
libtpu: 0.0.40
codegen_flags: <defaults>
</compile_context>

<pallas_src>
import functools
import math

import jax
import jax.numpy as jnp
from jax.experimental import pallas as pl
from jax.experimental.pallas import tpu as pltpu


INPUT_SIZE = 100
HIDDEN = 128
NUM_LAYERS = 3
OUT_DIM = 2
D_PAD = 128                     # layer-0 input padded to a full lane tile
MAX_TIME_BLOCK = 128            # tc*B ~= 256 at B=2 -> fills v6e/v7x MXU rows


def _pick_time_block(T, B, max_tc=MAX_TIME_BLOCK):
    """Time-block size: whole sequence if small, else an aligned divisor."""
    if T <= max_tc:
        return T
    for tc in range(max_tc, max_tc // 2, -1):
        if T % tc == 0 and (tc * B) % 8 == 0:     # exact, sublane-aligned blocks
            return tc
    return max_tc                 # ragged tail handled by predicated state updates


def _fused_lang_model_kernel(x_ref, w_ih_ref, w_hh_ref, b_ref, wo_ref, bo_ref,
                             out_ref, h_sc, c_sc, xproj_sc,
                             *, batch, t_total, t_block, masked):
    """All 3 LSTM layers + output head. Grid axis 0 = time blocks (sequential).

    x_ref    : (tc*B, 128) bf16   current time slab, time folded into sublanes
    w_ih_ref : (L, 128, 4H) bf16  input->gates weights (gate order i,f,o,g)
    w_hh_ref : (L, 128, 4H) bf16  hidden->gates weights (gate order i,f,o,g)
    b_ref    : (L, 1, 4H)   f32   b_ih + b_hh (gate order i,f,o,g)
    wo_ref   : (H, 2) f32, bo_ref: (1, 2) f32
    out_ref  : (B, 2) f32         written on the last time block only
    h_sc,c_sc: (L, B, H) f32      recurrent state, persists across grid steps
    xproj_sc : (tc*B, 4H) f32     per-block layer-0 input projection
    """
    tb = pl.program_id(0)
    H = HIDDEN
    B = batch

    @pl.when(tb == 0)
    def _():
        # h0 = c0 = 0, matching the module's explicitly zeroed initial state.
        h_sc[...] = jnp.zeros_like(h_sc)
        c_sc[...] = jnp.zeros_like(c_sc)

    # Layer-0 input projection for the WHOLE time block as one dense matmul
    # (bias folded in). Padded feature lanes hit zero weight rows; padded time
    # rows are computed but never committed to state.
    xproj_sc[...] = (
        jnp.dot(x_ref[...], w_ih_ref[0], preferred_element_type=jnp.float32)
        + b_ref[0])

    # Hoisted per-layer biases (broadcast once; JAX does not CSE broadcasts).
    b1 = jnp.broadcast_to(b_ref[1], (B, 4 * H))
    b2 = jnp.broadcast_to(b_ref[2], (B, 4 * H))

    def lstm_cell(layer, gates):
        # Packed gate order [i, f, o, g]: one sigmoid over 3H, one tanh over H.
        sig = jax.nn.sigmoid(gates[:, :3 * H])
        i_g = sig[:, 0 * H:1 * H]
        f_g = sig[:, 1 * H:2 * H]
        o_g = sig[:, 2 * H:3 * H]
        g_g = jnp.tanh(gates[:, 3 * H:])
        c_new = f_g * c_sc[layer] + i_g * g_g
        h_new = o_g * jnp.tanh(c_new)
        return h_new, c_new

    def step(t, valid=None):
        # ---- layer 0: precomputed x-projection slice + recurrent matmul
        g0 = xproj_sc[pl.ds(t * B, B), :] + jnp.dot(
            h_sc[0].astype(jnp.bfloat16), w_hh_ref[0],
            preferred_element_type=jnp.float32)
        h0, c0 = lstm_cell(0, g0)
        # ---- layer 1
        g1 = (jnp.dot(h0.astype(jnp.bfloat16), w_ih_ref[1],
                      preferred_element_type=jnp.float32)
              + jnp.dot(h_sc[1].astype(jnp.bfloat16), w_hh_ref[1],
                        preferred_element_type=jnp.float32) + b1)
        h1, c1 = lstm_cell(1, g1)
        # ---- layer 2
        g2 = (jnp.dot(h1.astype(jnp.bfloat16), w_ih_ref[2],
                      preferred_element_type=jnp.float32)
              + jnp.dot(h_sc[2].astype(jnp.bfloat16), w_hh_ref[2],
                        preferred_element_type=jnp.float32) + b2)
        h2, c2 = lstm_cell(2, g2)

        if valid is None:
            h_sc[0], c_sc[0] = h0, c0
            h_sc[1], c_sc[1] = h1, c1
            h_sc[2], c_sc[2] = h2, c2
        else:
            # Ragged-tail predication via VPU selects (no per-step scf.if).
            h_sc[0] = jnp.where(valid, h0, h_sc[0])
            c_sc[0] = jnp.where(valid, c0, c_sc[0])
            h_sc[1] = jnp.where(valid, h1, h_sc[1])
            c_sc[1] = jnp.where(valid, c1, c_sc[1])
            h_sc[2] = jnp.where(valid, h2, h_sc[2])
            c_sc[2] = jnp.where(valid, c2, c_sc[2])

    for t in range(t_block):                 # static, fully unrolled time loop
        if masked:
            step(t, valid=(tb * t_block + t) < t_total)
        else:
            step(t)

    @pl.when(tb == pl.num_programs(0) - 1)
    def _():
        # pred = lang_feature[:, -1, :] @ W_out^T + b_out
        out_ref[...] = (
            jnp.dot(h_sc[NUM_LAYERS - 1], wo_ref[...],
                    preferred_element_type=jnp.float32) + bo_ref[...])


@jax.jit
def lang_model_forward(params, text):
    """text: (B, T, input_size) float32, batch-first like the PyTorch module."""
    B, T, D = text.shape
    tc = _pick_time_block(T, B)
    n_blocks = pl.cdiv(T, tc)
    t_pad = n_blocks * tc

    # One tiny fused XLA pass: cast to bf16, lay out time-major, pad features
    # 100->128 and the ragged time tail, and fold time into the sublane axis so
    # the kernel sees a dense (tc*B, 128) slab per grid step.
    x = jnp.transpose(text.astype(jnp.bfloat16), (1, 0, 2))       # (T, B, D)
    x = jnp.pad(x, ((0, t_pad - T), (0, 0), (0, D_PAD - D)))      # (T_pad, B, 128)
    x = x.reshape(t_pad * B, D_PAD)                               # (T_pad*B, 128)

    kernel = functools.partial(_fused_lang_model_kernel, batch=B,
                               t_total=T, t_block=tc, masked=(t_pad != T))
    return pl.pallas_call(
        kernel,
        out_shape=jax.ShapeDtypeStruct((B, OUT_DIM), jnp.float32),
        grid_spec=pltpu.PrefetchScalarGridSpec(
            num_scalar_prefetch=0,
            grid=(n_blocks,),
            in_specs=[
                pl.BlockSpec((tc * B, D_PAD), lambda i: (i, 0)),
                pl.BlockSpec((NUM_LAYERS, D_PAD, 4 * HIDDEN), lambda i: (0, 0, 0)),
                pl.BlockSpec((NUM_LAYERS, HIDDEN, 4 * HIDDEN), lambda i: (0, 0, 0)),
                pl.BlockSpec((NUM_LAYERS, 1, 4 * HIDDEN), lambda i: (0, 0, 0)),
                pl.BlockSpec((HIDDEN, OUT_DIM), lambda i: (0, 0)),
                pl.BlockSpec((1, OUT_DIM), lambda i: (0, 0)),
            ],
            out_specs=pl.BlockSpec((B, OUT_DIM), lambda i: (0, 0)),
            scratch_shapes=[
                pltpu.VMEM((NUM_LAYERS, B, HIDDEN), jnp.float32),   # h state
                pltpu.VMEM((NUM_LAYERS, B, HIDDEN), jnp.float32),   # c state
                pltpu.VMEM((tc * B, 4 * HIDDEN), jnp.float32),      # layer-0 proj
            ],
        ),
        compiler_params=pltpu.CompilerParams(
            dimension_semantics=("arbitrary",),       # recurrent over time
        ),
    )(x, params["w_ih"], params["w_hh"], params["b"],
      params["out_w"], params["out_b"])


def init_raw_params(key, input_size=INPUT_SIZE, hidden=HIDDEN,
                    num_layers=NUM_LAYERS, out_dim=OUT_DIM):
    """Raw PyTorch-layout parameters (LSTM default init + the module's head re-init)."""
    k = 1.0 / math.sqrt(hidden)
    layers = []
    for layer in range(num_layers):
        d_in = input_size if layer == 0 else hidden
        key, k1, k2, k3, k4 = jax.random.split(key, 5)
        layers.append({
            "w_ih": jax.random.uniform(k1, (4 * hidden, d_in), jnp.float32, -k, k),
            "w_hh": jax.random.uniform(k2, (4 * hidden, hidden), jnp.float32, -k, k),
            "b_ih": jax.random.uniform(k3, (4 * hidden,), jnp.float32, -k, k),
            "b_hh": jax.random.uniform(k4, (4 * hidden,), jnp.float32, -k, k),
        })
    key, ko = jax.random.split(key)
    n = hidden * out_dim                       # matches nn.Linear weight.numel()
    out_w = jax.random.normal(ko, (out_dim, hidden), jnp.float32) * math.sqrt(2.0 / n)
    out_b = jnp.zeros((out_dim,), jnp.float32)
    return {"lstm": layers, "out_w": out_w, "out_b": out_b}


def pack_params(raw, hidden=HIDDEN, out_dim=OUT_DIM):
    """Kernel-layout params: split w_ih/w_hh, pad 100->128, gate order [i,f,o,g]."""
    H = hidden
    perm = jnp.concatenate([jnp.arange(0, H), jnp.arange(H, 2 * H),
                            jnp.arange(3 * H, 4 * H), jnp.arange(2 * H, 3 * H)])
    w_ih_stack, w_hh_stack, b_stack = [], [], []
    for lyr in raw["lstm"]:
        d_in = lyr["w_ih"].shape[1]
        w_ih_t = jnp.zeros((D_PAD, 4 * H), jnp.float32).at[:d_in].set(lyr["w_ih"].T)
        w_hh_t = lyr["w_hh"].T
        b = (lyr["b_ih"] + lyr["b_hh"]).reshape(1, 4 * H)
        w_ih_stack.append(w_ih_t[:, perm])
        w_hh_stack.append(w_hh_t[:, perm])
        b_stack.append(b[:, perm])
    return {
        "w_ih": jnp.stack(w_ih_stack).astype(jnp.bfloat16),   # (3, 128, 512) bf16
        "w_hh": jnp.stack(w_hh_stack).astype(jnp.bfloat16),   # (3, 128, 512) bf16
        "b": jnp.stack(b_stack),                              # (3, 1, 512)  f32
        "out_w": raw["out_w"].T,                              # (128, 2)     f32
        "out_b": raw["out_b"].reshape(1, out_dim),            # (1, 2)       f32
    }


def _reference_forward(raw, text):
    """Pure-JAX reference (PyTorch gate order) with the kernel's bf16 rounding."""
    B, T, D = text.shape
    H = HIDDEN
    x = text.astype(jnp.bfloat16).astype(jnp.float32)
    h = [jnp.zeros((B, H), jnp.float32) for _ in range(NUM_LAYERS)]
    c = [jnp.zeros((B, H), jnp.float32) for _ in range(NUM_LAYERS)]
    for t in range(T):
        layer_in = x[:, t, :]
        for l, lyr in enumerate(raw["lstm"]):
            w_ih = lyr["w_ih"].astype(jnp.bfloat16).astype(jnp.float32)
            w_hh = lyr["w_hh"].astype(jnp.bfloat16).astype(jnp.float32)
            b = lyr["b_ih"] + lyr["b_hh"]
            h_in = h[l].astype(jnp.bfloat16).astype(jnp.float32)
            gates = layer_in @ w_ih.T + h_in @ w_hh.T + b
            i_g = jax.nn.sigmoid(gates[:, 0 * H:1 * H])
            f_g = jax.nn.sigmoid(gates[:, 1 * H:2 * H])
            g_g = jnp.tanh(gates[:, 2 * H:3 * H])
            o_g = jax.nn.sigmoid(gates[:, 3 * H:4 * H])
            c[l] = f_g * c[l] + i_g * g_g
            h[l] = o_g * jnp.tanh(c[l])
            layer_in = h[l].astype(jnp.bfloat16).astype(jnp.float32)
    return h[-1] @ raw["out_w"].T + raw["out_b"]


if __name__ == "__main__":
    key = jax.random.PRNGKey(0)
    k_param, k_data = jax.random.split(key)

    B, T = 2, 8
    raw = init_raw_params(k_param)
    params = pack_params(raw)
    text = jax.random.normal(k_data, (B, T, INPUT_SIZE), jnp.float32)

    pred = lang_model_forward(params, text)
    jax.block_until_ready(pred)
    assert pred.shape == (B, OUT_DIM)

    ref = _reference_forward(raw, text)
    assert jnp.allclose(pred, ref, atol=2e-2, rtol=2e-2), (pred, ref)
    print("KERNEL_OK")
</pallas_src>

<mosaic_0001>
module attributes {stable_mosaic.version = 11 : i64} {
  func.func @_fused_lang_model_kernel(%arg0: i32, %arg1: memref<16x128xbf16, #tpu.memory_space<vmem>>, %arg2: memref<3x128x512xbf16, #tpu.memory_space<vmem>>, %arg3: memref<3x128x512xbf16, #tpu.memory_space<vmem>>, %arg4: memref<3x1x512xf32, #tpu.memory_space<vmem>>, %arg5: memref<128x2xf32, #tpu.memory_space<vmem>>, %arg6: memref<1x2xf32, #tpu.memory_space<vmem>>, %arg7: memref<2x2xf32, #tpu.memory_space<vmem>>, %arg8: memref<3x2x128xf32, #tpu.memory_space<vmem>>, %arg9: memref<3x2x128xf32, #tpu.memory_space<vmem>>, %arg10: memref<16x512xf32, #tpu.memory_space<vmem>>) attributes {dimension_semantics = [#tpu.dimension_semantics<arbitrary>], iteration_bounds = array<i64: 1>, scalar_prefetch = 0 : i64, scratch_operands = 3 : i64, tpu.core_type = #tpu.core_type<tc>, window_params = [{transform_indices = @transform_0, window_bounds = array<i64: 16, 128>}, {pipeline_mode = #tpu.pipeline_mode<synchronous>, transform_indices = @transform_1, window_bounds = array<i64: 3, 128, 512>}, {pipeline_mode = #tpu.pipeline_mode<synchronous>, transform_indices = @transform_2, window_bounds = array<i64: 3, 128, 512>}, {pipeline_mode = #tpu.pipeline_mode<synchronous>, transform_indices = @transform_3, window_bounds = array<i64: 3, 1, 512>}, {pipeline_mode = #tpu.pipeline_mode<synchronous>, transform_indices = @transform_4, window_bounds = array<i64: 128, 2>}, {pipeline_mode = #tpu.pipeline_mode<synchronous>, transform_indices = @transform_5, window_bounds = array<i64: 1, 2>}, {pipeline_mode = #tpu.pipeline_mode<synchronous>, transform_indices = @transform_6, window_bounds = array<i64: 2, 2>}]} {
    %c0_i32 = arith.constant 0 : i32
    %0 = arith.cmpi eq, %arg0, %c0_i32 : i32
    %1 = arith.extui %0 : i1 to i32
    %c0_i32_0 = arith.constant 0 : i32
    %2 = arith.cmpi ne, %1, %c0_i32_0 : i32
    scf.if %2 {
      %cst_498 = arith.constant 0.000000e+00 : f32
      %855 = vector.broadcast %cst_498 : f32 to vector<3x2x128xf32>
      %c0_499 = arith.constant 0 : index
      %c0_500 = arith.constant 0 : index
      %c0_501 = arith.constant 0 : index
      %856 = vector.load %arg8[%c0_499, %c0_500, %c0_501] : memref<3x2x128xf32, #tpu.memory_space<vmem>>, vector<3x2x128xf32>
      tpu.vector_store %arg8[%c0_499, %c0_500, %c0_501], %855 {strides = array<i32>} : memref<3x2x128xf32, #tpu.memory_space<vmem>>, vector<3x2x128xf32>,
      %cst_502 = arith.constant 0.000000e+00 : f32
      %857 = vector.broadcast %cst_502 : f32 to vector<3x2x128xf32>
      %c0_503 = arith.constant 0 : index
      %c0_504 = arith.constant 0 : index
      %c0_505 = arith.constant 0 : index
      %858 = vector.load %arg9[%c0_503, %c0_504, %c0_505] : memref<3x2x128xf32, #tpu.memory_space<vmem>>, vector<3x2x128xf32>
      tpu.vector_store %arg9[%c0_503, %c0_504, %c0_505], %857 {strides = array<i32>} : memref<3x2x128xf32, #tpu.memory_space<vmem>>, vector<3x2x128xf32>,
    } else {
    }
    %c0 = arith.constant 0 : index
    %c0_1 = arith.constant 0 : index
    %3 = vector.load %arg1[%c0, %c0_1] : memref<16x128xbf16, #tpu.memory_space<vmem>>, vector<16x128xbf16>
    %c0_2 = arith.constant 0 : index
    %c0_3 = arith.constant 0 : index
    %c0_4 = arith.constant 0 : index
    %4 = vector.load %arg2[%c0_2, %c0_3, %c0_4] : memref<3x128x512xbf16, #tpu.memory_space<vmem>>, vector<1x128x512xbf16>
    %5 = vector.shape_cast %4 : vector<1x128x512xbf16> to vector<128x512xbf16>
    %cst = arith.constant dense<0.000000e+00> : vector<16x512xf32>
    %6 = tpu.matmul %3, %5, %cst {dimension_numbers = #tpu.dot_dimension_numbers<[1], [0], [0], [1], [0, 0, 1, 1], [], []>} : vector<16x128xbf16>, vector<128x512xbf16>, vector<16x512xf32> -> vector<16x512xf32>
    %c0_5 = arith.constant 0 : index
    %c0_6 = arith.constant 0 : index
    %c0_7 = arith.constant 0 : index
    %7 = vector.load %arg4[%c0_5, %c0_6, %c0_7] : memref<3x1x512xf32, #tpu.memory_space<vmem>>, vector<1x1x512xf32>
    %8 = vector.shape_cast %7 : vector<1x1x512xf32> to vector<1x512xf32>
    %9 = vector.broadcast %8 : vector<1x512xf32> to vector<16x512xf32>
    %10 = arith.addf %6, %9 : vector<16x512xf32>
    %c0_8 = arith.constant 0 : index
    %c0_9 = arith.constant 0 : index
    %11 = vector.load %arg10[%c0_8, %c0_9] : memref<16x512xf32, #tpu.memory_space<vmem>>, vector<16x512xf32>
    tpu.vector_store %arg10[%c0_8, %c0_9], %10 {strides = array<i32>} : memref<16x512xf32, #tpu.memory_space<vmem>>, vector<16x512xf32>,
    %c1 = arith.constant 1 : index
    %c0_10 = arith.constant 0 : index
    %c0_11 = arith.constant 0 : index
    %12 = vector.load %arg4[%c1, %c0_10, %c0_11] : memref<3x1x512xf32, #tpu.memory_space<vmem>>, vector<1x1x512xf32>
    %13 = vector.shape_cast %12 : vector<1x1x512xf32> to vector<1x512xf32>
    %14 = vector.shape_cast %13 : vector<1x512xf32> to vector<1x512xf32>
    %15 = vector.broadcast %14 : vector<1x512xf32> to vector<2x512xf32>
    %c2 = arith.constant 2 : index
    %c0_12 = arith.constant 0 : index
    %c0_13 = arith.constant 0 : index
    %16 = vector.load %arg4[%c2, %c0_12, %c0_13] : memref<3x1x512xf32, #tpu.memory_space<vmem>>, vector<1x1x512xf32>
    %17 = vector.shape_cast %16 : vector<1x1x512xf32> to vector<1x512xf32>
    %18 = vector.shape_cast %17 : vector<1x512xf32> to vector<1x512xf32>
    %19 = vector.broadcast %18 : vector<1x512xf32> to vector<2x512xf32>
    %c0_14 = arith.constant 0 : index
    %c0_15 = arith.constant 0 : index
    %20 = vector.load %arg10[%c0_14, %c0_15] : memref<16x512xf32, #tpu.memory_space<vmem>>, vector<2x512xf32>
    %c0_16 = arith.constant 0 : index
    %c0_17 = arith.constant 0 : index
    %c0_18 = arith.constant 0 : index
    %21 = vector.load %arg8[%c0_16, %c0_17, %c0_18] : memref<3x2x128xf32, #tpu.memory_space<vmem>>, vector<1x2x128xf32>
    %22 = vector.shape_cast %21 : vector<1x2x128xf32> to vector<2x128xf32>
    %23 = arith.truncf %22 : vector<2x128xf32> to vector<2x128xbf16>
    %c0_19 = arith.constant 0 : index
    %c0_20 = arith.constant 0 : index
    %c0_21 = arith.constant 0 : index
    %24 = vector.load %arg3[%c0_19, %c0_20, %c0_21] : memref<3x128x512xbf16, #tpu.memory_space<vmem>>, vector<1x128x512xbf16>
    %25 = vector.shape_cast %24 : vector<1x128x512xbf16> to vector<128x512xbf16>
    %cst_22 = arith.constant dense<0.000000e+00> : vector<2x512xf32>
    %26 = tpu.matmul %23, %25, %cst_22 {dimension_numbers = #tpu.dot_dimension_numbers<[1], [0], [0], [1], [0, 0, 1, 1], [], []>} : vector<2x128xbf16>, vector<128x512xbf16>, vector<2x512xf32> -> vector<2x512xf32>
    %27 = arith.addf %20, %26 : vector<2x512xf32>
    %28 = vector.extract_strided_slice %27 {offsets = [0, 0], sizes = [2, 384], strides = [1, 1]} : vector<2x512xf32> to vector<2x384xf32>
    %29 = arith.negf %28 : vector<2x384xf32>
    %30 = math.exp %29 : vector<2x384xf32>
    %cst_23 = arith.constant 1.000000e+00 : f32
    %31 = vector.broadcast %cst_23 : f32 to vector<2x384xf32>
    %32 = arith.addf %31, %30 : vector<2x384xf32>
    %33 = arith.divf %31, %32 : vector<2x384xf32>
    %34 = vector.extract_strided_slice %33 {offsets = [0, 0], sizes = [2, 128], strides = [1, 1]} : vector<2x384xf32> to vector<2x128xf32>
    %35 = vector.extract_strided_slice %33 {offsets = [0, 128], sizes = [2, 128], strides = [1, 1]} : vector<2x384xf32> to vector<2x128xf32>
    %36 = vector.extract_strided_slice %33 {offsets = [0, 256], sizes = [2, 128], strides = [1, 1]} : vector<2x384xf32> to vector<2x128xf32>
    %37 = vector.extract_strided_slice %27 {offsets = [0, 384], sizes = [2, 128], strides = [1, 1]} : vector<2x512xf32> to vector<2x128xf32>
    %38 = math.tanh %37 : vector<2x128xf32>
    %c0_24 = arith.constant 0 : index
    %c0_25 = arith.constant 0 : index
    %c0_26 = arith.constant 0 : index
    %39 = vector.load %arg9[%c0_24, %c0_25, %c0_26] : memref<3x2x128xf32, #tpu.memory_space<vmem>>, vector<1x2x128xf32>
    %40 = vector.shape_cast %39 : vector<1x2x128xf32> to vector<2x128xf32>
    %41 = arith.mulf %35, %40 : vector<2x128xf32>
    %42 = arith.mulf %34, %38 : vector<2x128xf32>
    %43 = arith.addf %41, %42 : vector<2x128xf32>
    %44 = math.tanh %43 : vector<2x128xf32>
    %45 = arith.mulf %36, %44 : vector<2x128xf32>
    %46 = arith.truncf %45 : vector<2x128xf32> to vector<2x128xbf16>
    %c1_27 = arith.constant 1 : index
    %c0_28 = arith.constant 0 : index
    %c0_29 = arith.constant 0 : index
    %47 = vector.load %arg2[%c1_27, %c0_28, %c0_29] : memref<3x128x512xbf16, #tpu.memory_space<vmem>>, vector<1x128x512xbf16>
    %48 = vector.shape_cast %47 : vector<1x128x512xbf16> to vector<128x512xbf16>
    %cst_30 = arith.constant dense<0.000000e+00> : vector<2x512xf32>
    %49 = tpu.matmul %46, %48, %cst_30 {dimension_numbers = #tpu.dot_dimension_numbers<[1], [0], [0], [1], [0, 0, 1, 1], [], []>} : vector<2x128xbf16>, vector<128x512xbf16>, vector<2x512xf32> -> vector<2x512xf32>
    %c1_31 = arith.constant 1 : index
    %c0_32 = arith.constant 0 : index
    %c0_33 = arith.constant 0 : index
    %50 = vector.load %arg8[%c1_31, %c0_32, %c0_33] : memref<3x2x128xf32, #tpu.memory_space<vmem>>, vector<1x2x128xf32>
    %51 = vector.shape_cast %50 : vector<1x2x128xf32> to vector<2x128xf32>
    %52 = arith.truncf %51 : vector<2x128xf32> to vector<2x128xbf16>
    %c1_34 = arith.constant 1 : index
    %c0_35 = arith.constant 0 : index
    %c0_36 = arith.constant 0 : index
    %53 = vector.load %arg3[%c1_34, %c0_35, %c0_36] : memref<3x128x512xbf16, #tpu.memory_space<vmem>>, vector<1x128x512xbf16>
    %54 = vector.shape_cast %53 : vector<1x128x512xbf16> to vector<128x512xbf16>
    %cst_37 = arith.constant dense<0.000000e+00> : vector<2x512xf32>
    %55 = tpu.matmul %52, %54, %cst_37 {dimension_numbers = #tpu.dot_dimension_numbers<[1], [0], [0], [1], [0, 0, 1, 1], [], []>} : vector<2x128xbf16>, vector<128x512xbf16>, vector<2x512xf32> -> vector<2x512xf32>
    %56 = arith.addf %49, %55 : vector<2x512xf32>
    %57 = arith.addf %56, %15 : vector<2x512xf32>
    %58 = vector.extract_strided_slice %57 {offsets = [0, 0], sizes = [2, 384], strides = [1, 1]} : vector<2x512xf32> to vector<2x384xf32>
    %59 = arith.negf %58 : vector<2x384xf32>
    %60 = math.exp %59 : vector<2x384xf32>
    %cst_38 = arith.constant 1.000000e+00 : f32
    %61 = vector.broadcast %cst_38 : f32 to vector<2x384xf32>
    %62 = arith.addf %61, %60 : vector<2x384xf32>
    %63 = arith.divf %61, %62 : vector<2x384xf32>
    %64 = vector.extract_strided_slice %63 {offsets = [0, 0], sizes = [2, 128], strides = [1, 1]} : vector<2x384xf32> to vector<2x128xf32>
    %65 = vector.extract_strided_slice %63 {offsets = [0, 128], sizes = [2, 128], strides = [1, 1]} : vector<2x384xf32> to vector<2x128xf32>
    %66 = vector.extract_strided_slice %63 {offsets = [0, 256], sizes = [2, 128], strides = [1, 1]} : vector<2x384xf32> to vector<2x128xf32>
    %67 = vector.extract_strided_slice %57 {offsets = [0, 384], sizes = [2, 128], strides = [1, 1]} : vector<2x512xf32> to vector<2x128xf32>
    %68 = math.tanh %67 : vector<2x128xf32>
    %c1_39 = arith.constant 1 : index
    %c0_40 = arith.constant 0 : index
    %c0_41 = arith.constant 0 : index
    %69 = vector.load %arg9[%c1_39, %c0_40, %c0_41] : memref<3x2x128xf32, #tpu.memory_space<vmem>>, vector<1x2x128xf32>
    %70 = vector.shape_cast %69 : vector<1x2x128xf32> to vector<2x128xf32>
    %71 = arith.mulf %65, %70 : vector<2x128xf32>
    %72 = arith.mulf %64, %68 : vector<2x128xf32>
    %73 = arith.addf %71, %72 : vector<2x128xf32>
    %74 = math.tanh %73 : vector<2x128xf32>
    %75 = arith.mulf %66, %74 : vector<2x128xf32>
    %76 = arith.truncf %75 : vector<2x128xf32> to vector<2x128xbf16>
    %c2_42 = arith.constant 2 : index
    %c0_43 = arith.constant 0 : index
    %c0_44 = arith.constant 0 : index
    %77 = vector.load %arg2[%c2_42, %c0_43, %c0_44] : memref<3x128x512xbf16, #tpu.memory_space<vmem>>, vector<1x128x512xbf16>
    %78 = vector.shape_cast %77 : vector<1x128x512xbf16> to vector<128x512xbf16>
    %cst_45 = arith.constant dense<0.000000e+00> : vector<2x512xf32>
    %79 = tpu.matmul %76, %78, %cst_45 {dimension_numbers = #tpu.dot_dimension_numbers<[1], [0], [0], [1], [0, 0, 1, 1], [], []>} : vector<2x128xbf16>, vector<128x512xbf16>, vector<2x512xf32> -> vector<2x512xf32>
    %c2_46 = arith.constant 2 : index
    %c0_47 = arith.constant 0 : index
    %c0_48 = arith.constant 0 : index
    %80 = vector.load %arg8[%c2_46, %c0_47, %c0_48] : memref<3x2x128xf32, #tpu.memory_space<vmem>>, vector<1x2x128xf32>
    %81 = vector.shape_cast %80 : vector<1x2x128xf32> to vector<2x128xf32>
    %82 = arith.truncf %81 : vector<2x128xf32> to vector<2x128xbf16>
    %c2_49 = arith.constant 2 : index
    %c0_50 = arith.constant 0 : index
    %c0_51 = arith.constant 0 : index
    %83 = vector.load %arg3[%c2_49, %c0_50, %c0_51] : memref<3x128x512xbf16, #tpu.memory_space<vmem>>, vector<1x128x512xbf16>
    %84 = vector.shape_cast %83 : vector<1x128x512xbf16> to vector<128x512xbf16>
    %cst_52 = arith.constant dense<0.000000e+00> : vector<2x512xf32>
    %85 = tpu.matmul %82, %84, %cst_52 {dimension_numbers = #tpu.dot_dimension_numbers<[1], [0], [0], [1], [0, 0, 1, 1], [], []>} : vector<2x128xbf16>, vector<128x512xbf16>, vector<2x512xf32> -> vector<2x512xf32>
    %86 = arith.addf %79, %85 : vector<2x512xf32>
    %87 = arith.addf %86, %19 : vector<2x512xf32>
    %88 = vector.extract_strided_slice %87 {offsets = [0, 0], sizes = [2, 384], strides = [1, 1]} : vector<2x512xf32> to vector<2x384xf32>
    %89 = arith.negf %88 : vector<2x384xf32>
    %90 = math.exp %89 : vector<2x384xf32>
    %cst_53 = arith.constant 1.000000e+00 : f32
    %91 = vector.broadcast %cst_53 : f32 to vector<2x384xf32>
    %92 = arith.addf %91, %90 : vector<2x384xf32>
    %93 = arith.divf %91, %92 : vector<2x384xf32>
    %94 = vector.extract_strided_slice %93 {offsets = [0, 0], sizes = [2, 128], strides = [1, 1]} : vector<2x384xf32> to vector<2x128xf32>
    %95 = vector.extract_strided_slice %93 {offsets = [0, 128], sizes = [2, 128], strides = [1, 1]} : vector<2x384xf32> to vector<2x128xf32>
    %96 = vector.extract_strided_slice %93 {offsets = [0, 256], sizes = [2, 128], strides = [1, 1]} : vector<2x384xf32> to vector<2x128xf32>
    %97 = vector.extract_strided_slice %87 {offsets = [0, 384], sizes = [2, 128], strides = [1, 1]} : vector<2x512xf32> to vector<2x128xf32>
    %98 = math.tanh %97 : vector<2x128xf32>
    %c2_54 = arith.constant 2 : index
    %c0_55 = arith.constant 0 : index
    %c0_56 = arith.constant 0 : index
    %99 = vector.load %arg9[%c2_54, %c0_55, %c0_56] : memref<3x2x128xf32, #tpu.memory_space<vmem>>, vector<1x2x128xf32>
    %100 = vector.shape_cast %99 : vector<1x2x128xf32> to vector<2x128xf32>
    %101 = arith.mulf %95, %100 : vector<2x128xf32>
    %102 = arith.mulf %94, %98 : vector<2x128xf32>
    %103 = arith.addf %101, %102 : vector<2x128xf32>
    %104 = math.tanh %103 : vector<2x128xf32>
    %105 = arith.mulf %96, %104 : vector<2x128xf32>
    %c0_57 = arith.constant 0 : index
    %c0_58 = arith.constant 0 : index
    %c0_59 = arith.constant 0 : index
    %106 = vector.load %arg8[%c0_57, %c0_58, %c0_59] : memref<3x2x128xf32, #tpu.memory_space<vmem>>, vector<1x2x128xf32>
    %107 = vector.shape_cast %106 : vector<1x2x128xf32> to vector<2x128xf32>
    %108 = vector.shape_cast %45 : vector<2x128xf32> to vector<1x2x128xf32>
    tpu.vector_store %arg8[%c0_57, %c0_58, %c0_59], %108 {strides = array<i32>} : memref<3x2x128xf32, #tpu.memory_space<vmem>>, vector<1x2x128xf32>,
    %c0_60 = arith.constant 0 : index
    %c0_61 = arith.constant 0 : index
    %c0_62 = arith.constant 0 : index
    %109 = vector.load %arg9[%c0_60, %c0_61, %c0_62] : memref<3x2x128xf32, #tpu.memory_space<vmem>>, vector<1x2x128xf32>
    %110 = vector.shape_cast %109 : vector<1x2x128xf32> to vector<2x128xf32>
    %111 = vector.shape_cast %43 : vector<2x128xf32> to vector<1x2x128xf32>
    tpu.vector_store %arg9[%c0_60, %c0_61, %c0_62], %111 {strides = array<i32>} : memref<3x2x128xf32, #tpu.memory_space<vmem>>, vector<1x2x128xf32>,
    %c1_63 = arith.constant 1 : index
    %c0_64 = arith.constant 0 : index
    %c0_65 = arith.constant 0 : index
    %112 = vector.load %arg8[%c1_63, %c0_64, %c0_65] : memref<3x2x128xf32, #tpu.memory_space<vmem>>, vector<1x2x128xf32>
    %113 = vector.shape_cast %112 : vector<1x2x128xf32> to vector<2x128xf32>
    %114 = vector.shape_cast %75 : vector<2x128xf32> to vector<1x2x128xf32>
    tpu.vector_store %arg8[%c1_63, %c0_64, %c0_65], %114 {strides = array<i32>} : memref<3x2x128xf32, #tpu.memory_space<vmem>>, vector<1x2x128xf32>,
    %c1_66 = arith.constant 1 : index
    %c0_67 = arith.constant 0 : index
    %c0_68 = arith.constant 0 : index
    %115 = vector.load %arg9[%c1_66, %c0_67, %c0_68] : memref<3x2x128xf32, #tpu.memory_space<vmem>>, vector<1x2x128xf32>
    %116 = vector.shape_cast %115 : vector<1x2x128xf32> to vector<2x128xf32>
    %117 = vector.shape_cast %73 : vector<2x128xf32> to vector<1x2x128xf32>
    tpu.vector_store %arg9[%c1_66, %c0_67, %c0_68], %117 {strides = array<i32>} : memref<3x2x128xf32, #tpu.memory_space<vmem>>, vector<1x2x128xf32>,
    %c2_69 = arith.constant 2 : index
    %c0_70 = arith.constant 0 : index
    %c0_71 = arith.constant 0 : index
    %118 = vector.load %arg8[%c2_69, %c0_70, %c0_71] : memref<3x2x128xf32, #tpu.memory_space<vmem>>, vector<1x2x128xf32>
    %119 = vector.shape_cast %118 : vector<1x2x128xf32> to vector<2x128xf32>
    %120 = vector.shape_cast %105 : vector<2x128xf32> to vector<1x2x128xf32>
    tpu.vector_store %arg8[%c2_69, %c0_70, %c0_71], %120 {strides = array<i32>} : memref<3x2x128xf32, #tpu.memory_space<vmem>>, vector<1x2x128xf32>,
    %c2_72 = arith.constant 2 : index
    %c0_73 = arith.constant 0 : index
    %c0_74 = arith.constant 0 : index
    %121 = vector.load %arg9[%c2_72, %c0_73, %c0_74] : memref<3x2x128xf32, #tpu.memory_space<vmem>>, vector<1x2x128xf32>
    %122 = vector.shape_cast %121 : vector<1x2x128xf32> to vector<2x128xf32>
    %123 = vector.shape_cast %103 : vector<2x128xf32> to vector<1x2x128xf32>
    tpu.vector_store %arg9[%c2_72, %c0_73, %c0_74], %123 {strides = array<i32>} : memref<3x2x128xf32, #tpu.memory_space<vmem>>, vector<1x2x128xf32>,
    %c2_75 = arith.constant 2 : index
    %c0_76 = arith.constant 0 : index
    %124 = vector.load %arg10[%c2_75, %c0_76] : memref<16x512xf32, #tpu.memory_space<vmem>>, vector<2x512xf32>
    %c0_77 = arith.constant 0 : index
    %c0_78 = arith.constant 0 : index
    %c0_79 = arith.constant 0 : index
    %125 = vector.load %arg8[%c0_77, %c0_78, %c0_79] : memref<3x2x128xf32, #tpu.memory_space<vmem>>, vector<1x2x128xf32>
    %126 = vector.shape_cast %125 : vector<1x2x128xf32> to vector<2x128xf32>
    %127 = arith.truncf %126 : vector<2x128xf32> to vector<2x128xbf16>
    %c0_80 = arith.constant 0 : index
    %c0_81 = arith.constant 0 : index
    %c0_82 = arith.constant 0 : index
    %128 = vector.load %arg3[%c0_80, %c0_81, %c0_82] : memref<3x128x512xbf16, #tpu.memory_space<vmem>>, vector<1x128x512xbf16>
    %129 = vector.shape_cast %128 : vector<1x128x512xbf16> to vector<128x512xbf16>
    %cst_83 = arith.constant dense<0.000000e+00> : vector<2x512xf32>
    %130 = tpu.matmul %127, %129, %cst_83 {dimension_numbers = #tpu.dot_dimension_numbers<[1], [0], [0], [1], [0, 0, 1, 1], [], []>} : vector<2x128xbf16>, vector<128x512xbf16>, vector<2x512xf32> -> vector<2x512xf32>
    %131 = arith.addf %124, %130 : vector<2x512xf32>
    %132 = vector.extract_strided_slice %131 {offsets = [0, 0], sizes = [2, 384], strides = [1, 1]} : vector<2x512xf32> to vector<2x384xf32>
    %133 = arith.negf %132 : vector<2x384xf32>
    %134 = math.exp %133 : vector<2x384xf32>
    %cst_84 = arith.constant 1.000000e+00 : f32
    %135 = vector.broadcast %cst_84 : f32 to vector<2x384xf32>
    %136 = arith.addf %135, %134 : vector<2x384xf32>
    %137 = arith.divf %135, %136 : vector<2x384xf32>
    %138 = vector.extract_strided_slice %137 {offsets = [0, 0], sizes = [2, 128], strides = [1, 1]} : vector<2x384xf32> to vector<2x128xf32>
    %139 = vector.extract_strided_slice %137 {offsets = [0, 128], sizes = [2, 128], strides = [1, 1]} : vector<2x384xf32> to vector<2x128xf32>
    %140 = vector.extract_strided_slice %137 {offsets = [0, 256], sizes = [2, 128], strides = [1, 1]} : vector<2x384xf32> to vector<2x128xf32>
    %141 = vector.extract_strided_slice %131 {offsets = [0, 384], sizes = [2, 128], strides = [1, 1]} : vector<2x512xf32> to vector<2x128xf32>
    %142 = math.tanh %141 : vector<2x128xf32>
    %c0_85 = arith.constant 0 : index
    %c0_86 = arith.constant 0 : index
    %c0_87 = arith.constant 0 : index
    %143 = vector.load %arg9[%c0_85, %c0_86, %c0_87] : memref<3x2x128xf32, #tpu.memory_space<vmem>>, vector<1x2x128xf32>
    %144 = vector.shape_cast %143 : vector<1x2x128xf32> to vector<2x128xf32>
    %145 = arith.mulf %139, %144 : vector<2x128xf32>
    %146 = arith.mulf %138, %142 : vector<2x128xf32>
    %147 = arith.addf %145, %146 : vector<2x128xf32>
    %148 = math.tanh %147 : vector<2x128xf32>
    %149 = arith.mulf %140, %148 : vector<2x128xf32>
    %150 = arith.truncf %149 : vector<2x128xf32> to vector<2x128xbf16>
    %c1_88 = arith.constant 1 : index
    %c0_89 = arith.constant 0 : index
    %c0_90 = arith.constant 0 : index
    %151 = vector.load %arg2[%c1_88, %c0_89, %c0_90] : memref<3x128x512xbf16, #tpu.memory_space<vmem>>, vector<1x128x512xbf16>
    %152 = vector.shape_cast %151 : vector<1x128x512xbf16> to vector<128x512xbf16>
    %cst_91 = arith.constant dense<0.000000e+00> : vector<2x512xf32>
    %153 = tpu.matmul %150, %152, %cst_91 {dimension_numbers = #tpu.dot_dimension_numbers<[1], [0], [0], [1], [0, 0, 1, 1], [], []>} : vector<2x128xbf16>, vector<128x512xbf16>, vector<2x512xf32> -> vector<2x512xf32>
    %c1_92 = arith.constant 1 : index
    %c0_93 = arith.constant 0 : index
    %c0_94 = arith.constant 0 : index
    %154 = vector.load %arg8[%c1_92, %c0_93, %c0_94] : memref<3x2x128xf32, #tpu.memory_space<vmem>>, vector<1x2x128xf32>
    %155 = vector.shape_cast %154 : vector<1x2x128xf32> to vector<2x128xf32>
    %156 = arith.truncf %155 : vector<2x128xf32> to vector<2x128xbf16>
    %c1_95 = arith.constant 1 : index
    %c0_96 = arith.constant 0 : index
    %c0_97 = arith.constant 0 : index
    %157 = vector.load %arg3[%c1_95, %c0_96, %c0_97] : memref<3x128x512xbf16, #tpu.memory_space<vmem>>, vector<1x128x512xbf16>
    %158 = vector.shape_cast %157 : vector<1x128x512xbf16> to vector<128x512xbf16>
    %cst_98 = arith.constant dense<0.000000e+00> : vector<2x512xf32>
    %159 = tpu.matmul %156, %158, %cst_98 {dimension_numbers = #tpu.dot_dimension_numbers<[1], [0], [0], [1], [0, 0, 1, 1], [], []>} : vector<2x128xbf16>, vector<128x512xbf16>, vector<2x512xf32> -> vector<2x512xf32>
    %160 = arith.addf %153, %159 : vector<2x512xf32>
    %161 = arith.addf %160, %15 : vector<2x512xf32>
    %162 = vector.extract_strided_slice %161 {offsets = [0, 0], sizes = [2, 384], strides = [1, 1]} : vector<2x512xf32> to vector<2x384xf32>
    %163 = arith.negf %162 : vector<2x384xf32>
    %164 = math.exp %163 : vector<2x384xf32>
    %cst_99 = arith.constant 1.000000e+00 : f32
    %165 = vector.broadcast %cst_99 : f32 to vector<2x384xf32>
    %166 = arith.addf %165, %164 : vector<2x384xf32>
    %167 = arith.divf %165, %166 : vector<2x384xf32>
    %168 = vector.extract_strided_slice %167 {offsets = [0, 0], sizes = [2, 128], strides = [1, 1]} : vector<2x384xf32> to vector<2x128xf32>
    %169 = vector.extract_strided_slice %167 {offsets = [0, 128], sizes = [2, 128], strides = [1, 1]} : vector<2x384xf32> to vector<2x128xf32>
    %170 = vector.extract_strided_slice %167 {offsets = [0, 256], sizes = [2, 128], strides = [1, 1]} : vector<2x384xf32> to vector<2x128xf32>
    %171 = vector.extract_strided_slice %161 {offsets = [0, 384], sizes = [2, 128], strides = [1, 1]} : vector<2x512xf32> to vector<2x128xf32>
    %172 = math.tanh %171 : vector<2x128xf32>
    %c1_100 = arith.constant 1 : index
    %c0_101 = arith.constant 0 : index
    %c0_102 = arith.constant 0 : index
    %173 = vector.load %arg9[%c1_100, %c0_101, %c0_102] : memref<3x2x128xf32, #tpu.memory_space<vmem>>, vector<1x2x128xf32>
    %174 = vector.shape_cast %173 : vector<1x2x128xf32> to vector<2x128xf32>
    %175 = arith.mulf %169, %174 : vector<2x128xf32>
    %176 = arith.mulf %168, %172 : vector<2x128xf32>
    %177 = arith.addf %175, %176 : vector<2x128xf32>
    %178 = math.tanh %177 : vector<2x128xf32>
    %179 = arith.mulf %170, %178 : vector<2x128xf32>
    %180 = arith.truncf %179 : vector<2x128xf32> to vector<2x128xbf16>
    %c2_103 = arith.constant 2 : index
    %c0_104 = arith.constant 0 : index
    %c0_105 = arith.constant 0 : index
    %181 = vector.load %arg2[%c2_103, %c0_104, %c0_105] : memref<3x128x512xbf16, #tpu.memory_space<vmem>>, vector<1x128x512xbf16>
    %182 = vector.shape_cast %181 : vector<1x128x512xbf16> to vector<128x512xbf16>
    %cst_106 = arith.constant dense<0.000000e+00> : vector<2x512xf32>
    %183 = tpu.matmul %180, %182, %cst_106 {dimension_numbers = #tpu.dot_dimension_numbers<[1], [0], [0], [1], [0, 0, 1, 1], [], []>} : vector<2x128xbf16>, vector<128x512xbf16>, vector<2x512xf32> -> vector<2x512xf32>
    %c2_107 = arith.constant 2 : index
    %c0_108 = arith.constant 0 : index
    %c0_109 = arith.constant 0 : index
    %184 = vector.load %arg8[%c2_107, %c0_108, %c0_109] : memref<3x2x128xf32, #tpu.memory_space<vmem>>, vector<1x2x128xf32>
    %185 = vector.shape_cast %184 : vector<1x2x128xf32> to vector<2x128xf32>
    %186 = arith.truncf %185 : vector<2x128xf32> to vector<2x128xbf16>
    %c2_110 = arith.constant 2 : index
    %c0_111 = arith.constant 0 : index
    %c0_112 = arith.constant 0 : index
    %187 = vector.load %arg3[%c2_110, %c0_111, %c0_112] : memref<3x128x512xbf16, #tpu.memory_space<vmem>>, vector<1x128x512xbf16>
    %188 = vector.shape_cast %187 : vector<1x128x512xbf16> to vector<128x512xbf16>
    %cst_113 = arith.constant dense<0.000000e+00> : vector<2x512xf32>
    %189 = tpu.matmul %186, %188, %cst_113 {dimension_numbers = #tpu.dot_dimension_numbers<[1], [0], [0], [1], [0, 0, 1, 1], [], []>} : vector<2x128xbf16>, vector<128x512xbf16>, vector<2x512xf32> -> vector<2x512xf32>
    %190 = arith.addf %183, %189 : vector<2x512xf32>
    %191 = arith.addf %190, %19 : vector<2x512xf32>
    %192 = vector.extract_strided_slice %191 {offsets = [0, 0], sizes = [2, 384], strides = [1, 1]} : vector<2x512xf32> to vector<2x384xf32>
    %193 = arith.negf %192 : vector<2x384xf32>
    %194 = math.exp %193 : vector<2x384xf32>
    %cst_114 = arith.constant 1.000000e+00 : f32
    %195 = vector.broadcast %cst_114 : f32 to vector<2x384xf32>
    %196 = arith.addf %195, %194 : vector<2x384xf32>
    %197 = arith.divf %195, %196 : vector<2x384xf32>
    %198 = vector.extract_strided_slice %197 {offsets = [0, 0], sizes = [2, 128], strides = [1, 1]} : vector<2x384xf32> to vector<2x128xf32>
    %199 = vector.extract_strided_slice %197 {offsets = [0, 128], sizes = [2, 128], strides = [1, 1]} : vector<2x384xf32> to vector<2x128xf32>
    %200 = vector.extract_strided_slice %197 {offsets = [0, 256], sizes = [2, 128], strides = [1, 1]} : vector<2x384xf32> to vector<2x128xf32>
    %201 = vector.extract_strided_slice %191 {offsets = [0, 384], sizes = [2, 128], strides = [1, 1]} : vector<2x512xf32> to vector<2x128xf32>
    %202 = math.tanh %201 : vector<2x128xf32>
    %c2_115 = arith.constant 2 : index
    %c0_116 = arith.constant 0 : index
    %c0_117 = arith.constant 0 : index
    %203 = vector.load %arg9[%c2_115, %c0_116, %c0_117] : memref<3x2x128xf32, #tpu.memory_space<vmem>>, vector<1x2x128xf32>
    %204 = vector.shape_cast %203 : vector<1x2x128xf32> to vector<2x128xf32>
    %205 = arith.mulf %199, %204 : vector<2x128xf32>
    %206 = arith.mulf %198, %202 : vector<2x128xf32>
    %207 = arith.addf %205, %206 : vector<2x128xf32>
    %208 = math.tanh %207 : vector<2x128xf32>
    %209 = arith.mulf %200, %208 : vector<2x128xf32>
    %c0_118 = arith.constant 0 : index
    %c0_119 = arith.constant 0 : index
    %c0_120 = arith.constant 0 : index
    %210 = vector.load %arg8[%c0_118, %c0_119, %c0_120] : memref<3x2x128xf32, #tpu.memory_space<vmem>>, vector<1x2x128xf32>
    %211 = vector.shape_cast %210 : vector<1x2x128xf32> to vector<2x128xf32>
    %212 = vector.shape_cast %149 : vector<2x128xf32> to vector<1x2x128xf32>
    tpu.vector_store %arg8[%c0_118, %c0_119, %c0_120], %212 {strides = array<i32>} : memref<3x2x128xf32, #tpu.memory_space<vmem>>, vector<1x2x128xf32>,
    %c0_121 = arith.constant 0 : index
    %c0_122 = arith.constant 0 : index
    %c0_123 = arith.constant 0 : index
    %213 = vector.load %arg9[%c0_121, %c0_122, %c0_123] : memref<3x2x128xf32, #tpu.memory_space<vmem>>, vector<1x2x128xf32>
    %214 = vector.shape_cast %213 : vector<1x2x128xf32> to vector<2x128xf32>
    %215 = vector.shape_cast %147 : vector<2x128xf32> to vector<1x2x128xf32>
    tpu.vector_store %arg9[%c0_121, %c0_122, %c0_123], %215 {strides = array<i32>} : memref<3x2x128xf32, #tpu.memory_space<vmem>>, vector<1x2x128xf32>,
    %c1_124 = arith.constant 1 : index
    %c0_125 = arith.constant 0 : index
    %c0_126 = arith.constant 0 : index
    %216 = vector.load %arg8[%c1_124, %c0_125, %c0_126] : memref<3x2x128xf32, #tpu.memory_space<vmem>>, vector<1x2x128xf32>
    %217 = vector.shape_cast %216 : vector<1x2x128xf32> to vector<2x128xf32>
    %218 = vector.shape_cast %179 : vector<2x128xf32> to vector<1x2x128xf32>
    tpu.vector_store %arg8[%c1_124, %c0_125, %c0_126], %218 {strides = array<i32>} : memref<3x2x128xf32, #tpu.memory_space<vmem>>, vector<1x2x128xf32>,
    %c1_127 = arith.constant 1 : index
    %c0_128 = arith.constant 0 : index
    %c0_129 = arith.constant 0 : index
    %219 = vector.load %arg9[%c1_127, %c0_128, %c0_129] : memref<3x2x128xf32, #tpu.memory_space<vmem>>, vector<1x2x128xf32>
    %220 = vector.shape_cast %219 : vector<1x2x128xf32> to vector<2x128xf32>
    %221 = vector.shape_cast %177 : vector<2x128xf32> to vector<1x2x128xf32>
    tpu.vector_store %arg9[%c1_127, %c0_128, %c0_129], %221 {strides = array<i32>} : memref<3x2x128xf32, #tpu.memory_space<vmem>>, vector<1x2x128xf32>,
    %c2_130 = arith.constant 2 : index
    %c0_131 = arith.constant 0 : index
    %c0_132 = arith.constant 0 : index
    %222 = vector.load %arg8[%c2_130, %c0_131, %c0_132] : memref<3x2x128xf32, #tpu.memory_space<vmem>>, vector<1x2x128xf32>
    %223 = vector.shape_cast %222 : vector<1x2x128xf32> to vector<2x128xf32>
    %224 = vector.shape_cast %209 : vector<2x128xf32> to vector<1x2x128xf32>
    tpu.vector_store %arg8[%c2_130, %c0_131, %c0_132], %224 {strides = array<i32>} : memref<3x2x128xf32, #tpu.memory_space<vmem>>, vector<1x2x128xf32>,
    %c2_133 = arith.constant 2 : index
    %c0_134 = arith.constant 0 : index
    %c0_135 = arith.constant 0 : index
    %225 = vector.load %arg9[%c2_133, %c0_134, %c0_135] : memref<3x2x128xf32, #tpu.memory_space<vmem>>, vector<1x2x128xf32>
    %226 = vector.shape_cast %225 : vector<1x2x128xf32> to vector<2x128xf32>
    %227 = vector.shape_cast %207 : vector<2x128xf32> to vector<1x2x128xf32>
    tpu.vector_store %arg9[%c2_133, %c0_134, %c0_135], %227 {strides = array<i32>} : memref<3x2x128xf32, #tpu.memory_space<vmem>>, vector<1x2x128xf32>,
    %c4 = arith.constant 4 : index
    %c0_136 = arith.constant 0 : index
    %228 = vector.load %arg10[%c4, %c0_136] : memref<16x512xf32, #tpu.memory_space<vmem>>, vector<2x512xf32>
    %c0_137 = arith.constant 0 : index
    %c0_138 = arith.constant 0 : index
    %c0_139 = arith.constant 0 : index
    %229 = vector.load %arg8[%c0_137, %c0_138, %c0_139] : memref<3x2x128xf32, #tpu.memory_space<vmem>>, vector<1x2x128xf32>
    %230 = vector.shape_cast %229 : vector<1x2x128xf32> to vector<2x128xf32>
    %231 = arith.truncf %230 : vector<2x128xf32> to vector<2x128xbf16>
    %c0_140 = arith.constant 0 : index
    %c0_141 = arith.constant 0 : index
    %c0_142 = arith.constant 0 : index
    %232 = vector.load %arg3[%c0_140, %c0_141, %c0_142] : memref<3x128x512xbf16, #tpu.memory_space<vmem>>, vector<1x128x512xbf16>
    %233 = vector.shape_cast %232 : vector<1x128x512xbf16> to vector<128x512xbf16>
    %cst_143 = arith.constant dense<0.000000e+00> : vector<2x512xf32>
    %234 = tpu.matmul %231, %233, %cst_143 {dimension_numbers = #tpu.dot_dimension_numbers<[1], [0], [0], [1], [0, 0, 1, 1], [], []>} : vector<2x128xbf16>, vector<128x512xbf16>, vector<2x512xf32> -> vector<2x512xf32>
    %235 = arith.addf %228, %234 : vector<2x512xf32>
    %236 = vector.extract_strided_slice %235 {offsets = [0, 0], sizes = [2, 384], strides = [1, 1]} : vector<2x512xf32> to vector<2x384xf32>
    %237 = arith.negf %236 : vector<2x384xf32>
    %238 = math.exp %237 : vector<2x384xf32>
    %cst_144 = arith.constant 1.000000e+00 : f32
    %239 = vector.broadcast %cst_144 : f32 to vector<2x384xf32>
    %240 = arith.addf %239, %238 : vector<2x384xf32>
    %241 = arith.divf %239, %240 : vector<2x384xf32>
    %242 = vector.extract_strided_slice %241 {offsets = [0, 0], sizes = [2, 128], strides = [1, 1]} : vector<2x384xf32> to vector<2x128xf32>
    %243 = vector.extract_strided_slice %241 {offsets = [0, 128], sizes = [2, 128], strides = [1, 1]} : vector<2x384xf32> to vector<2x128xf32>
    %244 = vector.extract_strided_slice %241 {offsets = [0, 256], sizes = [2, 128], strides = [1, 1]} : vector<2x384xf32> to vector<2x128xf32>
    %245 = vector.extract_strided_slice %235 {offsets = [0, 384], sizes = [2, 128], strides = [1, 1]} : vector<2x512xf32> to vector<2x128xf32>
    %246 = math.tanh %245 : vector<2x128xf32>
    %c0_145 = arith.constant 0 : index
    %c0_146 = arith.constant 0 : index
    %c0_147 = arith.constant 0 : index
    %247 = vector.load %arg9[%c0_145, %c0_146, %c0_147] : memref<3x2x128xf32, #tpu.memory_space<vmem>>, vector<1x2x128xf32>
    %248 = vector.shape_cast %247 : vector<1x2x128xf32> to vector<2x128xf32>
    %249 = arith.mulf %243, %248 : vector<2x128xf32>
    %250 = arith.mulf %242, %246 : vector<2x128xf32>
    %251 = arith.addf %249, %250 : vector<2x128xf32>
    %252 = math.tanh %251 : vector<2x128xf32>
    %253 = arith.mulf %244, %252 : vector<2x128xf32>
    %254 = arith.truncf %253 : vector<2x128xf32> to vector<2x128xbf16>
    %c1_148 = arith.constant 1 : index
    %c0_149 = arith.constant 0 : index
    %c0_150 = arith.constant 0 : index
    %255 = vector.load %arg2[%c1_148, %c0_149, %c0_150] : memref<3x128x512xbf16, #tpu.memory_space<vmem>>, vector<1x128x512xbf16>
    %256 = vector.shape_cast %255 : vector<1x128x512xbf16> to vector<128x512xbf16>
    %cst_151 = arith.constant dense<0.000000e+00> : vector<2x512xf32>
    %257 = tpu.matmul %254, %256, %cst_151 {dimension_numbers = #tpu.dot_dimension_numbers<[1], [0], [0], [1], [0, 0, 1, 1], [], []>} : vector<2x128xbf16>, vector<128x512xbf16>, vector<2x512xf32> -> vector<2x512xf32>
    %c1_152 = arith.constant 1 : index
    %c0_153 = arith.constant 0 : index
    %c0_154 = arith.constant 0 : index
    %258 = vector.load %arg8[%c1_152, %c0_153, %c0_154] : memref<3x2x128xf32, #tpu.memory_space<vmem>>, vector<1x2x128xf32>
    %259 = vector.shape_cast %258 : vector<1x2x128xf32> to vector<2x128xf32>
    %260 = arith.truncf %259 : vector<2x128xf32> to vector<2x128xbf16>
    %c1_155 = arith.constant 1 : index
    %c0_156 = arith.constant 0 : index
    %c0_157 = arith.constant 0 : index
    %261 = vector.load %arg3[%c1_155, %c0_156, %c0_157] : memref<3x128x512xbf16, #tpu.memory_space<vmem>>, vector<1x128x512xbf16>
    %262 = vector.shape_cast %261 : vector<1x128x512xbf16> to vector<128x512xbf16>
    %cst_158 = arith.constant dense<0.000000e+00> : vector<2x512xf32>
    %263 = tpu.matmul %260, %262, %cst_158 {dimension_numbers = #tpu.dot_dimension_numbers<[1], [0], [0], [1], [0, 0, 1, 1], [], []>} : vector<2x128xbf16>, vector<128x512xbf16>, vector<2x512xf32> -> vector<2x512xf32>
    %264 = arith.addf %257, %263 : vector<2x512xf32>
    %265 = arith.addf %264, %15 : vector<2x512xf32>
    %266 = vector.extract_strided_slice %265 {offsets = [0, 0], sizes = [2, 384], strides = [1, 1]} : vector<2x512xf32> to vector<2x384xf32>
    %267 = arith.negf %266 : vector<2x384xf32>
    %268 = math.exp %267 : vector<2x384xf32>
    %cst_159 = arith.constant 1.000000e+00 : f32
    %269 = vector.broadcast %cst_159 : f32 to vector<2x384xf32>
    %270 = arith.addf %269, %268 : vector<2x384xf32>
    %271 = arith.divf %269, %270 : vector<2x384xf32>
    %272 = vector.extract_strided_slice %271 {offsets = [0, 0], sizes = [2, 128], strides = [1, 1]} : vector<2x384xf32> to vector<2x128xf32>
    %273 = vector.extract_strided_slice %271 {offsets = [0, 128], sizes = [2, 128], strides = [1, 1]} : vector<2x384xf32> to vector<2x128xf32>
    %274 = vector.extract_strided_slice %271 {offsets = [0, 256], sizes = [2, 128], strides = [1, 1]} : vector<2x384xf32> to vector<2x128xf32>
    %275 = vector.extract_strided_slice %265 {offsets = [0, 384], sizes = [2, 128], strides = [1, 1]} : vector<2x512xf32> to vector<2x128xf32>
    %276 = math.tanh %275 : vector<2x128xf32>
    %c1_160 = arith.constant 1 : index
    %c0_161 = arith.constant 0 : index
    %c0_162 = arith.constant 0 : index
    %277 = vector.load %arg9[%c1_160, %c0_161, %c0_162] : memref<3x2x128xf32, #tpu.memory_space<vmem>>, vector<1x2x128xf32>
    %278 = vector.shape_cast %277 : vector<1x2x128xf32> to vector<2x128xf32>
    %279 = arith.mulf %273, %278 : vector<2x128xf32>
    %280 = arith.mulf %272, %276 : vector<2x128xf32>
    %281 = arith.addf %279, %280 : vector<2x128xf32>
    %282 = math.tanh %281 : vector<2x128xf32>
    %283 = arith.mulf %274, %282 : vector<2x128xf32>
    %284 = arith.truncf %283 : vector<2x128xf32> to vector<2x128xbf16>
    %c2_163 = arith.constant 2 : index
    %c0_164 = arith.constant 0 : index
    %c0_165 = arith.constant 0 : index
    %285 = vector.load %arg2[%c2_163, %c0_164, %c0_165] : memref<3x128x512xbf16, #tpu.memory_space<vmem>>, vector<1x128x512xbf16>
    %286 = vector.shape_cast %285 : vector<1x128x512xbf16> to vector<128x512xbf16>
    %cst_166 = arith.constant dense<0.000000e+00> : vector<2x512xf32>
    %287 = tpu.matmul %284, %286, %cst_166 {dimension_numbers = #tpu.dot_dimension_numbers<[1], [0], [0], [1], [0, 0, 1, 1], [], []>} : vector<2x128xbf16>, vector<128x512xbf16>, vector<2x512xf32> -> vector<2x512xf32>
    %c2_167 = arith.constant 2 : index
    %c0_168 = arith.constant 0 : index
    %c0_169 = arith.constant 0 : index
    %288 = vector.load %arg8[%c2_167, %c0_168, %c0_169] : memref<3x2x128xf32, #tpu.memory_space<vmem>>, vector<1x2x128xf32>
    %289 = vector.shape_cast %288 : vector<1x2x128xf32> to vector<2x128xf32>
    %290 = arith.truncf %289 : vector<2x128xf32> to vector<2x128xbf16>
    %c2_170 = arith.constant 2 : index
    %c0_171 = arith.constant 0 : index
    %c0_172 = arith.constant 0 : index
    %291 = vector.load %arg3[%c2_170, %c0_171, %c0_172] : memref<3x128x512xbf16, #tpu.memory_space<vmem>>, vector<1x128x512xbf16>
    %292 = vector.shape_cast %291 : vector<1x128x512xbf16> to vector<128x512xbf16>
    %cst_173 = arith.constant dense<0.000000e+00> : vector<2x512xf32>
    %293 = tpu.matmul %290, %292, %cst_173 {dimension_numbers = #tpu.dot_dimension_numbers<[1], [0], [0], [1], [0, 0, 1, 1], [], []>} : vector<2x128xbf16>, vector<128x512xbf16>, vector<2x512xf32> -> vector<2x512xf32>
    %294 = arith.addf %287, %293 : vector<2x512xf32>
    %295 = arith.addf %294, %19 : vector<2x512xf32>
    %296 = vector.extract_strided_slice %295 {offsets = [0, 0], sizes = [2, 384], strides = [1, 1]} : vector<2x512xf32> to vector<2x384xf32>
    %297 = arith.negf %296 : vector<2x384xf32>
    %298 = math.exp %297 : vector<2x384xf32>
    %cst_174 = arith.constant 1.000000e+00 : f32
    %299 = vector.broadcast %cst_174 : f32 to vector<2x384xf32>
    %300 = arith.addf %299, %298 : vector<2x384xf32>
    %301 = arith.divf %299, %300 : vector<2x384xf32>
    %302 = vector.extract_strided_slice %301 {offsets = [0, 0], sizes = [2, 128], strides = [1, 1]} : vector<2x384xf32> to vector<2x128xf32>
    %303 = vector.extract_strided_slice %301 {offsets = [0, 128], sizes = [2, 128], strides = [1, 1]} : vector<2x384xf32> to vector<2x128xf32>
    %304 = vector.extract_strided_slice %301 {offsets = [0, 256], sizes = [2, 128], strides = [1, 1]} : vector<2x384xf32> to vector<2x128xf32>
    %305 = vector.extract_strided_slice %295 {offsets = [0, 384], sizes = [2, 128], strides = [1, 1]} : vector<2x512xf32> to vector<2x128xf32>
    %306 = math.tanh %305 : vector<2x128xf32>
    %c2_175 = arith.constant 2 : index
    %c0_176 = arith.constant 0 : index
    %c0_177 = arith.constant 0 : index
    %307 = vector.load %arg9[%c2_175, %c0_176, %c0_177] : memref<3x2x128xf32, #tpu.memory_space<vmem>>, vector<1x2x128xf32>
    %308 = vector.shape_cast %307 : vector<1x2x128xf32> to vector<2x128xf32>
    %309 = arith.mulf %303, %308 : vector<2x128xf32>
    %310 = arith.mulf %302, %306 : vector<2x128xf32>
    %311 = arith.addf %309, %310 : vector<2x128xf32>
    %312 = math.tanh %311 : vector<2x128xf32>
    %313 = arith.mulf %304, %312 : vector<2x128xf32>
    %c0_178 = arith.constant 0 : index
    %c0_179 = arith.constant 0 : index
    %c0_180 = arith.constant 0 : index
    %314 = vector.load %arg8[%c0_178, %c0_179, %c0_180] : memref<3x2x128xf32, #tpu.memory_space<vmem>>, vector<1x2x128xf32>
    %315 = vector.shape_cast %314 : vector<1x2x128xf32> to vector<2x128xf32>
    %316 = vector.shape_cast %253 : vector<2x128xf32> to vector<1x2x128xf32>
    tpu.vector_store %arg8[%c0_178, %c0_179, %c0_180], %316 {strides = array<i32>} : memref<3x2x128xf32, #tpu.memory_space<vmem>>, vector<1x2x128xf32>,
    %c0_181 = arith.constant 0 : index
    %c0_182 = arith.constant 0 : index
    %c0_183 = arith.constant 0 : index
    %317 = vector.load %arg9[%c0_181, %c0_182, %c0_183] : memref<3x2x128xf32, #tpu.memory_space<vmem>>, vector<1x2x128xf32>
    %318 = vector.shape_cast %317 : vector<1x2x128xf32> to vector<2x128xf32>
    %319 = vector.shape_cast %251 : vector<2x128xf32> to vector<1x2x128xf32>
    tpu.vector_store %arg9[%c0_181, %c0_182, %c0_183], %319 {strides = array<i32>} : memref<3x2x128xf32, #tpu.memory_space<vmem>>, vector<1x2x128xf32>,
    %c1_184 = arith.constant 1 : index
    %c0_185 = arith.constant 0 : index
    %c0_186 = arith.constant 0 : index
    %320 = vector.load %arg8[%c1_184, %c0_185, %c0_186] : memref<3x2x128xf32, #tpu.memory_space<vmem>>, vector<1x2x128xf32>
    %321 = vector.shape_cast %320 : vector<1x2x128xf32> to vector<2x128xf32>
    %322 = vector.shape_cast %283 : vector<2x128xf32> to vector<1x2x128xf32>
    tpu.vector_store %arg8[%c1_184, %c0_185, %c0_186], %322 {strides = array<i32>} : memref<3x2x128xf32, #tpu.memory_space<vmem>>, vector<1x2x128xf32>,
    %c1_187 = arith.constant 1 : index
    %c0_188 = arith.constant 0 : index
    %c0_189 = arith.constant 0 : index
    %323 = vector.load %arg9[%c1_187, %c0_188, %c0_189] : memref<3x2x128xf32, #tpu.memory_space<vmem>>, vector<1x2x128xf32>
    %324 = vector.shape_cast %323 : vector<1x2x128xf32> to vector<2x128xf32>
    %325 = vector.shape_cast %281 : vector<2x128xf32> to vector<1x2x128xf32>
    tpu.vector_store %arg9[%c1_187, %c0_188, %c0_189], %325 {strides = array<i32>} : memref<3x2x128xf32, #tpu.memory_space<vmem>>, vector<1x2x128xf32>,
    %c2_190 = arith.constant 2 : index
    %c0_191 = arith.constant 0 : index
    %c0_192 = arith.constant 0 : index
    %326 = vector.load %arg8[%c2_190, %c0_191, %c0_192] : memref<3x2x128xf32, #tpu.memory_space<vmem>>, vector<1x2x128xf32>
    %327 = vector.shape_cast %326 : vector<1x2x128xf32> to vector<2x128xf32>
    %328 = vector.shape_cast %313 : vector<2x128xf32> to vector<1x2x128xf32>
    tpu.vector_store %arg8[%c2_190, %c0_191, %c0_192], %328 {strides = array<i32>} : memref<3x2x128xf32, #tpu.memory_space<vmem>>, vector<1x2x128xf32>,
    %c2_193 = arith.constant 2 : index
    %c0_194 = arith.constant 0 : index
    %c0_195 = arith.constant 0 : index
    %329 = vector.load %arg9[%c2_193, %c0_194, %c0_195] : memref<3x2x128xf32, #tpu.memory_space<vmem>>, vector<1x2x128xf32>
    %330 = vector.shape_cast %329 : vector<1x2x128xf32> to vector<2x128xf32>
    %331 = vector.shape_cast %311 : vector<2x128xf32> to vector<1x2x128xf32>
    tpu.vector_store %arg9[%c2_193, %c0_194, %c0_195], %331 {strides = array<i32>} : memref<3x2x128xf32, #tpu.memory_space<vmem>>, vector<1x2x128xf32>,
    %c6 = arith.constant 6 : index
    %c0_196 = arith.constant 0 : index
    %332 = vector.load %arg10[%c6, %c0_196] : memref<16x512xf32, #tpu.memory_space<vmem>>, vector<2x512xf32>
    %c0_197 = arith.constant 0 : index
    %c0_198 = arith.constant 0 : index
    %c0_199 = arith.constant 0 : index
    %333 = vector.load %arg8[%c0_197, %c0_198, %c0_199] : memref<3x2x128xf32, #tpu.memory_space<vmem>>, vector<1x2x128xf32>
    %334 = vector.shape_cast %333 : vector<1x2x128xf32> to vector<2x128xf32>
    %335 = arith.truncf %334 : vector<2x128xf32> to vector<2x128xbf16>
    %c0_200 = arith.constant 0 : index
    %c0_201 = arith.constant 0 : index
    %c0_202 = arith.constant 0 : index
    %336 = vector.load %arg3[%c0_200, %c0_201, %c0_202] : memref<3x128x512xbf16, #tpu.memory_space<vmem>>, vector<1x128x512xbf16>
    %337 = vector.shape_cast %336 : vector<1x128x512xbf16> to vector<128x512xbf16>
    %cst_203 = arith.constant dense<0.000000e+00> : vector<2x512xf32>
    %338 = tpu.matmul %335, %337, %cst_203 {dimension_numbers = #tpu.dot_dimension_numbers<[1], [0], [0], [1], [0, 0, 1, 1], [], []>} : vector<2x128xbf16>, vector<128x512xbf16>, vector<2x512xf32> -> vector<2x512xf32>
    %339 = arith.addf %332, %338 : vector<2x512xf32>
    %340 = vector.extract_strided_slice %339 {offsets = [0, 0], sizes = [2, 384], strides = [1, 1]} : vector<2x512xf32> to vector<2x384xf32>
    %341 = arith.negf %340 : vector<2x384xf32>
    %342 = math.exp %341 : vector<2x384xf32>
    %cst_204 = arith.constant 1.000000e+00 : f32
    %343 = vector.broadcast %cst_204 : f32 to vector<2x384xf32>
    %344 = arith.addf %343, %342 : vector<2x384xf32>
    %345 = arith.divf %343, %344 : vector<2x384xf32>
    %346 = vector.extract_strided_slice %345 {offsets = [0, 0], sizes = [2, 128], strides = [1, 1]} : vector<2x384xf32> to vector<2x128xf32>
    %347 = vector.extract_strided_slice %345 {offsets = [0, 128], sizes = [2, 128], strides = [1, 1]} : vector<2x384xf32> to vector<2x128xf32>
    %348 = vector.extract_strided_slice %345 {offsets = [0, 256], sizes = [2, 128], strides = [1, 1]} : vector<2x384xf32> to vector<2x128xf32>
    %349 = vector.extract_strided_slice %339 {offsets = [0, 384], sizes = [2, 128], strides = [1, 1]} : vector<2x512xf32> to vector<2x128xf32>
    %350 = math.tanh %349 : vector<2x128xf32>
    %c0_205 = arith.constant 0 : index
    %c0_206 = arith.constant 0 : index
    %c0_207 = arith.constant 0 : index
    %351 = vector.load %arg9[%c0_205, %c0_206, %c0_207] : memref<3x2x128xf32, #tpu.memory_space<vmem>>, vector<1x2x128xf32>
    %352 = vector.shape_cast %351 : vector<1x2x128xf32> to vector<2x128xf32>
    %353 = arith.mulf %347, %352 : vector<2x128xf32>
    %354 = arith.mulf %346, %350 : vector<2x128xf32>
    %355 = arith.addf %353, %354 : vector<2x128xf32>
    %356 = math.tanh %355 : vector<2x128xf32>
    %357 = arith.mulf %348, %356 : vector<2x128xf32>
    %358 = arith.truncf %357 : vector<2x128xf32> to vector<2x128xbf16>
    %c1_208 = arith.constant 1 : index
    %c0_209 = arith.constant 0 : index
    %c0_210 = arith.constant 0 : index
    %359 = vector.load %arg2[%c1_208, %c0_209, %c0_210] : memref<3x128x512xbf16, #tpu.memory_space<vmem>>, vector<1x128x512xbf16>
    %360 = vector.shape_cast %359 : vector<1x128x512xbf16> to vector<128x512xbf16>
    %cst_211 = arith.constant dense<0.000000e+00> : vector<2x512xf32>
    %361 = tpu.matmul %358, %360, %cst_211 {dimension_numbers = #tpu.dot_dimension_numbers<[1], [0], [0], [1], [0, 0, 1, 1], [], []>} : vector<2x128xbf16>, vector<128x512xbf16>, vector<2x512xf32> -> vector<2x512xf32>
    %c1_212 = arith.constant 1 : index
    %c0_213 = arith.constant 0 : index
    %c0_214 = arith.constant 0 : index
    %362 = vector.load %arg8[%c1_212, %c0_213, %c0_214] : memref<3x2x128xf32, #tpu.memory_space<vmem>>, vector<1x2x128xf32>
    %363 = vector.shape_cast %362 : vector<1x2x128xf32> to vector<2x128xf32>
    %364 = arith.truncf %363 : vector<2x128xf32> to vector<2x128xbf16>
    %c1_215 = arith.constant 1 : index
    %c0_216 = arith.constant 0 : index
    %c0_217 = arith.constant 0 : index
    %365 = vector.load %arg3[%c1_215, %c0_216, %c0_217] : memref<3x128x512xbf16, #tpu.memory_space<vmem>>, vector<1x128x512xbf16>
    %366 = vector.shape_cast %365 : vector<1x128x512xbf16> to vector<128x512xbf16>
    %cst_218 = arith.constant dense<0.000000e+00> : vector<2x512xf32>
    %367 = tpu.matmul %364, %366, %cst_218 {dimension_numbers = #tpu.dot_dimension_numbers<[1], [0], [0], [1], [0, 0, 1, 1], [], []>} : vector<2x128xbf16>, vector<128x512xbf16>, vector<2x512xf32> -> vector<2x512xf32>
    %368 = arith.addf %361, %367 : vector<2x512xf32>
    %369 = arith.addf %368, %15 : vector<2x512xf32>
    %370 = vector.extract_strided_slice %369 {offsets = [0, 0], sizes = [2, 384], strides = [1, 1]} : vector<2x512xf32> to vector<2x384xf32>
    %371 = arith.negf %370 : vector<2x384xf32>
    %372 = math.exp %371 : vector<2x384xf32>
    %cst_219 = arith.constant 1.000000e+00 : f32
    %373 = vector.broadcast %cst_219 : f32 to vector<2x384xf32>
    %374 = arith.addf %373, %372 : vector<2x384xf32>
    %375 = arith.divf %373, %374 : vector<2x384xf32>
    %376 = vector.extract_strided_slice %375 {offsets = [0, 0], sizes = [2, 128], strides = [1, 1]} : vector<2x384xf32> to vector<2x128xf32>
    %377 = vector.extract_strided_slice %375 {offsets = [0, 128], sizes = [2, 128], strides = [1, 1]} : vector<2x384xf32> to vector<2x128xf32>
    %378 = vector.extract_strided_slice %375 {offsets = [0, 256], sizes = [2, 128], strides = [1, 1]} : vector<2x384xf32> to vector<2x128xf32>
    %379 = vector.extract_strided_slice %369 {offsets = [0, 384], sizes = [2, 128], strides = [1, 1]} : vector<2x512xf32> to vector<2x128xf32>
    %380 = math.tanh %379 : vector<2x128xf32>
    %c1_220 = arith.constant 1 : index
    %c0_221 = arith.constant 0 : index
    %c0_222 = arith.constant 0 : index
    %381 = vector.load %arg9[%c1_220, %c0_221, %c0_222] : memref<3x2x128xf32, #tpu.memory_space<vmem>>, vector<1x2x128xf32>
    %382 = vector.shape_cast %381 : vector<1x2x128xf32> to vector<2x128xf32>
    %383 = arith.mulf %377, %382 : vector<2x128xf32>
    %384 = arith.mulf %376, %380 : vector<2x128xf32>
    %385 = arith.addf %383, %384 : vector<2x128xf32>
    %386 = math.tanh %385 : vector<2x128xf32>
    %387 = arith.mulf %378, %386 : vector<2x128xf32>
    %388 = arith.truncf %387 : vector<2x128xf32> to vector<2x128xbf16>
    %c2_223 = arith.constant 2 : index
    %c0_224 = arith.constant 0 : index
    %c0_225 = arith.constant 0 : index
    %389 = vector.load %arg2[%c2_223, %c0_224, %c0_225] : memref<3x128x512xbf16, #tpu.memory_space<vmem>>, vector<1x128x512xbf16>
    %390 = vector.shape_cast %389 : vector<1x128x512xbf16> to vector<128x512xbf16>
    %cst_226 = arith.constant dense<0.000000e+00> : vector<2x512xf32>
    %391 = tpu.matmul %388, %390, %cst_226 {dimension_numbers = #tpu.dot_dimension_numbers<[1], [0], [0], [1], [0, 0, 1, 1], [], []>} : vector<2x128xbf16>, vector<128x512xbf16>, vector<2x512xf32> -> vector<2x512xf32>
    %c2_227 = arith.constant 2 : index
    %c0_228 = arith.constant 0 : index
    %c0_229 = arith.constant 0 : index
    %392 = vector.load %arg8[%c2_227, %c0_228, %c0_229] : memref<3x2x128xf32, #tpu.memory_space<vmem>>, vector<1x2x128xf32>
    %393 = vector.shape_cast %392 : vector<1x2x128xf32> to vector<2x128xf32>
    %394 = arith.truncf %393 : vector<2x128xf32> to vector<2x128xbf16>
    %c2_230 = arith.constant 2 : index
    %c0_231 = arith.constant 0 : index
    %c0_232 = arith.constant 0 : index
    %395 = vector.load %arg3[%c2_230, %c0_231, %c0_232] : memref<3x128x512xbf16, #tpu.memory_space<vmem>>, vector<1x128x512xbf16>
    %396 = vector.shape_cast %395 : vector<1x128x512xbf16> to vector<128x512xbf16>
    %cst_233 = arith.constant dense<0.000000e+00> : vector<2x512xf32>
    %397 = tpu.matmul %394, %396, %cst_233 {dimension_numbers = #tpu.dot_dimension_numbers<[1], [0], [0], [1], [0, 0, 1, 1], [], []>} : vector<2x128xbf16>, vector<128x512xbf16>, vector<2x512xf32> -> vector<2x512xf32>
    %398 = arith.addf %391, %397 : vector<2x512xf32>
    %399 = arith.addf %398, %19 : vector<2x512xf32>
    %400 = vector.extract_strided_slice %399 {offsets = [0, 0], sizes = [2, 384], strides = [1, 1]} : vector<2x512xf32> to vector<2x384xf32>
    %401 = arith.negf %400 : vector<2x384xf32>
    %402 = math.exp %401 : vector<2x384xf32>
    %cst_234 = arith.constant 1.000000e+00 : f32
    %403 = vector.broadcast %cst_234 : f32 to vector<2x384xf32>
    %404 = arith.addf %403, %402 : vector<2x384xf32>
    %405 = arith.divf %403, %404 : vector<2x384xf32>
    %406 = vector.extract_strided_slice %405 {offsets = [0, 0], sizes = [2, 128], strides = [1, 1]} : vector<2x384xf32> to vector<2x128xf32>
    %407 = vector.extract_strided_slice %405 {offsets = [0, 128], sizes = [2, 128], strides = [1, 1]} : vector<2x384xf32> to vector<2x128xf32>
    %408 = vector.extract_strided_slice %405 {offsets = [0, 256], sizes = [2, 128], strides = [1, 1]} : vector<2x384xf32> to vector<2x128xf32>
    %409 = vector.extract_strided_slice %399 {offsets = [0, 384], sizes = [2, 128], strides = [1, 1]} : vector<2x512xf32> to vector<2x128xf32>
    %410 = math.tanh %409 : vector<2x128xf32>
    %c2_235 = arith.constant 2 : index
    %c0_236 = arith.constant 0 : index
    %c0_237 = arith.constant 0 : index
    %411 = vector.load %arg9[%c2_235, %c0_236, %c0_237] : memref<3x2x128xf32, #tpu.memory_space<vmem>>, vector<1x2x128xf32>
    %412 = vector.shape_cast %411 : vector<1x2x128xf32> to vector<2x128xf32>
    %413 = arith.mulf %407, %412 : vector<2x128xf32>
    %414 = arith.mulf %406, %410 : vector<2x128xf32>
    %415 = arith.addf %413, %414 : vector<2x128xf32>
    %416 = math.tanh %415 : vector<2x128xf32>
    %417 = arith.mulf %408, %416 : vector<2x128xf32>
    %c0_238 = arith.constant 0 : index
    %c0_239 = arith.constant 0 : index
    %c0_240 = arith.constant 0 : index
    %418 = vector.load %arg8[%c0_238, %c0_239, %c0_240] : memref<3x2x128xf32, #tpu.memory_space<vmem>>, vector<1x2x128xf32>
    %419 = vector.shape_cast %418 : vector<1x2x128xf32> to vector<2x128xf32>
    %420 = vector.shape_cast %357 : vector<2x128xf32> to vector<1x2x128xf32>
    tpu.vector_store %arg8[%c0_238, %c0_239, %c0_240], %420 {strides = array<i32>} : memref<3x2x128xf32, #tpu.memory_space<vmem>>, vector<1x2x128xf32>,
    %c0_241 = arith.constant 0 : index
    %c0_242 = arith.constant 0 : index
    %c0_243 = arith.constant 0 : index
    %421 = vector.load %arg9[%c0_241, %c0_242, %c0_243] : memref<3x2x128xf32, #tpu.memory_space<vmem>>, vector<1x2x128xf32>
    %422 = vector.shape_cast %421 : vector<1x2x128xf32> to vector<2x128xf32>
    %423 = vector.shape_cast %355 : vector<2x128xf32> to vector<1x2x128xf32>
    tpu.vector_store %arg9[%c0_241, %c0_242, %c0_243], %423 {strides = array<i32>} : memref<3x2x128xf32, #tpu.memory_space<vmem>>, vector<1x2x128xf32>,
    %c1_244 = arith.constant 1 : index
    %c0_245 = arith.constant 0 : index
    %c0_246 = arith.constant 0 : index
    %424 = vector.load %arg8[%c1_244, %c0_245, %c0_246] : memref<3x2x128xf32, #tpu.memory_space<vmem>>, vector<1x2x128xf32>
    %425 = vector.shape_cast %424 : vector<1x2x128xf32> to vector<2x128xf32>
    %426 = vector.shape_cast %387 : vector<2x128xf32> to vector<1x2x128xf32>
    tpu.vector_store %arg8[%c1_244, %c0_245, %c0_246], %426 {strides = array<i32>} : memref<3x2x128xf32, #tpu.memory_space<vmem>>, vector<1x2x128xf32>,
    %c1_247 = arith.constant 1 : index
    %c0_248 = arith.constant 0 : index
    %c0_249 = arith.constant 0 : index
    %427 = vector.load %arg9[%c1_247, %c0_248, %c0_249] : memref<3x2x128xf32, #tpu.memory_space<vmem>>, vector<1x2x128xf32>
    %428 = vector.shape_cast %427 : vector<1x2x128xf32> to vector<2x128xf32>
    %429 = vector.shape_cast %385 : vector<2x128xf32> to vector<1x2x128xf32>
    tpu.vector_store %arg9[%c1_247, %c0_248, %c0_249], %429 {strides = array<i32>} : memref<3x2x128xf32, #tpu.memory_space<vmem>>, vector<1x2x128xf32>,
    %c2_250 = arith.constant 2 : index
    %c0_251 = arith.constant 0 : index
    %c0_252 = arith.constant 0 : index
    %430 = vector.load %arg8[%c2_250, %c0_251, %c0_252] : memref<3x2x128xf32, #tpu.memory_space<vmem>>, vector<1x2x128xf32>
    %431 = vector.shape_cast %430 : vector<1x2x128xf32> to vector<2x128xf32>
    %432 = vector.shape_cast %417 : vector<2x128xf32> to vector<1x2x128xf32>
    tpu.vector_store %arg8[%c2_250, %c0_251, %c0_252], %432 {strides = array<i32>} : memref<3x2x128xf32, #tpu.memory_space<vmem>>, vector<1x2x128xf32>,
    %c2_253 = arith.constant 2 : index
    %c0_254 = arith.constant 0 : index
    %c0_255 = arith.constant 0 : index
    %433 = vector.load %arg9[%c2_253, %c0_254, %c0_255] : memref<3x2x128xf32, #tpu.memory_space<vmem>>, vector<1x2x128xf32>
    %434 = vector.shape_cast %433 : vector<1x2x128xf32> to vector<2x128xf32>
    %435 = vector.shape_cast %415 : vector<2x128xf32> to vector<1x2x128xf32>
    tpu.vector_store %arg9[%c2_253, %c0_254, %c0_255], %435 {strides = array<i32>} : memref<3x2x128xf32, #tpu.memory_space<vmem>>, vector<1x2x128xf32>,
    %c8 = arith.constant 8 : index
    %c0_256 = arith.constant 0 : index
    %436 = vector.load %arg10[%c8, %c0_256] : memref<16x512xf32, #tpu.memory_space<vmem>>, vector<2x512xf32>
    %c0_257 = arith.constant 0 : index
    %c0_258 = arith.constant 0 : index
    %c0_259 = arith.constant 0 : index
    %437 = vector.load %arg8[%c0_257, %c0_258, %c0_259] : memref<3x2x128xf32, #tpu.memory_space<vmem>>, vector<1x2x128xf32>
    %438 = vector.shape_cast %437 : vector<1x2x128xf32> to vector<2x128xf32>
    %439 = arith.truncf %438 : vector<2x128xf32> to vector<2x128xbf16>
    %c0_260 = arith.constant 0 : index
    %c0_261 = arith.constant 0 : index
    %c0_262 = arith.constant 0 : index
    %440 = vector.load %arg3[%c0_260, %c0_261, %c0_262] : memref<3x128x512xbf16, #tpu.memory_space<vmem>>, vector<1x128x512xbf16>
    %441 = vector.shape_cast %440 : vector<1x128x512xbf16> to vector<128x512xbf16>
    %cst_263 = arith.constant dense<0.000000e+00> : vector<2x512xf32>
    %442 = tpu.matmul %439, %441, %cst_263 {dimension_numbers = #tpu.dot_dimension_numbers<[1], [0], [0], [1], [0, 0, 1, 1], [], []>} : vector<2x128xbf16>, vector<128x512xbf16>, vector<2x512xf32> -> vector<2x512xf32>
    %443 = arith.addf %436, %442 : vector<2x512xf32>
    %444 = vector.extract_strided_slice %443 {offsets = [0, 0], sizes = [2, 384], strides = [1, 1]} : vector<2x512xf32> to vector<2x384xf32>
    %445 = arith.negf %444 : vector<2x384xf32>
    %446 = math.exp %445 : vector<2x384xf32>
    %cst_264 = arith.constant 1.000000e+00 : f32
    %447 = vector.broadcast %cst_264 : f32 to vector<2x384xf32>
    %448 = arith.addf %447, %446 : vector<2x384xf32>
    %449 = arith.divf %447, %448 : vector<2x384xf32>
    %450 = vector.extract_strided_slice %449 {offsets = [0, 0], sizes = [2, 128], strides = [1, 1]} : vector<2x384xf32> to vector<2x128xf32>
    %451 = vector.extract_strided_slice %449 {offsets = [0, 128], sizes = [2, 128], strides = [1, 1]} : vector<2x384xf32> to vector<2x128xf32>
    %452 = vector.extract_strided_slice %449 {offsets = [0, 256], sizes = [2, 128], strides = [1, 1]} : vector<2x384xf32> to vector<2x128xf32>
    %453 = vector.extract_strided_slice %443 {offsets = [0, 384], sizes = [2, 128], strides = [1, 1]} : vector<2x512xf32> to vector<2x128xf32>
    %454 = math.tanh %453 : vector<2x128xf32>
    %c0_265 = arith.constant 0 : index
    %c0_266 = arith.constant 0 : index
    %c0_267 = arith.constant 0 : index
    %455 = vector.load %arg9[%c0_265, %c0_266, %c0_267] : memref<3x2x128xf32, #tpu.memory_space<vmem>>, vector<1x2x128xf32>
    %456 = vector.shape_cast %455 : vector<1x2x128xf32> to vector<2x128xf32>
    %457 = arith.mulf %451, %456 : vector<2x128xf32>
    %458 = arith.mulf %450, %454 : vector<2x128xf32>
    %459 = arith.addf %457, %458 : vector<2x128xf32>
    %460 = math.tanh %459 : vector<2x128xf32>
    %461 = arith.mulf %452, %460 : vector<2x128xf32>
    %462 = arith.truncf %461 : vector<2x128xf32> to vector<2x128xbf16>
    %c1_268 = arith.constant 1 : index
    %c0_269 = arith.constant 0 : index
    %c0_270 = arith.constant 0 : index
    %463 = vector.load %arg2[%c1_268, %c0_269, %c0_270] : memref<3x128x512xbf16, #tpu.memory_space<vmem>>, vector<1x128x512xbf16>
    %464 = vector.shape_cast %463 : vector<1x128x512xbf16> to vector<128x512xbf16>
    %cst_271 = arith.constant dense<0.000000e+00> : vector<2x512xf32>
    %465 = tpu.matmul %462, %464, %cst_271 {dimension_numbers = #tpu.dot_dimension_numbers<[1], [0], [0], [1], [0, 0, 1, 1], [], []>} : vector<2x128xbf16>, vector<128x512xbf16>, vector<2x512xf32> -> vector<2x512xf32>
    %c1_272 = arith.constant 1 : index
    %c0_273 = arith.constant 0 : index
    %c0_274 = arith.constant 0 : index
    %466 = vector.load %arg8[%c1_272, %c0_273, %c0_274] : memref<3x2x128xf32, #tpu.memory_space<vmem>>, vector<1x2x128xf32>
    %467 = vector.shape_cast %466 : vector<1x2x128xf32> to vector<2x128xf32>
    %468 = arith.truncf %467 : vector<2x128xf32> to vector<2x128xbf16>
    %c1_275 = arith.constant 1 : index
    %c0_276 = arith.constant 0 : index
    %c0_277 = arith.constant 0 : index
    %469 = vector.load %arg3[%c1_275, %c0_276, %c0_277] : memref<3x128x512xbf16, #tpu.memory_space<vmem>>, vector<1x128x512xbf16>
    %470 = vector.shape_cast %469 : vector<1x128x512xbf16> to vector<128x512xbf16>
    %cst_278 = arith.constant dense<0.000000e+00> : vector<2x512xf32>
    %471 = tpu.matmul %468, %470, %cst_278 {dimension_numbers = #tpu.dot_dimension_numbers<[1], [0], [0], [1], [0, 0, 1, 1], [], []>} : vector<2x128xbf16>, vector<128x512xbf16>, vector<2x512xf32> -> vector<2x512xf32>
    %472 = arith.addf %465, %471 : vector<2x512xf32>
    %473 = arith.addf %472, %15 : vector<2x512xf32>
    %474 = vector.extract_strided_slice %473 {offsets = [0, 0], sizes = [2, 384], strides = [1, 1]} : vector<2x512xf32> to vector<2x384xf32>
    %475 = arith.negf %474 : vector<2x384xf32>
    %476 = math.exp %475 : vector<2x384xf32>
    %cst_279 = arith.constant 1.000000e+00 : f32
    %477 = vector.broadcast %cst_279 : f32 to vector<2x384xf32>
    %478 = arith.addf %477, %476 : vector<2x384xf32>
    %479 = arith.divf %477, %478 : vector<2x384xf32>
    %480 = vector.extract_strided_slice %479 {offsets = [0, 0], sizes = [2, 128], strides = [1, 1]} : vector<2x384xf32> to vector<2x128xf32>
    %481 = vector.extract_strided_slice %479 {offsets = [0, 128], sizes = [2, 128], strides = [1, 1]} : vector<2x384xf32> to vector<2x128xf32>
    %482 = vector.extract_strided_slice %479 {offsets = [0, 256], sizes = [2, 128], strides = [1, 1]} : vector<2x384xf32> to vector<2x128xf32>
    %483 = vector.extract_strided_slice %473 {offsets = [0, 384], sizes = [2, 128], strides = [1, 1]} : vector<2x512xf32> to vector<2x128xf32>
    %484 = math.tanh %483 : vector<2x128xf32>
    %c1_280 = arith.constant 1 : index
    %c0_281 = arith.constant 0 : index
    %c0_282 = arith.constant 0 : index
    %485 = vector.load %arg9[%c1_280, %c0_281, %c0_282] : memref<3x2x128xf32, #tpu.memory_space<vmem>>, vector<1x2x128xf32>
    %486 = vector.shape_cast %485 : vector<1x2x128xf32> to vector<2x128xf32>
    %487 = arith.mulf %481, %486 : vector<2x128xf32>
    %488 = arith.mulf %480, %484 : vector<2x128xf32>
    %489 = arith.addf %487, %488 : vector<2x128xf32>
    %490 = math.tanh %489 : vector<2x128xf32>
    %491 = arith.mulf %482, %490 : vector<2x128xf32>
    %492 = arith.truncf %491 : vector<2x128xf32> to vector<2x128xbf16>
    %c2_283 = arith.constant 2 : index
    %c0_284 = arith.constant 0 : index
    %c0_285 = arith.constant 0 : index
    %493 = vector.load %arg2[%c2_283, %c0_284, %c0_285] : memref<3x128x512xbf16, #tpu.memory_space<vmem>>, vector<1x128x512xbf16>
    %494 = vector.shape_cast %493 : vector<1x128x512xbf16> to vector<128x512xbf16>
    %cst_286 = arith.constant dense<0.000000e+00> : vector<2x512xf32>
    %495 = tpu.matmul %492, %494, %cst_286 {dimension_numbers = #tpu.dot_dimension_numbers<[1], [0], [0], [1], [0, 0, 1, 1], [], []>} : vector<2x128xbf16>, vector<128x512xbf16>, vector<2x512xf32> -> vector<2x512xf32>
    %c2_287 = arith.constant 2 : index
    %c0_288 = arith.constant 0 : index
    %c0_289 = arith.constant 0 : index
    %496 = vector.load %arg8[%c2_287, %c0_288, %c0_289] : memref<3x2x128xf32, #tpu.memory_space<vmem>>, vector<1x2x128xf32>
    %497 = vector.shape_cast %496 : vector<1x2x128xf32> to vector<2x128xf32>
    %498 = arith.truncf %497 : vector<2x128xf32> to vector<2x128xbf16>
    %c2_290 = arith.constant 2 : index
    %c0_291 = arith.constant 0 : index
    %c0_292 = arith.constant 0 : index
    %499 = vector.load %arg3[%c2_290, %c0_291, %c0_292] : memref<3x128x512xbf16, #tpu.memory_space<vmem>>, vector<1x128x512xbf16>
    %500 = vector.shape_cast %499 : vector<1x128x512xbf16> to vector<128x512xbf16>
    %cst_293 = arith.constant dense<0.000000e+00> : vector<2x512xf32>
    %501 = tpu.matmul %498, %500, %cst_293 {dimension_numbers = #tpu.dot_dimension_numbers<[1], [0], [0], [1], [0, 0, 1, 1], [], []>} : vector<2x128xbf16>, vector<128x512xbf16>, vector<2x512xf32> -> vector<2x512xf32>
    %502 = arith.addf %495, %501 : vector<2x512xf32>
    %503 = arith.addf %502, %19 : vector<2x512xf32>
    %504 = vector.extract_strided_slice %503 {offsets = [0, 0], sizes = [2, 384], strides = [1, 1]} : vector<2x512xf32> to vector<2x384xf32>
    %505 = arith.negf %504 : vector<2x384xf32>
    %506 = math.exp %505 : vector<2x384xf32>
    %cst_294 = arith.constant 1.000000e+00 : f32
    %507 = vector.broadcast %cst_294 : f32 to vector<2x384xf32>
    %508 = arith.addf %507, %506 : vector<2x384xf32>
    %509 = arith.divf %507, %508 : vector<2x384xf32>
    %510 = vector.extract_strided_slice %509 {offsets = [0, 0], sizes = [2, 128], strides = [1, 1]} : vector<2x384xf32> to vector<2x128xf32>
    %511 = vector.extract_strided_slice %509 {offsets = [0, 128], sizes = [2, 128], strides = [1, 1]} : vector<2x384xf32> to vector<2x128xf32>
    %512 = vector.extract_strided_slice %509 {offsets = [0, 256], sizes = [2, 128], strides = [1, 1]} : vector<2x384xf32> to vector<2x128xf32>
    %513 = vector.extract_strided_slice %503 {offsets = [0, 384], sizes = [2, 128], strides = [1, 1]} : vector<2x512xf32> to vector<2x128xf32>
    %514 = math.tanh %513 : vector<2x128xf32>
    %c2_295 = arith.constant 2 : index
    %c0_296 = arith.constant 0 : index
    %c0_297 = arith.constant 0 : index
    %515 = vector.load %arg9[%c2_295, %c0_296, %c0_297] : memref<3x2x128xf32, #tpu.memory_space<vmem>>, vector<1x2x128xf32>
    %516 = vector.shape_cast %515 : vector<1x2x128xf32> to vector<2x128xf32>
    %517 = arith.mulf %511, %516 : vector<2x128xf32>
    %518 = arith.mulf %510, %514 : vector<2x128xf32>
    %519 = arith.addf %517, %518 : vector<2x128xf32>
    %520 = math.tanh %519 : vector<2x128xf32>
    %521 = arith.mulf %512, %520 : vector<2x128xf32>
    %c0_298 = arith.constant 0 : index
    %c0_299 = arith.constant 0 : index
    %c0_300 = arith.constant 0 : index
    %522 = vector.load %arg8[%c0_298, %c0_299, %c0_300] : memref<3x2x128xf32, #tpu.memory_space<vmem>>, vector<1x2x128xf32>
    %523 = vector.shape_cast %522 : vector<1x2x128xf32> to vector<2x128xf32>
    %524 = vector.shape_cast %461 : vector<2x128xf32> to vector<1x2x128xf32>
    tpu.vector_store %arg8[%c0_298, %c0_299, %c0_300], %524 {strides = array<i32>} : memref<3x2x128xf32, #tpu.memory_space<vmem>>, vector<1x2x128xf32>,
    %c0_301 = arith.constant 0 : index
    %c0_302 = arith.constant 0 : index
    %c0_303 = arith.constant 0 : index
    %525 = vector.load %arg9[%c0_301, %c0_302, %c0_303] : memref<3x2x128xf32, #tpu.memory_space<vmem>>, vector<1x2x128xf32>
    %526 = vector.shape_cast %525 : vector<1x2x128xf32> to vector<2x128xf32>
    %527 = vector.shape_cast %459 : vector<2x128xf32> to vector<1x2x128xf32>
    tpu.vector_store %arg9[%c0_301, %c0_302, %c0_303], %527 {strides = array<i32>} : memref<3x2x128xf32, #tpu.memory_space<vmem>>, vector<1x2x128xf32>,
    %c1_304 = arith.constant 1 : index
    %c0_305 = arith.constant 0 : index
    %c0_306 = arith.constant 0 : index
    %528 = vector.load %arg8[%c1_304, %c0_305, %c0_306] : memref<3x2x128xf32, #tpu.memory_space<vmem>>, vector<1x2x128xf32>
    %529 = vector.shape_cast %528 : vector<1x2x128xf32> to vector<2x128xf32>
    %530 = vector.shape_cast %491 : vector<2x128xf32> to vector<1x2x128xf32>
    tpu.vector_store %arg8[%c1_304, %c0_305, %c0_306], %530 {strides = array<i32>} : memref<3x2x128xf32, #tpu.memory_space<vmem>>, vector<1x2x128xf32>,
    %c1_307 = arith.constant 1 : index
    %c0_308 = arith.constant 0 : index
    %c0_309 = arith.constant 0 : index
    %531 = vector.load %arg9[%c1_307, %c0_308, %c0_309] : memref<3x2x128xf32, #tpu.memory_space<vmem>>, vector<1x2x128xf32>
    %532 = vector.shape_cast %531 : vector<1x2x128xf32> to vector<2x128xf32>
    %533 = vector.shape_cast %489 : vector<2x128xf32> to vector<1x2x128xf32>
    tpu.vector_store %arg9[%c1_307, %c0_308, %c0_309], %533 {strides = array<i32>} : memref<3x2x128xf32, #tpu.memory_space<vmem>>, vector<1x2x128xf32>,
    %c2_310 = arith.constant 2 : index
    %c0_311 = arith.constant 0 : index
    %c0_312 = arith.constant 0 : index
    %534 = vector.load %arg8[%c2_310, %c0_311, %c0_312] : memref<3x2x128xf32, #tpu.memory_space<vmem>>, vector<1x2x128xf32>
    %535 = vector.shape_cast %534 : vector<1x2x128xf32> to vector<2x128xf32>
    %536 = vector.shape_cast %521 : vector<2x128xf32> to vector<1x2x128xf32>
    tpu.vector_store %arg8[%c2_310, %c0_311, %c0_312], %536 {strides = array<i32>} : memref<3x2x128xf32, #tpu.memory_space<vmem>>, vector<1x2x128xf32>,
    %c2_313 = arith.constant 2 : index
    %c0_314 = arith.constant 0 : index
    %c0_315 = arith.constant 0 : index
    %537 = vector.load %arg9[%c2_313, %c0_314, %c0_315] : memref<3x2x128xf32, #tpu.memory_space<vmem>>, vector<1x2x128xf32>
    %538 = vector.shape_cast %537 : vector<1x2x128xf32> to vector<2x128xf32>
    %539 = vector.shape_cast %519 : vector<2x128xf32> to vector<1x2x128xf32>
    tpu.vector_store %arg9[%c2_313, %c0_314, %c0_315], %539 {strides = array<i32>} : memref<3x2x128xf32, #tpu.memory_space<vmem>>, vector<1x2x128xf32>,
    %c10 = arith.constant 10 : index
    %c0_316 = arith.constant 0 : index
    %540 = vector.load %arg10[%c10, %c0_316] : memref<16x512xf32, #tpu.memory_space<vmem>>, vector<2x512xf32>
    %c0_317 = arith.constant 0 : index
    %c0_318 = arith.constant 0 : index
    %c0_319 = arith.constant 0 : index
    %541 = vector.load %arg8[%c0_317, %c0_318, %c0_319] : memref<3x2x128xf32, #tpu.memory_space<vmem>>, vector<1x2x128xf32>
    %542 = vector.shape_cast %541 : vector<1x2x128xf32> to vector<2x128xf32>
    %543 = arith.truncf %542 : vector<2x128xf32> to vector<2x128xbf16>
    %c0_320 = arith.constant 0 : index
    %c0_321 = arith.constant 0 : index
    %c0_322 = arith.constant 0 : index
    %544 = vector.load %arg3[%c0_320, %c0_321, %c0_322] : memref<3x128x512xbf16, #tpu.memory_space<vmem>>, vector<1x128x512xbf16>
    %545 = vector.shape_cast %544 : vector<1x128x512xbf16> to vector<128x512xbf16>
    %cst_323 = arith.constant dense<0.000000e+00> : vector<2x512xf32>
    %546 = tpu.matmul %543, %545, %cst_323 {dimension_numbers = #tpu.dot_dimension_numbers<[1], [0], [0], [1], [0, 0, 1, 1], [], []>} : vector<2x128xbf16>, vector<128x512xbf16>, vector<2x512xf32> -> vector<2x512xf32>
    %547 = arith.addf %540, %546 : vector<2x512xf32>
    %548 = vector.extract_strided_slice %547 {offsets = [0, 0], sizes = [2, 384], strides = [1, 1]} : vector<2x512xf32> to vector<2x384xf32>
    %549 = arith.negf %548 : vector<2x384xf32>
    %550 = math.exp %549 : vector<2x384xf32>
    %cst_324 = arith.constant 1.000000e+00 : f32
    %551 = vector.broadcast %cst_324 : f32 to vector<2x384xf32>
    %552 = arith.addf %551, %550 : vector<2x384xf32>
    %553 = arith.divf %551, %552 : vector<2x384xf32>
    %554 = vector.extract_strided_slice %553 {offsets = [0, 0], sizes = [2, 128], strides = [1, 1]} : vector<2x384xf32> to vector<2x128xf32>
    %555 = vector.extract_strided_slice %553 {offsets = [0, 128], sizes = [2, 128], strides = [1, 1]} : vector<2x384xf32> to vector<2x128xf32>
    %556 = vector.extract_strided_slice %553 {offsets = [0, 256], sizes = [2, 128], strides = [1, 1]} : vector<2x384xf32> to vector<2x128xf32>
    %557 = vector.extract_strided_slice %547 {offsets = [0, 384], sizes = [2, 128], strides = [1, 1]} : vector<2x512xf32> to vector<2x128xf32>
    %558 = math.tanh %557 : vector<2x128xf32>
    %c0_325 = arith.constant 0 : index
    %c0_326 = arith.constant 0 : index
    %c0_327 = arith.constant 0 : index
    %559 = vector.load %arg9[%c0_325, %c0_326, %c0_327] : memref<3x2x128xf32, #tpu.memory_space<vmem>>, vector<1x2x128xf32>
    %560 = vector.shape_cast %559 : vector<1x2x128xf32> to vector<2x128xf32>
    %561 = arith.mulf %555, %560 : vector<2x128xf32>
    %562 = arith.mulf %554, %558 : vector<2x128xf32>
    %563 = arith.addf %561, %562 : vector<2x128xf32>
    %564 = math.tanh %563 : vector<2x128xf32>
    %565 = arith.mulf %556, %564 : vector<2x128xf32>
    %566 = arith.truncf %565 : vector<2x128xf32> to vector<2x128xbf16>
    %c1_328 = arith.constant 1 : index
    %c0_329 = arith.constant 0 : index
    %c0_330 = arith.constant 0 : index
    %567 = vector.load %arg2[%c1_328, %c0_329, %c0_330] : memref<3x128x512xbf16, #tpu.memory_space<vmem>>, vector<1x128x512xbf16>
    %568 = vector.shape_cast %567 : vector<1x128x512xbf16> to vector<128x512xbf16>
    %cst_331 = arith.constant dense<0.000000e+00> : vector<2x512xf32>
    %569 = tpu.matmul %566, %568, %cst_331 {dimension_numbers = #tpu.dot_dimension_numbers<[1], [0], [0], [1], [0, 0, 1, 1], [], []>} : vector<2x128xbf16>, vector<128x512xbf16>, vector<2x512xf32> -> vector<2x512xf32>
    %c1_332 = arith.constant 1 : index
    %c0_333 = arith.constant 0 : index
    %c0_334 = arith.constant 0 : index
    %570 = vector.load %arg8[%c1_332, %c0_333, %c0_334] : memref<3x2x128xf32, #tpu.memory_space<vmem>>, vector<1x2x128xf32>
    %571 = vector.shape_cast %570 : vector<1x2x128xf32> to vector<2x128xf32>
    %572 = arith.truncf %571 : vector<2x128xf32> to vector<2x128xbf16>
    %c1_335 = arith.constant 1 : index
    %c0_336 = arith.constant 0 : index
    %c0_337 = arith.constant 0 : index
    %573 = vector.load %arg3[%c1_335, %c0_336, %c0_337] : memref<3x128x512xbf16, #tpu.memory_space<vmem>>, vector<1x128x512xbf16>
    %574 = vector.shape_cast %573 : vector<1x128x512xbf16> to vector<128x512xbf16>
    %cst_338 = arith.constant dense<0.000000e+00> : vector<2x512xf32>
    %575 = tpu.matmul %572, %574, %cst_338 {dimension_numbers = #tpu.dot_dimension_numbers<[1], [0], [0], [1], [0, 0, 1, 1], [], []>} : vector<2x128xbf16>, vector<128x512xbf16>, vector<2x512xf32> -> vector<2x512xf32>
    %576 = arith.addf %569, %575 : vector<2x512xf32>
    %577 = arith.addf %576, %15 : vector<2x512xf32>
    %578 = vector.extract_strided_slice %577 {offsets = [0, 0], sizes = [2, 384], strides = [1, 1]} : vector<2x512xf32> to vector<2x384xf32>
    %579 = arith.negf %578 : vector<2x384xf32>
    %580 = math.exp %579 : vector<2x384xf32>
    %cst_339 = arith.constant 1.000000e+00 : f32
    %581 = vector.broadcast %cst_339 : f32 to vector<2x384xf32>
    %582 = arith.addf %581, %580 : vector<2x384xf32>
    %583 = arith.divf %581, %582 : vector<2x384xf32>
    %584 = vector.extract_strided_slice %583 {offsets = [0, 0], sizes = [2, 128], strides = [1, 1]} : vector<2x384xf32> to vector<2x128xf32>
    %585 = vector.extract_strided_slice %583 {offsets = [0, 128], sizes = [2, 128], strides = [1, 1]} : vector<2x384xf32> to vector<2x128xf32>
    %586 = vector.extract_strided_slice %583 {offsets = [0, 256], sizes = [2, 128], strides = [1, 1]} : vector<2x384xf32> to vector<2x128xf32>
    %587 = vector.extract_strided_slice %577 {offsets = [0, 384], sizes = [2, 128], strides = [1, 1]} : vector<2x512xf32> to vector<2x128xf32>
    %588 = math.tanh %587 : vector<2x128xf32>
    %c1_340 = arith.constant 1 : index
    %c0_341 = arith.constant 0 : index
    %c0_342 = arith.constant 0 : index
    %589 = vector.load %arg9[%c1_340, %c0_341, %c0_342] : memref<3x2x128xf32, #tpu.memory_space<vmem>>, vector<1x2x128xf32>
    %590 = vector.shape_cast %589 : vector<1x2x128xf32> to vector<2x128xf32>
    %591 = arith.mulf %585, %590 : vector<2x128xf32>
    %592 = arith.mulf %584, %588 : vector<2x128xf32>
    %593 = arith.addf %591, %592 : vector<2x128xf32>
    %594 = math.tanh %593 : vector<2x128xf32>
    %595 = arith.mulf %586, %594 : vector<2x128xf32>
    %596 = arith.truncf %595 : vector<2x128xf32> to vector<2x128xbf16>
    %c2_343 = arith.constant 2 : index
    %c0_344 = arith.constant 0 : index
    %c0_345 = arith.constant 0 : index
    %597 = vector.load %arg2[%c2_343, %c0_344, %c0_345] : memref<3x128x512xbf16, #tpu.memory_space<vmem>>, vector<1x128x512xbf16>
    %598 = vector.shape_cast %597 : vector<1x128x512xbf16> to vector<128x512xbf16>
    %cst_346 = arith.constant dense<0.000000e+00> : vector<2x512xf32>
    %599 = tpu.matmul %596, %598, %cst_346 {dimension_numbers = #tpu.dot_dimension_numbers<[1], [0], [0], [1], [0, 0, 1, 1], [], []>} : vector<2x128xbf16>, vector<128x512xbf16>, vector<2x512xf32> -> vector<2x512xf32>
    %c2_347 = arith.constant 2 : index
    %c0_348 = arith.constant 0 : index
    %c0_349 = arith.constant 0 : index
    %600 = vector.load %arg8[%c2_347, %c0_348, %c0_349] : memref<3x2x128xf32, #tpu.memory_space<vmem>>, vector<1x2x128xf32>
    %601 = vector.shape_cast %600 : vector<1x2x128xf32> to vector<2x128xf32>
    %602 = arith.truncf %601 : vector<2x128xf32> to vector<2x128xbf16>
    %c2_350 = arith.constant 2 : index
    %c0_351 = arith.constant 0 : index
    %c0_352 = arith.constant 0 : index
    %603 = vector.load %arg3[%c2_350, %c0_351, %c0_352] : memref<3x128x512xbf16, #tpu.memory_space<vmem>>, vector<1x128x512xbf16>
    %604 = vector.shape_cast %603 : vector<1x128x512xbf16> to vector<128x512xbf16>
    %cst_353 = arith.constant dense<0.000000e+00> : vector<2x512xf32>
    %605 = tpu.matmul %602, %604, %cst_353 {dimension_numbers = #tpu.dot_dimension_numbers<[1], [0], [0], [1], [0, 0, 1, 1], [], []>} : vector<2x128xbf16>, vector<128x512xbf16>, vector<2x512xf32> -> vector<2x512xf32>
    %606 = arith.addf %599, %605 : vector<2x512xf32>
    %607 = arith.addf %606, %19 : vector<2x512xf32>
    %608 = vector.extract_strided_slice %607 {offsets = [0, 0], sizes = [2, 384], strides = [1, 1]} : vector<2x512xf32> to vector<2x384xf32>
    %609 = arith.negf %608 : vector<2x384xf32>
    %610 = math.exp %609 : vector<2x384xf32>
    %cst_354 = arith.constant 1.000000e+00 : f32
    %611 = vector.broadcast %cst_354 : f32 to vector<2x384xf32>
    %612 = arith.addf %611, %610 : vector<2x384xf32>
    %613 = arith.divf %611, %612 : vector<2x384xf32>
    %614 = vector.extract_strided_slice %613 {offsets = [0, 0], sizes = [2, 128], strides = [1, 1]} : vector<2x384xf32> to vector<2x128xf32>
    %615 = vector.extract_strided_slice %613 {offsets = [0, 128], sizes = [2, 128], strides = [1, 1]} : vector<2x384xf32> to vector<2x128xf32>
    %616 = vector.extract_strided_slice %613 {offsets = [0, 256], sizes = [2, 128], strides = [1, 1]} : vector<2x384xf32> to vector<2x128xf32>
    %617 = vector.extract_strided_slice %607 {offsets = [0, 384], sizes = [2, 128], strides = [1, 1]} : vector<2x512xf32> to vector<2x128xf32>
    %618 = math.tanh %617 : vector<2x128xf32>
    %c2_355 = arith.constant 2 : index
    %c0_356 = arith.constant 0 : index
    %c0_357 = arith.constant 0 : index
    %619 = vector.load %arg9[%c2_355, %c0_356, %c0_357] : memref<3x2x128xf32, #tpu.memory_space<vmem>>, vector<1x2x128xf32>
    %620 = vector.shape_cast %619 : vector<1x2x128xf32> to vector<2x128xf32>
    %621 = arith.mulf %615, %620 : vector<2x128xf32>
    %622 = arith.mulf %614, %618 : vector<2x128xf32>
    %623 = arith.addf %621, %622 : vector<2x128xf32>
    %624 = math.tanh %623 : vector<2x128xf32>
    %625 = arith.mulf %616, %624 : vector<2x128xf32>
    %c0_358 = arith.constant 0 : index
    %c0_359 = arith.constant 0 : index
    %c0_360 = arith.constant 0 : index
    %626 = vector.load %arg8[%c0_358, %c0_359, %c0_360] : memref<3x2x128xf32, #tpu.memory_space<vmem>>, vector<1x2x128xf32>
    %627 = vector.shape_cast %626 : vector<1x2x128xf32> to vector<2x128xf32>
    %628 = vector.shape_cast %565 : vector<2x128xf32> to vector<1x2x128xf32>
    tpu.vector_store %arg8[%c0_358, %c0_359, %c0_360], %628 {strides = array<i32>} : memref<3x2x128xf32, #tpu.memory_space<vmem>>, vector<1x2x128xf32>,
    %c0_361 = arith.constant 0 : index
    %c0_362 = arith.constant 0 : index
    %c0_363 = arith.constant 0 : index
    %629 = vector.load %arg9[%c0_361, %c0_362, %c0_363] : memref<3x2x128xf32, #tpu.memory_space<vmem>>, vector<1x2x128xf32>
    %630 = vector.shape_cast %629 : vector<1x2x128xf32> to vector<2x128xf32>
    %631 = vector.shape_cast %563 : vector<2x128xf32> to vector<1x2x128xf32>
    tpu.vector_store %arg9[%c0_361, %c0_362, %c0_363], %631 {strides = array<i32>} : memref<3x2x128xf32, #tpu.memory_space<vmem>>, vector<1x2x128xf32>,
    %c1_364 = arith.constant 1 : index
    %c0_365 = arith.constant 0 : index
    %c0_366 = arith.constant 0 : index
    %632 = vector.load %arg8[%c1_364, %c0_365, %c0_366] : memref<3x2x128xf32, #tpu.memory_space<vmem>>, vector<1x2x128xf32>
    %633 = vector.shape_cast %632 : vector<1x2x128xf32> to vector<2x128xf32>
    %634 = vector.shape_cast %595 : vector<2x128xf32> to vector<1x2x128xf32>
    tpu.vector_store %arg8[%c1_364, %c0_365, %c0_366], %634 {strides = array<i32>} : memref<3x2x128xf32, #tpu.memory_space<vmem>>, vector<1x2x128xf32>,
    %c1_367 = arith.constant 1 : index
    %c0_368 = arith.constant 0 : index
    %c0_369 = arith.constant 0 : index
    %635 = vector.load %arg9[%c1_367, %c0_368, %c0_369] : memref<3x2x128xf32, #tpu.memory_space<vmem>>, vector<1x2x128xf32>
    %636 = vector.shape_cast %635 : vector<1x2x128xf32> to vector<2x128xf32>
    %637 = vector.shape_cast %593 : vector<2x128xf32> to vector<1x2x128xf32>
    tpu.vector_store %arg9[%c1_367, %c0_368, %c0_369], %637 {strides = array<i32>} : memref<3x2x128xf32, #tpu.memory_space<vmem>>, vector<1x2x128xf32>,
    %c2_370 = arith.constant 2 : index
    %c0_371 = arith.constant 0 : index
    %c0_372 = arith.constant 0 : index
    %638 = vector.load %arg8[%c2_370, %c0_371, %c0_372] : memref<3x2x128xf32, #tpu.memory_space<vmem>>, vector<1x2x128xf32>
    %639 = vector.shape_cast %638 : vector<1x2x128xf32> to vector<2x128xf32>
    %640 = vector.shape_cast %625 : vector<2x128xf32> to vector<1x2x128xf32>
    tpu.vector_store %arg8[%c2_370, %c0_371, %c0_372], %640 {strides = array<i32>} : memref<3x2x128xf32, #tpu.memory_space<vmem>>, vector<1x2x128xf32>,
    %c2_373 = arith.constant 2 : index
    %c0_374 = arith.constant 0 : index
    %c0_375 = arith.constant 0 : index
    %641 = vector.load %arg9[%c2_373, %c0_374, %c0_375] : memref<3x2x128xf32, #tpu.memory_space<vmem>>, vector<1x2x128xf32>
    %642 = vector.shape_cast %641 : vector<1x2x128xf32> to vector<2x128xf32>
    %643 = vector.shape_cast %623 : vector<2x128xf32> to vector<1x2x128xf32>
    tpu.vector_store %arg9[%c2_373, %c0_374, %c0_375], %643 {strides = array<i32>} : memref<3x2x128xf32, #tpu.memory_space<vmem>>, vector<1x2x128xf32>,
    %c12 = arith.constant 12 : index
    %c0_376 = arith.constant 0 : index
    %644 = vector.load %arg10[%c12, %c0_376] : memref<16x512xf32, #tpu.memory_space<vmem>>, vector<2x512xf32>
    %c0_377 = arith.constant 0 : index
    %c0_378 = arith.constant 0 : index
    %c0_379 = arith.constant 0 : index
    %645 = vector.load %arg8[%c0_377, %c0_378, %c0_379] : memref<3x2x128xf32, #tpu.memory_space<vmem>>, vector<1x2x128xf32>
    %646 = vector.shape_cast %645 : vector<1x2x128xf32> to vector<2x128xf32>
    %647 = arith.truncf %646 : vector<2x128xf32> to vector<2x128xbf16>
    %c0_380 = arith.constant 0 : index
    %c0_381 = arith.constant 0 : index
    %c0_382 = arith.constant 0 : index
    %648 = vector.load %arg3[%c0_380, %c0_381, %c0_382] : memref<3x128x512xbf16, #tpu.memory_space<vmem>>, vector<1x128x512xbf16>
    %649 = vector.shape_cast %648 : vector<1x128x512xbf16> to vector<128x512xbf16>
    %cst_383 = arith.constant dense<0.000000e+00> : vector<2x512xf32>
    %650 = tpu.matmul %647, %649, %cst_383 {dimension_numbers = #tpu.dot_dimension_numbers<[1], [0], [0], [1], [0, 0, 1, 1], [], []>} : vector<2x128xbf16>, vector<128x512xbf16>, vector<2x512xf32> -> vector<2x512xf32>
    %651 = arith.addf %644, %650 : vector<2x512xf32>
    %652 = vector.extract_strided_slice %651 {offsets = [0, 0], sizes = [2, 384], strides = [1, 1]} : vector<2x512xf32> to vector<2x384xf32>
    %653 = arith.negf %652 : vector<2x384xf32>
    %654 = math.exp %653 : vector<2x384xf32>
    %cst_384 = arith.constant 1.000000e+00 : f32
    %655 = vector.broadcast %cst_384 : f32 to vector<2x384xf32>
    %656 = arith.addf %655, %654 : vector<2x384xf32>
    %657 = arith.divf %655, %656 : vector<2x384xf32>
    %658 = vector.extract_strided_slice %657 {offsets = [0, 0], sizes = [2, 128], strides = [1, 1]} : vector<2x384xf32> to vector<2x128xf32>
    %659 = vector.extract_strided_slice %657 {offsets = [0, 128], sizes = [2, 128], strides = [1, 1]} : vector<2x384xf32> to vector<2x128xf32>
    %660 = vector.extract_strided_slice %657 {offsets = [0, 256], sizes = [2, 128], strides = [1, 1]} : vector<2x384xf32> to vector<2x128xf32>
    %661 = vector.extract_strided_slice %651 {offsets = [0, 384], sizes = [2, 128], strides = [1, 1]} : vector<2x512xf32> to vector<2x128xf32>
    %662 = math.tanh %661 : vector<2x128xf32>
    %c0_385 = arith.constant 0 : index
    %c0_386 = arith.constant 0 : index
    %c0_387 = arith.constant 0 : index
    %663 = vector.load %arg9[%c0_385, %c0_386, %c0_387] : memref<3x2x128xf32, #tpu.memory_space<vmem>>, vector<1x2x128xf32>
    %664 = vector.shape_cast %663 : vector<1x2x128xf32> to vector<2x128xf32>
    %665 = arith.mulf %659, %664 : vector<2x128xf32>
    %666 = arith.mulf %658, %662 : vector<2x128xf32>
    %667 = arith.addf %665, %666 : vector<2x128xf32>
    %668 = math.tanh %667 : vector<2x128xf32>
    %669 = arith.mulf %660, %668 : vector<2x128xf32>
    %670 = arith.truncf %669 : vector<2x128xf32> to vector<2x128xbf16>
    %c1_388 = arith.constant 1 : index
    %c0_389 = arith.constant 0 : index
    %c0_390 = arith.constant 0 : index
    %671 = vector.load %arg2[%c1_388, %c0_389, %c0_390] : memref<3x128x512xbf16, #tpu.memory_space<vmem>>, vector<1x128x512xbf16>
    %672 = vector.shape_cast %671 : vector<1x128x512xbf16> to vector<128x512xbf16>
    %cst_391 = arith.constant dense<0.000000e+00> : vector<2x512xf32>
    %673 = tpu.matmul %670, %672, %cst_391 {dimension_numbers = #tpu.dot_dimension_numbers<[1], [0], [0], [1], [0, 0, 1, 1], [], []>} : vector<2x128xbf16>, vector<128x512xbf16>, vector<2x512xf32> -> vector<2x512xf32>
    %c1_392 = arith.constant 1 : index
    %c0_393 = arith.constant 0 : index
    %c0_394 = arith.constant 0 : index
    %674 = vector.load %arg8[%c1_392, %c0_393, %c0_394] : memref<3x2x128xf32, #tpu.memory_space<vmem>>, vector<1x2x128xf32>
    %675 = vector.shape_cast %674 : vector<1x2x128xf32> to vector<2x128xf32>
    %676 = arith.truncf %675 : vector<2x128xf32> to vector<2x128xbf16>
    %c1_395 = arith.constant 1 : index
    %c0_396 = arith.constant 0 : index
    %c0_397 = arith.constant 0 : index
    %677 = vector.load %arg3[%c1_395, %c0_396, %c0_397] : memref<3x128x512xbf16, #tpu.memory_space<vmem>>, vector<1x128x512xbf16>
    %678 = vector.shape_cast %677 : vector<1x128x512xbf16> to vector<128x512xbf16>
    %cst_398 = arith.constant dense<0.000000e+00> : vector<2x512xf32>
    %679 = tpu.matmul %676, %678, %cst_398 {dimension_numbers = #tpu.dot_dimension_numbers<[1], [0], [0], [1], [0, 0, 1, 1], [], []>} : vector<2x128xbf16>, vector<128x512xbf16>, vector<2x512xf32> -> vector<2x512xf32>
    %680 = arith.addf %673, %679 : vector<2x512xf32>
    %681 = arith.addf %680, %15 : vector<2x512xf32>
    %682 = vector.extract_strided_slice %681 {offsets = [0, 0], sizes = [2, 384], strides = [1, 1]} : vector<2x512xf32> to vector<2x384xf32>
    %683 = arith.negf %682 : vector<2x384xf32>
    %684 = math.exp %683 : vector<2x384xf32>
    %cst_399 = arith.constant 1.000000e+00 : f32
    %685 = vector.broadcast %cst_399 : f32 to vector<2x384xf32>
    %686 = arith.addf %685, %684 : vector<2x384xf32>
    %687 = arith.divf %685, %686 : vector<2x384xf32>
    %688 = vector.extract_strided_slice %687 {offsets = [0, 0], sizes = [2, 128], strides = [1, 1]} : vector<2x384xf32> to vector<2x128xf32>
    %689 = vector.extract_strided_slice %687 {offsets = [0, 128], sizes = [2, 128], strides = [1, 1]} : vector<2x384xf32> to vector<2x128xf32>
    %690 = vector.extract_strided_slice %687 {offsets = [0, 256], sizes = [2, 128], strides = [1, 1]} : vector<2x384xf32> to vector<2x128xf32>
    %691 = vector.extract_strided_slice %681 {offsets = [0, 384], sizes = [2, 128], strides = [1, 1]} : vector<2x512xf32> to vector<2x128xf32>
    %692 = math.tanh %691 : vector<2x128xf32>
    %c1_400 = arith.constant 1 : index
    %c0_401 = arith.constant 0 : index
    %c0_402 = arith.constant 0 : index
    %693 = vector.load %arg9[%c1_400, %c0_401, %c0_402] : memref<3x2x128xf32, #tpu.memory_space<vmem>>, vector<1x2x128xf32>
    %694 = vector.shape_cast %693 : vector<1x2x128xf32> to vector<2x128xf32>
    %695 = arith.mulf %689, %694 : vector<2x128xf32>
    %696 = arith.mulf %688, %692 : vector<2x128xf32>
    %697 = arith.addf %695, %696 : vector<2x128xf32>
    %698 = math.tanh %697 : vector<2x128xf32>
    %699 = arith.mulf %690, %698 : vector<2x128xf32>
    %700 = arith.truncf %699 : vector<2x128xf32> to vector<2x128xbf16>
    %c2_403 = arith.constant 2 : index
    %c0_404 = arith.constant 0 : index
    %c0_405 = arith.constant 0 : index
    %701 = vector.load %arg2[%c2_403, %c0_404, %c0_405] : memref<3x128x512xbf16, #tpu.memory_space<vmem>>, vector<1x128x512xbf16>
    %702 = vector.shape_cast %701 : vector<1x128x512xbf16> to vector<128x512xbf16>
    %cst_406 = arith.constant dense<0.000000e+00> : vector<2x512xf32>
    %703 = tpu.matmul %700, %702, %cst_406 {dimension_numbers = #tpu.dot_dimension_numbers<[1], [0], [0], [1], [0, 0, 1, 1], [], []>} : vector<2x128xbf16>, vector<128x512xbf16>, vector<2x512xf32> -> vector<2x512xf32>
    %c2_407 = arith.constant 2 : index
    %c0_408 = arith.constant 0 : index
    %c0_409 = arith.constant 0 : index
    %704 = vector.load %arg8[%c2_407, %c0_408, %c0_409] : memref<3x2x128xf32, #tpu.memory_space<vmem>>, vector<1x2x128xf32>
    %705 = vector.shape_cast %704 : vector<1x2x128xf32> to vector<2x128xf32>
    %706 = arith.truncf %705 : vector<2x128xf32> to vector<2x128xbf16>
    %c2_410 = arith.constant 2 : index
    %c0_411 = arith.constant 0 : index
    %c0_412 = arith.constant 0 : index
    %707 = vector.load %arg3[%c2_410, %c0_411, %c0_412] : memref<3x128x512xbf16, #tpu.memory_space<vmem>>, vector<1x128x512xbf16>
    %708 = vector.shape_cast %707 : vector<1x128x512xbf16> to vector<128x512xbf16>
    %cst_413 = arith.constant dense<0.000000e+00> : vector<2x512xf32>
    %709 = tpu.matmul %706, %708, %cst_413 {dimension_numbers = #tpu.dot_dimension_numbers<[1], [0], [0], [1], [0, 0, 1, 1], [], []>} : vector<2x128xbf16>, vector<128x512xbf16>, vector<2x512xf32> -> vector<2x512xf32>
    %710 = arith.addf %703, %709 : vector<2x512xf32>
    %711 = arith.addf %710, %19 : vector<2x512xf32>
    %712 = vector.extract_strided_slice %711 {offsets = [0, 0], sizes = [2, 384], strides = [1, 1]} : vector<2x512xf32> to vector<2x384xf32>
    %713 = arith.negf %712 : vector<2x384xf32>
    %714 = math.exp %713 : vector<2x384xf32>
    %cst_414 = arith.constant 1.000000e+00 : f32
    %715 = vector.broadcast %cst_414 : f32 to vector<2x384xf32>
    %716 = arith.addf %715, %714 : vector<2x384xf32>
    %717 = arith.divf %715, %716 : vector<2x384xf32>
    %718 = vector.extract_strided_slice %717 {offsets = [0, 0], sizes = [2, 128], strides = [1, 1]} : vector<2x384xf32> to vector<2x128xf32>
    %719 = vector.extract_strided_slice %717 {offsets = [0, 128], sizes = [2, 128], strides = [1, 1]} : vector<2x384xf32> to vector<2x128xf32>
    %720 = vector.extract_strided_slice %717 {offsets = [0, 256], sizes = [2, 128], strides = [1, 1]} : vector<2x384xf32> to vector<2x128xf32>
    %721 = vector.extract_strided_slice %711 {offsets = [0, 384], sizes = [2, 128], strides = [1, 1]} : vector<2x512xf32> to vector<2x128xf32>
    %722 = math.tanh %721 : vector<2x128xf32>
    %c2_415 = arith.constant 2 : index
    %c0_416 = arith.constant 0 : index
    %c0_417 = arith.constant 0 : index
    %723 = vector.load %arg9[%c2_415, %c0_416, %c0_417] : memref<3x2x128xf32, #tpu.memory_space<vmem>>, vector<1x2x128xf32>
    %724 = vector.shape_cast %723 : vector<1x2x128xf32> to vector<2x128xf32>
    %725 = arith.mulf %719, %724 : vector<2x128xf32>
    %726 = arith.mulf %718, %722 : vector<2x128xf32>
    %727 = arith.addf %725, %726 : vector<2x128xf32>
    %728 = math.tanh %727 : vector<2x128xf32>
    %729 = arith.mulf %720, %728 : vector<2x128xf32>
    %c0_418 = arith.constant 0 : index
    %c0_419 = arith.constant 0 : index
    %c0_420 = arith.constant 0 : index
    %730 = vector.load %arg8[%c0_418, %c0_419, %c0_420] : memref<3x2x128xf32, #tpu.memory_space<vmem>>, vector<1x2x128xf32>
    %731 = vector.shape_cast %730 : vector<1x2x128xf32> to vector<2x128xf32>
    %732 = vector.shape_cast %669 : vector<2x128xf32> to vector<1x2x128xf32>
    tpu.vector_store %arg8[%c0_418, %c0_419, %c0_420], %732 {strides = array<i32>} : memref<3x2x128xf32, #tpu.memory_space<vmem>>, vector<1x2x128xf32>,
    %c0_421 = arith.constant 0 : index
    %c0_422 = arith.constant 0 : index
    %c0_423 = arith.constant 0 : index
    %733 = vector.load %arg9[%c0_421, %c0_422, %c0_423] : memref<3x2x128xf32, #tpu.memory_space<vmem>>, vector<1x2x128xf32>
    %734 = vector.shape_cast %733 : vector<1x2x128xf32> to vector<2x128xf32>
    %735 = vector.shape_cast %667 : vector<2x128xf32> to vector<1x2x128xf32>
    tpu.vector_store %arg9[%c0_421, %c0_422, %c0_423], %735 {strides = array<i32>} : memref<3x2x128xf32, #tpu.memory_space<vmem>>, vector<1x2x128xf32>,
    %c1_424 = arith.constant 1 : index
    %c0_425 = arith.constant 0 : index
    %c0_426 = arith.constant 0 : index
    %736 = vector.load %arg8[%c1_424, %c0_425, %c0_426] : memref<3x2x128xf32, #tpu.memory_space<vmem>>, vector<1x2x128xf32>
    %737 = vector.shape_cast %736 : vector<1x2x128xf32> to vector<2x128xf32>
    %738 = vector.shape_cast %699 : vector<2x128xf32> to vector<1x2x128xf32>
    tpu.vector_store %arg8[%c1_424, %c0_425, %c0_426], %738 {strides = array<i32>} : memref<3x2x128xf32, #tpu.memory_space<vmem>>, vector<1x2x128xf32>,
    %c1_427 = arith.constant 1 : index
    %c0_428 = arith.constant 0 : index
    %c0_429 = arith.constant 0 : index
    %739 = vector.load %arg9[%c1_427, %c0_428, %c0_429] : memref<3x2x128xf32, #tpu.memory_space<vmem>>, vector<1x2x128xf32>
    %740 = vector.shape_cast %739 : vector<1x2x128xf32> to vector<2x128xf32>
    %741 = vector.shape_cast %697 : vector<2x128xf32> to vector<1x2x128xf32>
    tpu.vector_store %arg9[%c1_427, %c0_428, %c0_429], %741 {strides = array<i32>} : memref<3x2x128xf32, #tpu.memory_space<vmem>>, vector<1x2x128xf32>,
    %c2_430 = arith.constant 2 : index
    %c0_431 = arith.constant 0 : index
    %c0_432 = arith.constant 0 : index
    %742 = vector.load %arg8[%c2_430, %c0_431, %c0_432] : memref<3x2x128xf32, #tpu.memory_space<vmem>>, vector<1x2x128xf32>
    %743 = vector.shape_cast %742 : vector<1x2x128xf32> to vector<2x128xf32>
    %744 = vector.shape_cast %729 : vector<2x128xf32> to vector<1x2x128xf32>
    tpu.vector_store %arg8[%c2_430, %c0_431, %c0_432], %744 {strides = array<i32>} : memref<3x2x128xf32, #tpu.memory_space<vmem>>, vector<1x2x128xf32>,
    %c2_433 = arith.constant 2 : index
    %c0_434 = arith.constant 0 : index
    %c0_435 = arith.constant 0 : index
    %745 = vector.load %arg9[%c2_433, %c0_434, %c0_435] : memref<3x2x128xf32, #tpu.memory_space<vmem>>, vector<1x2x128xf32>
    %746 = vector.shape_cast %745 : vector<1x2x128xf32> to vector<2x128xf32>
    %747 = vector.shape_cast %727 : vector<2x128xf32> to vector<1x2x128xf32>
    tpu.vector_store %arg9[%c2_433, %c0_434, %c0_435], %747 {strides = array<i32>} : memref<3x2x128xf32, #tpu.memory_space<vmem>>, vector<1x2x128xf32>,
    %c14 = arith.constant 14 : index
    %c0_436 = arith.constant 0 : index
    %748 = vector.load %arg10[%c14, %c0_436] : memref<16x512xf32, #tpu.memory_space<vmem>>, vector<2x512xf32>
    %c0_437 = arith.constant 0 : index
    %c0_438 = arith.constant 0 : index
    %c0_439 = arith.constant 0 : index
    %749 = vector.load %arg8[%c0_437, %c0_438, %c0_439] : memref<3x2x128xf32, #tpu.memory_space<vmem>>, vector<1x2x128xf32>
    %750 = vector.shape_cast %749 : vector<1x2x128xf32> to vector<2x128xf32>
    %751 = arith.truncf %750 : vector<2x128xf32> to vector<2x128xbf16>
    %c0_440 = arith.constant 0 : index
    %c0_441 = arith.constant 0 : index
    %c0_442 = arith.constant 0 : index
    %752 = vector.load %arg3[%c0_440, %c0_441, %c0_442] : memref<3x128x512xbf16, #tpu.memory_space<vmem>>, vector<1x128x512xbf16>
    %753 = vector.shape_cast %752 : vector<1x128x512xbf16> to vector<128x512xbf16>
    %cst_443 = arith.constant dense<0.000000e+00> : vector<2x512xf32>
    %754 = tpu.matmul %751, %753, %cst_443 {dimension_numbers = #tpu.dot_dimension_numbers<[1], [0], [0], [1], [0, 0, 1, 1], [], []>} : vector<2x128xbf16>, vector<128x512xbf16>, vector<2x512xf32> -> vector<2x512xf32>
    %755 = arith.addf %748, %754 : vector<2x512xf32>
    %756 = vector.extract_strided_slice %755 {offsets = [0, 0], sizes = [2, 384], strides = [1, 1]} : vector<2x512xf32> to vector<2x384xf32>
    %757 = arith.negf %756 : vector<2x384xf32>
    %758 = math.exp %757 : vector<2x384xf32>
    %cst_444 = arith.constant 1.000000e+00 : f32
    %759 = vector.broadcast %cst_444 : f32 to vector<2x384xf32>
    %760 = arith.addf %759, %758 : vector<2x384xf32>
    %761 = arith.divf %759, %760 : vector<2x384xf32>
    %762 = vector.extract_strided_slice %761 {offsets = [0, 0], sizes = [2, 128], strides = [1, 1]} : vector<2x384xf32> to vector<2x128xf32>
    %763 = vector.extract_strided_slice %761 {offsets = [0, 128], sizes = [2, 128], strides = [1, 1]} : vector<2x384xf32> to vector<2x128xf32>
    %764 = vector.extract_strided_slice %761 {offsets = [0, 256], sizes = [2, 128], strides = [1, 1]} : vector<2x384xf32> to vector<2x128xf32>
    %765 = vector.extract_strided_slice %755 {offsets = [0, 384], sizes = [2, 128], strides = [1, 1]} : vector<2x512xf32> to vector<2x128xf32>
    %766 = math.tanh %765 : vector<2x128xf32>
    %c0_445 = arith.constant 0 : index
    %c0_446 = arith.constant 0 : index
    %c0_447 = arith.constant 0 : index
    %767 = vector.load %arg9[%c0_445, %c0_446, %c0_447] : memref<3x2x128xf32, #tpu.memory_space<vmem>>, vector<1x2x128xf32>
    %768 = vector.shape_cast %767 : vector<1x2x128xf32> to vector<2x128xf32>
    %769 = arith.mulf %763, %768 : vector<2x128xf32>
    %770 = arith.mulf %762, %766 : vector<2x128xf32>
    %771 = arith.addf %769, %770 : vector<2x128xf32>
    %772 = math.tanh %771 : vector<2x128xf32>
    %773 = arith.mulf %764, %772 : vector<2x128xf32>
    %774 = arith.truncf %773 : vector<2x128xf32> to vector<2x128xbf16>
    %c1_448 = arith.constant 1 : index
    %c0_449 = arith.constant 0 : index
    %c0_450 = arith.constant 0 : index
    %775 = vector.load %arg2[%c1_448, %c0_449, %c0_450] : memref<3x128x512xbf16, #tpu.memory_space<vmem>>, vector<1x128x512xbf16>
    %776 = vector.shape_cast %775 : vector<1x128x512xbf16> to vector<128x512xbf16>
    %cst_451 = arith.constant dense<0.000000e+00> : vector<2x512xf32>
    %777 = tpu.matmul %774, %776, %cst_451 {dimension_numbers = #tpu.dot_dimension_numbers<[1], [0], [0], [1], [0, 0, 1, 1], [], []>} : vector<2x128xbf16>, vector<128x512xbf16>, vector<2x512xf32> -> vector<2x512xf32>
    %c1_452 = arith.constant 1 : index
    %c0_453 = arith.constant 0 : index
    %c0_454 = arith.constant 0 : index
    %778 = vector.load %arg8[%c1_452, %c0_453, %c0_454] : memref<3x2x128xf32, #tpu.memory_space<vmem>>, vector<1x2x128xf32>
    %779 = vector.shape_cast %778 : vector<1x2x128xf32> to vector<2x128xf32>
    %780 = arith.truncf %779 : vector<2x128xf32> to vector<2x128xbf16>
    %c1_455 = arith.constant 1 : index
    %c0_456 = arith.constant 0 : index
    %c0_457 = arith.constant 0 : index
    %781 = vector.load %arg3[%c1_455, %c0_456, %c0_457] : memref<3x128x512xbf16, #tpu.memory_space<vmem>>, vector<1x128x512xbf16>
    %782 = vector.shape_cast %781 : vector<1x128x512xbf16> to vector<128x512xbf16>
    %cst_458 = arith.constant dense<0.000000e+00> : vector<2x512xf32>
    %783 = tpu.matmul %780, %782, %cst_458 {dimension_numbers = #tpu.dot_dimension_numbers<[1], [0], [0], [1], [0, 0, 1, 1], [], []>} : vector<2x128xbf16>, vector<128x512xbf16>, vector<2x512xf32> -> vector<2x512xf32>
    %784 = arith.addf %777, %783 : vector<2x512xf32>
    %785 = arith.addf %784, %15 : vector<2x512xf32>
    %786 = vector.extract_strided_slice %785 {offsets = [0, 0], sizes = [2, 384], strides = [1, 1]} : vector<2x512xf32> to vector<2x384xf32>
    %787 = arith.negf %786 : vector<2x384xf32>
    %788 = math.exp %787 : vector<2x384xf32>
    %cst_459 = arith.constant 1.000000e+00 : f32
    %789 = vector.broadcast %cst_459 : f32 to vector<2x384xf32>
    %790 = arith.addf %789, %788 : vector<2x384xf32>
    %791 = arith.divf %789, %790 : vector<2x384xf32>
    %792 = vector.extract_strided_slice %791 {offsets = [0, 0], sizes = [2, 128], strides = [1, 1]} : vector<2x384xf32> to vector<2x128xf32>
    %793 = vector.extract_strided_slice %791 {offsets = [0, 128], sizes = [2, 128], strides = [1, 1]} : vector<2x384xf32> to vector<2x128xf32>
    %794 = vector.extract_strided_slice %791 {offsets = [0, 256], sizes = [2, 128], strides = [1, 1]} : vector<2x384xf32> to vector<2x128xf32>
    %795 = vector.extract_strided_slice %785 {offsets = [0, 384], sizes = [2, 128], strides = [1, 1]} : vector<2x512xf32> to vector<2x128xf32>
    %796 = math.tanh %795 : vector<2x128xf32>
    %c1_460 = arith.constant 1 : index
    %c0_461 = arith.constant 0 : index
    %c0_462 = arith.constant 0 : index
    %797 = vector.load %arg9[%c1_460, %c0_461, %c0_462] : memref<3x2x128xf32, #tpu.memory_space<vmem>>, vector<1x2x128xf32>
    %798 = vector.shape_cast %797 : vector<1x2x128xf32> to vector<2x128xf32>
    %799 = arith.mulf %793, %798 : vector<2x128xf32>
    %800 = arith.mulf %792, %796 : vector<2x128xf32>
    %801 = arith.addf %799, %800 : vector<2x128xf32>
    %802 = math.tanh %801 : vector<2x128xf32>
    %803 = arith.mulf %794, %802 : vector<2x128xf32>
    %804 = arith.truncf %803 : vector<2x128xf32> to vector<2x128xbf16>
    %c2_463 = arith.constant 2 : index
    %c0_464 = arith.constant 0 : index
    %c0_465 = arith.constant 0 : index
    %805 = vector.load %arg2[%c2_463, %c0_464, %c0_465] : memref<3x128x512xbf16, #tpu.memory_space<vmem>>, vector<1x128x512xbf16>
    %806 = vector.shape_cast %805 : vector<1x128x512xbf16> to vector<128x512xbf16>
    %cst_466 = arith.constant dense<0.000000e+00> : vector<2x512xf32>
    %807 = tpu.matmul %804, %806, %cst_466 {dimension_numbers = #tpu.dot_dimension_numbers<[1], [0], [0], [1], [0, 0, 1, 1], [], []>} : vector<2x128xbf16>, vector<128x512xbf16>, vector<2x512xf32> -> vector<2x512xf32>
    %c2_467 = arith.constant 2 : index
    %c0_468 = arith.constant 0 : index
    %c0_469 = arith.constant 0 : index
    %808 = vector.load %arg8[%c2_467, %c0_468, %c0_469] : memref<3x2x128xf32, #tpu.memory_space<vmem>>, vector<1x2x128xf32>
    %809 = vector.shape_cast %808 : vector<1x2x128xf32> to vector<2x128xf32>
    %810 = arith.truncf %809 : vector<2x128xf32> to vector<2x128xbf16>
    %c2_470 = arith.constant 2 : index
    %c0_471 = arith.constant 0 : index
    %c0_472 = arith.constant 0 : index
    %811 = vector.load %arg3[%c2_470, %c0_471, %c0_472] : memref<3x128x512xbf16, #tpu.memory_space<vmem>>, vector<1x128x512xbf16>
    %812 = vector.shape_cast %811 : vector<1x128x512xbf16> to vector<128x512xbf16>
    %cst_473 = arith.constant dense<0.000000e+00> : vector<2x512xf32>
    %813 = tpu.matmul %810, %812, %cst_473 {dimension_numbers = #tpu.dot_dimension_numbers<[1], [0], [0], [1], [0, 0, 1, 1], [], []>} : vector<2x128xbf16>, vector<128x512xbf16>, vector<2x512xf32> -> vector<2x512xf32>
    %814 = arith.addf %807, %813 : vector<2x512xf32>
    %815 = arith.addf %814, %19 : vector<2x512xf32>
    %816 = vector.extract_strided_slice %815 {offsets = [0, 0], sizes = [2, 384], strides = [1, 1]} : vector<2x512xf32> to vector<2x384xf32>
    %817 = arith.negf %816 : vector<2x384xf32>
    %818 = math.exp %817 : vector<2x384xf32>
    %cst_474 = arith.constant 1.000000e+00 : f32
    %819 = vector.broadcast %cst_474 : f32 to vector<2x384xf32>
    %820 = arith.addf %819, %818 : vector<2x384xf32>
    %821 = arith.divf %819, %820 : vector<2x384xf32>
    %822 = vector.extract_strided_slice %821 {offsets = [0, 0], sizes = [2, 128], strides = [1, 1]} : vector<2x384xf32> to vector<2x128xf32>
    %823 = vector.extract_strided_slice %821 {offsets = [0, 128], sizes = [2, 128], strides = [1, 1]} : vector<2x384xf32> to vector<2x128xf32>
    %824 = vector.extract_strided_slice %821 {offsets = [0, 256], sizes = [2, 128], strides = [1, 1]} : vector<2x384xf32> to vector<2x128xf32>
    %825 = vector.extract_strided_slice %815 {offsets = [0, 384], sizes = [2, 128], strides = [1, 1]} : vector<2x512xf32> to vector<2x128xf32>
    %826 = math.tanh %825 : vector<2x128xf32>
    %c2_475 = arith.constant 2 : index
    %c0_476 = arith.constant 0 : index
    %c0_477 = arith.constant 0 : index
    %827 = vector.load %arg9[%c2_475, %c0_476, %c0_477] : memref<3x2x128xf32, #tpu.memory_space<vmem>>, vector<1x2x128xf32>
    %828 = vector.shape_cast %827 : vector<1x2x128xf32> to vector<2x128xf32>
    %829 = arith.mulf %823, %828 : vector<2x128xf32>
    %830 = arith.mulf %822, %826 : vector<2x128xf32>
    %831 = arith.addf %829, %830 : vector<2x128xf32>
    %832 = math.tanh %831 : vector<2x128xf32>
    %833 = arith.mulf %824, %832 : vector<2x128xf32>
    %c0_478 = arith.constant 0 : index
    %c0_479 = arith.constant 0 : index
    %c0_480 = arith.constant 0 : index
    %834 = vector.load %arg8[%c0_478, %c0_479, %c0_480] : memref<3x2x128xf32, #tpu.memory_space<vmem>>, vector<1x2x128xf32>
    %835 = vector.shape_cast %834 : vector<1x2x128xf32> to vector<2x128xf32>
    %836 = vector.shape_cast %773 : vector<2x128xf32> to vector<1x2x128xf32>
    tpu.vector_store %arg8[%c0_478, %c0_479, %c0_480], %836 {strides = array<i32>} : memref<3x2x128xf32, #tpu.memory_space<vmem>>, vector<1x2x128xf32>,
    %c0_481 = arith.constant 0 : index
    %c0_482 = arith.constant 0 : index
    %c0_483 = arith.constant 0 : index
    %837 = vector.load %arg9[%c0_481, %c0_482, %c0_483] : memref<3x2x128xf32, #tpu.memory_space<vmem>>, vector<1x2x128xf32>
    %838 = vector.shape_cast %837 : vector<1x2x128xf32> to vector<2x128xf32>
    %839 = vector.shape_cast %771 : vector<2x128xf32> to vector<1x2x128xf32>
    tpu.vector_store %arg9[%c0_481, %c0_482, %c0_483], %839 {strides = array<i32>} : memref<3x2x128xf32, #tpu.memory_space<vmem>>, vector<1x2x128xf32>,
    %c1_484 = arith.constant 1 : index
    %c0_485 = arith.constant 0 : index
    %c0_486 = arith.constant 0 : index
    %840 = vector.load %arg8[%c1_484, %c0_485, %c0_486] : memref<3x2x128xf32, #tpu.memory_space<vmem>>, vector<1x2x128xf32>
    %841 = vector.shape_cast %840 : vector<1x2x128xf32> to vector<2x128xf32>
    %842 = vector.shape_cast %803 : vector<2x128xf32> to vector<1x2x128xf32>
    tpu.vector_store %arg8[%c1_484, %c0_485, %c0_486], %842 {strides = array<i32>} : memref<3x2x128xf32, #tpu.memory_space<vmem>>, vector<1x2x128xf32>,
    %c1_487 = arith.constant 1 : index
    %c0_488 = arith.constant 0 : index
    %c0_489 = arith.constant 0 : index
    %843 = vector.load %arg9[%c1_487, %c0_488, %c0_489] : memref<3x2x128xf32, #tpu.memory_space<vmem>>, vector<1x2x128xf32>
    %844 = vector.shape_cast %843 : vector<1x2x128xf32> to vector<2x128xf32>
    %845 = vector.shape_cast %801 : vector<2x128xf32> to vector<1x2x128xf32>
    tpu.vector_store %arg9[%c1_487, %c0_488, %c0_489], %845 {strides = array<i32>} : memref<3x2x128xf32, #tpu.memory_space<vmem>>, vector<1x2x128xf32>,
    %c2_490 = arith.constant 2 : index
    %c0_491 = arith.constant 0 : index
    %c0_492 = arith.constant 0 : index
    %846 = vector.load %arg8[%c2_490, %c0_491, %c0_492] : memref<3x2x128xf32, #tpu.memory_space<vmem>>, vector<1x2x128xf32>
    %847 = vector.shape_cast %846 : vector<1x2x128xf32> to vector<2x128xf32>
    %848 = vector.shape_cast %833 : vector<2x128xf32> to vector<1x2x128xf32>
    tpu.vector_store %arg8[%c2_490, %c0_491, %c0_492], %848 {strides = array<i32>} : memref<3x2x128xf32, #tpu.memory_space<vmem>>, vector<1x2x128xf32>,
    %c2_493 = arith.constant 2 : index
    %c0_494 = arith.constant 0 : index
    %c0_495 = arith.constant 0 : index
    %849 = vector.load %arg9[%c2_493, %c0_494, %c0_495] : memref<3x2x128xf32, #tpu.memory_space<vmem>>, vector<1x2x128xf32>
    %850 = vector.shape_cast %849 : vector<1x2x128xf32> to vector<2x128xf32>
    %851 = vector.shape_cast %831 : vector<2x128xf32> to vector<1x2x128xf32>
    tpu.vector_store %arg9[%c2_493, %c0_494, %c0_495], %851 {strides = array<i32>} : memref<3x2x128xf32, #tpu.memory_space<vmem>>, vector<1x2x128xf32>,
    %c0_i32_496 = arith.constant 0 : i32
    %852 = arith.cmpi eq, %arg0, %c0_i32_496 : i32
    %853 = arith.extui %852 : i1 to i32
    %c0_i32_497 = arith.constant 0 : i32
    %854 = arith.cmpi ne, %853, %c0_i32_497 : i32
    scf.if %854 {
      %c2_498 = arith.constant 2 : index
      %c0_499 = arith.constant 0 : index
      %c0_500 = arith.constant 0 : index
      %855 = vector.load %arg8[%c2_498, %c0_499, %c0_500] : memref<3x2x128xf32, #tpu.memory_space<vmem>>, vector<1x2x128xf32>
      %856 = vector.shape_cast %855 : vector<1x2x128xf32> to vector<2x128xf32>
      %c0_501 = arith.constant 0 : index
      %c0_502 = arith.constant 0 : index
      %857 = vector.load %arg5[%c0_501, %c0_502] : memref<128x2xf32, #tpu.memory_space<vmem>>, vector<128x2xf32>
      %cst_503 = arith.constant dense<0.000000e+00> : vector<2x2xf32>
      %858 = tpu.matmul %856, %857, %cst_503 {dimension_numbers = #tpu.dot_dimension_numbers<[1], [0], [0], [1], [0, 0, 1, 1], [], []>} : vector<2x128xf32>, vector<128x2xf32>, vector<2x2xf32> -> vector<2x2xf32>
      %c0_504 = arith.constant 0 : index
      %c0_505 = arith.constant 0 : index
      %859 = vector.load %arg6[%c0_504, %c0_505] : memref<1x2xf32, #tpu.memory_space<vmem>>, vector<1x2xf32>
      %860 = vector.broadcast %859 : vector<1x2xf32> to vector<2x2xf32>
      %861 = arith.addf %858, %860 : vector<2x2xf32>
      %c0_506 = arith.constant 0 : index
      %c0_507 = arith.constant 0 : index
      %862 = vector.load %arg7[%c0_506, %c0_507] : memref<2x2xf32, #tpu.memory_space<vmem>>, vector<2x2xf32>
      tpu.vector_store %arg7[%c0_506, %c0_507], %861 {strides = array<i32>} : memref<2x2xf32, #tpu.memory_space<vmem>>, vector<2x2xf32>,
    } else {
    }
    return
  }
  func.func @transform_0(%arg0: i32) -> (i32, i32) {
    %c0_i32 = arith.constant 0 : i32
    %c0_i32_0 = arith.constant 0 : i32
    return %arg0, %c0_i32 : i32, i32
  }
  func.func @transform_1(%arg0: i32) -> (i32, i32, i32) {
    %c0_i32 = arith.constant 0 : i32
    %c0_i32_0 = arith.constant 0 : i32
    %c0_i32_1 = arith.constant 0 : i32
    %c0_i32_2 = arith.constant 0 : i32
    return %c0_i32, %c0_i32_0, %c0_i32_1 : i32, i32, i32
  }
  func.func @transform_2(%arg0: i32) -> (i32, i32, i32) {
    %c0_i32 = arith.constant 0 : i32
    %c0_i32_0 = arith.constant 0 : i32
    %c0_i32_1 = arith.constant 0 : i32
    %c0_i32_2 = arith.constant 0 : i32
    return %c0_i32, %c0_i32_0, %c0_i32_1 : i32, i32, i32
  }
  func.func @transform_3(%arg0: i32) -> (i32, i32, i32) {
    %c0_i32 = arith.constant 0 : i32
    %c0_i32_0 = arith.constant 0 : i32
    %c0_i32_1 = arith.constant 0 : i32
    %c0_i32_2 = arith.constant 0 : i32
    return %c0_i32, %c0_i32_0, %c0_i32_1 : i32, i32, i32
  }
  func.func @transform_4(%arg0: i32) -> (i32, i32) {
    %c0_i32 = arith.constant 0 : i32
    %c0_i32_0 = arith.constant 0 : i32
    %c0_i32_1 = arith.constant 0 : i32
    return %c0_i32, %c0_i32_0 : i32, i32
  }
  func.func @transform_5(%arg0: i32) -> (i32, i32) {
    %c0_i32 = arith.constant 0 : i32
    %c0_i32_0 = arith.constant 0 : i32
    %c0_i32_1 = arith.constant 0 : i32
    return %c0_i32, %c0_i32_0 : i32, i32
  }
  func.func @transform_6(%arg0: i32) -> (i32, i32) {
    %c0_i32 = arith.constant 0 : i32
    %c0_i32_0 = arith.constant 0 : i32
    %c0_i32_1 = arith.constant 0 : i32
    return %c0_i32, %c0_i32_0 : i32, i32
  }
}

</mosaic_0001>

<bundles_post_ra>
// kernel: lang_model_forward.1
= control target key start
LH: loop header
LB: loop body
LE: loop exit
PB: predicated region body
PF: predicated region fallthrough
CT: control target
= control target key end

     0   :  { %11 = vsyncpa [#allocation6], 0  ;;  %s16835_s0 = inlined_call_operand.vmem [shape: bf16[16,128], index: 0, kind: input, shape index: {}]   ;;  %s16836_s1 = inlined_call_operand.hbm [shape: bf16[3,128,512], index: 1, kind: input, shape index: {}]   ;;  %s16837_s2 = inlined_call_operand.hbm [shape: bf16[3,128,512], index: 2, kind: input, shape index: {}]   ;;  %s16838_s3 = inlined_call_operand.vmem [shape: f32[3,1,512], index: 3, kind: input, shape index: {}]   ;;  %s16839_s4 = inlined_call_operand.vmem [shape: f32[128,2], index: 4, kind: input, shape index: {}]   ;;  %s16840_s5 = inlined_call_operand.vmem [shape: f32[1,2], index: 5, kind: input, shape index: {}]   ;;  %s16841_s6 = inlined_call_operand.hbm [shape: f32[2,2], index: 6, kind: output, shape index: {}]  }
   0x1   :  { %12 = vsyncpa [#allocation9], 0 }
   0x2   :  { %13 = vsyncpa [#allocation7], 0  ;;  %s16323_s21 = smov [#allocation5]  }
   0x3   :  { %s21_s22 = sshll.u32 %s16323_s21, 4  ;;  %s22_s22 = int_to_ptr.vmem [resolvable:$true] %s21_s22 }
   0x4   :  { %s16265_s23 = scalar_lea.vmem %s22_s22, 12288  ;;  %p16270_p1 = scmp.lt.s32.totalorder %s22_s22, %s22_s22 }
   0x5   :  { %p16266_p0 = scmp.ne.s32.totalorder %s22_s22, %s16265_s23  ;;  %p16271_p2 = scmp.lt.s32.totalorder %s16265_s23, %s16265_s23 }
   0x7   :  { %p16272_p3 = por %p16271_p2, %p16270_p1 }
   0x9   :  { %p16273_p4 = pnand %p16272_p3, %p16266_p0 }
   0xb   :  { %16276 = shalt.err (!%p16273_p4)
}
   0xc   :  { %s16324_s24 = smov 256   ;;  %s16325_s25 = smov 16  }
   0xd   :  { %27 = dma.hbm_to_vmem [thread:$0]  %s16836_s1, 12288, %s22_s22, [#allocation6], %s16324_s24, %s16324_s24, %s16325_s25  }
   0xe   :  { %s16326_s28 = smov [#allocation8]  }
   0xf   :  { %s33_s29 = sshll.u32 %s16326_s28, 4  ;;  %s34_s29 = int_to_ptr.vmem [resolvable:$true] %s33_s29 }
  0x10   :  { %s16285_s30 = scalar_lea.vmem %s34_s29, 12288  ;;  %p16290_p6 = scmp.lt.s32.totalorder %s34_s29, %s34_s29 }
  0x11   :  { %p16286_p5 = scmp.ne.s32.totalorder %s34_s29, %s16285_s30  ;;  %p16291_p7 = scmp.lt.s32.totalorder %s16285_s30, %s16285_s30 }
  0x13   :  { %p16292_p8 = por %p16291_p7, %p16290_p6 }
  0x15   :  { %p16293_p9 = pnand %p16292_p8, %p16286_p5 }
  0x17   :  { %16296 = shalt.err (!%p16293_p9)
}
  0x18   :  { %39 = dma.hbm_to_vmem [thread:$0]  %s16837_s2, 12288, %s34_s29, [#allocation9], %s16324_s24, %s16324_s24, %s16325_s25  }
  0x19   :  { %16317 = dma.done.wait [#allocation6], 12288  }
  0x1a   :  { %16318 = vsyncadd [#allocation6], 4294955008 }
  0x1b   :  { %16319 = dma.done.wait [#allocation9], 12288  }
  0x1c   :  { %16320 = vsyncadd [#allocation9], 4294955008  ;;  %v16327_v0 = vmov 0   ;;  %v16328_v1 = vmov 0.0   ;;  %v13904_v2 = vld [vmem:[#allocation5 + $0xe4] ss:$16 sps:$4 sm:$0xff]  }
  0x1d   :  { %317 = vmatprep.mubr.bf16.mxu0 %v16327_v0  ;;  %360 = vmatprep.mubr.bf16.mxu1 %v16327_v0  ;;  %57 = vst [vmem:[#allocation2] sm:$0x3] %v16328_v1  ;;  %58 = vst [vmem:[#allocation2 + $0x2] sm:$0x3] %v16328_v1  ;;  %v13906_v3 = vld [vmem:[#allocation5 + $0xec] ss:$16 sps:$4 sm:$0xff]  }
  0x1e   :  { %59 = vst [vmem:[#allocation2 + $0x4] sm:$0x3] %v16328_v1  ;;  %60 = vst [vmem:[#allocation3] sm:$0x3] %v16328_v1  ;;  %285 = vmatprep.subr.bf16.mxu0 %v13904_v2  ;;  %v13908_v4 = vld [vmem:[#allocation5 + $0xe0] ss:$16 sps:$4 sm:$0xff]   ;;  %328 = vmatprep.subr.bf16.mxu1 %v13906_v3 }
  0x1f   :  { %61 = vst [vmem:[#allocation3 + $0x2] sm:$0x3] %v16328_v1  ;;  %62 = vst [vmem:[#allocation3 + $0x4] sm:$0x3] %v16328_v1  ;;  %v13909_v5 = vld [vmem:[#allocation5 + $0xe8] ss:$16 sps:$4 sm:$0xff]   ;;  %286 = vmatpush1.bf16.msra.mxu0 %v13908_v4 }
  0x20   :  { %v13910_v6 = vld [vmem:[#allocation5 + $0xc4] ss:$16 sps:$4 sm:$0xff]   ;;  %329 = vmatpush1.bf16.msra.mxu1 %v13909_v5  ;;  %v13912_v7 = vld [vmem:[#allocation5 + $0xcc] ss:$16 sps:$4 sm:$0xff]   ;;  %v13914_v8 = vld [vmem:[#allocation5 + $0xc0] ss:$16 sps:$4 sm:$0xff]  }
  0x21   :  { %287 = vmatprep.subr.bf16.mxu0 %v13910_v6  ;;  %v13915_v9 = vld [vmem:[#allocation5 + $0xc8] ss:$16 sps:$4 sm:$0xff]   ;;  %330 = vmatprep.subr.bf16.mxu1 %v13912_v7  ;;  %v13916_v10 = vld [vmem:[#allocation5 + $0xa4] ss:$16 sps:$4 sm:$0xff]   ;;  %v13918_v11 = vld [vmem:[#allocation5 + $0xac] ss:$16 sps:$4 sm:$0xff]  }
  0x22   :  { %v13920_v12 = vld [vmem:[#allocation5 + $0xa0] ss:$16 sps:$4 sm:$0xff]   ;;  %v13921_v13 = vld [vmem:[#allocation5 + $0xa8] ss:$16 sps:$4 sm:$0xff]   ;;  %v13922_v14 = vld [vmem:[#allocation5 + $0x84] ss:$16 sps:$4 sm:$0xff]  }
  0x23   :  { %288 = vmatpush1.bf16.msra.mxu0 %v13914_v8  ;;  %v13924_v15 = vld [vmem:[#allocation5 + $0x8c] ss:$16 sps:$4 sm:$0xff]   ;;  %v13926_v16 = vld [vmem:[#allocation5 + $0x80] ss:$16 sps:$4 sm:$0xff]   ;;  %v13927_v17 = vld [vmem:[#allocation5 + $0x88] ss:$16 sps:$4 sm:$0xff]  }
  0x24   :  { %331 = vmatpush1.bf16.msra.mxu1 %v13915_v9  ;;  %289 = vmatprep.subr.bf16.mxu0 %v13916_v10  ;;  %v13928_v18 = vld [vmem:[#allocation5 + $0x64] ss:$16 sps:$4 sm:$0xff]   ;;  %v13930_v19 = vld [vmem:[#allocation5 + $0x6c] ss:$16 sps:$4 sm:$0xff]   ;;  %v13932_v20 = vld [vmem:[#allocation5 + $0x60] ss:$16 sps:$4 sm:$0xff]  }
  0x25   :  { %332 = vmatprep.subr.bf16.mxu1 %v13918_v11  ;;  %v13933_v21 = vld [vmem:[#allocation5 + $0x68] ss:$16 sps:$4 sm:$0xff]   ;;  %v13934_v22 = vld [vmem:[#allocation5 + $0x44] ss:$16 sps:$4 sm:$0xff]   ;;  %v13936_v23 = vld [vmem:[#allocation5 + $0x4c] ss:$16 sps:$4 sm:$0xff]  }
  0x26   :  { %v13938_v24 = vld [vmem:[#allocation5 + $0x40] ss:$16 sps:$4 sm:$0xff]   ;;  %v13939_v25 = vld [vmem:[#allocation5 + $0x48] ss:$16 sps:$4 sm:$0xff]   ;;  %v13940_v26 = vld [vmem:[#allocation5 + $0x24] ss:$16 sps:$4 sm:$0xff]  }
  0x27   :  { %290 = vmatpush1.bf16.msra.mxu0 %v13920_v12  ;;  %v13942_v27 = vld [vmem:[#allocation5 + $0x2c] ss:$16 sps:$4 sm:$0xff]   ;;  %v13944_v28 = vld [vmem:[#allocation5 + $0x20] ss:$16 sps:$4 sm:$0xff]   ;;  %v13945_v29 = vld [vmem:[#allocation5 + $0x28] ss:$16 sps:$4 sm:$0xff]  }
  0x28   :  { %333 = vmatpush1.bf16.msra.mxu1 %v13921_v13  ;;  %291 = vmatprep.subr.bf16.mxu0 %v13922_v14  ;;  %v13946_v30 = vld [vmem:[#allocation5 + $0x4] ss:$16 sps:$4 sm:$0xff]   ;;  %v13948_v31 = vld [vmem:[#allocation5 + $0xc] ss:$16 sps:$4 sm:$0xff]   ;;  %v13950_v32 = vld [vmem:[#allocation5] ss:$16 sps:$4 sm:$0xff]  }
  0x29   :  { %334 = vmatprep.subr.bf16.mxu1 %v13924_v15  ;;  %v13951_v33 = vld [vmem:[#allocation5 + $0x8] ss:$16 sps:$4 sm:$0xff]   ;;  %v13955_v34 = vld [vmem:[#allocation8 + $0xe4] ss:$16 sps:$4 sm:$0xff]   ;;  %v13958_v35 = vld [vmem:[#allocation8 + $0xec] ss:$16 sps:$4 sm:$0xff]  }
  0x2a   :  { %v13952_v36 = vld [vmem:[%s16835_s0] sm:$0xff]   ;;  %v13953_v37 = vld [vmem:[#allocation8 + $0xe0] ss:$16 sps:$4 sm:$0xff]   ;;  %v13964_v40 = vld [vmem:[#allocation8 + $0xcc] ss:$16 sps:$4 sm:$0xff]   ;;  %vm16329_vm0 = vmmov 0  }
  0x2b   :  { %292 = vmatpush1.bf16.msra.mxu0 %v13926_v16  ;;  %v13956_v38 = vld [vmem:[#allocation8 + $0xe8] ss:$16 sps:$4 sm:$0xff]   ;;  %v13961_v39 = vld [vmem:[#allocation8 + $0xc4] ss:$16 sps:$4 sm:$0xff]   ;;  %v13959_v41 = vld [vmem:[#allocation8 + $0xc0] ss:$16 sps:$4 sm:$0xff]  }
  0x2c   :  { %335 = vmatpush1.bf16.msra.mxu1 %v13927_v17  ;;  %293 = vmatprep.subr.bf16.mxu0 %v13928_v18  ;;  %v13962_v42 = vld [vmem:[#allocation8 + $0xc8] ss:$16 sps:$4 sm:$0xff]   ;;  %v13967_v43 = vld [vmem:[#allocation8 + $0xa4] ss:$16 sps:$4 sm:$0xff]   ;;  %v13970_v44 = vld [vmem:[#allocation8 + $0xac] ss:$16 sps:$4 sm:$0xff]  }
  0x2d   :  { %336 = vmatprep.subr.bf16.mxu1 %v13930_v19  ;;  %v13965_v45 = vld [vmem:[#allocation8 + $0xa0] ss:$16 sps:$4 sm:$0xff]   ;;  %v13968_v46 = vld [vmem:[#allocation8 + $0xa8] ss:$16 sps:$4 sm:$0xff]   ;;  %v13973_v47 = vld [vmem:[#allocation8 + $0x84] ss:$16 sps:$4 sm:$0xff]  }
  0x2e   :  { %v13976_v48 = vld [vmem:[#allocation8 + $0x8c] ss:$16 sps:$4 sm:$0xff]   ;;  %v13971_v49 = vld [vmem:[#allocation8 + $0x80] ss:$16 sps:$4 sm:$0xff]   ;;  %v13974_v50 = vld [vmem:[#allocation8 + $0x88] ss:$16 sps:$4 sm:$0xff]  }
  0x2f   :  { %294 = vmatpush1.bf16.msra.mxu0 %v13932_v20  ;;  %v13979_v51 = vld [vmem:[#allocation8 + $0x64] ss:$16 sps:$4 sm:$0xff]   ;;  %v13982_v52 = vld [vmem:[#allocation8 + $0x6c] ss:$16 sps:$4 sm:$0xff]   ;;  %v13977_v53 = vld [vmem:[#allocation8 + $0x60] ss:$16 sps:$4 sm:$0xff]  }
  0x30   :  { %337 = vmatpush1.bf16.msra.mxu1 %v13933_v21  ;;  %295 = vmatprep.subr.bf16.mxu0 %v13934_v22  ;;  %v13980_v54 = vld [vmem:[#allocation8 + $0x68] ss:$16 sps:$4 sm:$0xff]   ;;  %v13985_v55 = vld [vmem:[#allocation8 + $0x44] ss:$16 sps:$4 sm:$0xff]   ;;  %v13988_v56 = vld [vmem:[#allocation8 + $0x4c] ss:$16 sps:$4 sm:$0xff]  }
  0x31   :  { %338 = vmatprep.subr.bf16.mxu1 %v13936_v23  ;;  %v13983_v57 = vld [vmem:[#allocation8 + $0x40] ss:$16 sps:$4 sm:$0xff]   ;;  %v13986_v58 = vld [vmem:[#allocation8 + $0x48] ss:$16 sps:$4 sm:$0xff]   ;;  %v13991_v59 = vld [vmem:[#allocation8 + $0x24] ss:$16 sps:$4 sm:$0xff]  }
  0x32   :  { %v13994_v60 = vld [vmem:[#allocation8 + $0x2c] ss:$16 sps:$4 sm:$0xff]   ;;  %v13989_v61 = vld [vmem:[#allocation8 + $0x20] ss:$16 sps:$4 sm:$0xff]   ;;  %v13992_v62 = vld [vmem:[#allocation8 + $0x28] ss:$16 sps:$4 sm:$0xff]  }
  0x33   :  { %296 = vmatpush1.bf16.msra.mxu0 %v13938_v24  ;;  %v13997_v63 = vld [vmem:[#allocation8 + $0x4] ss:$16 sps:$4 sm:$0xff]   ;;  %v14000_v2 = vld [vmem:[#allocation8 + $0xc] ss:$16 sps:$4 sm:$0xff]   ;;  %v13995_v3 = vld [vmem:[#allocation8] ss:$16 sps:$4 sm:$0xff]  }
  0x34   :  { %339 = vmatpush1.bf16.msra.mxu1 %v13939_v25  ;;  %297 = vmatprep.subr.bf16.mxu0 %v13940_v26  ;;  %v13998_v4 = vld [vmem:[#allocation8 + $0x8] ss:$16 sps:$4 sm:$0xff]   ;;  %v429_v5 = vld [vmem:[#allocation2] sm:$0x3]  ;;  %v14001_v7 = vld [vmem:[#allocation8 + $0x1e0] ss:$16 sps:$4 sm:$0xff]  }
  0x35   :  { %340 = vmatprep.subr.bf16.mxu1 %v13942_v27  ;;  %v430_v6 = vpack.c.bf16 %v429_v5, %v429_v5  ;;  %v14003_v8 = vld [vmem:[#allocation8 + $0x1e4] ss:$16 sps:$4 sm:$0xff]   ;;  %v14007_v10 = vld [vmem:[#allocation8 + $0x1e8] ss:$16 sps:$4 sm:$0xff]   ;;  %v14004_v11 = vld [vmem:[#allocation8 + $0x1c0] ss:$16 sps:$4 sm:$0xff]  }
  0x36   :  { %v14006_v9 = vld [vmem:[#allocation8 + $0x1c4] ss:$16 sps:$4 sm:$0xff]   ;;  %v14009_v12 = vld [vmem:[#allocation8 + $0x1ec] ss:$16 sps:$4 sm:$0xff]   ;;  %v14013_v14 = vld [vmem:[#allocation8 + $0x1c8] ss:$16 sps:$4 sm:$0xff]  }
  0x37   :  { %298 = vmatpush1.bf16.msra.mxu0 %v13944_v28  ;;  %v14012_v13 = vld [vmem:[#allocation8 + $0x1a4] ss:$16 sps:$4 sm:$0xff]   ;;  %v14015_v15 = vld [vmem:[#allocation8 + $0x1cc] ss:$16 sps:$4 sm:$0xff]   ;;  %v14010_v16 = vld [vmem:[#allocation8 + $0x1a0] ss:$16 sps:$4 sm:$0xff]  }
  0x38   :  { %341 = vmatpush1.bf16.msra.mxu1 %v13945_v29  ;;  %299 = vmatprep.subr.bf16.mxu0 %v13946_v30  ;;  %v14018_v17 = vld [vmem:[#allocation8 + $0x184] ss:$16 sps:$4 sm:$0xff]   ;;  %v14016_v18 = vld [vmem:[#allocation8 + $0x180] ss:$16 sps:$4 sm:$0xff]   ;;  %v14021_v19 = vld [vmem:[#allocation8 + $0x1ac] ss:$16 sps:$4 sm:$0xff]  }
  0x39   :  { %342 = vmatprep.subr.bf16.mxu1 %v13948_v31  ;;  %v14019_v20 = vld [vmem:[#allocation8 + $0x1a8] ss:$16 sps:$4 sm:$0xff]   ;;  %v14024_v21 = vld [vmem:[#allocation8 + $0x164] ss:$16 sps:$4 sm:$0xff]   ;;  %v14022_v22 = vld [vmem:[#allocation8 + $0x160] ss:$16 sps:$4 sm:$0xff]  }
  0x3a   :  { %v14027_v23 = vld [vmem:[#allocation8 + $0x18c] ss:$16 sps:$4 sm:$0xff]   ;;  %v14025_v24 = vld [vmem:[#allocation8 + $0x188] ss:$16 sps:$4 sm:$0xff]   ;;  %v14030_v25 = vld [vmem:[#allocation8 + $0x144] ss:$16 sps:$4 sm:$0xff]  }
  0x3b   :  { %300 = vmatpush1.bf16.msra.mxu0 %v13950_v32  ;;  %v14028_v26 = vld [vmem:[#allocation8 + $0x140] ss:$16 sps:$4 sm:$0xff]   ;;  %v14033_v27 = vld [vmem:[#allocation8 + $0x16c] ss:$16 sps:$4 sm:$0xff]   ;;  %v14031_v28 = vld [vmem:[#allocation8 + $0x168] ss:$16 sps:$4 sm:$0xff]  }
  0x3c   :  { %343 = vmatpush1.bf16.msra.mxu1 %v13951_v33  ;;  %623 = vmatprep.subr.bf16.mxu0 %v13955_v34  ;;  %v14036_v29 = vld [vmem:[#allocation8 + $0x124] ss:$16 sps:$4 sm:$0xff]   ;;  %v14034_v30 = vld [vmem:[#allocation8 + $0x120] ss:$16 sps:$4 sm:$0xff]   ;;  %v14039_v31 = vld [vmem:[#allocation8 + $0x14c] ss:$16 sps:$4 sm:$0xff]  }
  0x3d   :  { %664 = vmatprep.subr.bf16.mxu1 %v13958_v35  ;;  %v14037_v32 = vld [vmem:[#allocation8 + $0x148] ss:$16 sps:$4 sm:$0xff]   ;;  %v14042_v33 = vld [vmem:[#allocation8 + $0x104] ss:$16 sps:$4 sm:$0xff]   ;;  %v14040_v34 = vld [vmem:[#allocation8 + $0x100] ss:$16 sps:$4 sm:$0xff]  }
  0x3e   :  { %318 = vmatmul.mubr.bf16.vlgmr.msra.gmra.mxu0 %v13952_v36  ;;  %v14045_v35 = vld [vmem:[#allocation8 + $0x12c] ss:$16 sps:$4 sm:$0xff]   ;;  %v14085_v5 = vld [vmem:[#allocation5 + $0x120] ss:$16 sps:$4 sm:$0xff]   ;;  %s16330_s18 = smov [#allocation10]   ;;  %vm12438_vm1 = vcmask 9216  }
  0x3f   :  { %361 = vmatmul.mubr.bf16.vlgmr.msra.gmra.mxu1 %v13952_v36  ;;  %624 = vmatpush1.bf16.msra.mxu0 %v13953_v37  ;;  %v14043_v36 = vld [vmem:[#allocation8 + $0x128] ss:$16 sps:$4 sm:$0xff]   ;;  %v769_v37 = vld [vmem:[#allocation2 + $0x2] sm:$0x3]  ;;  %s12446_s19 = sshll.u32 %s16330_s18, 4  ;;  %s12447_s19 = int_to_ptr.vmem [resolvable:$true] %s12446_s19 }
  0x40   :  { %665 = vmatpush1.bf16.msra.mxu1 %v13956_v38  ;;  %625 = vmatprep.subr.bf16.mxu0 %v13961_v39  ;;  %v770_v38 = vpack.c.bf16 %v769_v37, %v769_v37  ;;  %v14048_v39 = vld [vmem:[#allocation8 + $0x10c] ss:$16 sps:$4 sm:$0xff]   ;;  %s16297_s20 = scalar_lea.vmem %s12447_s19, 32  ;;  %p16302_p11 = scmp.lt.s32.totalorder %s12447_s19, %s12447_s19 }
  0x41   :  { %666 = vmatprep.subr.bf16.mxu1 %v13964_v40  ;;  %655 = vmatprep.mubr.bf16.mxu0 %v16327_v0  ;;  %v14046_v40 = vld [vmem:[#allocation8 + $0x108] ss:$16 sps:$4 sm:$0xff]   ;;  %v14105_v37 = vld [vmem:[#allocation8 + $0x2ec] ss:$16 sps:$4 sm:$0xff]   ;;  %p16298_p10 = scmp.ne.s32.totalorder %s12447_s19, %s16297_s20  ;;  %p16303_p12 = scmp.lt.s32.totalorder %s16297_s20, %s16297_s20 }
  0x42   :  { %696 = vmatprep.mubr.bf16.mxu1 %v16327_v0 }
  0x43   :  { %626 = vmatpush1.bf16.msra.mxu0 %v13959_v41  ;;  %v14051_v41 = vld [vmem:[#allocation5 + $0x1e4] ss:$16 sps:$4 sm:$0xff]   ;;  %p16304_p13 = por %p16303_p12, %p16302_p11 }
  0x44   :  { %667 = vmatpush1.bf16.msra.mxu1 %v13962_v42  ;;  %627 = vmatprep.subr.bf16.mxu0 %v13967_v43  ;;  %v14054_v42 = vld [vmem:[#allocation5 + $0x1ec] ss:$16 sps:$4 sm:$0xff]   ;;  %v14049_v43 = vld [vmem:[#allocation5 + $0x1e0] ss:$16 sps:$4 sm:$0xff]  }
  0x45   :  { %668 = vmatprep.subr.bf16.mxu1 %v13970_v44  ;;  %v14052_v44 = vld [vmem:[#allocation5 + $0x1e8] ss:$16 sps:$4 sm:$0xff]   ;;  %p16305_p0 = pnand %p16304_p13, %p16298_p10 }
  0x47   :  { %628 = vmatpush1.bf16.msra.mxu0 %v13965_v45  ;;  %v14057_v45 = vld [vmem:[#allocation5 + $0x1c4] ss:$16 sps:$4 sm:$0xff]  }
  0x48   :  { %669 = vmatpush1.bf16.msra.mxu1 %v13968_v46  ;;  %629 = vmatprep.subr.bf16.mxu0 %v13973_v47  ;;  %v14060_v46 = vld [vmem:[#allocation5 + $0x1cc] ss:$16 sps:$4 sm:$0xff]   ;;  %v14055_v47 = vld [vmem:[#allocation5 + $0x1c0] ss:$16 sps:$4 sm:$0xff]  }
  0x49   :  { %670 = vmatprep.subr.bf16.mxu1 %v13976_v48  ;;  %v14058_v48 = vld [vmem:[#allocation5 + $0x1c8] ss:$16 sps:$4 sm:$0xff]  }
  0x4b   :  { %630 = vmatpush1.bf16.msra.mxu0 %v13971_v49  ;;  %v14063_v49 = vld [vmem:[#allocation5 + $0x1a4] ss:$16 sps:$4 sm:$0xff]  }
  0x4c   :  { %671 = vmatpush1.bf16.msra.mxu1 %v13974_v50  ;;  %631 = vmatprep.subr.bf16.mxu0 %v13979_v51  ;;  %v14066_v50 = vld [vmem:[#allocation5 + $0x1ac] ss:$16 sps:$4 sm:$0xff]   ;;  %v14061_v51 = vld [vmem:[#allocation5 + $0x1a0] ss:$16 sps:$4 sm:$0xff]  }
  0x4d   :  { %672 = vmatprep.subr.bf16.mxu1 %v13982_v52  ;;  %v14064_v52 = vld [vmem:[#allocation5 + $0x1a8] ss:$16 sps:$4 sm:$0xff]  }
  0x4f   :  { %632 = vmatpush1.bf16.msra.mxu0 %v13977_v53  ;;  %v14069_v53 = vld [vmem:[#allocation5 + $0x184] ss:$16 sps:$4 sm:$0xff]  }
  0x50   :  { %673 = vmatpush1.bf16.msra.mxu1 %v13980_v54  ;;  %633 = vmatprep.subr.bf16.mxu0 %v13985_v55  ;;  %v14072_v54 = vld [vmem:[#allocation5 + $0x18c] ss:$16 sps:$4 sm:$0xff]   ;;  %v14067_v55 = vld [vmem:[#allocation5 + $0x180] ss:$16 sps:$4 sm:$0xff]  }
  0x51   :  { %674 = vmatprep.subr.bf16.mxu1 %v13988_v56  ;;  %v14070_v56 = vld [vmem:[#allocation5 + $0x188] ss:$16 sps:$4 sm:$0xff]  }
  0x53   :  { %634 = vmatpush1.bf16.msra.mxu0 %v13983_v57  ;;  %v14075_v57 = vld [vmem:[#allocation5 + $0x164] ss:$16 sps:$4 sm:$0xff]  }
  0x54   :  { %675 = vmatpush1.bf16.msra.mxu1 %v13986_v58  ;;  %635 = vmatprep.subr.bf16.mxu0 %v13991_v59  ;;  %v14078_v58 = vld [vmem:[#allocation5 + $0x16c] ss:$16 sps:$4 sm:$0xff]   ;;  %v14073_v59 = vld [vmem:[#allocation5 + $0x160] ss:$16 sps:$4 sm:$0xff]  }
  0x55   :  { %676 = vmatprep.subr.bf16.mxu1 %v13994_v60  ;;  %v14076_v60 = vld [vmem:[#allocation5 + $0x168] ss:$16 sps:$4 sm:$0xff]  }
  0x57   :  { %636 = vmatpush1.bf16.msra.mxu0 %v13989_v61  ;;  %v14081_v61 = vld [vmem:[#allocation5 + $0x144] ss:$16 sps:$4 sm:$0xff]  }
  0x58   :  { %677 = vmatpush1.bf16.msra.mxu1 %v13992_v62  ;;  %637 = vmatprep.subr.bf16.mxu0 %v13997_v63  ;;  %v14084_v62 = vld [vmem:[#allocation5 + $0x14c] ss:$16 sps:$4 sm:$0xff]   ;;  %v14079_v63 = vld [vmem:[#allocation5 + $0x140] ss:$16 sps:$4 sm:$0xff]  }
  0x59   :  { %678 = vmatprep.subr.bf16.mxu1 %v14000_v2  ;;  %v14082_v2 = vld [vmem:[#allocation5 + $0x148] ss:$16 sps:$4 sm:$0xff]  }
  0x5b   :  { %638 = vmatpush1.bf16.msra.mxu0 %v13995_v3  ;;  %v14087_v3 = vld [vmem:[#allocation5 + $0x124] ss:$16 sps:$4 sm:$0xff]  }
  0x5c   :  { %679 = vmatpush1.bf16.msra.mxu1 %v13998_v4  ;;  %964 = vmatprep.subr.bf16.mxu0 %v14003_v8  ;;  %v14090_v4 = vld [vmem:[#allocation5 + $0x12c] ss:$16 sps:$4 sm:$0xff]  }
  0x5d   :  { %1005 = vmatprep.subr.bf16.mxu1 %v14009_v12  ;;  %v14096_v8 = vld [vmem:[#allocation5 + $0x10c] ss:$16 sps:$4 sm:$0xff]  }
  0x5e   :  { %656 = vmatmul.mubr.bf16.vlgmr.msra.gmra.mxu0 %v430_v6 }
  0x5f   :  { %697 = vmatmul.mubr.bf16.vlgmr.msra.gmra.mxu1 %v430_v6  ;;  %996 = vmatprep.mubr.bf16.mxu0 %v16327_v0  ;;  %v14088_v6 = vld [vmem:[#allocation5 + $0x128] ss:$16 sps:$4 sm:$0xff]  }
  0x60   :  { %1037 = vmatprep.mubr.bf16.mxu1 %v16327_v0  ;;  %965 = vmatpush1.bf16.msra.mxu0 %v14001_v7  ;;  %v14093_v7 = vld [vmem:[#allocation5 + $0x104] ss:$16 sps:$4 sm:$0xff]  }
  0x61   :  { %966 = vmatprep.subr.bf16.mxu0 %v14006_v9  ;;  %1006 = vmatpush1.bf16.msra.mxu1 %v14007_v10  ;;  %v14091_v9 = vld [vmem:[#allocation5 + $0x100] ss:$16 sps:$4 sm:$0xff]   ;;  %v14094_v10 = vld [vmem:[#allocation5 + $0x108] ss:$16 sps:$4 sm:$0xff]  }
  0x62   :  { %1007 = vmatprep.subr.bf16.mxu1 %v14015_v15 }
  0x64   :  { %967 = vmatpush1.bf16.msra.mxu0 %v14004_v11  ;;  %v99_v11 = vlaneseq }
  0x65   :  { %968 = vmatprep.subr.bf16.mxu0 %v14012_v13  ;;  %1008 = vmatpush1.bf16.msra.mxu1 %v14013_v14  ;;  %v97_v13 = vld [vmem:[%s16838_s3] sm:$0xf] }
  0x66   :  { %1009 = vmatprep.subr.bf16.mxu1 %v14021_v19  ;;  %v100_v12 = vshrl.u32 %v99_v11, 7 }
  0x68   :  { %969 = vmatpush1.bf16.msra.mxu0 %v14010_v16  ;;  %v16392_v14 = vsub.s32 0, %v100_v12  ;;  %v16394_v15 = vsub.s32 2, %v100_v12  ;;  %v16396_v16 = vsub.s32 1, %v100_v12 }
  0x69   :  { %970 = vmatprep.subr.bf16.mxu0 %v14018_v17  ;;  %1010 = vmatpush1.bf16.msra.mxu1 %v14019_v20  ;;  %v16398_v17 = vsub.s32 3, %v100_v12  ;;  %v14097_v12 = vld [vmem:[#allocation8 + $0x2e0] ss:$16 sps:$4 sm:$0xff]  }
  0x6a   :  { %1011 = vmatprep.subr.bf16.mxu1 %v14027_v23  ;;  %v110_v19 = vrot.slane %v97_v13, %v16394_v15  ;;  %v106_v20 = vrot.slane %v97_v13, %v16396_v16 }
  0x6c   :  { %971 = vmatpush1.bf16.msra.mxu0 %v14016_v18  ;;  %v102_v18 = vrot.slane %v97_v13, %v16392_v14 }
  0x6d   :  { %972 = vmatprep.subr.bf16.mxu0 %v14024_v21  ;;  %1012 = vmatpush1.bf16.msra.mxu1 %v14025_v24  ;;  %v114_v21 = vrot.slane %v97_v13, %v16398_v17  ;;  %v14103_v13 = vld [vmem:[#allocation8 + $0x2e8] ss:$16 sps:$4 sm:$0xff]  }
  0x6e   :  { %1013 = vmatprep.subr.bf16.mxu1 %v14033_v27 }
  0x70   :  { %973 = vmatpush1.bf16.msra.mxu0 %v14022_v22 }
  0x71   :  { %974 = vmatprep.subr.bf16.mxu0 %v14030_v25  ;;  %1014 = vmatpush1.bf16.msra.mxu1 %v14031_v28 }
  0x72   :  { %1015 = vmatprep.subr.bf16.mxu1 %v14039_v31 }
  0x74   :  { %975 = vmatpush1.bf16.msra.mxu0 %v14028_v26 }
  0x75   :  { %976 = vmatprep.subr.bf16.mxu0 %v14036_v29  ;;  %1016 = vmatpush1.bf16.msra.mxu1 %v14037_v32 }
  0x76   :  { %1017 = vmatprep.subr.bf16.mxu1 %v14045_v35 }
  0x78   :  { %977 = vmatpush1.bf16.msra.mxu0 %v14034_v30 }
  0x79   :  { %978 = vmatprep.subr.bf16.mxu0 %v14042_v33  ;;  %1018 = vmatpush1.bf16.msra.mxu1 %v14043_v36 }
  0x7a   :  { %1019 = vmatprep.subr.bf16.mxu1 %v14048_v39 }
  0x7c   :  { %979 = vmatpush1.bf16.msra.mxu0 %v14040_v34  ;;  %v14099_v34 = vld [vmem:[#allocation8 + $0x2e4] ss:$16 sps:$4 sm:$0xff]  }
  0x7d   :  { %1020 = vmatpush1.bf16.msra.mxu1 %v14046_v40  ;;  %1206 = vmatprep.subr.bf16.mxu0 %v14051_v41 }
  0x7e   :  { %1247 = vmatprep.subr.bf16.mxu1 %v14054_v42 }
  0x7f   :  { %997 = vmatmul.mubr.bf16.vlgmr.msra.gmra.mxu0 %v770_v38 }
  0x80   :  { %1238 = vmatprep.mubr.bf16.mxu0 %v16327_v0  ;;  %1038 = vmatmul.mubr.bf16.vlgmr.msra.gmra.mxu1 %v770_v38 }
  0x81   :  { %1207 = vmatpush1.bf16.msra.mxu0 %v14049_v43  ;;  %1248 = vmatpush1.bf16.msra.mxu1 %v14052_v44 }
  0x82   :  { %1279 = vmatprep.mubr.bf16.mxu1 %v16327_v0  ;;  %1208 = vmatprep.subr.bf16.mxu0 %v14057_v45 }
  0x83   :  { %1249 = vmatprep.subr.bf16.mxu1 %v14060_v46 }
  0x85   :  { %1209 = vmatpush1.bf16.msra.mxu0 %v14055_v47  ;;  %1250 = vmatpush1.bf16.msra.mxu1 %v14058_v48 }
  0x86   :  { %1210 = vmatprep.subr.bf16.mxu0 %v14063_v49  ;;  %1251 = vmatprep.subr.bf16.mxu1 %v14066_v50 }
  0x89   :  { %1211 = vmatpush1.bf16.msra.mxu0 %v14061_v51  ;;  %1252 = vmatpush1.bf16.msra.mxu1 %v14064_v52 }
  0x8a   :  { %1212 = vmatprep.subr.bf16.mxu0 %v14069_v53  ;;  %1253 = vmatprep.subr.bf16.mxu1 %v14072_v54 }
  0x8d   :  { %1213 = vmatpush1.bf16.msra.mxu0 %v14067_v55  ;;  %1254 = vmatpush1.bf16.msra.mxu1 %v14070_v56 }
  0x8e   :  { %1214 = vmatprep.subr.bf16.mxu0 %v14075_v57  ;;  %1255 = vmatprep.subr.bf16.mxu1 %v14078_v58 }
  0x91   :  { %1215 = vmatpush1.bf16.msra.mxu0 %v14073_v59  ;;  %1256 = vmatpush1.bf16.msra.mxu1 %v14076_v60 }
  0x92   :  { %1216 = vmatprep.subr.bf16.mxu0 %v14081_v61  ;;  %1257 = vmatprep.subr.bf16.mxu1 %v14084_v62 }
  0x95   :  { %1217 = vmatpush1.bf16.msra.mxu0 %v14079_v63  ;;  %1258 = vmatpush1.bf16.msra.mxu1 %v14082_v2  ;;  %v728_v63 = vld [vmem:[#allocation3] sm:$0x3] }
  0x96   :  { %1218 = vmatprep.subr.bf16.mxu0 %v14087_v3  ;;  %1259 = vmatprep.subr.bf16.mxu1 %v14090_v4 }
  0x99   :  { %1219 = vmatpush1.bf16.msra.mxu0 %v14085_v5  ;;  %1260 = vmatpush1.bf16.msra.mxu1 %v14088_v6 }
  0x9a   :  { %1220 = vmatprep.subr.bf16.mxu0 %v14093_v7  ;;  %1261 = vmatprep.subr.bf16.mxu1 %v14096_v8 }
  0x9d   :  { %1221 = vmatpush1.bf16.msra.mxu0 %v14091_v9  ;;  %1262 = vmatpush1.bf16.msra.mxu1 %v14094_v10 }
  0x9e   :  { %1548 = vmatprep.subr.bf16.mxu0 %v14099_v34  ;;  %1589 = vmatprep.subr.bf16.mxu1 %v14105_v37  ;;  %v14114_v34 = vld [vmem:[#allocation8 + $0x284] ss:$16 sps:$4 sm:$0xff]   ;;  %v14115_v37 = vld [vmem:[#allocation8 + $0x2a8] ss:$16 sps:$4 sm:$0xff]  }
  0xfe   :  { %v319_v22 = vpop.f32.mrf.mxu0 }
  0xff   :  { %v362_v23 = vpop.f32.mrf.mxu1  ;;  %v320_v24 = vadd.f32 %v319_v22, %v102_v18  ;;  %v14108_v22 = vld [vmem:[#allocation8 + $0x2a4] ss:$16 sps:$4 sm:$0xff]  }
 0x100   :  { %v363_v25 = vadd.f32 %v362_v23, %v110_v19  ;;  %v321_v26 = vpop.f32.mrf.mxu0  ;;  %v14106_v23 = vld [vmem:[#allocation8 + $0x2a0] ss:$16 sps:$4 sm:$0xff]  }
 0x101   :  { %v364_v27 = vpop.f32.mrf.mxu1  ;;  %371 = vst [vmem:[#allocation4 + $0x30] sm:$0xff] %v320_v24  ;;  %v322_v28 = vadd.f32 %v321_v26, %v106_v20 }
 0x102   :  { %373 = vst [vmem:[#allocation4 + $0x18] sm:$0xff] %v363_v25  ;;  %v365_v29 = vadd.f32 %v364_v27, %v114_v21  ;;  %v323_v30 = vpop.f32.mrf.mxu0 }
 0x103   :  { %v366_v31 = vpop.f32.mrf.mxu1  ;;  %372 = vst [vmem:[#allocation4] sm:$0xff] %v322_v28  ;;  %v324_v32 = vadd.f32 %v323_v30, %v102_v18 }
 0x104   :  { %374 = vst [vmem:[#allocation4 + $0x10] sm:$0xff] %v365_v29  ;;  %v367_v33 = vadd.f32 %v366_v31, %v110_v19  ;;  %v325_v35 = vpop.f32.mrf.mxu0  ;;  %v14102_v19 = vld [vmem:[#allocation8 + $0x2c4] ss:$16 sps:$4 sm:$0xff]  }
 0x105   :  { %v368_v36 = vpop.f32.mrf.mxu1  ;;  %375 = vst [vmem:[#allocation4 + $0x8] sm:$0xff] %v324_v32  ;;  %v326_v38 = vadd.f32 %v325_v35, %v106_v20  ;;  %v14111_v32 = vld [vmem:[#allocation8 + $0x2cc] ss:$16 sps:$4 sm:$0xff]   ;;  %v14112_v35 = vld [vmem:[#allocation8 + $0x280] ss:$16 sps:$4 sm:$0xff]  }
 0x106   :  { %377 = vst [vmem:[#allocation4 + $0x28] sm:$0xff] %v367_v33  ;;  %v369_v39 = vadd.f32 %v368_v36, %v114_v21  ;;  %v14100_v21 = vld [vmem:[#allocation8 + $0x2c0] ss:$16 sps:$4 sm:$0xff]   ;;  %v14109_v33 = vld [vmem:[#allocation8 + $0x2c8] ss:$16 sps:$4 sm:$0xff]  }
 0x107   :  { %376 = vst [vmem:[#allocation4 + $0x20] sm:$0xff] %v326_v38  ;;  %v14117_v36 = vld [vmem:[#allocation8 + $0x2ac] ss:$16 sps:$4 sm:$0xff]   ;;  %v14120_v38 = vld [vmem:[#allocation8 + $0x264] ss:$16 sps:$4 sm:$0xff]  }
 0x108   :  { %378 = vst [vmem:[#allocation4 + $0x38] sm:$0xff] %v369_v39  ;;  %v425_v40 = vld [vmem:[#allocation4 + $0x30] sm:$0x3] }
 0x109   :  { %v427_v54 = vld [vmem:[#allocation4 + $0x18] sm:$0x3]  ;;  %v14118_v39 = vld [vmem:[#allocation8 + $0x260] ss:$16 sps:$4 sm:$0xff]  }
 0x10a   :  { %v426_v43 = vld [vmem:[#allocation4] sm:$0x3] }
 0x10b   :  { %v428_v56 = vld [vmem:[#allocation4 + $0x10] sm:$0x3] }
 0x11e   :  { %v657_v41 = vpop.f32.mrf.mxu0 }
 0x11f   :  { %v698_v42 = vpop.f32.mrf.mxu1  ;;  %v705_v44 = vadd.f32 %v657_v41, %v425_v40  ;;  %v14123_v40 = vld [vmem:[#allocation8 + $0x28c] ss:$16 sps:$4 sm:$0xff]   ;;  %v14121_v41 = vld [vmem:[#allocation8 + $0x288] ss:$16 sps:$4 sm:$0xff]  }
 0x120   :  { %v659_v45 = vpop.f32.mrf.mxu0  ;;  %v707_v55 = vadd.f32 %v698_v42, %v427_v54  ;;  %v14126_v42 = vld [vmem:[#allocation8 + $0x244] ss:$16 sps:$4 sm:$0xff]   ;;  %v1353_v54 = vld [vmem:[#allocation2 + $0x4] sm:$0x3] }
 0x121   :  { %v700_v46 = vpop.f32.mrf.mxu1  ;;  %v12523_v47 = vmul.f32 -1.442695, %v705_v44  ;;  %v706_v48 = vadd.f32 %v659_v45, %v426_v43  ;;  %v14124_v43 = vld [vmem:[#allocation8 + $0x240] ss:$16 sps:$4 sm:$0xff]   ;;  %v14129_v44 = vld [vmem:[#allocation8 + $0x26c] ss:$16 sps:$4 sm:$0xff]  }
 0x122   :  { %v661_v49 = vpop.f32.mrf.mxu0  ;;  %v12525_v57 = vmul.f32 -1.442695, %v707_v55  ;;  %v708_v59 = vadd.f32 %v700_v46, %v428_v56  ;;  %v14127_v45 = vld [vmem:[#allocation8 + $0x268] ss:$16 sps:$4 sm:$0xff]   ;;  %v14132_v46 = vld [vmem:[#allocation8 + $0x224] ss:$16 sps:$4 sm:$0xff]   ;;  %v1354_v55 = vpack.c.bf16 %v1353_v54, %v1353_v54 }
 0x123   :  { %v702_v50 = vpop.f32.mrf.mxu1  ;;  %15873 = vpow2.f32 %v12523_v47  ;;  %v12524_v51 = vmul.f32 -1.442695, %v706_v48  ;;  %v14130_v47 = vld [vmem:[#allocation8 + $0x220] ss:$16 sps:$4 sm:$0xff]   ;;  %v14135_v48 = vld [vmem:[#allocation8 + $0x24c] ss:$16 sps:$4 sm:$0xff]  }
 0x124   :  { %v662_v52 = vpop.f32.mrf.mxu0  ;;  %v14133_v49 = vld [vmem:[#allocation8 + $0x248] ss:$16 sps:$4 sm:$0xff]   ;;  %v14138_v50 = vld [vmem:[#allocation8 + $0x204] ss:$16 sps:$4 sm:$0xff]   ;;  %v14144_v56 = vld [vmem:[#allocation8 + $0x20c] ss:$16 sps:$4 sm:$0xff]  }
 0x125   :  { %v703_v53 = vpop.f32.mrf.mxu1  ;;  %15875 = vpow2.f32 %v12524_v51  ;;  %v14136_v51 = vld [vmem:[#allocation8 + $0x200] ss:$16 sps:$4 sm:$0xff]   ;;  %v14141_v52 = vld [vmem:[#allocation8 + $0x22c] ss:$16 sps:$4 sm:$0xff]  }
 0x126   :  { %15877 = vpow2.f32 %v12525_v57  ;;  %v14139_v53 = vld [vmem:[#allocation8 + $0x228] ss:$16 sps:$4 sm:$0xff]  }
 0x127   :  { %v14142_v57 = vld [vmem:[#allocation8 + $0x208] ss:$16 sps:$4 sm:$0xff]  }
 0x130   :  { %v15874_v58 = vpop.eup %15873 }
 0x131   :  { %v718_v60 = vadd.f32 1.0, %v15874_v58  ;;  %v14147_v58 = vld [vmem:[#allocation5 + $0x2e4] ss:$16 sps:$4 sm:$0xff]  }
 0x132   :  { %v15876_v61 = vpop.eup %15875 }
 0x133   :  { %15879 = vrcp.f32 %v718_v60  ;;  %v719_v62 = vadd.f32 1.0, %v15876_v61  ;;  %v15878_v2 = vpop.eup %15877  ;;  %v14145_v60 = vld [vmem:[#allocation5 + $0x2e0] ss:$16 sps:$4 sm:$0xff]   ;;  %v14148_v61 = vld [vmem:[#allocation5 + $0x2e8] ss:$16 sps:$4 sm:$0xff]  }
 0x134   :  { %15881 = vtanh.f32 %v708_v59  ;;  %v720_v6 = vadd.f32 1.0, %v15878_v2  ;;  %v14150_v59 = vld [vmem:[#allocation5 + $0x2ec] ss:$16 sps:$4 sm:$0xff]   ;;  %v14151_v2 = vld [vmem:[#allocation5 + $0x2c0] ss:$16 sps:$4 sm:$0xff]  }
 0x135   :  { %15883 = vrcp.f32 %v719_v62  ;;  %v14153_v62 = vld [vmem:[#allocation5 + $0x2c4] ss:$16 sps:$4 sm:$0xff]  }
 0x136   :  { %15885 = vrcp.f32 %v720_v6  ;;  %v14157_v6 = vld [vmem:[#allocation5 + $0x2a0] ss:$16 sps:$4 sm:$0xff]  }
 0x13f   :  { %v16406_v24 = vpop.f32.mrf.mxu0 }
 0x140   :  { %v15880_v3 = vpop.eup %15879  ;;  %v16410_v28 = vpop.f32.mrf.mxu1 }
 0x141   :  { %v15882_v4 = vpop.eup %15881  ;;  %v16408_v25 = vpop.f32.mrf.mxu0 }
 0x142   :  { %v15884_v5 = vpop.eup %15883  ;;  %v730_v8 = vmul.f32 %v15882_v4, %v15880_v3  ;;  %v16412_v29 = vpop.f32.mrf.mxu1  ;;  %v14154_v3 = vld [vmem:[#allocation5 + $0x2c8] ss:$16 sps:$4 sm:$0xff]   ;;  %v14159_v4 = vld [vmem:[#allocation5 + $0x2a4] ss:$16 sps:$4 sm:$0xff]  }
 0x143   :  { %v729_v7 = vmul.f32 %v15884_v5, %v728_v63  ;;  %v15886_v10 = vpop.eup %15885  ;;  %v1002_v26 = vpop.f32.mrf.mxu0  ;;  %v14156_v63 = vld [vmem:[#allocation5 + $0x2cc] ss:$16 sps:$4 sm:$0xff]  }
 0x144   :  { %v1043_v30 = vpop.f32.mrf.mxu1  ;;  %v14162_v5 = vld [vmem:[#allocation5 + $0x2ac] ss:$16 sps:$4 sm:$0xff]   ;;  %v14183_v26 = vld [vmem:[#allocation5 + $0x224] ss:$16 sps:$4 sm:$0xff]  }
 0x145   :  { %v731_v9 = vadd.f32 %v730_v8, %v729_v7  ;;  %v1003_v27 = vpop.f32.mrf.mxu0  ;;  %v14160_v7 = vld [vmem:[#allocation5 + $0x2a8] ss:$16 sps:$4 sm:$0xff]   ;;  %v14165_v8 = vld [vmem:[#allocation5 + $0x284] ss:$16 sps:$4 sm:$0xff]   ;;  %v14181_v30 = vld [vmem:[#allocation5 + $0x220] ss:$16 sps:$4 sm:$0xff]  }
 0x146   :  { %v1044_v31 = vpop.f32.mrf.mxu1  ;;  %v14186_v27 = vld [vmem:[#allocation5 + $0x22c] ss:$16 sps:$4 sm:$0xff]  }
 0x147   :  { %15887 = vtanh.f32 %v731_v9  ;;  %1903 = vst [vmem:[#allocation3] sm:$0x3] %v731_v9  ;;  %v14168_v9 = vld [vmem:[#allocation5 + $0x28c] ss:$16 sps:$4 sm:$0xff]   ;;  %v14184_v31 = vld [vmem:[#allocation5 + $0x228] ss:$16 sps:$4 sm:$0xff]  }
 0x154   :  { %v15888_v11 = vpop.eup %15887 }
 0x155   :  { %v733_v18 = vmul.f32 %v15888_v11, %v15886_v10  ;;  %v14163_v10 = vld [vmem:[#allocation5 + $0x280] ss:$16 sps:$4 sm:$0xff]   ;;  %v14166_v11 = vld [vmem:[#allocation5 + $0x288] ss:$16 sps:$4 sm:$0xff]  }
 0x157   :  { %v734_v20 = vpack.c.bf16 %v733_v18, %v733_v18  ;;  %1902 = vst [vmem:[#allocation2] sm:$0x3] %v733_v18  ;;  %v14174_v18 = vld [vmem:[#allocation5 + $0x26c] ss:$16 sps:$4 sm:$0xff]  }
 0x159   :  { %1239 = vmatmul.mubr.bf16.vlgmr.msra.gmra.mxu0 %v734_v20  ;;  %1280 = vmatmul.mubr.bf16.vlgmr.msra.gmra.mxu1 %v734_v20  ;;  %v14177_v20 = vld [vmem:[#allocation5 + $0x244] ss:$16 sps:$4 sm:$0xff]  }
 0x15a   :  { %1549 = vmatpush1.bf16.msra.mxu0 %v14097_v12  ;;  %1590 = vmatpush1.bf16.msra.mxu1 %v14103_v13  ;;  %v14171_v12 = vld [vmem:[#allocation5 + $0x264] ss:$16 sps:$4 sm:$0xff]   ;;  %v14169_v13 = vld [vmem:[#allocation5 + $0x260] ss:$16 sps:$4 sm:$0xff]  }
 0x15b   :  { %1550 = vmatprep.subr.bf16.mxu0 %v14102_v19  ;;  %1580 = vmatprep.mubr.bf16.mxu0 %v16327_v0  ;;  %v14172_v19 = vld [vmem:[#allocation5 + $0x268] ss:$16 sps:$4 sm:$0xff]  }
 0x15c   :  { %1621 = vmatprep.mubr.bf16.mxu1 %v16327_v0  ;;  %1591 = vmatprep.subr.bf16.mxu1 %v14111_v32  ;;  %v14189_v32 = vld [vmem:[#allocation5 + $0x204] ss:$16 sps:$4 sm:$0xff]  }
 0x15e   :  { %1551 = vmatpush1.bf16.msra.mxu0 %v14100_v21  ;;  %1592 = vmatpush1.bf16.msra.mxu1 %v14109_v33  ;;  %v14180_v21 = vld [vmem:[#allocation5 + $0x24c] ss:$16 sps:$4 sm:$0xff]  }
 0x15f   :  { %1552 = vmatprep.subr.bf16.mxu0 %v14108_v22  ;;  %1593 = vmatprep.subr.bf16.mxu1 %v14117_v36  ;;  %v14175_v22 = vld [vmem:[#allocation5 + $0x240] ss:$16 sps:$4 sm:$0xff]   ;;  %v14192_v33 = vld [vmem:[#allocation5 + $0x20c] ss:$16 sps:$4 sm:$0xff]   ;;  %v14195_v36 = vld [vmem:[#allocation8 + $0xe4] ss:$16 sps:$4 sm:$0xff]  }
 0x162   :  { %1553 = vmatpush1.bf16.msra.mxu0 %v14106_v23  ;;  %1594 = vmatpush1.bf16.msra.mxu1 %v14115_v37  ;;  %v14178_v23 = vld [vmem:[#allocation5 + $0x248] ss:$16 sps:$4 sm:$0xff]   ;;  %v14198_v37 = vld [vmem:[#allocation8 + $0xec] ss:$16 sps:$4 sm:$0xff]  }
 0x163   :  { %1554 = vmatprep.subr.bf16.mxu0 %v14114_v34  ;;  %1595 = vmatprep.subr.bf16.mxu1 %v14123_v40  ;;  %v14187_v34 = vld [vmem:[#allocation5 + $0x200] ss:$16 sps:$4 sm:$0xff]  }
 0x166   :  { %1555 = vmatpush1.bf16.msra.mxu0 %v14112_v35  ;;  %1596 = vmatpush1.bf16.msra.mxu1 %v14121_v41  ;;  %v14190_v35 = vld [vmem:[#allocation5 + $0x208] ss:$16 sps:$4 sm:$0xff]  }
 0x167   :  { %1556 = vmatprep.subr.bf16.mxu0 %v14120_v38  ;;  %1597 = vmatprep.subr.bf16.mxu1 %v14129_v44  ;;  %v12489_v38 = vld [vmem:[%s16838_s3 + $0x4] sm:$0xf] }
 0x16a   :  { %1557 = vmatpush1.bf16.msra.mxu0 %v14118_v39  ;;  %1598 = vmatpush1.bf16.msra.mxu1 %v14127_v45  ;;  %v16420_v39 = vrot.slane %v12489_v38, %v16392_v14 }
 0x16b   :  { %1558 = vmatprep.subr.bf16.mxu0 %v14126_v42  ;;  %1599 = vmatprep.subr.bf16.mxu1 %v14135_v48  ;;  %v16423_v42 = vrot.slane %v12489_v38, %v16396_v16 }
 0x16e   :  { %1559 = vmatpush1.bf16.msra.mxu0 %v14124_v43  ;;  %1600 = vmatpush1.bf16.msra.mxu1 %v14133_v49 }
 0x16f   :  { %1560 = vmatprep.subr.bf16.mxu0 %v14132_v46  ;;  %1601 = vmatprep.subr.bf16.mxu1 %v14141_v52 }
 0x172   :  { %1561 = vmatpush1.bf16.msra.mxu0 %v14130_v47  ;;  %1602 = vmatpush1.bf16.msra.mxu1 %v14139_v53 }
 0x173   :  { %1562 = vmatprep.subr.bf16.mxu0 %v14138_v50  ;;  %1603 = vmatprep.subr.bf16.mxu1 %v14144_v56 }
 0x176   :  { %1563 = vmatpush1.bf16.msra.mxu0 %v14136_v51  ;;  %1604 = vmatpush1.bf16.msra.mxu1 %v14142_v57  ;;  %v16435_v57 = vrot.slane %v12489_v38, %v16398_v17 }
 0x177   :  { %1790 = vmatprep.subr.bf16.mxu0 %v14147_v58  ;;  %1831 = vmatprep.subr.bf16.mxu1 %v14150_v59 }
 0x179   :  { %1581 = vmatmul.mubr.bf16.vlgmr.msra.gmra.mxu0 %v1354_v55  ;;  %1622 = vmatmul.mubr.bf16.vlgmr.msra.gmra.mxu1 %v1354_v55  ;;  %v16430_v55 = vrot.slane %v12489_v38, %v16394_v15  ;;  %v14220_v38 = vld [vmem:[#allocation8 + $0x68] ss:$16 sps:$4 sm:$0xff]  }
 0x17a   :  { %1822 = vmatprep.mubr.bf16.mxu0 %v16327_v0  ;;  %1791 = vmatpush1.bf16.msra.mxu0 %v14145_v60 }
 0x17b   :  { %1832 = vmatpush1.bf16.msra.mxu1 %v14148_v61  ;;  %1863 = vmatprep.mubr.bf16.mxu1 %v16327_v0 }
 0x17c   :  { %1792 = vmatprep.subr.bf16.mxu0 %v14153_v62  ;;  %1833 = vmatprep.subr.bf16.mxu1 %v14156_v63 }
 0x17e   :  { %1793 = vmatpush1.bf16.msra.mxu0 %v14151_v2 }
 0x17f   :  { %1834 = vmatpush1.bf16.msra.mxu1 %v14154_v3  ;;  %1794 = vmatprep.subr.bf16.mxu0 %v14159_v4  ;;  %v1312_v3 = vld [vmem:[#allocation3 + $0x2] sm:$0x3] }
 0x180   :  { %1835 = vmatprep.subr.bf16.mxu1 %v14162_v5 }
 0x182   :  { %1795 = vmatpush1.bf16.msra.mxu0 %v14157_v6 }
 0x183   :  { %1836 = vmatpush1.bf16.msra.mxu1 %v14160_v7  ;;  %1796 = vmatprep.subr.bf16.mxu0 %v14165_v8 }
 0x184   :  { %1837 = vmatprep.subr.bf16.mxu1 %v14168_v9 }
 0x186   :  { %1797 = vmatpush1.bf16.msra.mxu0 %v14163_v10 }
 0x187   :  { %1838 = vmatpush1.bf16.msra.mxu1 %v14166_v11  ;;  %1798 = vmatprep.subr.bf16.mxu0 %v14171_v12  ;;  %v14193_v12 = vld [vmem:[#allocation8 + $0xe0] ss:$16 sps:$4 sm:$0xff]  }
 0x188   :  { %1839 = vmatprep.subr.bf16.mxu1 %v14174_v18 }
 0x18a   :  { %1799 = vmatpush1.bf16.msra.mxu0 %v14169_v13  ;;  %v14196_v13 = vld [vmem:[#allocation8 + $0xe8] ss:$16 sps:$4 sm:$0xff]  }
 0x18b   :  { %1840 = vmatpush1.bf16.msra.mxu1 %v14172_v19  ;;  %1800 = vmatprep.subr.bf16.mxu0 %v14177_v20  ;;  %v14201_v19 = vld [vmem:[#allocation8 + $0xc4] ss:$16 sps:$4 sm:$0xff]   ;;  %v14204_v20 = vld [vmem:[#allocation8 + $0xcc] ss:$16 sps:$4 sm:$0xff]  }
 0x18c   :  { %1841 = vmatprep.subr.bf16.mxu1 %v14180_v21  ;;  %v14199_v21 = vld [vmem:[#allocation8 + $0xc0] ss:$16 sps:$4 sm:$0xff]  }
 0x18e   :  { %1801 = vmatpush1.bf16.msra.mxu0 %v14175_v22  ;;  %v14202_v22 = vld [vmem:[#allocation8 + $0xc8] ss:$16 sps:$4 sm:$0xff]  }
 0x18f   :  { %1842 = vmatpush1.bf16.msra.mxu1 %v14178_v23  ;;  %1802 = vmatprep.subr.bf16.mxu0 %v14183_v26  ;;  %v14207_v23 = vld [vmem:[#allocation8 + $0xa4] ss:$16 sps:$4 sm:$0xff]   ;;  %v14210_v26 = vld [vmem:[#allocation8 + $0xac] ss:$16 sps:$4 sm:$0xff]  }
 0x190   :  { %1843 = vmatprep.subr.bf16.mxu1 %v14186_v27  ;;  %v14205_v27 = vld [vmem:[#allocation8 + $0xa0] ss:$16 sps:$4 sm:$0xff]  }
 0x192   :  { %1803 = vmatpush1.bf16.msra.mxu0 %v14181_v30  ;;  %v14208_v30 = vld [vmem:[#allocation8 + $0xa8] ss:$16 sps:$4 sm:$0xff]  }
 0x193   :  { %1844 = vmatpush1.bf16.msra.mxu1 %v14184_v31  ;;  %1804 = vmatprep.subr.bf16.mxu0 %v14189_v32  ;;  %v14213_v31 = vld [vmem:[#allocation8 + $0x84] ss:$16 sps:$4 sm:$0xff]   ;;  %v14216_v32 = vld [vmem:[#allocation8 + $0x8c] ss:$16 sps:$4 sm:$0xff]  }
 0x194   :  { %1845 = vmatprep.subr.bf16.mxu1 %v14192_v33  ;;  %v14211_v33 = vld [vmem:[#allocation8 + $0x80] ss:$16 sps:$4 sm:$0xff]  }
 0x196   :  { %1805 = vmatpush1.bf16.msra.mxu0 %v14187_v34  ;;  %v14214_v34 = vld [vmem:[#allocation8 + $0x88] ss:$16 sps:$4 sm:$0xff]  }
 0x197   :  { %1846 = vmatpush1.bf16.msra.mxu1 %v14190_v35  ;;  %2106 = vmatprep.subr.bf16.mxu0 %v14195_v36  ;;  %v14219_v35 = vld [vmem:[#allocation8 + $0x64] ss:$16 sps:$4 sm:$0xff]   ;;  %v14222_v36 = vld [vmem:[#allocation8 + $0x6c] ss:$16 sps:$4 sm:$0xff]  }
 0x198   :  { %2147 = vmatprep.subr.bf16.mxu1 %v14198_v37  ;;  %v14217_v37 = vld [vmem:[#allocation8 + $0x60] ss:$16 sps:$4 sm:$0xff]  }
 0x219   :  { %v1240_v40 = vpop.f32.mrf.mxu0  ;;  %v1281_v41 = vpop.f32.mrf.mxu1 }
 0x21a   :  { %v1241_v43 = vadd.f32 %v1240_v40, %v16406_v24  ;;  %v1282_v24 = vadd.f32 %v1281_v41, %v16410_v28  ;;  %v14225_v40 = vld [vmem:[#allocation8 + $0x44] ss:$16 sps:$4 sm:$0xff]   ;;  %v14228_v41 = vld [vmem:[#allocation8 + $0x4c] ss:$16 sps:$4 sm:$0xff]  }
 0x21b   :  { %v1242_v44 = vpop.f32.mrf.mxu0  ;;  %v1283_v45 = vpop.f32.mrf.mxu1 }
 0x21c   :  { %v1288_v46 = vadd.f32 %v1241_v43, %v16420_v39  ;;  %v1243_v47 = vadd.f32 %v1242_v44, %v16408_v25  ;;  %v1290_v56 = vadd.f32 %v1282_v24, %v16430_v55  ;;  %v1284_v25 = vadd.f32 %v1283_v45, %v16412_v29  ;;  %v14223_v43 = vld [vmem:[#allocation8 + $0x40] ss:$16 sps:$4 sm:$0xff]   ;;  %v14226_v44 = vld [vmem:[#allocation8 + $0x48] ss:$16 sps:$4 sm:$0xff]   ;;  %v14231_v45 = vld [vmem:[#allocation8 + $0x24] ss:$16 sps:$4 sm:$0xff]  }
 0x21d   :  { %v1244_v48 = vpop.f32.mrf.mxu0  ;;  %v1285_v49 = vpop.f32.mrf.mxu1  ;;  %v1912_v24 = vld [vmem:[#allocation2] sm:$0x3] }
 0x21e   :  { %v12590_v50 = vmul.f32 -1.442695, %v1288_v46  ;;  %v1289_v51 = vadd.f32 %v1243_v47, %v16423_v42  ;;  %v12592_v58 = vmul.f32 -1.442695, %v1290_v56  ;;  %v1291_v60 = vadd.f32 %v1284_v25, %v16435_v57  ;;  %v14234_v46 = vld [vmem:[#allocation8 + $0x2c] ss:$16 sps:$4 sm:$0xff]  }
 0x21f   :  { %v1245_v52 = vpop.f32.mrf.mxu0  ;;  %v1286_v53 = vpop.f32.mrf.mxu1  ;;  %v14229_v47 = vld [vmem:[#allocation8 + $0x20] ss:$16 sps:$4 sm:$0xff]   ;;  %v14232_v48 = vld [vmem:[#allocation8 + $0x28] ss:$16 sps:$4 sm:$0xff]   ;;  %v14237_v49 = vld [vmem:[#allocation8 + $0x4] ss:$16 sps:$4 sm:$0xff]  }
 0x220   :  { %15889 = vpow2.f32 %v12590_v50  ;;  %v12591_v54 = vmul.f32 -1.442695, %v1289_v51  ;;  %v14240_v50 = vld [vmem:[#allocation8 + $0xc] ss:$16 sps:$4 sm:$0xff]   ;;  %v14235_v51 = vld [vmem:[#allocation8] ss:$16 sps:$4 sm:$0xff]  }
 0x221   :  { %v14238_v52 = vld [vmem:[#allocation8 + $0x8] ss:$16 sps:$4 sm:$0xff]   ;;  %v14243_v53 = vld [vmem:[#allocation8 + $0x1e4] ss:$16 sps:$4 sm:$0xff]   ;;  %v14241_v56 = vld [vmem:[#allocation8 + $0x1e0] ss:$16 sps:$4 sm:$0xff]  }
 0x222   :  { %15891 = vpow2.f32 %v12591_v54  ;;  %v14246_v54 = vld [vmem:[#allocation8 + $0x1ec] ss:$16 sps:$4 sm:$0xff]   ;;  %v14244_v25 = vld [vmem:[#allocation8 + $0x1e8] ss:$16 sps:$4 sm:$0xff]  }
 0x223   :  { %15893 = vpow2.f32 %v12592_v58 }
 0x22d   :  { %v15890_v59 = vpop.eup %15889 }
 0x22e   :  { %v1301_v61 = vadd.f32 1.0, %v15890_v59  ;;  %v1913_v59 = vpack.c.bf16 %v1912_v24, %v1912_v24  ;;  %v14307_v24 = vld [vmem:[#allocation5 + $0x180] ss:$16 sps:$4 sm:$0xff]  }
 0x22f   :  { %v15892_v62 = vpop.eup %15891 }
 0x230   :  { %15895 = vrcp.f32 %v1301_v61  ;;  %v1302_v63 = vadd.f32 1.0, %v15892_v62  ;;  %v15894_v2 = vpop.eup %15893  ;;  %v14252_v61 = vld [vmem:[#allocation8 + $0x1cc] ss:$16 sps:$4 sm:$0xff]  }
 0x231   :  { %15897 = vtanh.f32 %v1291_v60  ;;  %v1303_v6 = vadd.f32 1.0, %v15894_v2  ;;  %v14249_v60 = vld [vmem:[#allocation8 + $0x1c4] ss:$16 sps:$4 sm:$0xff]   ;;  %v14250_v2 = vld [vmem:[#allocation8 + $0x1c8] ss:$16 sps:$4 sm:$0xff]  }
 0x232   :  { %15899 = vrcp.f32 %v1302_v63  ;;  %v14247_v63 = vld [vmem:[#allocation8 + $0x1c0] ss:$16 sps:$4 sm:$0xff]  }
 0x233   :  { %15901 = vrcp.f32 %v1303_v6 }
 0x239   :  { %v16441_v58 = vpop.f32.mrf.mxu0  ;;  %v16447_v6 = vpop.f32.mrf.mxu1 }
 0x23b   :  { %v16443_v62 = vpop.f32.mrf.mxu0 }
 0x23d   :  { %v15896_v28 = vpop.eup %15895 }
 0x23e   :  { %v15898_v4 = vpop.eup %15897 }
 0x23f   :  { %v15900_v5 = vpop.eup %15899  ;;  %v1314_v8 = vmul.f32 %v15898_v4, %v15896_v28  ;;  %v1586_v28 = vpop.f32.mrf.mxu0  ;;  %v14258_v4 = vld [vmem:[#allocation8 + $0x1ac] ss:$16 sps:$4 sm:$0xff]  }
 0x240   :  { %v1313_v7 = vmul.f32 %v15900_v5, %v1312_v3  ;;  %v15902_v9 = vpop.eup %15901  ;;  %v14255_v3 = vld [vmem:[#allocation8 + $0x1a4] ss:$16 sps:$4 sm:$0xff]  }
 0x241   :  { %v1587_v5 = vpop.f32.mrf.mxu0  ;;  %v14321_v28 = vld [vmem:[#allocation5 + $0x144] ss:$16 sps:$4 sm:$0xff]  }
 0x242   :  { %v1315_v29 = vadd.f32 %v1314_v8, %v1313_v7  ;;  %v14253_v7 = vld [vmem:[#allocation8 + $0x1a0] ss:$16 sps:$4 sm:$0xff]   ;;  %v14256_v8 = vld [vmem:[#allocation8 + $0x1a8] ss:$16 sps:$4 sm:$0xff]  }
 0x243   :  { %v14322_v5 = vld [vmem:[#allocation5 + $0x148] ss:$16 sps:$4 sm:$0xff]  }
 0x244   :  { %15903 = vtanh.f32 %v1315_v29  ;;  %1905 = vst [vmem:[#allocation3 + $0x2] sm:$0x3] %v1315_v29  ;;  %v16449_v29 = vpop.f32.mrf.mxu1 }
 0x251   :  { %v15904_v10 = vpop.eup %15903 }
 0x252   :  { %v1317_v11 = vmul.f32 %v15904_v10, %v15902_v9  ;;  %v14261_v9 = vld [vmem:[#allocation8 + $0x184] ss:$16 sps:$4 sm:$0xff]   ;;  %v14264_v10 = vld [vmem:[#allocation8 + $0x18c] ss:$16 sps:$4 sm:$0xff]  }
 0x254   :  { %v1318_v18 = vpack.c.bf16 %v1317_v11, %v1317_v11  ;;  %1904 = vst [vmem:[#allocation2 + $0x2] sm:$0x3] %v1317_v11  ;;  %v1627_v11 = vpop.f32.mrf.mxu1 }
 0x255   :  { %v14333_v11 = vld [vmem:[#allocation5 + $0x104] ss:$16 sps:$4 sm:$0xff]  }
 0x256   :  { %1823 = vmatmul.mubr.bf16.vlgmr.msra.gmra.mxu0 %v1318_v18  ;;  %1864 = vmatmul.mubr.bf16.vlgmr.msra.gmra.mxu1 %v1318_v18  ;;  %v1628_v18 = vpop.f32.mrf.mxu1 }
 0x257   :  { %2107 = vmatpush1.bf16.msra.mxu0 %v14193_v12  ;;  %2148 = vmatpush1.bf16.msra.mxu1 %v14196_v13  ;;  %v14259_v12 = vld [vmem:[#allocation8 + $0x180] ss:$16 sps:$4 sm:$0xff]   ;;  %v14262_v13 = vld [vmem:[#allocation8 + $0x188] ss:$16 sps:$4 sm:$0xff]  }
 0x258   :  { %2108 = vmatprep.subr.bf16.mxu0 %v14201_v19  ;;  %2149 = vmatprep.subr.bf16.mxu1 %v14204_v20  ;;  %v14267_v19 = vld [vmem:[#allocation8 + $0x164] ss:$16 sps:$4 sm:$0xff]   ;;  %v14270_v20 = vld [vmem:[#allocation8 + $0x16c] ss:$16 sps:$4 sm:$0xff]   ;;  %v14334_v18 = vld [vmem:[#allocation5 + $0x108] ss:$16 sps:$4 sm:$0xff]  }
 0x259   :  { %2138 = vmatprep.mubr.bf16.mxu0 %v16327_v0  ;;  %2179 = vmatprep.mubr.bf16.mxu1 %v16327_v0 }
 0x25b   :  { %2109 = vmatpush1.bf16.msra.mxu0 %v14199_v21  ;;  %2150 = vmatpush1.bf16.msra.mxu1 %v14202_v22  ;;  %v14265_v21 = vld [vmem:[#allocation8 + $0x160] ss:$16 sps:$4 sm:$0xff]   ;;  %v14268_v22 = vld [vmem:[#allocation8 + $0x168] ss:$16 sps:$4 sm:$0xff]  }
 0x25c   :  { %2110 = vmatprep.subr.bf16.mxu0 %v14207_v23  ;;  %2151 = vmatprep.subr.bf16.mxu1 %v14210_v26  ;;  %v14273_v23 = vld [vmem:[#allocation8 + $0x144] ss:$16 sps:$4 sm:$0xff]   ;;  %v14276_v26 = vld [vmem:[#allocation8 + $0x14c] ss:$16 sps:$4 sm:$0xff]  }
 0x25f   :  { %2111 = vmatpush1.bf16.msra.mxu0 %v14205_v27  ;;  %2152 = vmatpush1.bf16.msra.mxu1 %v14208_v30  ;;  %v14271_v27 = vld [vmem:[#allocation8 + $0x140] ss:$16 sps:$4 sm:$0xff]   ;;  %v14274_v30 = vld [vmem:[#allocation8 + $0x148] ss:$16 sps:$4 sm:$0xff]  }
 0x260   :  { %2112 = vmatprep.subr.bf16.mxu0 %v14213_v31  ;;  %2153 = vmatprep.subr.bf16.mxu1 %v14216_v32  ;;  %v14279_v31 = vld [vmem:[#allocation8 + $0x124] ss:$16 sps:$4 sm:$0xff]   ;;  %v14282_v32 = vld [vmem:[#allocation8 + $0x12c] ss:$16 sps:$4 sm:$0xff]  }
 0x263   :  { %2113 = vmatpush1.bf16.msra.mxu0 %v14211_v33  ;;  %2154 = vmatpush1.bf16.msra.mxu1 %v14214_v34  ;;  %v14277_v33 = vld [vmem:[#allocation8 + $0x120] ss:$16 sps:$4 sm:$0xff]   ;;  %v14280_v34 = vld [vmem:[#allocation8 + $0x128] ss:$16 sps:$4 sm:$0xff]  }
 0x264   :  { %2114 = vmatprep.subr.bf16.mxu0 %v14219_v35  ;;  %2155 = vmatprep.subr.bf16.mxu1 %v14222_v36  ;;  %v14285_v35 = vld [vmem:[#allocation8 + $0x104] ss:$16 sps:$4 sm:$0xff]   ;;  %v14288_v36 = vld [vmem:[#allocation8 + $0x10c] ss:$16 sps:$4 sm:$0xff]  }
 0x267   :  { %2115 = vmatpush1.bf16.msra.mxu0 %v14217_v37  ;;  %2156 = vmatpush1.bf16.msra.mxu1 %v14220_v38  ;;  %v14283_v37 = vld [vmem:[#allocation8 + $0x100] ss:$16 sps:$4 sm:$0xff]   ;;  %v14286_v38 = vld [vmem:[#allocation8 + $0x108] ss:$16 sps:$4 sm:$0xff]  }
 0x268   :  { %2116 = vmatprep.subr.bf16.mxu0 %v14225_v40  ;;  %2157 = vmatprep.subr.bf16.mxu1 %v14228_v41  ;;  %v2265_v40 = vld [vmem:[#allocation2 + $0x2] sm:$0x3] }
 0x269   :  { %v2266_v41 = vpack.c.bf16 %v2265_v40, %v2265_v40 }
 0x26b   :  { %2117 = vmatpush1.bf16.msra.mxu0 %v14223_v43  ;;  %2158 = vmatpush1.bf16.msra.mxu1 %v14226_v44  ;;  %v14291_v43 = vld [vmem:[#allocation5 + $0x1e4] ss:$16 sps:$4 sm:$0xff]   ;;  %v14294_v44 = vld [vmem:[#allocation5 + $0x1ec] ss:$16 sps:$4 sm:$0xff]  }
 0x26c   :  { %2118 = vmatprep.subr.bf16.mxu0 %v14231_v45  ;;  %2159 = vmatprep.subr.bf16.mxu1 %v14234_v46  ;;  %v14289_v45 = vld [vmem:[#allocation5 + $0x1e0] ss:$16 sps:$4 sm:$0xff]   ;;  %v14292_v46 = vld [vmem:[#allocation5 + $0x1e8] ss:$16 sps:$4 sm:$0xff]  }
 0x26f   :  { %2119 = vmatpush1.bf16.msra.mxu0 %v14229_v47  ;;  %2160 = vmatpush1.bf16.msra.mxu1 %v14232_v48  ;;  %v14297_v47 = vld [vmem:[#allocation5 + $0x1c4] ss:$16 sps:$4 sm:$0xff]   ;;  %v14300_v48 = vld [vmem:[#allocation5 + $0x1cc] ss:$16 sps:$4 sm:$0xff]  }
 0x270   :  { %2120 = vmatprep.subr.bf16.mxu0 %v14237_v49  ;;  %2161 = vmatprep.subr.bf16.mxu1 %v14240_v50  ;;  %v14295_v49 = vld [vmem:[#allocation5 + $0x1c0] ss:$16 sps:$4 sm:$0xff]   ;;  %v14298_v50 = vld [vmem:[#allocation5 + $0x1c8] ss:$16 sps:$4 sm:$0xff]  }
 0x273   :  { %2121 = vmatpush1.bf16.msra.mxu0 %v14235_v51  ;;  %2162 = vmatpush1.bf16.msra.mxu1 %v14238_v52  ;;  %v14303_v51 = vld [vmem:[#allocation5 + $0x1a4] ss:$16 sps:$4 sm:$0xff]   ;;  %v14306_v52 = vld [vmem:[#allocation5 + $0x1ac] ss:$16 sps:$4 sm:$0xff]  }
 0x274   :  { %2459 = vmatprep.subr.bf16.mxu0 %v14243_v53  ;;  %2500 = vmatprep.subr.bf16.mxu1 %v14246_v54  ;;  %v14301_v53 = vld [vmem:[#allocation5 + $0x1a0] ss:$16 sps:$4 sm:$0xff]   ;;  %v14304_v54 = vld [vmem:[#allocation5 + $0x1a8] ss:$16 sps:$4 sm:$0xff]  }
 0x276   :  { %2139 = vmatmul.mubr.bf16.vlgmr.msra.gmra.mxu0 %v1913_v59  ;;  %2180 = vmatmul.mubr.bf16.vlgmr.msra.gmra.mxu1 %v1913_v59  ;;  %v14312_v59 = vld [vmem:[#allocation5 + $0x18c] ss:$16 sps:$4 sm:$0xff]  }
 0x277   :  { %2460 = vmatpush1.bf16.msra.mxu0 %v14241_v56  ;;  %2501 = vmatpush1.bf16.msra.mxu1 %v14244_v25  ;;  %v14309_v56 = vld [vmem:[#allocation5 + $0x184] ss:$16 sps:$4 sm:$0xff]   ;;  %v14310_v25 = vld [vmem:[#allocation5 + $0x188] ss:$16 sps:$4 sm:$0xff]  }
 0x278   :  { %2461 = vmatprep.subr.bf16.mxu0 %v14249_v60  ;;  %2502 = vmatprep.subr.bf16.mxu1 %v14252_v61  ;;  %v14315_v60 = vld [vmem:[#allocation5 + $0x164] ss:$16 sps:$4 sm:$0xff]   ;;  %v14318_v61 = vld [vmem:[#allocation5 + $0x16c] ss:$16 sps:$4 sm:$0xff]  }
 0x279   :  { %2491 = vmatprep.mubr.bf16.mxu0 %v16327_v0  ;;  %2532 = vmatprep.mubr.bf16.mxu1 %v16327_v0 }
 0x27b   :  { %2462 = vmatpush1.bf16.msra.mxu0 %v14247_v63  ;;  %2503 = vmatpush1.bf16.msra.mxu1 %v14250_v2  ;;  %v14313_v63 = vld [vmem:[#allocation5 + $0x160] ss:$16 sps:$4 sm:$0xff]   ;;  %v14316_v2 = vld [vmem:[#allocation5 + $0x168] ss:$16 sps:$4 sm:$0xff]  }
 0x27c   :  { %2463 = vmatprep.subr.bf16.mxu0 %v14255_v3  ;;  %2504 = vmatprep.subr.bf16.mxu1 %v14258_v4  ;;  %v14324_v3 = vld [vmem:[#allocation5 + $0x14c] ss:$16 sps:$4 sm:$0xff]   ;;  %v14319_v4 = vld [vmem:[#allocation5 + $0x140] ss:$16 sps:$4 sm:$0xff]  }
 0x27f   :  { %2464 = vmatpush1.bf16.msra.mxu0 %v14253_v7  ;;  %2505 = vmatpush1.bf16.msra.mxu1 %v14256_v8  ;;  %v14327_v7 = vld [vmem:[#allocation5 + $0x124] ss:$16 sps:$4 sm:$0xff]   ;;  %v14330_v8 = vld [vmem:[#allocation5 + $0x12c] ss:$16 sps:$4 sm:$0xff]  }
 0x280   :  { %2465 = vmatprep.subr.bf16.mxu0 %v14261_v9  ;;  %2506 = vmatprep.subr.bf16.mxu1 %v14264_v10  ;;  %v14325_v9 = vld [vmem:[#allocation5 + $0x120] ss:$16 sps:$4 sm:$0xff]   ;;  %v14328_v10 = vld [vmem:[#allocation5 + $0x128] ss:$16 sps:$4 sm:$0xff]  }
 0x283   :  { %2466 = vmatpush1.bf16.msra.mxu0 %v14259_v12  ;;  %2507 = vmatpush1.bf16.msra.mxu1 %v14262_v13  ;;  %v14336_v12 = vld [vmem:[#allocation5 + $0x10c] ss:$16 sps:$4 sm:$0xff]   ;;  %v14331_v13 = vld [vmem:[#allocation5 + $0x100] ss:$16 sps:$4 sm:$0xff]  }
 0x284   :  { %2467 = vmatprep.subr.bf16.mxu0 %v14267_v19  ;;  %2508 = vmatprep.subr.bf16.mxu1 %v14270_v20  ;;  %v14339_v19 = vld [vmem:[#allocation8 + $0x2e4] ss:$16 sps:$4 sm:$0xff]   ;;  %v14342_v20 = vld [vmem:[#allocation8 + $0x2ec] ss:$16 sps:$4 sm:$0xff]  }
 0x287   :  { %2468 = vmatpush1.bf16.msra.mxu0 %v14265_v21  ;;  %2509 = vmatpush1.bf16.msra.mxu1 %v14268_v22  ;;  %v12490_v21 = vld [vmem:[%s16838_s3 + $0x8] sm:$0xf] }
 0x288   :  { %2469 = vmatprep.subr.bf16.mxu0 %v14273_v23  ;;  %2510 = vmatprep.subr.bf16.mxu1 %v14276_v26  ;;  %v16457_v22 = vrot.slane %v12490_v21, %v16392_v14 }
 0x28b   :  { %2470 = vmatpush1.bf16.msra.mxu0 %v14271_v27  ;;  %2511 = vmatpush1.bf16.msra.mxu1 %v14274_v30  ;;  %v16460_v27 = vrot.slane %v12490_v21, %v16396_v16  ;;  %v16467_v16 = vrot.slane %v12490_v21, %v16394_v15 }
 0x28c   :  { %2471 = vmatprep.subr.bf16.mxu0 %v14279_v31  ;;  %2512 = vmatprep.subr.bf16.mxu1 %v14282_v32 }
 0x28f   :  { %2472 = vmatpush1.bf16.msra.mxu0 %v14277_v33  ;;  %2513 = vmatpush1.bf16.msra.mxu1 %v14280_v34 }
 0x290   :  { %2473 = vmatprep.subr.bf16.mxu0 %v14285_v35  ;;  %2514 = vmatprep.subr.bf16.mxu1 %v14288_v36 }
 0x293   :  { %2474 = vmatpush1.bf16.msra.mxu0 %v14283_v37  ;;  %2515 = vmatpush1.bf16.msra.mxu1 %v14286_v38 }
 0x294   :  { %2704 = vmatprep.subr.bf16.mxu0 %v14291_v43  ;;  %2745 = vmatprep.subr.bf16.mxu1 %v14294_v44  ;;  %v16472_v44 = vrot.slane %v12490_v21, %v16398_v17  ;;  %v1911_v21 = vld [vmem:[#allocation4 + $0x10] sm:$0xc] }
 0x296   :  { %2492 = vmatmul.mubr.bf16.vlgmr.msra.gmra.mxu0 %v2266_v41  ;;  %2533 = vmatmul.mubr.bf16.vlgmr.msra.gmra.mxu1 %v2266_v41 }
 0x297   :  { %2736 = vmatprep.mubr.bf16.mxu0 %v16327_v0  ;;  %2777 = vmatprep.mubr.bf16.mxu1 %v16327_v0 }
 0x298   :  { %2705 = vmatpush1.bf16.msra.mxu0 %v14289_v45  ;;  %2746 = vmatpush1.bf16.msra.mxu1 %v14292_v46 }
 0x299   :  { %2706 = vmatprep.subr.bf16.mxu0 %v14297_v47  ;;  %2747 = vmatprep.subr.bf16.mxu1 %v14300_v48 }
 0x29c   :  { %2707 = vmatpush1.bf16.msra.mxu0 %v14295_v49  ;;  %2748 = vmatpush1.bf16.msra.mxu1 %v14298_v50 }
 0x29d   :  { %2708 = vmatprep.subr.bf16.mxu0 %v14303_v51  ;;  %2749 = vmatprep.subr.bf16.mxu1 %v14306_v52  ;;  %v1908_v52 = vld [vmem:[#allocation4 + $0x30] sm:$0xc] }
 0x2a0   :  { %2709 = vmatpush1.bf16.msra.mxu0 %v14301_v53  ;;  %2750 = vmatpush1.bf16.msra.mxu1 %v14304_v54 }
 0x2a1   :  { %2710 = vmatprep.subr.bf16.mxu0 %v14309_v56  ;;  %2751 = vmatprep.subr.bf16.mxu1 %v14312_v59  ;;  %v1909_v59 = vld [vmem:[#allocation4] sm:$0xc] }
 0x2a4   :  { %2711 = vmatpush1.bf16.msra.mxu0 %v14307_v24  ;;  %2752 = vmatpush1.bf16.msra.mxu1 %v14310_v25  ;;  %v1896_v25 = vld [vmem:[#allocation3 + $0x4] sm:$0x3] }
 0x2a5   :  { %2712 = vmatprep.subr.bf16.mxu0 %v14315_v60  ;;  %2753 = vmatprep.subr.bf16.mxu1 %v14318_v61 }
 0x2a8   :  { %2713 = vmatpush1.bf16.msra.mxu0 %v14313_v63  ;;  %2754 = vmatpush1.bf16.msra.mxu1 %v14316_v2 }
 0x2a9   :  { %2714 = vmatprep.subr.bf16.mxu0 %v14321_v28  ;;  %2755 = vmatprep.subr.bf16.mxu1 %v14324_v3 }
 0x2ac   :  { %2715 = vmatpush1.bf16.msra.mxu0 %v14319_v4  ;;  %2756 = vmatpush1.bf16.msra.mxu1 %v14322_v5 }
 0x2ad   :  { %2716 = vmatprep.subr.bf16.mxu0 %v14327_v7  ;;  %2757 = vmatprep.subr.bf16.mxu1 %v14330_v8 }
 0x2b0   :  { %2717 = vmatpush1.bf16.msra.mxu0 %v14325_v9  ;;  %2758 = vmatpush1.bf16.msra.mxu1 %v14328_v10 }
 0x2b1   :  { %2718 = vmatprep.subr.bf16.mxu0 %v14333_v11  ;;  %2759 = vmatprep.subr.bf16.mxu1 %v14336_v12 }
 0x2b4   :  { %2719 = vmatpush1.bf16.msra.mxu0 %v14331_v13  ;;  %2760 = vmatpush1.bf16.msra.mxu1 %v14334_v18  ;;  %v1910_v13 = vld [vmem:[#allocation4 + $0x18] sm:$0xc] }
 0x2b5   :  { %3042 = vmatprep.subr.bf16.mxu0 %v14339_v19  ;;  %3083 = vmatprep.subr.bf16.mxu1 %v14342_v20 }
 0x316   :  { %v1824_v23 = vpop.f32.mrf.mxu0  ;;  %v1865_v26 = vpop.f32.mrf.mxu1 }
 0x317   :  { %v1825_v30 = vadd.f32 %v1824_v23, %v16441_v58  ;;  %v1866_v58 = vadd.f32 %v1865_v26, %v16447_v6 }
 0x318   :  { %v1826_v31 = vpop.f32.mrf.mxu0  ;;  %v1867_v32 = vpop.f32.mrf.mxu1 }
 0x319   :  { %v1872_v33 = vadd.f32 %v1825_v30, %v16457_v22  ;;  %v1827_v34 = vadd.f32 %v1826_v31, %v16443_v62  ;;  %v1874_v43 = vadd.f32 %v1866_v58, %v16467_v16  ;;  %v1868_v62 = vadd.f32 %v1867_v32, %v16449_v29 }
 0x31a   :  { %v1828_v35 = vpop.f32.mrf.mxu0  ;;  %v1869_v36 = vpop.f32.mrf.mxu1 }
 0x31b   :  { %v12657_v37 = vmul.f32 -1.442695, %v1872_v33  ;;  %v1873_v38 = vadd.f32 %v1827_v34, %v16460_v27  ;;  %v12659_v45 = vmul.f32 -1.442695, %v1874_v43  ;;  %v1875_v47 = vadd.f32 %v1868_v62, %v16472_v44 }
 0x31c   :  { %v1829_v14 = vpop.f32.mrf.mxu0  ;;  %v1870_v40 = vpop.f32.mrf.mxu1 }
 0x31d   :  { %15905 = vpow2.f32 %v12657_v37  ;;  %v12658_v41 = vmul.f32 -1.442695, %v1873_v38  ;;  %v2223_v38 = vld [vmem:[#allocation3] sm:$0x3] }
 0x31f   :  { %15907 = vpow2.f32 %v12658_v41 }
 0x320   :  { %15909 = vpow2.f32 %v12659_v45 }
 0x32a   :  { %v15906_v46 = vpop.eup %15905 }
 0x32b   :  { %v1885_v48 = vadd.f32 1.0, %v15906_v46  ;;  %v2225_v46 = vrot.slane %v2223_v38, 6 }
 0x32c   :  { %v15908_v49 = vpop.eup %15907 }
 0x32d   :  { %15911 = vrcp.f32 %v1885_v48  ;;  %v1886_v50 = vadd.f32 1.0, %v15908_v49  ;;  %v15910_v54 = vpop.eup %15909 }
 0x32e   :  { %15913 = vtanh.f32 %v1875_v47  ;;  %v1887_v4 = vadd.f32 1.0, %v15910_v54 }
 0x32f   :  { %15915 = vrcp.f32 %v1886_v50 }
 0x336   :  { %v2140_v15 = vpop.f32.mrf.mxu0  ;;  %v2181_v6 = vpop.f32.mrf.mxu1 }
 0x337   :  { %v2192_v51 = vrot.slane %v2140_v15, 6  ;;  %v2194_v12 = vrot.slane %v2181_v6, 6 }
 0x338   :  { %v2142_v53 = vpop.f32.mrf.mxu0  ;;  %v2183_v17 = vpop.f32.mrf.mxu1 }
 0x339   :  { %v2200_v24 = vadd.f32 %v2192_v51, %v1908_v52  ;;  %v2193_v29 = vrot.slane %v2142_v53, 6  ;;  %v2202_v18 = vadd.f32 %v2194_v12, %v1910_v13  ;;  %v2195_v19 = vrot.slane %v2183_v17, 6  ;;  %v14364_v12 = vld [vmem:[#allocation8 + $0x268] ss:$16 sps:$4 sm:$0xff]   ;;  %v14369_v13 = vld [vmem:[#allocation8 + $0x244] ss:$16 sps:$4 sm:$0xff]  }
 0x33a   :  { %v15912_v56 = vpop.eup %15911  ;;  %v2144_v60 = vpop.f32.mrf.mxu0 }
 0x33b   :  { %v2185_v61 = vpop.f32.mrf.mxu1  ;;  %v15914_v63 = vpop.eup %15913  ;;  %v12692_v2 = vmul.f32 -1.442695, %v2200_v24  ;;  %v2201_v28 = vadd.f32 %v2193_v29, %v1909_v59  ;;  %v12694_v20 = vmul.f32 -1.442695, %v2202_v18  ;;  %v2203_v26 = vadd.f32 %v2195_v19, %v1911_v21  ;;  %v14337_v24 = vld [vmem:[#allocation8 + $0x2e0] ss:$16 sps:$4 sm:$0xff]  }
 0x33c   :  { %v15916_v3 = vpop.eup %15915  ;;  %v2145_v5 = vpop.f32.mrf.mxu0  ;;  %v1898_v9 = vmul.f32 %v15914_v63, %v15912_v56  ;;  %v14340_v29 = vld [vmem:[#allocation8 + $0x2e8] ss:$16 sps:$4 sm:$0xff]   ;;  %v14348_v59 = vld [vmem:[#allocation8 + $0x2cc] ss:$16 sps:$4 sm:$0xff]   ;;  %v14343_v60 = vld [vmem:[#allocation8 + $0x2c0] ss:$16 sps:$4 sm:$0xff]  }
 0x33d   :  { %v2186_v7 = vpop.f32.mrf.mxu1  ;;  %v1897_v8 = vmul.f32 %v15916_v3, %v1896_v25  ;;  %15917 = vpow2.f32 %v12692_v2  ;;  %v12693_v10 = vmul.f32 -1.442695, %v2201_v28  ;;  %v14345_v25 = vld [vmem:[#allocation8 + $0x2c4] ss:$16 sps:$4 sm:$0xff]   ;;  %v14346_v61 = vld [vmem:[#allocation8 + $0x2c8] ss:$16 sps:$4 sm:$0xff]  }
 0x33e   :  { %v14351_v63 = vld [vmem:[#allocation8 + $0x2a4] ss:$16 sps:$4 sm:$0xff]   ;;  %v14354_v2 = vld [vmem:[#allocation8 + $0x2ac] ss:$16 sps:$4 sm:$0xff]   ;;  %v14349_v28 = vld [vmem:[#allocation8 + $0x2a0] ss:$16 sps:$4 sm:$0xff]  }
 0x33f   :  { %v1899_v11 = vadd.f32 %v1898_v9, %v1897_v8  ;;  %15919 = vpow2.f32 %v12693_v10  ;;  %v14352_v3 = vld [vmem:[#allocation8 + $0x2a8] ss:$16 sps:$4 sm:$0xff]   ;;  %v14360_v5 = vld [vmem:[#allocation8 + $0x28c] ss:$16 sps:$4 sm:$0xff]   ;;  %v14355_v7 = vld [vmem:[#allocation8 + $0x280] ss:$16 sps:$4 sm:$0xff]  }
 0x340   :  { %15921 = vrcp.f32 %v1887_v4  ;;  %v14357_v4 = vld [vmem:[#allocation8 + $0x284] ss:$16 sps:$4 sm:$0xff]   ;;  %v14358_v8 = vld [vmem:[#allocation8 + $0x288] ss:$16 sps:$4 sm:$0xff]   ;;  %v14366_v10 = vld [vmem:[#allocation8 + $0x26c] ss:$16 sps:$4 sm:$0xff]  }
 0x341   :  { %15923 = vtanh.f32 %v1899_v11  ;;  %1907 = vst [vmem:[#allocation3 + $0x4] sm:$0x3] %v1899_v11  ;;  %v14363_v9 = vld [vmem:[#allocation8 + $0x264] ss:$16 sps:$4 sm:$0xff]   ;;  %v14361_v11 = vld [vmem:[#allocation8 + $0x260] ss:$16 sps:$4 sm:$0xff]  }
 0x342   :  { %15925 = vpow2.f32 %v12694_v20  ;;  %v14372_v18 = vld [vmem:[#allocation8 + $0x24c] ss:$16 sps:$4 sm:$0xff]   ;;  %v14367_v19 = vld [vmem:[#allocation8 + $0x240] ss:$16 sps:$4 sm:$0xff]   ;;  %v14370_v20 = vld [vmem:[#allocation8 + $0x248] ss:$16 sps:$4 sm:$0xff]  }
 0x343   :  { %v14375_v21 = vld [vmem:[#allocation8 + $0x224] ss:$16 sps:$4 sm:$0xff]  }
 0x34a   :  { %v15918_v23 = vpop.eup %15917 }
 0x34b   :  { %v2213_v30 = vadd.f32 1.0, %v15918_v23  ;;  %v14378_v23 = vld [vmem:[#allocation8 + $0x22c] ss:$16 sps:$4 sm:$0xff]  }
 0x34c   :  { %v15920_v31 = vpop.eup %15919 }
 0x34d   :  { %v15922_v32 = vpop.eup %15921  ;;  %15927 = vrcp.f32 %v2213_v30  ;;  %v2214_v33 = vadd.f32 1.0, %v15920_v31  ;;  %v14376_v30 = vld [vmem:[#allocation8 + $0x228] ss:$16 sps:$4 sm:$0xff]   ;;  %v14381_v31 = vld [vmem:[#allocation8 + $0x204] ss:$16 sps:$4 sm:$0xff]  }
 0x34e   :  { %v15924_v34 = vpop.eup %15923  ;;  %15929 = vtanh.f32 %v2203_v26  ;;  %v14373_v26 = vld [vmem:[#allocation8 + $0x220] ss:$16 sps:$4 sm:$0xff]  }
 0x34f   :  { %v1901_v35 = vmul.f32 %v15924_v34, %v15922_v32  ;;  %15931 = vrcp.f32 %v2214_v33  ;;  %v15926_v41 = vpop.eup %15925  ;;  %v14384_v32 = vld [vmem:[#allocation8 + $0x20c] ss:$16 sps:$4 sm:$0xff]   ;;  %v14379_v33 = vld [vmem:[#allocation8 + $0x200] ss:$16 sps:$4 sm:$0xff]   ;;  %v14382_v34 = vld [vmem:[#allocation8 + $0x208] ss:$16 sps:$4 sm:$0xff]  }
 0x350   :  { %v2215_v48 = vadd.f32 1.0, %v15926_v41  ;;  %v14387_v41 = vld [vmem:[#allocation5 + $0x2e4] ss:$16 sps:$4 sm:$0xff]  }
 0x351   :  { %1906 = vst [vmem:[#allocation2 + $0x4] sm:$0x3] %v1901_v35 }
 0x352   :  { %15933 = vrcp.f32 %v2215_v48  ;;  %v14394_v48 = vld [vmem:[#allocation5 + $0x2c8] ss:$16 sps:$4 sm:$0xff]  }
 0x356   :  { %v16476_v36 = vpop.f32.mrf.mxu0  ;;  %v16478_v37 = vpop.f32.mrf.mxu1 }
 0x358   :  { %v16480_v14 = vpop.f32.mrf.mxu0  ;;  %v16482_v40 = vpop.f32.mrf.mxu1  ;;  %v2848_v35 = vld [vmem:[#allocation2 + $0x4] sm:$0x3] }
 0x359   :  { %v2849_v38 = vpack.c.bf16 %v2848_v35, %v2848_v35 }
 0x35a   :  { %v15928_v58 = vpop.eup %15927  ;;  %v2497_v43 = vpop.f32.mrf.mxu0 }
 0x35b   :  { %v2538_v62 = vpop.f32.mrf.mxu1  ;;  %v15930_v45 = vpop.eup %15929  ;;  %v14385_v43 = vld [vmem:[#allocation5 + $0x2e0] ss:$16 sps:$4 sm:$0xff]  }
 0x35c   :  { %v15932_v47 = vpop.eup %15931  ;;  %v2498_v49 = vpop.f32.mrf.mxu0  ;;  %v2228_v6 = vmul.f32 %v15930_v45, %v15928_v58  ;;  %v14390_v58 = vld [vmem:[#allocation5 + $0x2ec] ss:$16 sps:$4 sm:$0xff]   ;;  %v14388_v62 = vld [vmem:[#allocation5 + $0x2e8] ss:$16 sps:$4 sm:$0xff]   ;;  %v14393_v45 = vld [vmem:[#allocation5 + $0x2c4] ss:$16 sps:$4 sm:$0xff]  }
 0x35d   :  { %v2539_v50 = vpop.f32.mrf.mxu1  ;;  %v2227_v15 = vmul.f32 %v15932_v47, %v2225_v46  ;;  %v14396_v46 = vld [vmem:[#allocation5 + $0x2cc] ss:$16 sps:$4 sm:$0xff]   ;;  %v14391_v47 = vld [vmem:[#allocation5 + $0x2c0] ss:$16 sps:$4 sm:$0xff]   ;;  %v14399_v49 = vld [vmem:[#allocation5 + $0x2a4] ss:$16 sps:$4 sm:$0xff]  }
 0x35e   :  { %v14402_v50 = vld [vmem:[#allocation5 + $0x2ac] ss:$16 sps:$4 sm:$0xff]  }
 0x35f   :  { %v2229_v51 = vadd.f32 %v2228_v6, %v2227_v15  ;;  %v15934_v52 = vpop.eup %15933  ;;  %v14397_v15 = vld [vmem:[#allocation5 + $0x2a0] ss:$16 sps:$4 sm:$0xff]   ;;  %v14400_v6 = vld [vmem:[#allocation5 + $0x2a8] ss:$16 sps:$4 sm:$0xff]  }
 0x361   :  { %15935 = vtanh.f32 %v2229_v51  ;;  %3396 = vst [vmem:[#allocation3 - $0x2] sm:$0xc] %v2229_v51  ;;  %v14405_v51 = vld [vmem:[#allocation5 + $0x284] ss:$16 sps:$4 sm:$0xff]  }
 0x36e   :  { %v15936_v53 = vpop.eup %15935 }
 0x36f   :  { %v2231_v17 = vmul.f32 %v15936_v53, %v15934_v52  ;;  %v14408_v52 = vld [vmem:[#allocation5 + $0x28c] ss:$16 sps:$4 sm:$0xff]   ;;  %v14403_v53 = vld [vmem:[#allocation5 + $0x280] ss:$16 sps:$4 sm:$0xff]  }
 0x371   :  { %v2232_v54 = vpack.c.bf16 %v2231_v17, %v2231_v17  ;;  %3395 = vst [vmem:[#allocation2 - $0x2] sm:$0xc] %v2231_v17  ;;  %v14406_v17 = vld [vmem:[#allocation5 + $0x288] ss:$16 sps:$4 sm:$0xff]  }
 0x373   :  { %v2542_v56 = vrot.slane %v2232_v54, 1  ;;  %v14411_v54 = vld [vmem:[#allocation5 + $0x264] ss:$16 sps:$4 sm:$0xff]  }
 0x375   :  { %2737 = vmatmul.mubr.bf16.vlgmr.msra.gmra.mxu0 %v2542_v56  ;;  %2778 = vmatmul.mubr.bf16.vlgmr.msra.gmra.mxu1 %v2542_v56  ;;  %v14414_v56 = vld [vmem:[#allocation5 + $0x26c] ss:$16 sps:$4 sm:$0xff]  }
 0x376   :  { %3043 = vmatpush1.bf16.msra.mxu0 %v14337_v24  ;;  %3084 = vmatpush1.bf16.msra.mxu1 %v14340_v29  ;;  %v14409_v24 = vld [vmem:[#allocation5 + $0x260] ss:$16 sps:$4 sm:$0xff]   ;;  %v14412_v29 = vld [vmem:[#allocation5 + $0x268] ss:$16 sps:$4 sm:$0xff]  }
 0x377   :  { %3044 = vmatprep.subr.bf16.mxu0 %v14345_v25  ;;  %3085 = vmatprep.subr.bf16.mxu1 %v14348_v59  ;;  %v14417_v25 = vld [vmem:[#allocation5 + $0x244] ss:$16 sps:$4 sm:$0xff]   ;;  %v14420_v59 = vld [vmem:[#allocation5 + $0x24c] ss:$16 sps:$4 sm:$0xff]  }
 0x378   :  { %3074 = vmatprep.mubr.bf16.mxu0 %v16327_v0  ;;  %3115 = vmatprep.mubr.bf16.mxu1 %v16327_v0 }
 0x37a   :  { %3045 = vmatpush1.bf16.msra.mxu0 %v14343_v60  ;;  %3086 = vmatpush1.bf16.msra.mxu1 %v14346_v61  ;;  %v14415_v60 = vld [vmem:[#allocation5 + $0x240] ss:$16 sps:$4 sm:$0xff]   ;;  %v14418_v61 = vld [vmem:[#allocation5 + $0x248] ss:$16 sps:$4 sm:$0xff]  }
 0x37b   :  { %3046 = vmatprep.subr.bf16.mxu0 %v14351_v63  ;;  %3087 = vmatprep.subr.bf16.mxu1 %v14354_v2  ;;  %v14423_v63 = vld [vmem:[#allocation5 + $0x224] ss:$16 sps:$4 sm:$0xff]   ;;  %v14426_v2 = vld [vmem:[#allocation5 + $0x22c] ss:$16 sps:$4 sm:$0xff]  }
 0x37e   :  { %3047 = vmatpush1.bf16.msra.mxu0 %v14349_v28  ;;  %3088 = vmatpush1.bf16.msra.mxu1 %v14352_v3  ;;  %v14421_v28 = vld [vmem:[#allocation5 + $0x220] ss:$16 sps:$4 sm:$0xff]   ;;  %v14424_v3 = vld [vmem:[#allocation5 + $0x228] ss:$16 sps:$4 sm:$0xff]  }
 0x37f   :  { %3048 = vmatprep.subr.bf16.mxu0 %v14357_v4  ;;  %3089 = vmatprep.subr.bf16.mxu1 %v14360_v5  ;;  %v14429_v4 = vld [vmem:[#allocation5 + $0x204] ss:$16 sps:$4 sm:$0xff]   ;;  %v14432_v5 = vld [vmem:[#allocation5 + $0x20c] ss:$16 sps:$4 sm:$0xff]  }
 0x382   :  { %3049 = vmatpush1.bf16.msra.mxu0 %v14355_v7  ;;  %3090 = vmatpush1.bf16.msra.mxu1 %v14358_v8  ;;  %v14427_v7 = vld [vmem:[#allocation5 + $0x200] ss:$16 sps:$4 sm:$0xff]   ;;  %v14430_v8 = vld [vmem:[#allocation5 + $0x208] ss:$16 sps:$4 sm:$0xff]  }
 0x383   :  { %3050 = vmatprep.subr.bf16.mxu0 %v14363_v9  ;;  %3091 = vmatprep.subr.bf16.mxu1 %v14366_v10  ;;  %v14435_v9 = vld [vmem:[#allocation8 + $0xe4] ss:$16 sps:$4 sm:$0xff]   ;;  %v14438_v10 = vld [vmem:[#allocation8 + $0xec] ss:$16 sps:$4 sm:$0xff]  }
 0x386   :  { %3051 = vmatpush1.bf16.msra.mxu0 %v14361_v11  ;;  %3092 = vmatpush1.bf16.msra.mxu1 %v14364_v12 }
 0x387   :  { %3052 = vmatprep.subr.bf16.mxu0 %v14369_v13  ;;  %3093 = vmatprep.subr.bf16.mxu1 %v14372_v18 }
 0x38a   :  { %3053 = vmatpush1.bf16.msra.mxu0 %v14367_v19  ;;  %3094 = vmatpush1.bf16.msra.mxu1 %v14370_v20 }
 0x38b   :  { %3054 = vmatprep.subr.bf16.mxu0 %v14375_v21  ;;  %3095 = vmatprep.subr.bf16.mxu1 %v14378_v23 }
 0x38e   :  { %3055 = vmatpush1.bf16.msra.mxu0 %v14373_v26  ;;  %3096 = vmatpush1.bf16.msra.mxu1 %v14376_v30 }
 0x38f   :  { %3056 = vmatprep.subr.bf16.mxu0 %v14381_v31  ;;  %3097 = vmatprep.subr.bf16.mxu1 %v14384_v32 }
 0x392   :  { %3057 = vmatpush1.bf16.msra.mxu0 %v14379_v33  ;;  %3098 = vmatpush1.bf16.msra.mxu1 %v14382_v34 }
 0x393   :  { %3284 = vmatprep.subr.bf16.mxu0 %v14387_v41  ;;  %3325 = vmatprep.subr.bf16.mxu1 %v14390_v58 }
 0x395   :  { %3075 = vmatmul.mubr.bf16.vlgmr.msra.gmra.mxu0 %v2849_v38  ;;  %3116 = vmatmul.mubr.bf16.vlgmr.msra.gmra.mxu1 %v2849_v38 }
 0x396   :  { %3316 = vmatprep.mubr.bf16.mxu0 %v16327_v0  ;;  %3357 = vmatprep.mubr.bf16.mxu1 %v16327_v0 }
 0x397   :  { %3285 = vmatpush1.bf16.msra.mxu0 %v14385_v43  ;;  %3326 = vmatpush1.bf16.msra.mxu1 %v14388_v62 }
 0x398   :  { %3286 = vmatprep.subr.bf16.mxu0 %v14393_v45  ;;  %3327 = vmatprep.subr.bf16.mxu1 %v14396_v46 }
 0x39b   :  { %3287 = vmatpush1.bf16.msra.mxu0 %v14391_v47  ;;  %3328 = vmatpush1.bf16.msra.mxu1 %v14394_v48 }
 0x39c   :  { %3288 = vmatprep.subr.bf16.mxu0 %v14399_v49  ;;  %3329 = vmatprep.subr.bf16.mxu1 %v14402_v50 }
 0x39f   :  { %3289 = vmatpush1.bf16.msra.mxu0 %v14397_v15  ;;  %3330 = vmatpush1.bf16.msra.mxu1 %v14400_v6 }
 0x3a0   :  { %3290 = vmatprep.subr.bf16.mxu0 %v14405_v51  ;;  %3331 = vmatprep.subr.bf16.mxu1 %v14408_v52 }
 0x3a3   :  { %3291 = vmatpush1.bf16.msra.mxu0 %v14403_v53  ;;  %3332 = vmatpush1.bf16.msra.mxu1 %v14406_v17  ;;  %v2809_v53 = vld [vmem:[#allocation3 + $0x2] sm:$0x3] }
 0x3a4   :  { %3292 = vmatprep.subr.bf16.mxu0 %v14411_v54  ;;  %3333 = vmatprep.subr.bf16.mxu1 %v14414_v56 }
 0x3a7   :  { %3293 = vmatpush1.bf16.msra.mxu0 %v14409_v24  ;;  %3334 = vmatpush1.bf16.msra.mxu1 %v14412_v29 }
 0x3a8   :  { %3294 = vmatprep.subr.bf16.mxu0 %v14417_v25  ;;  %3335 = vmatprep.subr.bf16.mxu1 %v14420_v59 }
 0x3ab   :  { %3295 = vmatpush1.bf16.msra.mxu0 %v14415_v60  ;;  %3336 = vmatpush1.bf16.msra.mxu1 %v14418_v61  ;;  %v14433_v61 = vld [vmem:[#allocation8 + $0xe0] ss:$16 sps:$4 sm:$0xff]  }
 0x3ac   :  { %3296 = vmatprep.subr.bf16.mxu0 %v14423_v63  ;;  %3337 = vmatprep.subr.bf16.mxu1 %v14426_v2  ;;  %v14436_v63 = vld [vmem:[#allocation8 + $0xe8] ss:$16 sps:$4 sm:$0xff]  }
 0x3af   :  { %3297 = vmatpush1.bf16.msra.mxu0 %v14421_v28  ;;  %3338 = vmatpush1.bf16.msra.mxu1 %v14424_v3  ;;  %v14441_v28 = vld [vmem:[#allocation8 + $0xc4] ss:$16 sps:$4 sm:$0xff]   ;;  %v14444_v3 = vld [vmem:[#allocation8 + $0xcc] ss:$16 sps:$4 sm:$0xff]  }
 0x3b0   :  { %3298 = vmatprep.subr.bf16.mxu0 %v14429_v4  ;;  %3339 = vmatprep.subr.bf16.mxu1 %v14432_v5  ;;  %v14439_v4 = vld [vmem:[#allocation8 + $0xc0] ss:$16 sps:$4 sm:$0xff]   ;;  %v14442_v5 = vld [vmem:[#allocation8 + $0xc8] ss:$16 sps:$4 sm:$0xff]  }
 0x3b3   :  { %3299 = vmatpush1.bf16.msra.mxu0 %v14427_v7  ;;  %3340 = vmatpush1.bf16.msra.mxu1 %v14430_v8  ;;  %v14447_v7 = vld [vmem:[#allocation8 + $0xa4] ss:$16 sps:$4 sm:$0xff]   ;;  %v14450_v8 = vld [vmem:[#allocation8 + $0xac] ss:$16 sps:$4 sm:$0xff]  }
 0x3b4   :  { %3599 = vmatprep.subr.bf16.mxu0 %v14435_v9  ;;  %3640 = vmatprep.subr.bf16.mxu1 %v14438_v10  ;;  %v14445_v9 = vld [vmem:[#allocation8 + $0xa0] ss:$16 sps:$4 sm:$0xff]   ;;  %v14448_v10 = vld [vmem:[#allocation8 + $0xa8] ss:$16 sps:$4 sm:$0xff]  }
 0x435   :  { %v2738_v11 = vpop.f32.mrf.mxu0  ;;  %v2779_v12 = vpop.f32.mrf.mxu1 }
 0x436   :  { %v2739_v13 = vadd.f32 %v2738_v11, %v16476_v36  ;;  %v2780_v35 = vadd.f32 %v2779_v12, %v16478_v37  ;;  %v14453_v11 = vld [vmem:[#allocation8 + $0x84] ss:$16 sps:$4 sm:$0xff]   ;;  %v14456_v12 = vld [vmem:[#allocation8 + $0x8c] ss:$16 sps:$4 sm:$0xff]  }
 0x437   :  { %v2740_v18 = vpop.f32.mrf.mxu0  ;;  %v2781_v19 = vpop.f32.mrf.mxu1 }
 0x438   :  { %v2786_v20 = vadd.f32 %v2739_v13, %v16420_v39  ;;  %v2741_v21 = vadd.f32 %v2740_v18, %v16480_v14  ;;  %v2788_v36 = vadd.f32 %v2780_v35, %v16430_v55  ;;  %v2782_v38 = vadd.f32 %v2781_v19, %v16482_v40  ;;  %v14451_v13 = vld [vmem:[#allocation8 + $0x80] ss:$16 sps:$4 sm:$0xff]   ;;  %v14454_v18 = vld [vmem:[#allocation8 + $0x88] ss:$16 sps:$4 sm:$0xff]   ;;  %v14459_v19 = vld [vmem:[#allocation8 + $0x64] ss:$16 sps:$4 sm:$0xff]  }
 0x439   :  { %v2742_v23 = vpop.f32.mrf.mxu0  ;;  %v2783_v26 = vpop.f32.mrf.mxu1  ;;  %v14469_v35 = vld [vmem:[#allocation8 + $0x20] ss:$16 sps:$4 sm:$0xff]  }
 0x43a   :  { %v12759_v30 = vmul.f32 -1.442695, %v2786_v20  ;;  %v2787_v31 = vadd.f32 %v2741_v21, %v16423_v42  ;;  %v12761_v41 = vmul.f32 -1.442695, %v2788_v36  ;;  %v2789_v14 = vadd.f32 %v2782_v38, %v16435_v57  ;;  %v14462_v20 = vld [vmem:[#allocation8 + $0x6c] ss:$16 sps:$4 sm:$0xff]  }
 0x43b   :  { %v2743_v32 = vpop.f32.mrf.mxu0  ;;  %v2784_v33 = vpop.f32.mrf.mxu1  ;;  %v14457_v21 = vld [vmem:[#allocation8 + $0x60] ss:$16 sps:$4 sm:$0xff]   ;;  %v14460_v23 = vld [vmem:[#allocation8 + $0x68] ss:$16 sps:$4 sm:$0xff]   ;;  %v14465_v26 = vld [vmem:[#allocation8 + $0x44] ss:$16 sps:$4 sm:$0xff]  }
 0x43c   :  { %15937 = vpow2.f32 %v12759_v30  ;;  %v12760_v34 = vmul.f32 -1.442695, %v2787_v31  ;;  %v14468_v30 = vld [vmem:[#allocation8 + $0x4c] ss:$16 sps:$4 sm:$0xff]   ;;  %v14463_v31 = vld [vmem:[#allocation8 + $0x40] ss:$16 sps:$4 sm:$0xff]  }
 0x43d   :  { %v14466_v32 = vld [vmem:[#allocation8 + $0x48] ss:$16 sps:$4 sm:$0xff]   ;;  %v14471_v33 = vld [vmem:[#allocation8 + $0x24] ss:$16 sps:$4 sm:$0xff]  }
 0x43e   :  { %15939 = vpow2.f32 %v12760_v34  ;;  %v14474_v34 = vld [vmem:[#allocation8 + $0x2c] ss:$16 sps:$4 sm:$0xff]   ;;  %v14472_v36 = vld [vmem:[#allocation8 + $0x28] ss:$16 sps:$4 sm:$0xff]   ;;  %v14477_v38 = vld [vmem:[#allocation8 + $0x4] ss:$16 sps:$4 sm:$0xff]  }
 0x43f   :  { %15941 = vpow2.f32 %v12761_v41  ;;  %v14480_v41 = vld [vmem:[#allocation8 + $0xc] ss:$16 sps:$4 sm:$0xff]  }
 0x449   :  { %v15938_v58 = vpop.eup %15937 }
 0x44a   :  { %v2799_v43 = vadd.f32 1.0, %v15938_v58  ;;  %v14475_v58 = vld [vmem:[#allocation8] ss:$16 sps:$4 sm:$0xff]  }
 0x44b   :  { %v15940_v62 = vpop.eup %15939 }
 0x44c   :  { %15943 = vrcp.f32 %v2799_v43  ;;  %v2800_v45 = vadd.f32 1.0, %v15940_v62  ;;  %v15942_v40 = vpop.eup %15941  ;;  %v14483_v43 = vld [vmem:[#allocation8 + $0x1e4] ss:$16 sps:$4 sm:$0xff]   ;;  %v14486_v62 = vld [vmem:[#allocation8 + $0x1ec] ss:$16 sps:$4 sm:$0xff]  }
 0x44d   :  { %15945 = vtanh.f32 %v2789_v14  ;;  %v2801_v52 = vadd.f32 1.0, %v15942_v40  ;;  %v14478_v14 = vld [vmem:[#allocation8 + $0x8] ss:$16 sps:$4 sm:$0xff]   ;;  %v14481_v40 = vld [vmem:[#allocation8 + $0x1e0] ss:$16 sps:$4 sm:$0xff]  }
 0x44e   :  { %15947 = vrcp.f32 %v2800_v45  ;;  %v3405_v45 = vld [vmem:[#allocation2] sm:$0x3] }
 0x44f   :  { %15949 = vrcp.f32 %v2801_v52  ;;  %v14490_v52 = vld [vmem:[#allocation8 + $0x1c8] ss:$16 sps:$4 sm:$0xff]  }
 0x455   :  { %v16496_v46 = vpop.f32.mrf.mxu0  ;;  %v16498_v47 = vpop.f32.mrf.mxu1 }
 0x457   :  { %v16500_v37 = vpop.f32.mrf.mxu0  ;;  %v16502_v48 = vpop.f32.mrf.mxu1 }
 0x459   :  { %v15944_v49 = vpop.eup %15943  ;;  %v3080_v50 = vpop.f32.mrf.mxu0 }
 0x45a   :  { %v3121_v15 = vpop.f32.mrf.mxu1  ;;  %v15946_v6 = vpop.eup %15945  ;;  %v3406_v50 = vpack.c.bf16 %v3405_v45, %v3405_v45  ;;  %v14555_v45 = vld [vmem:[#allocation5 + $0x164] ss:$16 sps:$4 sm:$0xff]  }
 0x45b   :  { %v15948_v51 = vpop.eup %15947  ;;  %v3081_v17 = vpop.f32.mrf.mxu0  ;;  %v2811_v29 = vmul.f32 %v15946_v6, %v15944_v49  ;;  %v14484_v49 = vld [vmem:[#allocation8 + $0x1e8] ss:$16 sps:$4 sm:$0xff]   ;;  %v14489_v15 = vld [vmem:[#allocation8 + $0x1c4] ss:$16 sps:$4 sm:$0xff]   ;;  %v14492_v6 = vld [vmem:[#allocation8 + $0x1cc] ss:$16 sps:$4 sm:$0xff]  }
 0x45c   :  { %v3122_v54 = vpop.f32.mrf.mxu1  ;;  %v2810_v24 = vmul.f32 %v15948_v51, %v2809_v53  ;;  %v15950_v25 = vpop.eup %15949  ;;  %v14487_v51 = vld [vmem:[#allocation8 + $0x1c0] ss:$16 sps:$4 sm:$0xff]   ;;  %v14495_v53 = vld [vmem:[#allocation8 + $0x1a4] ss:$16 sps:$4 sm:$0xff]   ;;  %v14498_v17 = vld [vmem:[#allocation8 + $0x1ac] ss:$16 sps:$4 sm:$0xff]  }
 0x45d   :  { %v14493_v54 = vld [vmem:[#allocation8 + $0x1a0] ss:$16 sps:$4 sm:$0xff]  }
 0x45e   :  { %v2812_v56 = vadd.f32 %v2811_v29, %v2810_v24  ;;  %v14496_v24 = vld [vmem:[#allocation8 + $0x1a8] ss:$16 sps:$4 sm:$0xff]   ;;  %v14501_v29 = vld [vmem:[#allocation8 + $0x184] ss:$16 sps:$4 sm:$0xff]  }
 0x460   :  { %15951 = vtanh.f32 %v2812_v56  ;;  %3398 = vst [vmem:[#allocation3 + $0x2] sm:$0x3] %v2812_v56  ;;  %v14504_v56 = vld [vmem:[#allocation8 + $0x18c] ss:$16 sps:$4 sm:$0xff]  }
 0x46d   :  { %v15952_v59 = vpop.eup %15951 }
 0x46e   :  { %v2814_v60 = vmul.f32 %v15952_v59, %v15950_v25  ;;  %v14499_v25 = vld [vmem:[#allocation8 + $0x180] ss:$16 sps:$4 sm:$0xff]   ;;  %v14502_v59 = vld [vmem:[#allocation8 + $0x188] ss:$16 sps:$4 sm:$0xff]  }
 0x470   :  { %v2815_v2 = vpack.c.bf16 %v2814_v60, %v2814_v60  ;;  %3397 = vst [vmem:[#allocation2 + $0x2] sm:$0x3] %v2814_v60  ;;  %v14507_v60 = vld [vmem:[#allocation8 + $0x164] ss:$16 sps:$4 sm:$0xff]  }
 0x472   :  { %3317 = vmatmul.mubr.bf16.vlgmr.msra.gmra.mxu0 %v2815_v2  ;;  %3358 = vmatmul.mubr.bf16.vlgmr.msra.gmra.mxu1 %v2815_v2  ;;  %v14508_v2 = vld [vmem:[#allocation8 + $0x168] ss:$16 sps:$4 sm:$0xff]  }
 0x473   :  { %3600 = vmatpush1.bf16.msra.mxu0 %v14433_v61  ;;  %3641 = vmatpush1.bf16.msra.mxu1 %v14436_v63  ;;  %v14510_v61 = vld [vmem:[#allocation8 + $0x16c] ss:$16 sps:$4 sm:$0xff]   ;;  %v14505_v63 = vld [vmem:[#allocation8 + $0x160] ss:$16 sps:$4 sm:$0xff]  }
 0x474   :  { %3601 = vmatprep.subr.bf16.mxu0 %v14441_v28  ;;  %3642 = vmatprep.subr.bf16.mxu1 %v14444_v3  ;;  %v14513_v28 = vld [vmem:[#allocation8 + $0x144] ss:$16 sps:$4 sm:$0xff]   ;;  %v14516_v3 = vld [vmem:[#allocation8 + $0x14c] ss:$16 sps:$4 sm:$0xff]  }
 0x475   :  { %3631 = vmatprep.mubr.bf16.mxu0 %v16327_v0  ;;  %3672 = vmatprep.mubr.bf16.mxu1 %v16327_v0 }
 0x477   :  { %3602 = vmatpush1.bf16.msra.mxu0 %v14439_v4  ;;  %3643 = vmatpush1.bf16.msra.mxu1 %v14442_v5  ;;  %v14511_v4 = vld [vmem:[#allocation8 + $0x140] ss:$16 sps:$4 sm:$0xff]   ;;  %v14514_v5 = vld [vmem:[#allocation8 + $0x148] ss:$16 sps:$4 sm:$0xff]  }
 0x478   :  { %3603 = vmatprep.subr.bf16.mxu0 %v14447_v7  ;;  %3644 = vmatprep.subr.bf16.mxu1 %v14450_v8  ;;  %v14519_v7 = vld [vmem:[#allocation8 + $0x124] ss:$16 sps:$4 sm:$0xff]   ;;  %v14522_v8 = vld [vmem:[#allocation8 + $0x12c] ss:$16 sps:$4 sm:$0xff]  }
 0x47b   :  { %3604 = vmatpush1.bf16.msra.mxu0 %v14445_v9  ;;  %3645 = vmatpush1.bf16.msra.mxu1 %v14448_v10  ;;  %v14517_v9 = vld [vmem:[#allocation8 + $0x120] ss:$16 sps:$4 sm:$0xff]   ;;  %v14520_v10 = vld [vmem:[#allocation8 + $0x128] ss:$16 sps:$4 sm:$0xff]  }
 0x47c   :  { %3605 = vmatprep.subr.bf16.mxu0 %v14453_v11  ;;  %3646 = vmatprep.subr.bf16.mxu1 %v14456_v12  ;;  %v14525_v11 = vld [vmem:[#allocation8 + $0x104] ss:$16 sps:$4 sm:$0xff]   ;;  %v14528_v12 = vld [vmem:[#allocation8 + $0x10c] ss:$16 sps:$4 sm:$0xff]  }
 0x47f   :  { %3606 = vmatpush1.bf16.msra.mxu0 %v14451_v13  ;;  %3647 = vmatpush1.bf16.msra.mxu1 %v14454_v18  ;;  %v14523_v13 = vld [vmem:[#allocation8 + $0x100] ss:$16 sps:$4 sm:$0xff]   ;;  %v14526_v18 = vld [vmem:[#allocation8 + $0x108] ss:$16 sps:$4 sm:$0xff]  }
 0x480   :  { %3607 = vmatprep.subr.bf16.mxu0 %v14459_v19  ;;  %3648 = vmatprep.subr.bf16.mxu1 %v14462_v20  ;;  %v3758_v19 = vld [vmem:[#allocation2 + $0x2] sm:$0x3] }
 0x481   :  { %v3759_v20 = vpack.c.bf16 %v3758_v19, %v3758_v19 }
 0x483   :  { %3608 = vmatpush1.bf16.msra.mxu0 %v14457_v21  ;;  %3649 = vmatpush1.bf16.msra.mxu1 %v14460_v23  ;;  %v14531_v21 = vld [vmem:[#allocation5 + $0x1e4] ss:$16 sps:$4 sm:$0xff]   ;;  %v14534_v23 = vld [vmem:[#allocation5 + $0x1ec] ss:$16 sps:$4 sm:$0xff]  }
 0x484   :  { %3609 = vmatprep.subr.bf16.mxu0 %v14465_v26  ;;  %3650 = vmatprep.subr.bf16.mxu1 %v14468_v30  ;;  %v14529_v26 = vld [vmem:[#allocation5 + $0x1e0] ss:$16 sps:$4 sm:$0xff]   ;;  %v14532_v30 = vld [vmem:[#allocation5 + $0x1e8] ss:$16 sps:$4 sm:$0xff]  }
 0x487   :  { %3610 = vmatpush1.bf16.msra.mxu0 %v14463_v31  ;;  %3651 = vmatpush1.bf16.msra.mxu1 %v14466_v32  ;;  %v14537_v31 = vld [vmem:[#allocation5 + $0x1c4] ss:$16 sps:$4 sm:$0xff]   ;;  %v14540_v32 = vld [vmem:[#allocation5 + $0x1cc] ss:$16 sps:$4 sm:$0xff]  }
 0x488   :  { %3611 = vmatprep.subr.bf16.mxu0 %v14471_v33  ;;  %3652 = vmatprep.subr.bf16.mxu1 %v14474_v34  ;;  %v14535_v33 = vld [vmem:[#allocation5 + $0x1c0] ss:$16 sps:$4 sm:$0xff]   ;;  %v14538_v34 = vld [vmem:[#allocation5 + $0x1c8] ss:$16 sps:$4 sm:$0xff]  }
 0x48b   :  { %3612 = vmatpush1.bf16.msra.mxu0 %v14469_v35  ;;  %3653 = vmatpush1.bf16.msra.mxu1 %v14472_v36  ;;  %v14543_v35 = vld [vmem:[#allocation5 + $0x1a4] ss:$16 sps:$4 sm:$0xff]   ;;  %v14546_v36 = vld [vmem:[#allocation5 + $0x1ac] ss:$16 sps:$4 sm:$0xff]  }
 0x48c   :  { %3613 = vmatprep.subr.bf16.mxu0 %v14477_v38  ;;  %3654 = vmatprep.subr.bf16.mxu1 %v14480_v41  ;;  %v14541_v38 = vld [vmem:[#allocation5 + $0x1a0] ss:$16 sps:$4 sm:$0xff]   ;;  %v14544_v41 = vld [vmem:[#allocation5 + $0x1a8] ss:$16 sps:$4 sm:$0xff]  }
 0x48f   :  { %3614 = vmatpush1.bf16.msra.mxu0 %v14475_v58  ;;  %3655 = vmatpush1.bf16.msra.mxu1 %v14478_v14  ;;  %v14547_v58 = vld [vmem:[#allocation5 + $0x180] ss:$16 sps:$4 sm:$0xff]   ;;  %v14549_v14 = vld [vmem:[#allocation5 + $0x184] ss:$16 sps:$4 sm:$0xff]  }
 0x490   :  { %3952 = vmatprep.subr.bf16.mxu0 %v14483_v43  ;;  %3993 = vmatprep.subr.bf16.mxu1 %v14486_v62  ;;  %v14550_v43 = vld [vmem:[#allocation5 + $0x188] ss:$16 sps:$4 sm:$0xff]   ;;  %v14552_v62 = vld [vmem:[#allocation5 + $0x18c] ss:$16 sps:$4 sm:$0xff]  }
 0x492   :  { %3632 = vmatmul.mubr.bf16.vlgmr.msra.gmra.mxu0 %v3406_v50  ;;  %3673 = vmatmul.mubr.bf16.vlgmr.msra.gmra.mxu1 %v3406_v50  ;;  %v14556_v50 = vld [vmem:[#allocation5 + $0x168] ss:$16 sps:$4 sm:$0xff]  }
 0x493   :  { %3953 = vmatpush1.bf16.msra.mxu0 %v14481_v40  ;;  %3994 = vmatpush1.bf16.msra.mxu1 %v14484_v49  ;;  %v14558_v40 = vld [vmem:[#allocation5 + $0x16c] ss:$16 sps:$4 sm:$0xff]   ;;  %v14553_v49 = vld [vmem:[#allocation5 + $0x160] ss:$16 sps:$4 sm:$0xff]  }
 0x494   :  { %3954 = vmatprep.subr.bf16.mxu0 %v14489_v15  ;;  %3995 = vmatprep.subr.bf16.mxu1 %v14492_v6  ;;  %v14561_v15 = vld [vmem:[#allocation5 + $0x144] ss:$16 sps:$4 sm:$0xff]   ;;  %v14564_v6 = vld [vmem:[#allocation5 + $0x14c] ss:$16 sps:$4 sm:$0xff]  }
 0x495   :  { %3984 = vmatprep.mubr.bf16.mxu0 %v16327_v0  ;;  %4025 = vmatprep.mubr.bf16.mxu1 %v16327_v0 }
 0x497   :  { %3955 = vmatpush1.bf16.msra.mxu0 %v14487_v51  ;;  %3996 = vmatpush1.bf16.msra.mxu1 %v14490_v52  ;;  %v14559_v51 = vld [vmem:[#allocation5 + $0x140] ss:$16 sps:$4 sm:$0xff]   ;;  %v14562_v52 = vld [vmem:[#allocation5 + $0x148] ss:$16 sps:$4 sm:$0xff]  }
 0x498   :  { %3956 = vmatprep.subr.bf16.mxu0 %v14495_v53  ;;  %3997 = vmatprep.subr.bf16.mxu1 %v14498_v17  ;;  %v14567_v53 = vld [vmem:[#allocation5 + $0x124] ss:$16 sps:$4 sm:$0xff]   ;;  %v14570_v17 = vld [vmem:[#allocation5 + $0x12c] ss:$16 sps:$4 sm:$0xff]  }
 0x49b   :  { %3957 = vmatpush1.bf16.msra.mxu0 %v14493_v54  ;;  %3998 = vmatpush1.bf16.msra.mxu1 %v14496_v24  ;;  %v14565_v54 = vld [vmem:[#allocation5 + $0x120] ss:$16 sps:$4 sm:$0xff]   ;;  %v14568_v24 = vld [vmem:[#allocation5 + $0x128] ss:$16 sps:$4 sm:$0xff]  }
 0x49c   :  { %3958 = vmatprep.subr.bf16.mxu0 %v14501_v29  ;;  %3999 = vmatprep.subr.bf16.mxu1 %v14504_v56  ;;  %v14573_v29 = vld [vmem:[#allocation5 + $0x104] ss:$16 sps:$4 sm:$0xff]   ;;  %v14576_v56 = vld [vmem:[#allocation5 + $0x10c] ss:$16 sps:$4 sm:$0xff]  }
 0x49f   :  { %3959 = vmatpush1.bf16.msra.mxu0 %v14499_v25  ;;  %4000 = vmatpush1.bf16.msra.mxu1 %v14502_v59  ;;  %v14571_v25 = vld [vmem:[#allocation5 + $0x100] ss:$16 sps:$4 sm:$0xff]   ;;  %v14574_v59 = vld [vmem:[#allocation5 + $0x108] ss:$16 sps:$4 sm:$0xff]  }
 0x4a0   :  { %3960 = vmatprep.subr.bf16.mxu0 %v14507_v60  ;;  %4001 = vmatprep.subr.bf16.mxu1 %v14510_v61  ;;  %v14579_v60 = vld [vmem:[#allocation8 + $0x2e4] ss:$16 sps:$4 sm:$0xff]   ;;  %v14582_v61 = vld [vmem:[#allocation8 + $0x2ec] ss:$16 sps:$4 sm:$0xff]  }
 0x4a3   :  { %3961 = vmatpush1.bf16.msra.mxu0 %v14505_v63  ;;  %4002 = vmatpush1.bf16.msra.mxu1 %v14508_v2 }
 0x4a4   :  { %3962 = vmatprep.subr.bf16.mxu0 %v14513_v28  ;;  %4003 = vmatprep.subr.bf16.mxu1 %v14516_v3 }
 0x4a7   :  { %3963 = vmatpush1.bf16.msra.mxu0 %v14511_v4  ;;  %4004 = vmatpush1.bf16.msra.mxu1 %v14514_v5 }
 0x4a8   :  { %3964 = vmatprep.subr.bf16.mxu0 %v14519_v7  ;;  %4005 = vmatprep.subr.bf16.mxu1 %v14522_v8 }
 0x4ab   :  { %3965 = vmatpush1.bf16.msra.mxu0 %v14517_v9  ;;  %4006 = vmatpush1.bf16.msra.mxu1 %v14520_v10 }
 0x4ac   :  { %3966 = vmatprep.subr.bf16.mxu0 %v14525_v11  ;;  %4007 = vmatprep.subr.bf16.mxu1 %v14528_v12 }
 0x4af   :  { %3967 = vmatpush1.bf16.msra.mxu0 %v14523_v13  ;;  %4008 = vmatpush1.bf16.msra.mxu1 %v14526_v18 }
 0x4b0   :  { %4197 = vmatprep.subr.bf16.mxu0 %v14531_v21  ;;  %4238 = vmatprep.subr.bf16.mxu1 %v14534_v23 }
 0x4b2   :  { %3985 = vmatmul.mubr.bf16.vlgmr.msra.gmra.mxu0 %v3759_v20  ;;  %4026 = vmatmul.mubr.bf16.vlgmr.msra.gmra.mxu1 %v3759_v20 }
 0x4b3   :  { %4229 = vmatprep.mubr.bf16.mxu0 %v16327_v0  ;;  %4270 = vmatprep.mubr.bf16.mxu1 %v16327_v0 }
 0x4b4   :  { %4198 = vmatpush1.bf16.msra.mxu0 %v14529_v26  ;;  %4239 = vmatpush1.bf16.msra.mxu1 %v14532_v30 }
 0x4b5   :  { %4199 = vmatprep.subr.bf16.mxu0 %v14537_v31  ;;  %4240 = vmatprep.subr.bf16.mxu1 %v14540_v32 }
 0x4b8   :  { %4200 = vmatpush1.bf16.msra.mxu0 %v14535_v33  ;;  %4241 = vmatpush1.bf16.msra.mxu1 %v14538_v34 }
 0x4b9   :  { %4201 = vmatprep.subr.bf16.mxu0 %v14543_v35  ;;  %4242 = vmatprep.subr.bf16.mxu1 %v14546_v36  ;;  %v3401_v35 = vld [vmem:[#allocation4 + $0x30] sm:$0x30] }
 0x4bc   :  { %4202 = vmatpush1.bf16.msra.mxu0 %v14541_v38  ;;  %4243 = vmatpush1.bf16.msra.mxu1 %v14544_v41 }
 0x4bd   :  { %4203 = vmatprep.subr.bf16.mxu0 %v14549_v14  ;;  %4244 = vmatprep.subr.bf16.mxu1 %v14552_v62  ;;  %v3402_v14 = vld [vmem:[#allocation4] sm:$0x30] }
 0x4c0   :  { %4204 = vmatpush1.bf16.msra.mxu0 %v14547_v58  ;;  %4245 = vmatpush1.bf16.msra.mxu1 %v14550_v43 }
 0x4c1   :  { %4205 = vmatprep.subr.bf16.mxu0 %v14555_v45  ;;  %4246 = vmatprep.subr.bf16.mxu1 %v14558_v40 }
 0x4c4   :  { %4206 = vmatpush1.bf16.msra.mxu0 %v14553_v49  ;;  %4247 = vmatpush1.bf16.msra.mxu1 %v14556_v50 }
 0x4c5   :  { %4207 = vmatprep.subr.bf16.mxu0 %v14561_v15  ;;  %4248 = vmatprep.subr.bf16.mxu1 %v14564_v6  ;;  %v3389_v6 = vld [vmem:[#allocation3 + $0x4] sm:$0x3] }
 0x4c8   :  { %4208 = vmatpush1.bf16.msra.mxu0 %v14559_v51  ;;  %4249 = vmatpush1.bf16.msra.mxu1 %v14562_v52 }
 0x4c9   :  { %4209 = vmatprep.subr.bf16.mxu0 %v14567_v53  ;;  %4250 = vmatprep.subr.bf16.mxu1 %v14570_v17 }
 0x4cc   :  { %4210 = vmatpush1.bf16.msra.mxu0 %v14565_v54  ;;  %4251 = vmatpush1.bf16.msra.mxu1 %v14568_v24 }
 0x4cd   :  { %4211 = vmatprep.subr.bf16.mxu0 %v14573_v29  ;;  %4252 = vmatprep.subr.bf16.mxu1 %v14576_v56  ;;  %v3403_v56 = vld [vmem:[#allocation4 + $0x18] sm:$0x30] }
 0x4d0   :  { %4212 = vmatpush1.bf16.msra.mxu0 %v14571_v25  ;;  %4253 = vmatpush1.bf16.msra.mxu1 %v14574_v59 }
 0x4d1   :  { %4535 = vmatprep.subr.bf16.mxu0 %v14579_v60  ;;  %4576 = vmatprep.subr.bf16.mxu1 %v14582_v61  ;;  %v3404_v61 = vld [vmem:[#allocation4 + $0x10] sm:$0x30] }
 0x532   :  { %v3318_v63 = vpop.f32.mrf.mxu0  ;;  %v3359_v2 = vpop.f32.mrf.mxu1 }
 0x533   :  { %v3319_v28 = vadd.f32 %v3318_v63, %v16496_v46  ;;  %v3360_v19 = vadd.f32 %v3359_v2, %v16498_v47 }
 0x534   :  { %v3320_v3 = vpop.f32.mrf.mxu0  ;;  %v3361_v4 = vpop.f32.mrf.mxu1 }
 0x535   :  { %v3366_v5 = vadd.f32 %v3319_v28, %v16457_v22  ;;  %v3321_v7 = vadd.f32 %v3320_v3, %v16500_v37  ;;  %v3368_v46 = vadd.f32 %v3360_v19, %v16467_v16  ;;  %v3362_v20 = vadd.f32 %v3361_v4, %v16502_v48 }
 0x536   :  { %v3322_v8 = vpop.f32.mrf.mxu0  ;;  %v3363_v9 = vpop.f32.mrf.mxu1 }
 0x537   :  { %v12826_v10 = vmul.f32 -1.442695, %v3366_v5  ;;  %v3367_v11 = vadd.f32 %v3321_v7, %v16460_v27  ;;  %v12828_v21 = vmul.f32 -1.442695, %v3368_v46  ;;  %v3369_v37 = vadd.f32 %v3362_v20, %v16472_v44 }
 0x538   :  { %v3323_v12 = vpop.f32.mrf.mxu0  ;;  %v3364_v13 = vpop.f32.mrf.mxu1 }
 0x539   :  { %15953 = vpow2.f32 %v12826_v10  ;;  %v12827_v18 = vmul.f32 -1.442695, %v3367_v11  ;;  %v3716_v11 = vld [vmem:[#allocation3] sm:$0x3] }
 0x53b   :  { %15955 = vpow2.f32 %v12827_v18 }
 0x53c   :  { %15957 = vpow2.f32 %v12828_v21 }
 0x546   :  { %v15954_v23 = vpop.eup %15953 }
 0x547   :  { %v3379_v26 = vadd.f32 1.0, %v15954_v23  ;;  %v3718_v23 = vrot.slane %v3716_v11, 4 }
 0x548   :  { %v15956_v30 = vpop.eup %15955 }
 0x549   :  { %15959 = vrcp.f32 %v3379_v26  ;;  %v3380_v31 = vadd.f32 1.0, %v15956_v30  ;;  %v15958_v38 = vpop.eup %15957 }
 0x54a   :  { %15961 = vtanh.f32 %v3369_v37  ;;  %v3381_v15 = vadd.f32 1.0, %v15958_v38 }
 0x54b   :  { %15963 = vrcp.f32 %v3380_v31 }
 0x552   :  { %v3633_v32 = vpop.f32.mrf.mxu0  ;;  %v3674_v33 = vpop.f32.mrf.mxu1 }
 0x553   :  { %v3685_v34 = vrot.slane %v3633_v32, 4  ;;  %v3687_v29 = vrot.slane %v3674_v33, 4 }
 0x554   :  { %v3635_v47 = vpop.f32.mrf.mxu0  ;;  %v3676_v36 = vpop.f32.mrf.mxu1 }
 0x555   :  { %v3693_v41 = vadd.f32 %v3685_v34, %v3401_v35  ;;  %v3686_v48 = vrot.slane %v3635_v47, 4  ;;  %v3695_v25 = vadd.f32 %v3687_v29, %v3403_v56  ;;  %v3688_v59 = vrot.slane %v3676_v36, 4  ;;  %v14604_v29 = vld [vmem:[#allocation8 + $0x268] ss:$16 sps:$4 sm:$0xff]   ;;  %v14609_v56 = vld [vmem:[#allocation8 + $0x244] ss:$16 sps:$4 sm:$0xff]  }
 0x556   :  { %v15960_v58 = vpop.eup %15959  ;;  %v3637_v43 = vpop.f32.mrf.mxu0 }
 0x557   :  { %v3678_v62 = vpop.f32.mrf.mxu1  ;;  %v15962_v45 = vpop.eup %15961  ;;  %v12861_v40 = vmul.f32 -1.442695, %v3693_v41  ;;  %v3694_v49 = vadd.f32 %v3686_v48, %v3402_v14  ;;  %v12863_v60 = vmul.f32 -1.442695, %v3695_v25  ;;  %v3696_v2 = vadd.f32 %v3688_v59, %v3404_v61  ;;  %v14577_v41 = vld [vmem:[#allocation8 + $0x2e0] ss:$16 sps:$4 sm:$0xff]  }
 0x558   :  { %v15964_v50 = vpop.eup %15963  ;;  %v3638_v51 = vpop.f32.mrf.mxu0  ;;  %v3391_v17 = vmul.f32 %v15962_v45, %v15960_v58  ;;  %v14580_v48 = vld [vmem:[#allocation8 + $0x2e8] ss:$16 sps:$4 sm:$0xff]   ;;  %v14585_v14 = vld [vmem:[#allocation8 + $0x2c4] ss:$16 sps:$4 sm:$0xff]   ;;  %v14588_v43 = vld [vmem:[#allocation8 + $0x2cc] ss:$16 sps:$4 sm:$0xff]  }
 0x559   :  { %v3679_v52 = vpop.f32.mrf.mxu1  ;;  %v3390_v53 = vmul.f32 %v15964_v50, %v3389_v6  ;;  %15965 = vpow2.f32 %v12861_v40  ;;  %v12862_v54 = vmul.f32 -1.442695, %v3694_v49  ;;  %v14583_v62 = vld [vmem:[#allocation8 + $0x2c0] ss:$16 sps:$4 sm:$0xff]   ;;  %v14586_v45 = vld [vmem:[#allocation8 + $0x2c8] ss:$16 sps:$4 sm:$0xff]  }
 0x55a   :  { %v14591_v40 = vld [vmem:[#allocation8 + $0x2a4] ss:$16 sps:$4 sm:$0xff]   ;;  %v14594_v49 = vld [vmem:[#allocation8 + $0x2ac] ss:$16 sps:$4 sm:$0xff]   ;;  %v14589_v50 = vld [vmem:[#allocation8 + $0x2a0] ss:$16 sps:$4 sm:$0xff]  }
 0x55b   :  { %v3392_v24 = vadd.f32 %v3391_v17, %v3390_v53  ;;  %15967 = vpow2.f32 %v12862_v54  ;;  %v14597_v6 = vld [vmem:[#allocation8 + $0x284] ss:$16 sps:$4 sm:$0xff]   ;;  %v14600_v51 = vld [vmem:[#allocation8 + $0x28c] ss:$16 sps:$4 sm:$0xff]   ;;  %v14595_v52 = vld [vmem:[#allocation8 + $0x280] ss:$16 sps:$4 sm:$0xff]  }
 0x55c   :  { %15969 = vrcp.f32 %v3381_v15  ;;  %v14592_v15 = vld [vmem:[#allocation8 + $0x2a8] ss:$16 sps:$4 sm:$0xff]   ;;  %v14603_v17 = vld [vmem:[#allocation8 + $0x264] ss:$16 sps:$4 sm:$0xff]   ;;  %v14606_v54 = vld [vmem:[#allocation8 + $0x26c] ss:$16 sps:$4 sm:$0xff]  }
 0x55d   :  { %15971 = vtanh.f32 %v3392_v24  ;;  %3400 = vst [vmem:[#allocation3 + $0x4] sm:$0x3] %v3392_v24  ;;  %v14598_v53 = vld [vmem:[#allocation8 + $0x288] ss:$16 sps:$4 sm:$0xff]   ;;  %v14601_v24 = vld [vmem:[#allocation8 + $0x260] ss:$16 sps:$4 sm:$0xff]  }
 0x55e   :  { %15973 = vpow2.f32 %v12863_v60  ;;  %v14612_v25 = vld [vmem:[#allocation8 + $0x24c] ss:$16 sps:$4 sm:$0xff]   ;;  %v14607_v59 = vld [vmem:[#allocation8 + $0x240] ss:$16 sps:$4 sm:$0xff]   ;;  %v14610_v60 = vld [vmem:[#allocation8 + $0x248] ss:$16 sps:$4 sm:$0xff]  }
 0x55f   :  { %v14615_v61 = vld [vmem:[#allocation8 + $0x224] ss:$16 sps:$4 sm:$0xff]  }
 0x566   :  { %v15966_v63 = vpop.eup %15965 }
 0x567   :  { %v3706_v28 = vadd.f32 1.0, %v15966_v63  ;;  %v14618_v63 = vld [vmem:[#allocation8 + $0x22c] ss:$16 sps:$4 sm:$0xff]  }
 0x568   :  { %v15968_v3 = vpop.eup %15967 }
 0x569   :  { %v15970_v4 = vpop.eup %15969  ;;  %15975 = vrcp.f32 %v3706_v28  ;;  %v3707_v5 = vadd.f32 1.0, %v15968_v3  ;;  %v14616_v28 = vld [vmem:[#allocation8 + $0x228] ss:$16 sps:$4 sm:$0xff]   ;;  %v14621_v3 = vld [vmem:[#allocation8 + $0x204] ss:$16 sps:$4 sm:$0xff]  }
 0x56a   :  { %v15972_v7 = vpop.eup %15971  ;;  %15977 = vtanh.f32 %v3696_v2  ;;  %v14613_v2 = vld [vmem:[#allocation8 + $0x220] ss:$16 sps:$4 sm:$0xff]  }
 0x56b   :  { %v3394_v8 = vmul.f32 %v15972_v7, %v15970_v4  ;;  %15979 = vrcp.f32 %v3707_v5  ;;  %v15974_v18 = vpop.eup %15973  ;;  %v14624_v4 = vld [vmem:[#allocation8 + $0x20c] ss:$16 sps:$4 sm:$0xff]   ;;  %v14619_v5 = vld [vmem:[#allocation8 + $0x200] ss:$16 sps:$4 sm:$0xff]   ;;  %v14622_v7 = vld [vmem:[#allocation8 + $0x208] ss:$16 sps:$4 sm:$0xff]  }
 0x56c   :  { %v3708_v26 = vadd.f32 1.0, %v15974_v18  ;;  %v14627_v18 = vld [vmem:[#allocation5 + $0x2e4] ss:$16 sps:$4 sm:$0xff]  }
 0x56d   :  { %3399 = vst [vmem:[#allocation2 + $0x4] sm:$0x3] %v3394_v8 }
 0x56e   :  { %15981 = vrcp.f32 %v3708_v26  ;;  %v14634_v26 = vld [vmem:[#allocation5 + $0x2c8] ss:$16 sps:$4 sm:$0xff]  }
 0x572   :  { %v16518_v9 = vpop.f32.mrf.mxu0  ;;  %v16520_v10 = vpop.f32.mrf.mxu1 }
 0x574   :  { %v16522_v12 = vpop.f32.mrf.mxu0  ;;  %v16524_v13 = vpop.f32.mrf.mxu1  ;;  %v4341_v8 = vld [vmem:[#allocation2 + $0x4] sm:$0x3] }
 0x575   :  { %v4342_v11 = vpack.c.bf16 %v4341_v8, %v4341_v8 }
 0x576   :  { %v15976_v19 = vpop.eup %15975  ;;  %v3990_v46 = vpop.f32.mrf.mxu0 }
 0x577   :  { %v4031_v20 = vpop.f32.mrf.mxu1  ;;  %v15978_v21 = vpop.eup %15977  ;;  %v14625_v46 = vld [vmem:[#allocation5 + $0x2e0] ss:$16 sps:$4 sm:$0xff]  }
 0x578   :  { %v15980_v37 = vpop.eup %15979  ;;  %v3991_v30 = vpop.f32.mrf.mxu0  ;;  %v3721_v33 = vmul.f32 %v15978_v21, %v15976_v19  ;;  %v14630_v19 = vld [vmem:[#allocation5 + $0x2ec] ss:$16 sps:$4 sm:$0xff]   ;;  %v14628_v20 = vld [vmem:[#allocation5 + $0x2e8] ss:$16 sps:$4 sm:$0xff]   ;;  %v14633_v21 = vld [vmem:[#allocation5 + $0x2c4] ss:$16 sps:$4 sm:$0xff]  }
 0x579   :  { %v4032_v31 = vpop.f32.mrf.mxu1  ;;  %v3720_v32 = vmul.f32 %v15980_v37, %v3718_v23  ;;  %v14636_v23 = vld [vmem:[#allocation5 + $0x2cc] ss:$16 sps:$4 sm:$0xff]   ;;  %v14631_v37 = vld [vmem:[#allocation5 + $0x2c0] ss:$16 sps:$4 sm:$0xff]   ;;  %v14639_v30 = vld [vmem:[#allocation5 + $0x2a4] ss:$16 sps:$4 sm:$0xff]  }
 0x57a   :  { %v14642_v31 = vld [vmem:[#allocation5 + $0x2ac] ss:$16 sps:$4 sm:$0xff]  }
 0x57b   :  { %v3722_v34 = vadd.f32 %v3721_v33, %v3720_v32  ;;  %v15982_v35 = vpop.eup %15981  ;;  %v14637_v32 = vld [vmem:[#allocation5 + $0x2a0] ss:$16 sps:$4 sm:$0xff]   ;;  %v14640_v33 = vld [vmem:[#allocation5 + $0x2a8] ss:$16 sps:$4 sm:$0xff]  }
 0x57d   :  { %15983 = vtanh.f32 %v3722_v34  ;;  %4889 = vst [vmem:[#allocation3 - $0x4] sm:$0x30] %v3722_v34  ;;  %v14645_v34 = vld [vmem:[#allocation5 + $0x284] ss:$16 sps:$4 sm:$0xff]  }
 0x58a   :  { %v15984_v47 = vpop.eup %15983 }
 0x58b   :  { %v3724_v36 = vmul.f32 %v15984_v47, %v15982_v35  ;;  %v14648_v35 = vld [vmem:[#allocation5 + $0x28c] ss:$16 sps:$4 sm:$0xff]   ;;  %v14643_v47 = vld [vmem:[#allocation5 + $0x280] ss:$16 sps:$4 sm:$0xff]  }
 0x58d   :  { %v3725_v38 = vpack.c.bf16 %v3724_v36, %v3724_v36  ;;  %4888 = vst [vmem:[#allocation2 - $0x4] sm:$0x30] %v3724_v36  ;;  %v14646_v36 = vld [vmem:[#allocation5 + $0x288] ss:$16 sps:$4 sm:$0xff]  }
 0x58f   :  { %v4035_v58 = vrot.slane %v3725_v38, 2  ;;  %v14651_v38 = vld [vmem:[#allocation5 + $0x264] ss:$16 sps:$4 sm:$0xff]  }
 0x591   :  { %4230 = vmatmul.mubr.bf16.vlgmr.msra.gmra.mxu0 %v4035_v58  ;;  %4271 = vmatmul.mubr.bf16.vlgmr.msra.gmra.mxu1 %v4035_v58  ;;  %v14654_v58 = vld [vmem:[#allocation5 + $0x26c] ss:$16 sps:$4 sm:$0xff]  }
 0x592   :  { %4536 = vmatpush1.bf16.msra.mxu0 %v14577_v41  ;;  %4577 = vmatpush1.bf16.msra.mxu1 %v14580_v48  ;;  %v14649_v41 = vld [vmem:[#allocation5 + $0x260] ss:$16 sps:$4 sm:$0xff]   ;;  %v14652_v48 = vld [vmem:[#allocation5 + $0x268] ss:$16 sps:$4 sm:$0xff]  }
 0x593   :  { %4537 = vmatprep.subr.bf16.mxu0 %v14585_v14  ;;  %4578 = vmatprep.subr.bf16.mxu1 %v14588_v43  ;;  %v14657_v14 = vld [vmem:[#allocation5 + $0x244] ss:$16 sps:$4 sm:$0xff]   ;;  %v14660_v43 = vld [vmem:[#allocation5 + $0x24c] ss:$16 sps:$4 sm:$0xff]  }
 0x594   :  { %4567 = vmatprep.mubr.bf16.mxu0 %v16327_v0  ;;  %4608 = vmatprep.mubr.bf16.mxu1 %v16327_v0 }
 0x596   :  { %4538 = vmatpush1.bf16.msra.mxu0 %v14583_v62  ;;  %4579 = vmatpush1.bf16.msra.mxu1 %v14586_v45  ;;  %v14655_v62 = vld [vmem:[#allocation5 + $0x240] ss:$16 sps:$4 sm:$0xff]   ;;  %v14658_v45 = vld [vmem:[#allocation5 + $0x248] ss:$16 sps:$4 sm:$0xff]  }
 0x597   :  { %4539 = vmatprep.subr.bf16.mxu0 %v14591_v40  ;;  %4580 = vmatprep.subr.bf16.mxu1 %v14594_v49  ;;  %v14663_v40 = vld [vmem:[#allocation5 + $0x224] ss:$16 sps:$4 sm:$0xff]   ;;  %v14666_v49 = vld [vmem:[#allocation5 + $0x22c] ss:$16 sps:$4 sm:$0xff]  }
 0x59a   :  { %4540 = vmatpush1.bf16.msra.mxu0 %v14589_v50  ;;  %4581 = vmatpush1.bf16.msra.mxu1 %v14592_v15  ;;  %v14661_v50 = vld [vmem:[#allocation5 + $0x220] ss:$16 sps:$4 sm:$0xff]   ;;  %v14664_v15 = vld [vmem:[#allocation5 + $0x228] ss:$16 sps:$4 sm:$0xff]  }
 0x59b   :  { %4541 = vmatprep.subr.bf16.mxu0 %v14597_v6  ;;  %4582 = vmatprep.subr.bf16.mxu1 %v14600_v51  ;;  %v14669_v6 = vld [vmem:[#allocation5 + $0x204] ss:$16 sps:$4 sm:$0xff]   ;;  %v14672_v51 = vld [vmem:[#allocation5 + $0x20c] ss:$16 sps:$4 sm:$0xff]  }
 0x59e   :  { %4542 = vmatpush1.bf16.msra.mxu0 %v14595_v52  ;;  %4583 = vmatpush1.bf16.msra.mxu1 %v14598_v53  ;;  %v14667_v52 = vld [vmem:[#allocation5 + $0x200] ss:$16 sps:$4 sm:$0xff]   ;;  %v14670_v53 = vld [vmem:[#allocation5 + $0x208] ss:$16 sps:$4 sm:$0xff]  }
 0x59f   :  { %4543 = vmatprep.subr.bf16.mxu0 %v14603_v17  ;;  %4584 = vmatprep.subr.bf16.mxu1 %v14606_v54  ;;  %v14675_v17 = vld [vmem:[#allocation8 + $0xe4] ss:$16 sps:$4 sm:$0xff]   ;;  %v14678_v54 = vld [vmem:[#allocation8 + $0xec] ss:$16 sps:$4 sm:$0xff]  }
 0x5a2   :  { %4544 = vmatpush1.bf16.msra.mxu0 %v14601_v24  ;;  %4585 = vmatpush1.bf16.msra.mxu1 %v14604_v29 }
 0x5a3   :  { %4545 = vmatprep.subr.bf16.mxu0 %v14609_v56  ;;  %4586 = vmatprep.subr.bf16.mxu1 %v14612_v25 }
 0x5a6   :  { %4546 = vmatpush1.bf16.msra.mxu0 %v14607_v59  ;;  %4587 = vmatpush1.bf16.msra.mxu1 %v14610_v60 }
 0x5a7   :  { %4547 = vmatprep.subr.bf16.mxu0 %v14615_v61  ;;  %4588 = vmatprep.subr.bf16.mxu1 %v14618_v63 }
 0x5aa   :  { %4548 = vmatpush1.bf16.msra.mxu0 %v14613_v2  ;;  %4589 = vmatpush1.bf16.msra.mxu1 %v14616_v28 }
 0x5ab   :  { %4549 = vmatprep.subr.bf16.mxu0 %v14621_v3  ;;  %4590 = vmatprep.subr.bf16.mxu1 %v14624_v4 }
 0x5ae   :  { %4550 = vmatpush1.bf16.msra.mxu0 %v14619_v5  ;;  %4591 = vmatpush1.bf16.msra.mxu1 %v14622_v7 }
 0x5af   :  { %4777 = vmatprep.subr.bf16.mxu0 %v14627_v18  ;;  %4818 = vmatprep.subr.bf16.mxu1 %v14630_v19 }
 0x5b1   :  { %4568 = vmatmul.mubr.bf16.vlgmr.msra.gmra.mxu0 %v4342_v11  ;;  %4609 = vmatmul.mubr.bf16.vlgmr.msra.gmra.mxu1 %v4342_v11 }
 0x5b2   :  { %4809 = vmatprep.mubr.bf16.mxu0 %v16327_v0  ;;  %4850 = vmatprep.mubr.bf16.mxu1 %v16327_v0 }
 0x5b3   :  { %4778 = vmatpush1.bf16.msra.mxu0 %v14625_v46  ;;  %4819 = vmatpush1.bf16.msra.mxu1 %v14628_v20 }
 0x5b4   :  { %4779 = vmatprep.subr.bf16.mxu0 %v14633_v21  ;;  %4820 = vmatprep.subr.bf16.mxu1 %v14636_v23 }
 0x5b7   :  { %4780 = vmatpush1.bf16.msra.mxu0 %v14631_v37  ;;  %4821 = vmatpush1.bf16.msra.mxu1 %v14634_v26 }
 0x5b8   :  { %4781 = vmatprep.subr.bf16.mxu0 %v14639_v30  ;;  %4822 = vmatprep.subr.bf16.mxu1 %v14642_v31 }
 0x5bb   :  { %4782 = vmatpush1.bf16.msra.mxu0 %v14637_v32  ;;  %4823 = vmatpush1.bf16.msra.mxu1 %v14640_v33 }
 0x5bc   :  { %4783 = vmatprep.subr.bf16.mxu0 %v14645_v34  ;;  %4824 = vmatprep.subr.bf16.mxu1 %v14648_v35 }
 0x5bf   :  { %4784 = vmatpush1.bf16.msra.mxu0 %v14643_v47  ;;  %4825 = vmatpush1.bf16.msra.mxu1 %v14646_v36  ;;  %v4302_v47 = vld [vmem:[#allocation3 + $0x2] sm:$0x3] }
 0x5c0   :  { %4785 = vmatprep.subr.bf16.mxu0 %v14651_v38  ;;  %4826 = vmatprep.subr.bf16.mxu1 %v14654_v58 }
 0x5c3   :  { %4786 = vmatpush1.bf16.msra.mxu0 %v14649_v41  ;;  %4827 = vmatpush1.bf16.msra.mxu1 %v14652_v48 }
 0x5c4   :  { %4787 = vmatprep.subr.bf16.mxu0 %v14657_v14  ;;  %4828 = vmatprep.subr.bf16.mxu1 %v14660_v43 }
 0x5c7   :  { %4788 = vmatpush1.bf16.msra.mxu0 %v14655_v62  ;;  %4829 = vmatpush1.bf16.msra.mxu1 %v14658_v45  ;;  %v14673_v45 = vld [vmem:[#allocation8 + $0xe0] ss:$16 sps:$4 sm:$0xff]  }
 0x5c8   :  { %4789 = vmatprep.subr.bf16.mxu0 %v14663_v40  ;;  %4830 = vmatprep.subr.bf16.mxu1 %v14666_v49  ;;  %v14676_v40 = vld [vmem:[#allocation8 + $0xe8] ss:$16 sps:$4 sm:$0xff]  }
 0x5cb   :  { %4790 = vmatpush1.bf16.msra.mxu0 %v14661_v50  ;;  %4831 = vmatpush1.bf16.msra.mxu1 %v14664_v15  ;;  %v14681_v50 = vld [vmem:[#allocation8 + $0xc4] ss:$16 sps:$4 sm:$0xff]   ;;  %v14684_v15 = vld [vmem:[#allocation8 + $0xcc] ss:$16 sps:$4 sm:$0xff]  }
 0x5cc   :  { %4791 = vmatprep.subr.bf16.mxu0 %v14669_v6  ;;  %4832 = vmatprep.subr.bf16.mxu1 %v14672_v51  ;;  %v14679_v6 = vld [vmem:[#allocation8 + $0xc0] ss:$16 sps:$4 sm:$0xff]   ;;  %v14682_v51 = vld [vmem:[#allocation8 + $0xc8] ss:$16 sps:$4 sm:$0xff]  }
 0x5cf   :  { %4792 = vmatpush1.bf16.msra.mxu0 %v14667_v52  ;;  %4833 = vmatpush1.bf16.msra.mxu1 %v14670_v53  ;;  %v14687_v52 = vld [vmem:[#allocation8 + $0xa4] ss:$16 sps:$4 sm:$0xff]   ;;  %v14690_v53 = vld [vmem:[#allocation8 + $0xac] ss:$16 sps:$4 sm:$0xff]  }
 0x5d0   :  { %5092 = vmatprep.subr.bf16.mxu0 %v14675_v17  ;;  %5133 = vmatprep.subr.bf16.mxu1 %v14678_v54  ;;  %v14685_v17 = vld [vmem:[#allocation8 + $0xa0] ss:$16 sps:$4 sm:$0xff]   ;;  %v14688_v54 = vld [vmem:[#allocation8 + $0xa8] ss:$16 sps:$4 sm:$0xff]  }
 0x651   :  { %v4231_v24 = vpop.f32.mrf.mxu0  ;;  %v4272_v29 = vpop.f32.mrf.mxu1 }
 0x652   :  { %v4232_v56 = vadd.f32 %v4231_v24, %v16518_v9  ;;  %v4273_v8 = vadd.f32 %v4272_v29, %v16520_v10  ;;  %v14693_v24 = vld [vmem:[#allocation8 + $0x84] ss:$16 sps:$4 sm:$0xff]   ;;  %v14696_v29 = vld [vmem:[#allocation8 + $0x8c] ss:$16 sps:$4 sm:$0xff]  }
 0x653   :  { %v4233_v25 = vpop.f32.mrf.mxu0  ;;  %v4274_v59 = vpop.f32.mrf.mxu1 }
 0x654   :  { %v4279_v60 = vadd.f32 %v4232_v56, %v16420_v39  ;;  %v4234_v61 = vadd.f32 %v4233_v25, %v16522_v12  ;;  %v4281_v9 = vadd.f32 %v4273_v8, %v16430_v55  ;;  %v4275_v11 = vadd.f32 %v4274_v59, %v16524_v13  ;;  %v14691_v56 = vld [vmem:[#allocation8 + $0x80] ss:$16 sps:$4 sm:$0xff]   ;;  %v14694_v25 = vld [vmem:[#allocation8 + $0x88] ss:$16 sps:$4 sm:$0xff]   ;;  %v14699_v59 = vld [vmem:[#allocation8 + $0x64] ss:$16 sps:$4 sm:$0xff]  }
 0x655   :  { %v4235_v63 = vpop.f32.mrf.mxu0  ;;  %v4276_v2 = vpop.f32.mrf.mxu1  ;;  %v14709_v8 = vld [vmem:[#allocation8 + $0x20] ss:$16 sps:$4 sm:$0xff]  }
 0x656   :  { %v12928_v28 = vmul.f32 -1.442695, %v4279_v60  ;;  %v4280_v3 = vadd.f32 %v4234_v61, %v16423_v42  ;;  %v12930_v18 = vmul.f32 -1.442695, %v4281_v9  ;;  %v4282_v12 = vadd.f32 %v4275_v11, %v16435_v57  ;;  %v14702_v60 = vld [vmem:[#allocation8 + $0x6c] ss:$16 sps:$4 sm:$0xff]  }
 0x657   :  { %v4236_v4 = vpop.f32.mrf.mxu0  ;;  %v4277_v5 = vpop.f32.mrf.mxu1  ;;  %v14697_v61 = vld [vmem:[#allocation8 + $0x60] ss:$16 sps:$4 sm:$0xff]   ;;  %v14700_v63 = vld [vmem:[#allocation8 + $0x68] ss:$16 sps:$4 sm:$0xff]   ;;  %v14705_v2 = vld [vmem:[#allocation8 + $0x44] ss:$16 sps:$4 sm:$0xff]  }
 0x658   :  { %15985 = vpow2.f32 %v12928_v28  ;;  %v12929_v7 = vmul.f32 -1.442695, %v4280_v3  ;;  %v14708_v28 = vld [vmem:[#allocation8 + $0x4c] ss:$16 sps:$4 sm:$0xff]   ;;  %v14703_v3 = vld [vmem:[#allocation8 + $0x40] ss:$16 sps:$4 sm:$0xff]  }
 0x659   :  { %v14706_v4 = vld [vmem:[#allocation8 + $0x48] ss:$16 sps:$4 sm:$0xff]   ;;  %v14711_v5 = vld [vmem:[#allocation8 + $0x24] ss:$16 sps:$4 sm:$0xff]  }
 0x65a   :  { %15987 = vpow2.f32 %v12929_v7  ;;  %v14714_v7 = vld [vmem:[#allocation8 + $0x2c] ss:$16 sps:$4 sm:$0xff]   ;;  %v14712_v9 = vld [vmem:[#allocation8 + $0x28] ss:$16 sps:$4 sm:$0xff]   ;;  %v14717_v11 = vld [vmem:[#allocation8 + $0x4] ss:$16 sps:$4 sm:$0xff]  }
 0x65b   :  { %15989 = vpow2.f32 %v12930_v18  ;;  %v14720_v18 = vld [vmem:[#allocation8 + $0xc] ss:$16 sps:$4 sm:$0xff]  }
 0x665   :  { %v15986_v19 = vpop.eup %15985 }
 0x666   :  { %v4292_v46 = vadd.f32 1.0, %v15986_v19  ;;  %v14715_v19 = vld [vmem:[#allocation8] ss:$16 sps:$4 sm:$0xff]  }
 0x667   :  { %v15988_v20 = vpop.eup %15987 }
 0x668   :  { %15991 = vrcp.f32 %v4292_v46  ;;  %v4293_v21 = vadd.f32 1.0, %v15988_v20  ;;  %v15990_v13 = vpop.eup %15989  ;;  %v14723_v46 = vld [vmem:[#allocation8 + $0x1e4] ss:$16 sps:$4 sm:$0xff]   ;;  %v14726_v20 = vld [vmem:[#allocation8 + $0x1ec] ss:$16 sps:$4 sm:$0xff]  }
 0x669   :  { %15993 = vtanh.f32 %v4282_v12  ;;  %v4294_v35 = vadd.f32 1.0, %v15990_v13  ;;  %v14718_v12 = vld [vmem:[#allocation8 + $0x8] ss:$16 sps:$4 sm:$0xff]   ;;  %v14721_v13 = vld [vmem:[#allocation8 + $0x1e0] ss:$16 sps:$4 sm:$0xff]  }
 0x66a   :  { %15995 = vrcp.f32 %v4293_v21  ;;  %v4898_v21 = vld [vmem:[#allocation2] sm:$0x3] }
 0x66b   :  { %15997 = vrcp.f32 %v4294_v35  ;;  %v14730_v35 = vld [vmem:[#allocation8 + $0x1c8] ss:$16 sps:$4 sm:$0xff]  }
 0x671   :  { %v16538_v23 = vpop.f32.mrf.mxu0  ;;  %v16540_v37 = vpop.f32.mrf.mxu1 }
 0x673   :  { %v16542_v10 = vpop.f32.mrf.mxu0  ;;  %v16544_v26 = vpop.f32.mrf.mxu1 }
 0x675   :  { %v15992_v30 = vpop.eup %15991  ;;  %v4573_v31 = vpop.f32.mrf.mxu0 }
 0x676   :  { %v4614_v32 = vpop.f32.mrf.mxu1  ;;  %v15994_v33 = vpop.eup %15993  ;;  %v4899_v31 = vpack.c.bf16 %v4898_v21, %v4898_v21  ;;  %v14795_v21 = vld [vmem:[#allocation5 + $0x164] ss:$16 sps:$4 sm:$0xff]  }
 0x677   :  { %v15996_v34 = vpop.eup %15995  ;;  %v4574_v36 = vpop.f32.mrf.mxu0  ;;  %v4304_v48 = vmul.f32 %v15994_v33, %v15992_v30  ;;  %v14724_v30 = vld [vmem:[#allocation8 + $0x1e8] ss:$16 sps:$4 sm:$0xff]   ;;  %v14729_v32 = vld [vmem:[#allocation8 + $0x1c4] ss:$16 sps:$4 sm:$0xff]   ;;  %v14732_v33 = vld [vmem:[#allocation8 + $0x1cc] ss:$16 sps:$4 sm:$0xff]  }
 0x678   :  { %v4615_v38 = vpop.f32.mrf.mxu1  ;;  %v4303_v41 = vmul.f32 %v15996_v34, %v4302_v47  ;;  %v15998_v14 = vpop.eup %15997  ;;  %v14727_v34 = vld [vmem:[#allocation8 + $0x1c0] ss:$16 sps:$4 sm:$0xff]   ;;  %v14735_v47 = vld [vmem:[#allocation8 + $0x1a4] ss:$16 sps:$4 sm:$0xff]   ;;  %v14738_v36 = vld [vmem:[#allocation8 + $0x1ac] ss:$16 sps:$4 sm:$0xff]  }
 0x679   :  { %v14733_v38 = vld [vmem:[#allocation8 + $0x1a0] ss:$16 sps:$4 sm:$0xff]  }
 0x67a   :  { %v4305_v58 = vadd.f32 %v4304_v48, %v4303_v41  ;;  %v14736_v41 = vld [vmem:[#allocation8 + $0x1a8] ss:$16 sps:$4 sm:$0xff]   ;;  %v14741_v48 = vld [vmem:[#allocation8 + $0x184] ss:$16 sps:$4 sm:$0xff]  }
 0x67c   :  { %15999 = vtanh.f32 %v4305_v58  ;;  %4891 = vst [vmem:[#allocation3 + $0x2] sm:$0x3] %v4305_v58  ;;  %v14744_v58 = vld [vmem:[#allocation8 + $0x18c] ss:$16 sps:$4 sm:$0xff]  }
 0x689   :  { %v16000_v43 = vpop.eup %15999 }
 0x68a   :  { %v4307_v62 = vmul.f32 %v16000_v43, %v15998_v14  ;;  %v14739_v14 = vld [vmem:[#allocation8 + $0x180] ss:$16 sps:$4 sm:$0xff]   ;;  %v14742_v43 = vld [vmem:[#allocation8 + $0x188] ss:$16 sps:$4 sm:$0xff]  }
 0x68c   :  { %v4308_v49 = vpack.c.bf16 %v4307_v62, %v4307_v62  ;;  %4890 = vst [vmem:[#allocation2 + $0x2] sm:$0x3] %v4307_v62  ;;  %v14747_v62 = vld [vmem:[#allocation8 + $0x164] ss:$16 sps:$4 sm:$0xff]  }
 0x68e   :  { %4810 = vmatmul.mubr.bf16.vlgmr.msra.gmra.mxu0 %v4308_v49  ;;  %4851 = vmatmul.mubr.bf16.vlgmr.msra.gmra.mxu1 %v4308_v49  ;;  %v14748_v49 = vld [vmem:[#allocation8 + $0x168] ss:$16 sps:$4 sm:$0xff]  }
 0x68f   :  { %5093 = vmatpush1.bf16.msra.mxu0 %v14673_v45  ;;  %5134 = vmatpush1.bf16.msra.mxu1 %v14676_v40  ;;  %v14750_v45 = vld [vmem:[#allocation8 + $0x16c] ss:$16 sps:$4 sm:$0xff]   ;;  %v14745_v40 = vld [vmem:[#allocation8 + $0x160] ss:$16 sps:$4 sm:$0xff]  }
 0x690   :  { %5094 = vmatprep.subr.bf16.mxu0 %v14681_v50  ;;  %5135 = vmatprep.subr.bf16.mxu1 %v14684_v15  ;;  %v14753_v50 = vld [vmem:[#allocation8 + $0x144] ss:$16 sps:$4 sm:$0xff]   ;;  %v14756_v15 = vld [vmem:[#allocation8 + $0x14c] ss:$16 sps:$4 sm:$0xff]  }
 0x691   :  { %5124 = vmatprep.mubr.bf16.mxu0 %v16327_v0  ;;  %5165 = vmatprep.mubr.bf16.mxu1 %v16327_v0 }
 0x693   :  { %5095 = vmatpush1.bf16.msra.mxu0 %v14679_v6  ;;  %5136 = vmatpush1.bf16.msra.mxu1 %v14682_v51  ;;  %v14751_v6 = vld [vmem:[#allocation8 + $0x140] ss:$16 sps:$4 sm:$0xff]   ;;  %v14754_v51 = vld [vmem:[#allocation8 + $0x148] ss:$16 sps:$4 sm:$0xff]  }
 0x694   :  { %5096 = vmatprep.subr.bf16.mxu0 %v14687_v52  ;;  %5137 = vmatprep.subr.bf16.mxu1 %v14690_v53  ;;  %v14759_v52 = vld [vmem:[#allocation8 + $0x124] ss:$16 sps:$4 sm:$0xff]   ;;  %v14762_v53 = vld [vmem:[#allocation8 + $0x12c] ss:$16 sps:$4 sm:$0xff]  }
 0x697   :  { %5097 = vmatpush1.bf16.msra.mxu0 %v14685_v17  ;;  %5138 = vmatpush1.bf16.msra.mxu1 %v14688_v54  ;;  %v14757_v17 = vld [vmem:[#allocation8 + $0x120] ss:$16 sps:$4 sm:$0xff]   ;;  %v14760_v54 = vld [vmem:[#allocation8 + $0x128] ss:$16 sps:$4 sm:$0xff]  }
 0x698   :  { %5098 = vmatprep.subr.bf16.mxu0 %v14693_v24  ;;  %5139 = vmatprep.subr.bf16.mxu1 %v14696_v29  ;;  %v14765_v24 = vld [vmem:[#allocation8 + $0x104] ss:$16 sps:$4 sm:$0xff]   ;;  %v14768_v29 = vld [vmem:[#allocation8 + $0x10c] ss:$16 sps:$4 sm:$0xff]  }
 0x69b   :  { %5099 = vmatpush1.bf16.msra.mxu0 %v14691_v56  ;;  %5140 = vmatpush1.bf16.msra.mxu1 %v14694_v25  ;;  %v14763_v56 = vld [vmem:[#allocation8 + $0x100] ss:$16 sps:$4 sm:$0xff]   ;;  %v14766_v25 = vld [vmem:[#allocation8 + $0x108] ss:$16 sps:$4 sm:$0xff]  }
 0x69c   :  { %5100 = vmatprep.subr.bf16.mxu0 %v14699_v59  ;;  %5141 = vmatprep.subr.bf16.mxu1 %v14702_v60  ;;  %v5251_v59 = vld [vmem:[#allocation2 + $0x2] sm:$0x3] }
 0x69d   :  { %v5252_v60 = vpack.c.bf16 %v5251_v59, %v5251_v59 }
 0x69f   :  { %5101 = vmatpush1.bf16.msra.mxu0 %v14697_v61  ;;  %5142 = vmatpush1.bf16.msra.mxu1 %v14700_v63  ;;  %v14771_v61 = vld [vmem:[#allocation5 + $0x1e4] ss:$16 sps:$4 sm:$0xff]   ;;  %v14774_v63 = vld [vmem:[#allocation5 + $0x1ec] ss:$16 sps:$4 sm:$0xff]  }
 0x6a0   :  { %5102 = vmatprep.subr.bf16.mxu0 %v14705_v2  ;;  %5143 = vmatprep.subr.bf16.mxu1 %v14708_v28  ;;  %v14769_v2 = vld [vmem:[#allocation5 + $0x1e0] ss:$16 sps:$4 sm:$0xff]   ;;  %v14772_v28 = vld [vmem:[#allocation5 + $0x1e8] ss:$16 sps:$4 sm:$0xff]  }
 0x6a3   :  { %5103 = vmatpush1.bf16.msra.mxu0 %v14703_v3  ;;  %5144 = vmatpush1.bf16.msra.mxu1 %v14706_v4  ;;  %v14777_v3 = vld [vmem:[#allocation5 + $0x1c4] ss:$16 sps:$4 sm:$0xff]   ;;  %v14780_v4 = vld [vmem:[#allocation5 + $0x1cc] ss:$16 sps:$4 sm:$0xff]  }
 0x6a4   :  { %5104 = vmatprep.subr.bf16.mxu0 %v14711_v5  ;;  %5145 = vmatprep.subr.bf16.mxu1 %v14714_v7  ;;  %v14775_v5 = vld [vmem:[#allocation5 + $0x1c0] ss:$16 sps:$4 sm:$0xff]   ;;  %v14778_v7 = vld [vmem:[#allocation5 + $0x1c8] ss:$16 sps:$4 sm:$0xff]  }
 0x6a7   :  { %5105 = vmatpush1.bf16.msra.mxu0 %v14709_v8  ;;  %5146 = vmatpush1.bf16.msra.mxu1 %v14712_v9  ;;  %v14783_v8 = vld [vmem:[#allocation5 + $0x1a4] ss:$16 sps:$4 sm:$0xff]   ;;  %v14786_v9 = vld [vmem:[#allocation5 + $0x1ac] ss:$16 sps:$4 sm:$0xff]  }
 0x6a8   :  { %5106 = vmatprep.subr.bf16.mxu0 %v14717_v11  ;;  %5147 = vmatprep.subr.bf16.mxu1 %v14720_v18  ;;  %v14781_v11 = vld [vmem:[#allocation5 + $0x1a0] ss:$16 sps:$4 sm:$0xff]   ;;  %v14784_v18 = vld [vmem:[#allocation5 + $0x1a8] ss:$16 sps:$4 sm:$0xff]  }
 0x6ab   :  { %5107 = vmatpush1.bf16.msra.mxu0 %v14715_v19  ;;  %5148 = vmatpush1.bf16.msra.mxu1 %v14718_v12  ;;  %v14787_v19 = vld [vmem:[#allocation5 + $0x180] ss:$16 sps:$4 sm:$0xff]   ;;  %v14789_v12 = vld [vmem:[#allocation5 + $0x184] ss:$16 sps:$4 sm:$0xff]  }
 0x6ac   :  { %5445 = vmatprep.subr.bf16.mxu0 %v14723_v46  ;;  %5486 = vmatprep.subr.bf16.mxu1 %v14726_v20  ;;  %v14790_v46 = vld [vmem:[#allocation5 + $0x188] ss:$16 sps:$4 sm:$0xff]   ;;  %v14792_v20 = vld [vmem:[#allocation5 + $0x18c] ss:$16 sps:$4 sm:$0xff]  }
 0x6ae   :  { %5125 = vmatmul.mubr.bf16.vlgmr.msra.gmra.mxu0 %v4899_v31  ;;  %5166 = vmatmul.mubr.bf16.vlgmr.msra.gmra.mxu1 %v4899_v31  ;;  %v14796_v31 = vld [vmem:[#allocation5 + $0x168] ss:$16 sps:$4 sm:$0xff]  }
 0x6af   :  { %5446 = vmatpush1.bf16.msra.mxu0 %v14721_v13  ;;  %5487 = vmatpush1.bf16.msra.mxu1 %v14724_v30  ;;  %v14798_v13 = vld [vmem:[#allocation5 + $0x16c] ss:$16 sps:$4 sm:$0xff]   ;;  %v14793_v30 = vld [vmem:[#allocation5 + $0x160] ss:$16 sps:$4 sm:$0xff]  }
 0x6b0   :  { %5447 = vmatprep.subr.bf16.mxu0 %v14729_v32  ;;  %5488 = vmatprep.subr.bf16.mxu1 %v14732_v33  ;;  %v14801_v32 = vld [vmem:[#allocation5 + $0x144] ss:$16 sps:$4 sm:$0xff]   ;;  %v14804_v33 = vld [vmem:[#allocation5 + $0x14c] ss:$16 sps:$4 sm:$0xff]  }
 0x6b1   :  { %5477 = vmatprep.mubr.bf16.mxu0 %v16327_v0  ;;  %5518 = vmatprep.mubr.bf16.mxu1 %v16327_v0 }
 0x6b3   :  { %5448 = vmatpush1.bf16.msra.mxu0 %v14727_v34  ;;  %5489 = vmatpush1.bf16.msra.mxu1 %v14730_v35  ;;  %v14799_v34 = vld [vmem:[#allocation5 + $0x140] ss:$16 sps:$4 sm:$0xff]   ;;  %v14802_v35 = vld [vmem:[#allocation5 + $0x148] ss:$16 sps:$4 sm:$0xff]  }
 0x6b4   :  { %5449 = vmatprep.subr.bf16.mxu0 %v14735_v47  ;;  %5490 = vmatprep.subr.bf16.mxu1 %v14738_v36  ;;  %v14807_v47 = vld [vmem:[#allocation5 + $0x124] ss:$16 sps:$4 sm:$0xff]   ;;  %v14810_v36 = vld [vmem:[#allocation5 + $0x12c] ss:$16 sps:$4 sm:$0xff]  }
 0x6b7   :  { %5450 = vmatpush1.bf16.msra.mxu0 %v14733_v38  ;;  %5491 = vmatpush1.bf16.msra.mxu1 %v14736_v41  ;;  %v14805_v38 = vld [vmem:[#allocation5 + $0x120] ss:$16 sps:$4 sm:$0xff]   ;;  %v14808_v41 = vld [vmem:[#allocation5 + $0x128] ss:$16 sps:$4 sm:$0xff]  }
 0x6b8   :  { %5451 = vmatprep.subr.bf16.mxu0 %v14741_v48  ;;  %5492 = vmatprep.subr.bf16.mxu1 %v14744_v58  ;;  %v14813_v48 = vld [vmem:[#allocation5 + $0x104] ss:$16 sps:$4 sm:$0xff]   ;;  %v14816_v58 = vld [vmem:[#allocation5 + $0x10c] ss:$16 sps:$4 sm:$0xff]  }
 0x6bb   :  { %5452 = vmatpush1.bf16.msra.mxu0 %v14739_v14  ;;  %5493 = vmatpush1.bf16.msra.mxu1 %v14742_v43  ;;  %v14811_v14 = vld [vmem:[#allocation5 + $0x100] ss:$16 sps:$4 sm:$0xff]   ;;  %v14814_v43 = vld [vmem:[#allocation5 + $0x108] ss:$16 sps:$4 sm:$0xff]  }
 0x6bc   :  { %5453 = vmatprep.subr.bf16.mxu0 %v14747_v62  ;;  %5494 = vmatprep.subr.bf16.mxu1 %v14750_v45  ;;  %v14819_v62 = vld [vmem:[#allocation8 + $0x2e4] ss:$16 sps:$4 sm:$0xff]   ;;  %v14822_v45 = vld [vmem:[#allocation8 + $0x2ec] ss:$16 sps:$4 sm:$0xff]  }
 0x6bf   :  { %5454 = vmatpush1.bf16.msra.mxu0 %v14745_v40  ;;  %5495 = vmatpush1.bf16.msra.mxu1 %v14748_v49 }
 0x6c0   :  { %5455 = vmatprep.subr.bf16.mxu0 %v14753_v50  ;;  %5496 = vmatprep.subr.bf16.mxu1 %v14756_v15 }
 0x6c3   :  { %5456 = vmatpush1.bf16.msra.mxu0 %v14751_v6  ;;  %5497 = vmatpush1.bf16.msra.mxu1 %v14754_v51 }
 0x6c4   :  { %5457 = vmatprep.subr.bf16.mxu0 %v14759_v52  ;;  %5498 = vmatprep.subr.bf16.mxu1 %v14762_v53 }
 0x6c7   :  { %5458 = vmatpush1.bf16.msra.mxu0 %v14757_v17  ;;  %5499 = vmatpush1.bf16.msra.mxu1 %v14760_v54 }
 0x6c8   :  { %5459 = vmatprep.subr.bf16.mxu0 %v14765_v24  ;;  %5500 = vmatprep.subr.bf16.mxu1 %v14768_v29 }
 0x6cb   :  { %5460 = vmatpush1.bf16.msra.mxu0 %v14763_v56  ;;  %5501 = vmatpush1.bf16.msra.mxu1 %v14766_v25 }
 0x6cc   :  { %5690 = vmatprep.subr.bf16.mxu0 %v14771_v61  ;;  %5731 = vmatprep.subr.bf16.mxu1 %v14774_v63 }
 0x6ce   :  { %5478 = vmatmul.mubr.bf16.vlgmr.msra.gmra.mxu0 %v5252_v60  ;;  %5519 = vmatmul.mubr.bf16.vlgmr.msra.gmra.mxu1 %v5252_v60 }
 0x6cf   :  { %5722 = vmatprep.mubr.bf16.mxu0 %v16327_v0  ;;  %5763 = vmatprep.mubr.bf16.mxu1 %v16327_v0 }
 0x6d0   :  { %5691 = vmatpush1.bf16.msra.mxu0 %v14769_v2  ;;  %5732 = vmatpush1.bf16.msra.mxu1 %v14772_v28 }
 0x6d1   :  { %5692 = vmatprep.subr.bf16.mxu0 %v14777_v3  ;;  %5733 = vmatprep.subr.bf16.mxu1 %v14780_v4 }
 0x6d4   :  { %5693 = vmatpush1.bf16.msra.mxu0 %v14775_v5  ;;  %5734 = vmatpush1.bf16.msra.mxu1 %v14778_v7 }
 0x6d5   :  { %5694 = vmatprep.subr.bf16.mxu0 %v14783_v8  ;;  %5735 = vmatprep.subr.bf16.mxu1 %v14786_v9  ;;  %v4894_v8 = vld [vmem:[#allocation4 + $0x30] sm:$0xc0] }
 0x6d8   :  { %5695 = vmatpush1.bf16.msra.mxu0 %v14781_v11  ;;  %5736 = vmatpush1.bf16.msra.mxu1 %v14784_v18 }
 0x6d9   :  { %5696 = vmatprep.subr.bf16.mxu0 %v14789_v12  ;;  %5737 = vmatprep.subr.bf16.mxu1 %v14792_v20  ;;  %v4895_v12 = vld [vmem:[#allocation4] sm:$0xc0] }
 0x6dc   :  { %5697 = vmatpush1.bf16.msra.mxu0 %v14787_v19  ;;  %5738 = vmatpush1.bf16.msra.mxu1 %v14790_v46 }
 0x6dd   :  { %5698 = vmatprep.subr.bf16.mxu0 %v14795_v21  ;;  %5739 = vmatprep.subr.bf16.mxu1 %v14798_v13 }
 0x6e0   :  { %5699 = vmatpush1.bf16.msra.mxu0 %v14793_v30  ;;  %5740 = vmatpush1.bf16.msra.mxu1 %v14796_v31 }
 0x6e1   :  { %5700 = vmatprep.subr.bf16.mxu0 %v14801_v32  ;;  %5741 = vmatprep.subr.bf16.mxu1 %v14804_v33  ;;  %v4882_v33 = vld [vmem:[#allocation3 + $0x4] sm:$0x3] }
 0x6e4   :  { %5701 = vmatpush1.bf16.msra.mxu0 %v14799_v34  ;;  %5742 = vmatpush1.bf16.msra.mxu1 %v14802_v35 }
 0x6e5   :  { %5702 = vmatprep.subr.bf16.mxu0 %v14807_v47  ;;  %5743 = vmatprep.subr.bf16.mxu1 %v14810_v36 }
 0x6e8   :  { %5703 = vmatpush1.bf16.msra.mxu0 %v14805_v38  ;;  %5744 = vmatpush1.bf16.msra.mxu1 %v14808_v41 }
 0x6e9   :  { %5704 = vmatprep.subr.bf16.mxu0 %v14813_v48  ;;  %5745 = vmatprep.subr.bf16.mxu1 %v14816_v58  ;;  %v4896_v58 = vld [vmem:[#allocation4 + $0x18] sm:$0xc0] }
 0x6ec   :  { %5705 = vmatpush1.bf16.msra.mxu0 %v14811_v14  ;;  %5746 = vmatpush1.bf16.msra.mxu1 %v14814_v43 }
 0x6ed   :  { %6028 = vmatprep.subr.bf16.mxu0 %v14819_v62  ;;  %6069 = vmatprep.subr.bf16.mxu1 %v14822_v45  ;;  %v4897_v45 = vld [vmem:[#allocation4 + $0x10] sm:$0xc0] }
 0x74e   :  { %v4811_v40 = vpop.f32.mrf.mxu0  ;;  %v4852_v49 = vpop.f32.mrf.mxu1 }
 0x74f   :  { %v4812_v50 = vadd.f32 %v4811_v40, %v16538_v23  ;;  %v4853_v59 = vadd.f32 %v4852_v49, %v16540_v37 }
 0x750   :  { %v4813_v15 = vpop.f32.mrf.mxu0  ;;  %v4854_v6 = vpop.f32.mrf.mxu1 }
 0x751   :  { %v4859_v51 = vadd.f32 %v4812_v50, %v16457_v22  ;;  %v4814_v52 = vadd.f32 %v4813_v15, %v16542_v10  ;;  %v4861_v23 = vadd.f32 %v4853_v59, %v16467_v16  ;;  %v4855_v60 = vadd.f32 %v4854_v6, %v16544_v26 }
 0x752   :  { %v4815_v53 = vpop.f32.mrf.mxu0  ;;  %v4856_v17 = vpop.f32.mrf.mxu1 }
 0x753   :  { %v12995_v54 = vmul.f32 -1.442695, %v4859_v51  ;;  %v4860_v24 = vadd.f32 %v4814_v52, %v16460_v27  ;;  %v12997_v61 = vmul.f32 -1.442695, %v4861_v23  ;;  %v4862_v10 = vadd.f32 %v4855_v60, %v16472_v44 }
 0x754   :  { %v4816_v29 = vpop.f32.mrf.mxu0  ;;  %v4857_v56 = vpop.f32.mrf.mxu1 }
 0x755   :  { %16001 = vpow2.f32 %v12995_v54  ;;  %v12996_v25 = vmul.f32 -1.442695, %v4860_v24  ;;  %v5209_v24 = vld [vmem:[#allocation3] sm:$0x3] }
 0x757   :  { %16003 = vpow2.f32 %v12996_v25 }
 0x758   :  { %16005 = vpow2.f32 %v12997_v61 }
 0x762   :  { %v16002_v63 = vpop.eup %16001 }
 0x763   :  { %v4872_v2 = vadd.f32 1.0, %v16002_v63  ;;  %v5211_v63 = vrot.slane %v5209_v24, 2 }
 0x764   :  { %v16004_v28 = vpop.eup %16003 }
 0x765   :  { %16007 = vrcp.f32 %v4872_v2  ;;  %v4873_v3 = vadd.f32 1.0, %v16004_v28  ;;  %v16006_v11 = vpop.eup %16005 }
 0x766   :  { %16009 = vtanh.f32 %v4862_v10  ;;  %v4874_v32 = vadd.f32 1.0, %v16006_v11 }
 0x767   :  { %16011 = vrcp.f32 %v4873_v3 }
 0x76e   :  { %v5126_v4 = vpop.f32.mrf.mxu0  ;;  %v5167_v5 = vpop.f32.mrf.mxu1 }
 0x76f   :  { %v5178_v7 = vrot.slane %v5126_v4, 2  ;;  %v5180_v48 = vrot.slane %v5167_v5, 2 }
 0x770   :  { %v5128_v37 = vpop.f32.mrf.mxu0  ;;  %v5169_v9 = vpop.f32.mrf.mxu1 }
 0x771   :  { %v5186_v18 = vadd.f32 %v5178_v7, %v4894_v8  ;;  %v5179_v26 = vrot.slane %v5128_v37, 2  ;;  %v5188_v14 = vadd.f32 %v5180_v48, %v4896_v58  ;;  %v5181_v43 = vrot.slane %v5169_v9, 2  ;;  %v14844_v48 = vld [vmem:[#allocation8 + $0x268] ss:$16 sps:$4 sm:$0xff]   ;;  %v14849_v58 = vld [vmem:[#allocation8 + $0x244] ss:$16 sps:$4 sm:$0xff]  }
 0x772   :  { %v16008_v19 = vpop.eup %16007  ;;  %v5130_v46 = vpop.f32.mrf.mxu0 }
 0x773   :  { %v5171_v20 = vpop.f32.mrf.mxu1  ;;  %v16010_v21 = vpop.eup %16009  ;;  %v13030_v13 = vmul.f32 -1.442695, %v5186_v18  ;;  %v5187_v30 = vadd.f32 %v5179_v26, %v4895_v12  ;;  %v13032_v62 = vmul.f32 -1.442695, %v5188_v14  ;;  %v5189_v49 = vadd.f32 %v5181_v43, %v4897_v45  ;;  %v14817_v18 = vld [vmem:[#allocation8 + $0x2e0] ss:$16 sps:$4 sm:$0xff]  }
 0x774   :  { %v16012_v31 = vpop.eup %16011  ;;  %v5131_v34 = vpop.f32.mrf.mxu0  ;;  %v4884_v36 = vmul.f32 %v16010_v21, %v16008_v19  ;;  %v14820_v26 = vld [vmem:[#allocation8 + $0x2e8] ss:$16 sps:$4 sm:$0xff]   ;;  %v14825_v12 = vld [vmem:[#allocation8 + $0x2c4] ss:$16 sps:$4 sm:$0xff]   ;;  %v14828_v46 = vld [vmem:[#allocation8 + $0x2cc] ss:$16 sps:$4 sm:$0xff]  }
 0x775   :  { %v5172_v35 = vpop.f32.mrf.mxu1  ;;  %v4883_v47 = vmul.f32 %v16012_v31, %v4882_v33  ;;  %16013 = vpow2.f32 %v13030_v13  ;;  %v13031_v38 = vmul.f32 -1.442695, %v5187_v30  ;;  %v14823_v20 = vld [vmem:[#allocation8 + $0x2c0] ss:$16 sps:$4 sm:$0xff]   ;;  %v14826_v21 = vld [vmem:[#allocation8 + $0x2c8] ss:$16 sps:$4 sm:$0xff]  }
 0x776   :  { %v14831_v13 = vld [vmem:[#allocation8 + $0x2a4] ss:$16 sps:$4 sm:$0xff]   ;;  %v14834_v30 = vld [vmem:[#allocation8 + $0x2ac] ss:$16 sps:$4 sm:$0xff]   ;;  %v14829_v31 = vld [vmem:[#allocation8 + $0x2a0] ss:$16 sps:$4 sm:$0xff]  }
 0x777   :  { %v4885_v41 = vadd.f32 %v4884_v36, %v4883_v47  ;;  %16015 = vpow2.f32 %v13031_v38  ;;  %v14837_v33 = vld [vmem:[#allocation8 + $0x284] ss:$16 sps:$4 sm:$0xff]   ;;  %v14840_v34 = vld [vmem:[#allocation8 + $0x28c] ss:$16 sps:$4 sm:$0xff]   ;;  %v14835_v35 = vld [vmem:[#allocation8 + $0x280] ss:$16 sps:$4 sm:$0xff]  }
 0x778   :  { %16017 = vrcp.f32 %v4874_v32  ;;  %v14832_v32 = vld [vmem:[#allocation8 + $0x2a8] ss:$16 sps:$4 sm:$0xff]   ;;  %v14843_v36 = vld [vmem:[#allocation8 + $0x264] ss:$16 sps:$4 sm:$0xff]   ;;  %v14846_v38 = vld [vmem:[#allocation8 + $0x26c] ss:$16 sps:$4 sm:$0xff]  }
 0x779   :  { %16019 = vtanh.f32 %v4885_v41  ;;  %4893 = vst [vmem:[#allocation3 + $0x4] sm:$0x3] %v4885_v41  ;;  %v14838_v47 = vld [vmem:[#allocation8 + $0x288] ss:$16 sps:$4 sm:$0xff]   ;;  %v14841_v41 = vld [vmem:[#allocation8 + $0x260] ss:$16 sps:$4 sm:$0xff]  }
 0x77a   :  { %16021 = vpow2.f32 %v13032_v62  ;;  %v14852_v14 = vld [vmem:[#allocation8 + $0x24c] ss:$16 sps:$4 sm:$0xff]   ;;  %v14847_v43 = vld [vmem:[#allocation8 + $0x240] ss:$16 sps:$4 sm:$0xff]   ;;  %v14850_v62 = vld [vmem:[#allocation8 + $0x248] ss:$16 sps:$4 sm:$0xff]  }
 0x77b   :  { %v14855_v45 = vld [vmem:[#allocation8 + $0x224] ss:$16 sps:$4 sm:$0xff]  }
 0x782   :  { %v16014_v40 = vpop.eup %16013 }
 0x783   :  { %v5199_v50 = vadd.f32 1.0, %v16014_v40  ;;  %v14858_v40 = vld [vmem:[#allocation8 + $0x22c] ss:$16 sps:$4 sm:$0xff]  }
 0x784   :  { %v16016_v15 = vpop.eup %16015 }
 0x785   :  { %v16018_v6 = vpop.eup %16017  ;;  %16023 = vrcp.f32 %v5199_v50  ;;  %v5200_v51 = vadd.f32 1.0, %v16016_v15  ;;  %v14856_v50 = vld [vmem:[#allocation8 + $0x228] ss:$16 sps:$4 sm:$0xff]   ;;  %v14861_v15 = vld [vmem:[#allocation8 + $0x204] ss:$16 sps:$4 sm:$0xff]  }
 0x786   :  { %v16020_v52 = vpop.eup %16019  ;;  %16025 = vtanh.f32 %v5189_v49  ;;  %v14853_v49 = vld [vmem:[#allocation8 + $0x220] ss:$16 sps:$4 sm:$0xff]  }
 0x787   :  { %v4887_v53 = vmul.f32 %v16020_v52, %v16018_v6  ;;  %16027 = vrcp.f32 %v5200_v51  ;;  %v16022_v25 = vpop.eup %16021  ;;  %v14864_v6 = vld [vmem:[#allocation8 + $0x20c] ss:$16 sps:$4 sm:$0xff]   ;;  %v14859_v51 = vld [vmem:[#allocation8 + $0x200] ss:$16 sps:$4 sm:$0xff]   ;;  %v14862_v52 = vld [vmem:[#allocation8 + $0x208] ss:$16 sps:$4 sm:$0xff]  }
 0x788   :  { %v5201_v2 = vadd.f32 1.0, %v16022_v25  ;;  %v14867_v25 = vld [vmem:[#allocation5 + $0x2e4] ss:$16 sps:$4 sm:$0xff]  }
 0x789   :  { %4892 = vst [vmem:[#allocation2 + $0x4] sm:$0x3] %v4887_v53 }
 0x78a   :  { %16029 = vrcp.f32 %v5201_v2  ;;  %v14874_v2 = vld [vmem:[#allocation5 + $0x2c8] ss:$16 sps:$4 sm:$0xff]  }
 0x78e   :  { %v16560_v17 = vpop.f32.mrf.mxu0  ;;  %v16562_v54 = vpop.f32.mrf.mxu1 }
 0x790   :  { %v16564_v29 = vpop.f32.mrf.mxu0  ;;  %v16566_v56 = vpop.f32.mrf.mxu1  ;;  %v5834_v53 = vld [vmem:[#allocation2 + $0x4] sm:$0x3] }
 0x791   :  { %v5835_v24 = vpack.c.bf16 %v5834_v53, %v5834_v53 }
 0x792   :  { %v16024_v59 = vpop.eup %16023  ;;  %v5483_v23 = vpop.f32.mrf.mxu0 }
 0x793   :  { %v5524_v60 = vpop.f32.mrf.mxu1  ;;  %v16026_v61 = vpop.eup %16025  ;;  %v14865_v23 = vld [vmem:[#allocation5 + $0x2e0] ss:$16 sps:$4 sm:$0xff]  }
 0x794   :  { %v16028_v10 = vpop.eup %16027  ;;  %v5484_v28 = vpop.f32.mrf.mxu0  ;;  %v5214_v5 = vmul.f32 %v16026_v61, %v16024_v59  ;;  %v14870_v59 = vld [vmem:[#allocation5 + $0x2ec] ss:$16 sps:$4 sm:$0xff]   ;;  %v14868_v60 = vld [vmem:[#allocation5 + $0x2e8] ss:$16 sps:$4 sm:$0xff]   ;;  %v14873_v61 = vld [vmem:[#allocation5 + $0x2c4] ss:$16 sps:$4 sm:$0xff]  }
 0x795   :  { %v5525_v3 = vpop.f32.mrf.mxu1  ;;  %v5213_v4 = vmul.f32 %v16028_v10, %v5211_v63  ;;  %v14876_v63 = vld [vmem:[#allocation5 + $0x2cc] ss:$16 sps:$4 sm:$0xff]   ;;  %v14871_v10 = vld [vmem:[#allocation5 + $0x2c0] ss:$16 sps:$4 sm:$0xff]   ;;  %v14879_v28 = vld [vmem:[#allocation5 + $0x2a4] ss:$16 sps:$4 sm:$0xff]  }
 0x796   :  { %v14882_v3 = vld [vmem:[#allocation5 + $0x2ac] ss:$16 sps:$4 sm:$0xff]  }
 0x797   :  { %v5215_v7 = vadd.f32 %v5214_v5, %v5213_v4  ;;  %v16030_v8 = vpop.eup %16029  ;;  %v14877_v4 = vld [vmem:[#allocation5 + $0x2a0] ss:$16 sps:$4 sm:$0xff]   ;;  %v14880_v5 = vld [vmem:[#allocation5 + $0x2a8] ss:$16 sps:$4 sm:$0xff]  }
 0x799   :  { %16031 = vtanh.f32 %v5215_v7  ;;  %6382 = vst [vmem:[#allocation3 - $0x6] sm:$0xc0] %v5215_v7  ;;  %v14885_v7 = vld [vmem:[#allocation5 + $0x284] ss:$16 sps:$4 sm:$0xff]  }
 0x7a6   :  { %v16032_v37 = vpop.eup %16031 }
 0x7a7   :  { %v5217_v9 = vmul.f32 %v16032_v37, %v16030_v8  ;;  %v14888_v8 = vld [vmem:[#allocation5 + $0x28c] ss:$16 sps:$4 sm:$0xff]   ;;  %v14883_v37 = vld [vmem:[#allocation5 + $0x280] ss:$16 sps:$4 sm:$0xff]  }
 0x7a9   :  { %v5218_v11 = vpack.c.bf16 %v5217_v9, %v5217_v9  ;;  %6381 = vst [vmem:[#allocation2 - $0x6] sm:$0xc0] %v5217_v9  ;;  %v14886_v9 = vld [vmem:[#allocation5 + $0x288] ss:$16 sps:$4 sm:$0xff]  }
 0x7ab   :  { %v5528_v19 = vrot.slane %v5218_v11, 3  ;;  %v14891_v11 = vld [vmem:[#allocation5 + $0x264] ss:$16 sps:$4 sm:$0xff]  }
 0x7ad   :  { %5723 = vmatmul.mubr.bf16.vlgmr.msra.gmra.mxu0 %v5528_v19  ;;  %5764 = vmatmul.mubr.bf16.vlgmr.msra.gmra.mxu1 %v5528_v19  ;;  %v14894_v19 = vld [vmem:[#allocation5 + $0x26c] ss:$16 sps:$4 sm:$0xff]  }
 0x7ae   :  { %6029 = vmatpush1.bf16.msra.mxu0 %v14817_v18  ;;  %6070 = vmatpush1.bf16.msra.mxu1 %v14820_v26  ;;  %v14889_v18 = vld [vmem:[#allocation5 + $0x260] ss:$16 sps:$4 sm:$0xff]   ;;  %v14892_v26 = vld [vmem:[#allocation5 + $0x268] ss:$16 sps:$4 sm:$0xff]  }
 0x7af   :  { %6030 = vmatprep.subr.bf16.mxu0 %v14825_v12  ;;  %6071 = vmatprep.subr.bf16.mxu1 %v14828_v46  ;;  %v14897_v12 = vld [vmem:[#allocation5 + $0x244] ss:$16 sps:$4 sm:$0xff]   ;;  %v14900_v46 = vld [vmem:[#allocation5 + $0x24c] ss:$16 sps:$4 sm:$0xff]  }
 0x7b0   :  { %6060 = vmatprep.mubr.bf16.mxu0 %v16327_v0  ;;  %6101 = vmatprep.mubr.bf16.mxu1 %v16327_v0 }
 0x7b2   :  { %6031 = vmatpush1.bf16.msra.mxu0 %v14823_v20  ;;  %6072 = vmatpush1.bf16.msra.mxu1 %v14826_v21  ;;  %v14895_v20 = vld [vmem:[#allocation5 + $0x240] ss:$16 sps:$4 sm:$0xff]   ;;  %v14898_v21 = vld [vmem:[#allocation5 + $0x248] ss:$16 sps:$4 sm:$0xff]  }
 0x7b3   :  { %6032 = vmatprep.subr.bf16.mxu0 %v14831_v13  ;;  %6073 = vmatprep.subr.bf16.mxu1 %v14834_v30  ;;  %v14903_v13 = vld [vmem:[#allocation5 + $0x224] ss:$16 sps:$4 sm:$0xff]   ;;  %v14906_v30 = vld [vmem:[#allocation5 + $0x22c] ss:$16 sps:$4 sm:$0xff]  }
 0x7b6   :  { %6033 = vmatpush1.bf16.msra.mxu0 %v14829_v31  ;;  %6074 = vmatpush1.bf16.msra.mxu1 %v14832_v32  ;;  %v14901_v31 = vld [vmem:[#allocation5 + $0x220] ss:$16 sps:$4 sm:$0xff]   ;;  %v14904_v32 = vld [vmem:[#allocation5 + $0x228] ss:$16 sps:$4 sm:$0xff]  }
 0x7b7   :  { %6034 = vmatprep.subr.bf16.mxu0 %v14837_v33  ;;  %6075 = vmatprep.subr.bf16.mxu1 %v14840_v34  ;;  %v14909_v33 = vld [vmem:[#allocation5 + $0x204] ss:$16 sps:$4 sm:$0xff]   ;;  %v14912_v34 = vld [vmem:[#allocation5 + $0x20c] ss:$16 sps:$4 sm:$0xff]  }
 0x7ba   :  { %6035 = vmatpush1.bf16.msra.mxu0 %v14835_v35  ;;  %6076 = vmatpush1.bf16.msra.mxu1 %v14838_v47  ;;  %v14907_v35 = vld [vmem:[#allocation5 + $0x200] ss:$16 sps:$4 sm:$0xff]   ;;  %v14910_v47 = vld [vmem:[#allocation5 + $0x208] ss:$16 sps:$4 sm:$0xff]  }
 0x7bb   :  { %6036 = vmatprep.subr.bf16.mxu0 %v14843_v36  ;;  %6077 = vmatprep.subr.bf16.mxu1 %v14846_v38  ;;  %v14915_v36 = vld [vmem:[#allocation8 + $0xe4] ss:$16 sps:$4 sm:$0xff]   ;;  %v14918_v38 = vld [vmem:[#allocation8 + $0xec] ss:$16 sps:$4 sm:$0xff]  }
 0x7be   :  { %6037 = vmatpush1.bf16.msra.mxu0 %v14841_v41  ;;  %6078 = vmatpush1.bf16.msra.mxu1 %v14844_v48 }
 0x7bf   :  { %6038 = vmatprep.subr.bf16.mxu0 %v14849_v58  ;;  %6079 = vmatprep.subr.bf16.mxu1 %v14852_v14 }
 0x7c2   :  { %6039 = vmatpush1.bf16.msra.mxu0 %v14847_v43  ;;  %6080 = vmatpush1.bf16.msra.mxu1 %v14850_v62 }
 0x7c3   :  { %6040 = vmatprep.subr.bf16.mxu0 %v14855_v45  ;;  %6081 = vmatprep.subr.bf16.mxu1 %v14858_v40 }
 0x7c6   :  { %6041 = vmatpush1.bf16.msra.mxu0 %v14853_v49  ;;  %6082 = vmatpush1.bf16.msra.mxu1 %v14856_v50 }
 0x7c7   :  { %6042 = vmatprep.subr.bf16.mxu0 %v14861_v15  ;;  %6083 = vmatprep.subr.bf16.mxu1 %v14864_v6 }
 0x7ca   :  { %6043 = vmatpush1.bf16.msra.mxu0 %v14859_v51  ;;  %6084 = vmatpush1.bf16.msra.mxu1 %v14862_v52 }
 0x7cb   :  { %6270 = vmatprep.subr.bf16.mxu0 %v14867_v25  ;;  %6311 = vmatprep.subr.bf16.mxu1 %v14870_v59 }
 0x7cd   :  { %6061 = vmatmul.mubr.bf16.vlgmr.msra.gmra.mxu0 %v5835_v24  ;;  %6102 = vmatmul.mubr.bf16.vlgmr.msra.gmra.mxu1 %v5835_v24 }
 0x7ce   :  { %6302 = vmatprep.mubr.bf16.mxu0 %v16327_v0  ;;  %6343 = vmatprep.mubr.bf16.mxu1 %v16327_v0 }
 0x7cf   :  { %6271 = vmatpush1.bf16.msra.mxu0 %v14865_v23  ;;  %6312 = vmatpush1.bf16.msra.mxu1 %v14868_v60 }
 0x7d0   :  { %6272 = vmatprep.subr.bf16.mxu0 %v14873_v61  ;;  %6313 = vmatprep.subr.bf16.mxu1 %v14876_v63 }
 0x7d3   :  { %6273 = vmatpush1.bf16.msra.mxu0 %v14871_v10  ;;  %6314 = vmatpush1.bf16.msra.mxu1 %v14874_v2 }
 0x7d4   :  { %6274 = vmatprep.subr.bf16.mxu0 %v14879_v28  ;;  %6315 = vmatprep.subr.bf16.mxu1 %v14882_v3 }
 0x7d7   :  { %6275 = vmatpush1.bf16.msra.mxu0 %v14877_v4  ;;  %6316 = vmatpush1.bf16.msra.mxu1 %v14880_v5 }
 0x7d8   :  { %6276 = vmatprep.subr.bf16.mxu0 %v14885_v7  ;;  %6317 = vmatprep.subr.bf16.mxu1 %v14888_v8 }
 0x7db   :  { %6277 = vmatpush1.bf16.msra.mxu0 %v14883_v37  ;;  %6318 = vmatpush1.bf16.msra.mxu1 %v14886_v9  ;;  %v5795_v37 = vld [vmem:[#allocation3 + $0x2] sm:$0x3] }
 0x7dc   :  { %6278 = vmatprep.subr.bf16.mxu0 %v14891_v11  ;;  %6319 = vmatprep.subr.bf16.mxu1 %v14894_v19 }
 0x7df   :  { %6279 = vmatpush1.bf16.msra.mxu0 %v14889_v18  ;;  %6320 = vmatpush1.bf16.msra.mxu1 %v14892_v26 }
 0x7e0   :  { %6280 = vmatprep.subr.bf16.mxu0 %v14897_v12  ;;  %6321 = vmatprep.subr.bf16.mxu1 %v14900_v46 }
 0x7e3   :  { %6281 = vmatpush1.bf16.msra.mxu0 %v14895_v20  ;;  %6322 = vmatpush1.bf16.msra.mxu1 %v14898_v21  ;;  %v14913_v21 = vld [vmem:[#allocation8 + $0xe0] ss:$16 sps:$4 sm:$0xff]  }
 0x7e4   :  { %6282 = vmatprep.subr.bf16.mxu0 %v14903_v13  ;;  %6323 = vmatprep.subr.bf16.mxu1 %v14906_v30  ;;  %v14916_v13 = vld [vmem:[#allocation8 + $0xe8] ss:$16 sps:$4 sm:$0xff]  }
 0x7e7   :  { %6283 = vmatpush1.bf16.msra.mxu0 %v14901_v31  ;;  %6324 = vmatpush1.bf16.msra.mxu1 %v14904_v32  ;;  %v14921_v31 = vld [vmem:[#allocation8 + $0xc4] ss:$16 sps:$4 sm:$0xff]   ;;  %v14924_v32 = vld [vmem:[#allocation8 + $0xcc] ss:$16 sps:$4 sm:$0xff]  }
 0x7e8   :  { %6284 = vmatprep.subr.bf16.mxu0 %v14909_v33  ;;  %6325 = vmatprep.subr.bf16.mxu1 %v14912_v34  ;;  %v14919_v33 = vld [vmem:[#allocation8 + $0xc0] ss:$16 sps:$4 sm:$0xff]   ;;  %v14922_v34 = vld [vmem:[#allocation8 + $0xc8] ss:$16 sps:$4 sm:$0xff]  }
 0x7eb   :  { %6285 = vmatpush1.bf16.msra.mxu0 %v14907_v35  ;;  %6326 = vmatpush1.bf16.msra.mxu1 %v14910_v47  ;;  %v14927_v35 = vld [vmem:[#allocation8 + $0xa4] ss:$16 sps:$4 sm:$0xff]   ;;  %v14930_v47 = vld [vmem:[#allocation8 + $0xac] ss:$16 sps:$4 sm:$0xff]  }
 0x7ec   :  { %6585 = vmatprep.subr.bf16.mxu0 %v14915_v36  ;;  %6626 = vmatprep.subr.bf16.mxu1 %v14918_v38  ;;  %v14925_v36 = vld [vmem:[#allocation8 + $0xa0] ss:$16 sps:$4 sm:$0xff]   ;;  %v14928_v38 = vld [vmem:[#allocation8 + $0xa8] ss:$16 sps:$4 sm:$0xff]  }
 0x86d   :  { %v5724_v41 = vpop.f32.mrf.mxu0  ;;  %v5765_v48 = vpop.f32.mrf.mxu1 }
 0x86e   :  { %v5725_v58 = vadd.f32 %v5724_v41, %v16560_v17  ;;  %v5766_v53 = vadd.f32 %v5765_v48, %v16562_v54  ;;  %v14933_v41 = vld [vmem:[#allocation8 + $0x84] ss:$16 sps:$4 sm:$0xff]   ;;  %v14936_v48 = vld [vmem:[#allocation8 + $0x8c] ss:$16 sps:$4 sm:$0xff]  }
 0x86f   :  { %v5726_v14 = vpop.f32.mrf.mxu0  ;;  %v5767_v43 = vpop.f32.mrf.mxu1 }
 0x870   :  { %v5772_v62 = vadd.f32 %v5725_v58, %v16420_v39  ;;  %v5727_v45 = vadd.f32 %v5726_v14, %v16564_v29  ;;  %v5774_v17 = vadd.f32 %v5766_v53, %v16430_v55  ;;  %v5768_v24 = vadd.f32 %v5767_v43, %v16566_v56  ;;  %v14931_v58 = vld [vmem:[#allocation8 + $0x80] ss:$16 sps:$4 sm:$0xff]   ;;  %v14934_v14 = vld [vmem:[#allocation8 + $0x88] ss:$16 sps:$4 sm:$0xff]   ;;  %v14939_v43 = vld [vmem:[#allocation8 + $0x64] ss:$16 sps:$4 sm:$0xff]  }
 0x871   :  { %v5728_v40 = vpop.f32.mrf.mxu0  ;;  %v5769_v49 = vpop.f32.mrf.mxu1  ;;  %v14949_v53 = vld [vmem:[#allocation8 + $0x20] ss:$16 sps:$4 sm:$0xff]  }
 0x872   :  { %v13097_v50 = vmul.f32 -1.442695, %v5772_v62  ;;  %v5773_v15 = vadd.f32 %v5727_v45, %v16423_v42  ;;  %v13099_v25 = vmul.f32 -1.442695, %v5774_v17  ;;  %v5775_v29 = vadd.f32 %v5768_v24, %v16435_v57  ;;  %v14942_v62 = vld [vmem:[#allocation8 + $0x6c] ss:$16 sps:$4 sm:$0xff]  }
 0x873   :  { %v5729_v6 = vpop.f32.mrf.mxu0  ;;  %v5770_v51 = vpop.f32.mrf.mxu1  ;;  %v14937_v45 = vld [vmem:[#allocation8 + $0x60] ss:$16 sps:$4 sm:$0xff]   ;;  %v14940_v40 = vld [vmem:[#allocation8 + $0x68] ss:$16 sps:$4 sm:$0xff]   ;;  %v14945_v49 = vld [vmem:[#allocation8 + $0x44] ss:$16 sps:$4 sm:$0xff]  }
 0x874   :  { %16033 = vpow2.f32 %v13097_v50  ;;  %v13098_v52 = vmul.f32 -1.442695, %v5773_v15  ;;  %v14948_v50 = vld [vmem:[#allocation8 + $0x4c] ss:$16 sps:$4 sm:$0xff]   ;;  %v14943_v15 = vld [vmem:[#allocation8 + $0x40] ss:$16 sps:$4 sm:$0xff]  }
 0x875   :  { %v14946_v6 = vld [vmem:[#allocation8 + $0x48] ss:$16 sps:$4 sm:$0xff]   ;;  %v14951_v51 = vld [vmem:[#allocation8 + $0x24] ss:$16 sps:$4 sm:$0xff]  }
 0x876   :  { %16035 = vpow2.f32 %v13098_v52  ;;  %v14954_v52 = vld [vmem:[#allocation8 + $0x2c] ss:$16 sps:$4 sm:$0xff]   ;;  %v14952_v17 = vld [vmem:[#allocation8 + $0x28] ss:$16 sps:$4 sm:$0xff]   ;;  %v14957_v24 = vld [vmem:[#allocation8 + $0x4] ss:$16 sps:$4 sm:$0xff]  }
 0x877   :  { %16037 = vpow2.f32 %v13099_v25  ;;  %v14960_v25 = vld [vmem:[#allocation8 + $0xc] ss:$16 sps:$4 sm:$0xff]  }
 0x881   :  { %v16034_v59 = vpop.eup %16033 }
 0x882   :  { %v5785_v23 = vadd.f32 1.0, %v16034_v59  ;;  %v14955_v59 = vld [vmem:[#allocation8] ss:$16 sps:$4 sm:$0xff]  }
 0x883   :  { %v16036_v60 = vpop.eup %16035 }
 0x884   :  { %16039 = vrcp.f32 %v5785_v23  ;;  %v5786_v61 = vadd.f32 1.0, %v16036_v60  ;;  %v16038_v56 = vpop.eup %16037  ;;  %v14963_v23 = vld [vmem:[#allocation8 + $0x1e4] ss:$16 sps:$4 sm:$0xff]   ;;  %v14966_v60 = vld [vmem:[#allocation8 + $0x1ec] ss:$16 sps:$4 sm:$0xff]  }
 0x885   :  { %16041 = vtanh.f32 %v5775_v29  ;;  %v5787_v8 = vadd.f32 1.0, %v16038_v56  ;;  %v14958_v29 = vld [vmem:[#allocation8 + $0x8] ss:$16 sps:$4 sm:$0xff]   ;;  %v14961_v56 = vld [vmem:[#allocation8 + $0x1e0] ss:$16 sps:$4 sm:$0xff]  }
 0x886   :  { %16043 = vrcp.f32 %v5786_v61  ;;  %v6391_v61 = vld [vmem:[#allocation2] sm:$0x3] }
 0x887   :  { %16045 = vrcp.f32 %v5787_v8  ;;  %v14970_v8 = vld [vmem:[#allocation8 + $0x1c8] ss:$16 sps:$4 sm:$0xff]  }
 0x88d   :  { %v16580_v63 = vpop.f32.mrf.mxu0  ;;  %v16582_v10 = vpop.f32.mrf.mxu1 }
 0x88f   :  { %v16584_v54 = vpop.f32.mrf.mxu0  ;;  %v16586_v2 = vpop.f32.mrf.mxu1 }
 0x891   :  { %v16040_v28 = vpop.eup %16039  ;;  %v6066_v3 = vpop.f32.mrf.mxu0 }
 0x892   :  { %v6107_v4 = vpop.f32.mrf.mxu1  ;;  %v16042_v5 = vpop.eup %16041  ;;  %v6392_v3 = vpack.c.bf16 %v6391_v61, %v6391_v61  ;;  %v15035_v61 = vld [vmem:[#allocation5 + $0x164] ss:$16 sps:$4 sm:$0xff]  }
 0x893   :  { %v16044_v7 = vpop.eup %16043  ;;  %v6067_v9 = vpop.f32.mrf.mxu0  ;;  %v5797_v26 = vmul.f32 %v16042_v5, %v16040_v28  ;;  %v14964_v28 = vld [vmem:[#allocation8 + $0x1e8] ss:$16 sps:$4 sm:$0xff]   ;;  %v14969_v4 = vld [vmem:[#allocation8 + $0x1c4] ss:$16 sps:$4 sm:$0xff]   ;;  %v14972_v5 = vld [vmem:[#allocation8 + $0x1cc] ss:$16 sps:$4 sm:$0xff]  }
 0x894   :  { %v6108_v11 = vpop.f32.mrf.mxu1  ;;  %v5796_v18 = vmul.f32 %v16044_v7, %v5795_v37  ;;  %v16046_v12 = vpop.eup %16045  ;;  %v14967_v7 = vld [vmem:[#allocation8 + $0x1c0] ss:$16 sps:$4 sm:$0xff]   ;;  %v14975_v37 = vld [vmem:[#allocation8 + $0x1a4] ss:$16 sps:$4 sm:$0xff]   ;;  %v14978_v9 = vld [vmem:[#allocation8 + $0x1ac] ss:$16 sps:$4 sm:$0xff]  }
 0x895   :  { %v14973_v11 = vld [vmem:[#allocation8 + $0x1a0] ss:$16 sps:$4 sm:$0xff]  }
 0x896   :  { %v5798_v19 = vadd.f32 %v5797_v26, %v5796_v18  ;;  %v14976_v18 = vld [vmem:[#allocation8 + $0x1a8] ss:$16 sps:$4 sm:$0xff]   ;;  %v14981_v26 = vld [vmem:[#allocation8 + $0x184] ss:$16 sps:$4 sm:$0xff]  }
 0x898   :  { %16047 = vtanh.f32 %v5798_v19  ;;  %6384 = vst [vmem:[#allocation3 + $0x2] sm:$0x3] %v5798_v19  ;;  %v14984_v19 = vld [vmem:[#allocation8 + $0x18c] ss:$16 sps:$4 sm:$0xff]  }
 0x8a5   :  { %v16048_v46 = vpop.eup %16047 }
 0x8a6   :  { %v5800_v20 = vmul.f32 %v16048_v46, %v16046_v12  ;;  %v14979_v12 = vld [vmem:[#allocation8 + $0x180] ss:$16 sps:$4 sm:$0xff]   ;;  %v14982_v46 = vld [vmem:[#allocation8 + $0x188] ss:$16 sps:$4 sm:$0xff]  }
 0x8a8   :  { %v5801_v30 = vpack.c.bf16 %v5800_v20, %v5800_v20  ;;  %6383 = vst [vmem:[#allocation2 + $0x2] sm:$0x3] %v5800_v20  ;;  %v14987_v20 = vld [vmem:[#allocation8 + $0x164] ss:$16 sps:$4 sm:$0xff]  }
 0x8aa   :  { %6303 = vmatmul.mubr.bf16.vlgmr.msra.gmra.mxu0 %v5801_v30  ;;  %6344 = vmatmul.mubr.bf16.vlgmr.msra.gmra.mxu1 %v5801_v30  ;;  %v14988_v30 = vld [vmem:[#allocation8 + $0x168] ss:$16 sps:$4 sm:$0xff]  }
 0x8ab   :  { %6586 = vmatpush1.bf16.msra.mxu0 %v14913_v21  ;;  %6627 = vmatpush1.bf16.msra.mxu1 %v14916_v13  ;;  %v14990_v21 = vld [vmem:[#allocation8 + $0x16c] ss:$16 sps:$4 sm:$0xff]   ;;  %v14985_v13 = vld [vmem:[#allocation8 + $0x160] ss:$16 sps:$4 sm:$0xff]  }
 0x8ac   :  { %6587 = vmatprep.subr.bf16.mxu0 %v14921_v31  ;;  %6628 = vmatprep.subr.bf16.mxu1 %v14924_v32  ;;  %v14993_v31 = vld [vmem:[#allocation8 + $0x144] ss:$16 sps:$4 sm:$0xff]   ;;  %v14996_v32 = vld [vmem:[#allocation8 + $0x14c] ss:$16 sps:$4 sm:$0xff]  }
 0x8ad   :  { %6617 = vmatprep.mubr.bf16.mxu0 %v16327_v0  ;;  %6658 = vmatprep.mubr.bf16.mxu1 %v16327_v0 }
 0x8af   :  { %6588 = vmatpush1.bf16.msra.mxu0 %v14919_v33  ;;  %6629 = vmatpush1.bf16.msra.mxu1 %v14922_v34  ;;  %v14991_v33 = vld [vmem:[#allocation8 + $0x140] ss:$16 sps:$4 sm:$0xff]   ;;  %v14994_v34 = vld [vmem:[#allocation8 + $0x148] ss:$16 sps:$4 sm:$0xff]  }
 0x8b0   :  { %6589 = vmatprep.subr.bf16.mxu0 %v14927_v35  ;;  %6630 = vmatprep.subr.bf16.mxu1 %v14930_v47  ;;  %v14999_v35 = vld [vmem:[#allocation8 + $0x124] ss:$16 sps:$4 sm:$0xff]   ;;  %v15002_v47 = vld [vmem:[#allocation8 + $0x12c] ss:$16 sps:$4 sm:$0xff]  }
 0x8b3   :  { %6590 = vmatpush1.bf16.msra.mxu0 %v14925_v36  ;;  %6631 = vmatpush1.bf16.msra.mxu1 %v14928_v38  ;;  %v14997_v36 = vld [vmem:[#allocation8 + $0x120] ss:$16 sps:$4 sm:$0xff]   ;;  %v15000_v38 = vld [vmem:[#allocation8 + $0x128] ss:$16 sps:$4 sm:$0xff]  }
 0x8b4   :  { %6591 = vmatprep.subr.bf16.mxu0 %v14933_v41  ;;  %6632 = vmatprep.subr.bf16.mxu1 %v14936_v48  ;;  %v15005_v41 = vld [vmem:[#allocation8 + $0x104] ss:$16 sps:$4 sm:$0xff]   ;;  %v15008_v48 = vld [vmem:[#allocation8 + $0x10c] ss:$16 sps:$4 sm:$0xff]  }
 0x8b7   :  { %6592 = vmatpush1.bf16.msra.mxu0 %v14931_v58  ;;  %6633 = vmatpush1.bf16.msra.mxu1 %v14934_v14  ;;  %v15003_v58 = vld [vmem:[#allocation8 + $0x100] ss:$16 sps:$4 sm:$0xff]   ;;  %v15006_v14 = vld [vmem:[#allocation8 + $0x108] ss:$16 sps:$4 sm:$0xff]  }
 0x8b8   :  { %6593 = vmatprep.subr.bf16.mxu0 %v14939_v43  ;;  %6634 = vmatprep.subr.bf16.mxu1 %v14942_v62  ;;  %v6729_v43 = vld [vmem:[#allocation2 + $0x2] sm:$0x3] }
 0x8b9   :  { %v6730_v62 = vpack.c.bf16 %v6729_v43, %v6729_v43 }
 0x8bb   :  { %6594 = vmatpush1.bf16.msra.mxu0 %v14937_v45  ;;  %6635 = vmatpush1.bf16.msra.mxu1 %v14940_v40  ;;  %v15009_v45 = vld [vmem:[#allocation5 + $0x1e0] ss:$16 sps:$4 sm:$0xff]   ;;  %v15011_v40 = vld [vmem:[#allocation5 + $0x1e4] ss:$16 sps:$4 sm:$0xff]  }
 0x8bc   :  { %6595 = vmatprep.subr.bf16.mxu0 %v14945_v49  ;;  %6636 = vmatprep.subr.bf16.mxu1 %v14948_v50  ;;  %v15012_v49 = vld [vmem:[#allocation5 + $0x1e8] ss:$16 sps:$4 sm:$0xff]   ;;  %v15014_v50 = vld [vmem:[#allocation5 + $0x1ec] ss:$16 sps:$4 sm:$0xff]  }
 0x8bf   :  { %6596 = vmatpush1.bf16.msra.mxu0 %v14943_v15  ;;  %6637 = vmatpush1.bf16.msra.mxu1 %v14946_v6  ;;  %v15017_v15 = vld [vmem:[#allocation5 + $0x1c4] ss:$16 sps:$4 sm:$0xff]   ;;  %v15020_v6 = vld [vmem:[#allocation5 + $0x1cc] ss:$16 sps:$4 sm:$0xff]  }
 0x8c0   :  { %6597 = vmatprep.subr.bf16.mxu0 %v14951_v51  ;;  %6638 = vmatprep.subr.bf16.mxu1 %v14954_v52  ;;  %v15015_v51 = vld [vmem:[#allocation5 + $0x1c0] ss:$16 sps:$4 sm:$0xff]   ;;  %v15018_v52 = vld [vmem:[#allocation5 + $0x1c8] ss:$16 sps:$4 sm:$0xff]  }
 0x8c3   :  { %6598 = vmatpush1.bf16.msra.mxu0 %v14949_v53  ;;  %6639 = vmatpush1.bf16.msra.mxu1 %v14952_v17  ;;  %v15023_v53 = vld [vmem:[#allocation5 + $0x1a4] ss:$16 sps:$4 sm:$0xff]   ;;  %v15026_v17 = vld [vmem:[#allocation5 + $0x1ac] ss:$16 sps:$4 sm:$0xff]  }
 0x8c4   :  { %6599 = vmatprep.subr.bf16.mxu0 %v14957_v24  ;;  %6640 = vmatprep.subr.bf16.mxu1 %v14960_v25  ;;  %v15021_v24 = vld [vmem:[#allocation5 + $0x1a0] ss:$16 sps:$4 sm:$0xff]   ;;  %v15024_v25 = vld [vmem:[#allocation5 + $0x1a8] ss:$16 sps:$4 sm:$0xff]  }
 0x8c7   :  { %6600 = vmatpush1.bf16.msra.mxu0 %v14955_v59  ;;  %6641 = vmatpush1.bf16.msra.mxu1 %v14958_v29  ;;  %v15029_v59 = vld [vmem:[#allocation5 + $0x184] ss:$16 sps:$4 sm:$0xff]   ;;  %v15032_v29 = vld [vmem:[#allocation5 + $0x18c] ss:$16 sps:$4 sm:$0xff]  }
 0x8c8   :  { %6923 = vmatprep.subr.bf16.mxu0 %v14963_v23  ;;  %6964 = vmatprep.subr.bf16.mxu1 %v14966_v60  ;;  %v15027_v23 = vld [vmem:[#allocation5 + $0x180] ss:$16 sps:$4 sm:$0xff]   ;;  %v15030_v60 = vld [vmem:[#allocation5 + $0x188] ss:$16 sps:$4 sm:$0xff]  }
 0x8ca   :  { %6618 = vmatmul.mubr.bf16.vlgmr.msra.gmra.mxu0 %v6392_v3  ;;  %6659 = vmatmul.mubr.bf16.vlgmr.msra.gmra.mxu1 %v6392_v3  ;;  %v15036_v3 = vld [vmem:[#allocation5 + $0x168] ss:$16 sps:$4 sm:$0xff]  }
 0x8cb   :  { %6924 = vmatpush1.bf16.msra.mxu0 %v14961_v56  ;;  %6965 = vmatpush1.bf16.msra.mxu1 %v14964_v28  ;;  %v15038_v56 = vld [vmem:[#allocation5 + $0x16c] ss:$16 sps:$4 sm:$0xff]   ;;  %v15033_v28 = vld [vmem:[#allocation5 + $0x160] ss:$16 sps:$4 sm:$0xff]  }
 0x8cc   :  { %6925 = vmatprep.subr.bf16.mxu0 %v14969_v4  ;;  %6966 = vmatprep.subr.bf16.mxu1 %v14972_v5  ;;  %v15041_v4 = vld [vmem:[#allocation5 + $0x144] ss:$16 sps:$4 sm:$0xff]   ;;  %v15044_v5 = vld [vmem:[#allocation5 + $0x14c] ss:$16 sps:$4 sm:$0xff]  }
 0x8cd   :  { %6955 = vmatprep.mubr.bf16.mxu0 %v16327_v0  ;;  %6996 = vmatprep.mubr.bf16.mxu1 %v16327_v0 }
 0x8cf   :  { %6926 = vmatpush1.bf16.msra.mxu0 %v14967_v7  ;;  %6967 = vmatpush1.bf16.msra.mxu1 %v14970_v8  ;;  %v15039_v7 = vld [vmem:[#allocation5 + $0x140] ss:$16 sps:$4 sm:$0xff]   ;;  %v15042_v8 = vld [vmem:[#allocation5 + $0x148] ss:$16 sps:$4 sm:$0xff]  }
 0x8d0   :  { %6927 = vmatprep.subr.bf16.mxu0 %v14975_v37  ;;  %6968 = vmatprep.subr.bf16.mxu1 %v14978_v9  ;;  %v15047_v37 = vld [vmem:[#allocation5 + $0x124] ss:$16 sps:$4 sm:$0xff]   ;;  %v15050_v9 = vld [vmem:[#allocation5 + $0x12c] ss:$16 sps:$4 sm:$0xff]  }
 0x8d3   :  { %6928 = vmatpush1.bf16.msra.mxu0 %v14973_v11  ;;  %6969 = vmatpush1.bf16.msra.mxu1 %v14976_v18  ;;  %v15045_v11 = vld [vmem:[#allocation5 + $0x120] ss:$16 sps:$4 sm:$0xff]   ;;  %v15048_v18 = vld [vmem:[#allocation5 + $0x128] ss:$16 sps:$4 sm:$0xff]  }
 0x8d4   :  { %6929 = vmatprep.subr.bf16.mxu0 %v14981_v26  ;;  %6970 = vmatprep.subr.bf16.mxu1 %v14984_v19  ;;  %v15053_v26 = vld [vmem:[#allocation5 + $0x104] ss:$16 sps:$4 sm:$0xff]   ;;  %v15056_v19 = vld [vmem:[#allocation5 + $0x10c] ss:$16 sps:$4 sm:$0xff]  }
 0x8d7   :  { %6930 = vmatpush1.bf16.msra.mxu0 %v14979_v12  ;;  %6971 = vmatpush1.bf16.msra.mxu1 %v14982_v46  ;;  %v15051_v12 = vld [vmem:[#allocation5 + $0x100] ss:$16 sps:$4 sm:$0xff]   ;;  %v15054_v46 = vld [vmem:[#allocation5 + $0x108] ss:$16 sps:$4 sm:$0xff]  }
 0x8d8   :  { %6931 = vmatprep.subr.bf16.mxu0 %v14987_v20  ;;  %6972 = vmatprep.subr.bf16.mxu1 %v14990_v21  ;;  %v15059_v20 = vld [vmem:[#allocation8 + $0x2e4] ss:$16 sps:$4 sm:$0xff]   ;;  %v15062_v21 = vld [vmem:[#allocation8 + $0x2ec] ss:$16 sps:$4 sm:$0xff]  }
 0x8db   :  { %6932 = vmatpush1.bf16.msra.mxu0 %v14985_v13  ;;  %6973 = vmatpush1.bf16.msra.mxu1 %v14988_v30 }
 0x8dc   :  { %6933 = vmatprep.subr.bf16.mxu0 %v14993_v31  ;;  %6974 = vmatprep.subr.bf16.mxu1 %v14996_v32 }
 0x8df   :  { %6934 = vmatpush1.bf16.msra.mxu0 %v14991_v33  ;;  %6975 = vmatpush1.bf16.msra.mxu1 %v14994_v34 }
 0x8e0   :  { %6935 = vmatprep.subr.bf16.mxu0 %v14999_v35  ;;  %6976 = vmatprep.subr.bf16.mxu1 %v15002_v47 }
 0x8e3   :  { %6936 = vmatpush1.bf16.msra.mxu0 %v14997_v36  ;;  %6977 = vmatpush1.bf16.msra.mxu1 %v15000_v38 }
 0x8e4   :  { %6937 = vmatprep.subr.bf16.mxu0 %v15005_v41  ;;  %6978 = vmatprep.subr.bf16.mxu1 %v15008_v48 }
 0x8e7   :  { %6938 = vmatpush1.bf16.msra.mxu0 %v15003_v58  ;;  %6979 = vmatpush1.bf16.msra.mxu1 %v15006_v14 }
 0x8e8   :  { %7165 = vmatprep.subr.bf16.mxu0 %v15011_v40  ;;  %7206 = vmatprep.subr.bf16.mxu1 %v15014_v50 }
 0x8ea   :  { %6956 = vmatmul.mubr.bf16.vlgmr.msra.gmra.mxu0 %v6730_v62  ;;  %6997 = vmatmul.mubr.bf16.vlgmr.msra.gmra.mxu1 %v6730_v62 }
 0x8eb   :  { %7197 = vmatprep.mubr.bf16.mxu0 %v16327_v0  ;;  %7238 = vmatprep.mubr.bf16.mxu1 %v16327_v0 }
 0x8ec   :  { %7166 = vmatpush1.bf16.msra.mxu0 %v15009_v45  ;;  %7207 = vmatpush1.bf16.msra.mxu1 %v15012_v49 }
 0x8ed   :  { %7167 = vmatprep.subr.bf16.mxu0 %v15017_v15  ;;  %7208 = vmatprep.subr.bf16.mxu1 %v15020_v6  ;;  %v6387_v6 = vld [vmem:[#allocation4 + $0x8] sm:$0x3] }
 0x8f0   :  { %7168 = vmatpush1.bf16.msra.mxu0 %v15015_v51  ;;  %7209 = vmatpush1.bf16.msra.mxu1 %v15018_v52 }
 0x8f1   :  { %7169 = vmatprep.subr.bf16.mxu0 %v15023_v53  ;;  %7210 = vmatprep.subr.bf16.mxu1 %v15026_v17 }
 0x8f4   :  { %7170 = vmatpush1.bf16.msra.mxu0 %v15021_v24  ;;  %7211 = vmatpush1.bf16.msra.mxu1 %v15024_v25 }
 0x8f5   :  { %7171 = vmatprep.subr.bf16.mxu0 %v15029_v59  ;;  %7212 = vmatprep.subr.bf16.mxu1 %v15032_v29 }
 0x8f8   :  { %7172 = vmatpush1.bf16.msra.mxu0 %v15027_v23  ;;  %7213 = vmatpush1.bf16.msra.mxu1 %v15030_v60 }
 0x8f9   :  { %7173 = vmatprep.subr.bf16.mxu0 %v15035_v61  ;;  %7214 = vmatprep.subr.bf16.mxu1 %v15038_v56 }
 0x8fc   :  { %7174 = vmatpush1.bf16.msra.mxu0 %v15033_v28  ;;  %7215 = vmatpush1.bf16.msra.mxu1 %v15036_v3 }
 0x8fd   :  { %7175 = vmatprep.subr.bf16.mxu0 %v15041_v4  ;;  %7216 = vmatprep.subr.bf16.mxu1 %v15044_v5  ;;  %v6375_v4 = vld [vmem:[#allocation3 + $0x4] sm:$0x3] }
 0x900   :  { %7176 = vmatpush1.bf16.msra.mxu0 %v15039_v7  ;;  %7217 = vmatpush1.bf16.msra.mxu1 %v15042_v8 }
 0x901   :  { %7177 = vmatprep.subr.bf16.mxu0 %v15047_v37  ;;  %7218 = vmatprep.subr.bf16.mxu1 %v15050_v9 }
 0x904   :  { %7178 = vmatpush1.bf16.msra.mxu0 %v15045_v11  ;;  %7219 = vmatpush1.bf16.msra.mxu1 %v15048_v18  ;;  %v6389_v11 = vld [vmem:[#allocation4 + $0x28] sm:$0x3] }
 0x905   :  { %7179 = vmatprep.subr.bf16.mxu0 %v15053_v26  ;;  %7220 = vmatprep.subr.bf16.mxu1 %v15056_v19  ;;  %v6390_v19 = vld [vmem:[#allocation4 + $0x38] sm:$0x3] }
 0x908   :  { %7180 = vmatpush1.bf16.msra.mxu0 %v15051_v12  ;;  %7221 = vmatpush1.bf16.msra.mxu1 %v15054_v46 }
 0x909   :  { %7503 = vmatprep.subr.bf16.mxu0 %v15059_v20  ;;  %7544 = vmatprep.subr.bf16.mxu1 %v15062_v21 }
 0x96a   :  { %v6304_v13 = vpop.f32.mrf.mxu0  ;;  %v6345_v30 = vpop.f32.mrf.mxu1 }
 0x96b   :  { %v6305_v31 = vadd.f32 %v6304_v13, %v16580_v63  ;;  %v6346_v43 = vadd.f32 %v6345_v30, %v16582_v10  ;;  %v6388_v10 = vld [vmem:[#allocation4 + $0x20] sm:$0x3] }
 0x96c   :  { %v6306_v32 = vpop.f32.mrf.mxu0  ;;  %v6347_v33 = vpop.f32.mrf.mxu1 }
 0x96d   :  { %v6352_v34 = vadd.f32 %v6305_v31, %v16457_v22  ;;  %v6307_v35 = vadd.f32 %v6306_v32, %v16584_v54  ;;  %v6354_v63 = vadd.f32 %v6346_v43, %v16467_v16  ;;  %v6348_v62 = vadd.f32 %v6347_v33, %v16586_v2 }
 0x96e   :  { %v6308_v47 = vpop.f32.mrf.mxu0  ;;  %v6349_v36 = vpop.f32.mrf.mxu1 }
 0x96f   :  { %v13164_v38 = vmul.f32 -1.442695, %v6352_v34  ;;  %v6353_v41 = vadd.f32 %v6307_v35, %v16460_v27  ;;  %v13166_v45 = vmul.f32 -1.442695, %v6354_v63  ;;  %v6355_v54 = vadd.f32 %v6348_v62, %v16472_v44 }
 0x970   :  { %v6309_v48 = vpop.f32.mrf.mxu0  ;;  %v6350_v58 = vpop.f32.mrf.mxu1 }
 0x971   :  { %16049 = vpow2.f32 %v13164_v38  ;;  %v13165_v14 = vmul.f32 -1.442695, %v6353_v41 }
 0x973   :  { %16051 = vpow2.f32 %v13165_v14  ;;  %v6690_v14 = vld [vmem:[#allocation3] sm:$0x3] }
 0x974   :  { %16053 = vpow2.f32 %v13166_v45 }
 0x97e   :  { %v16050_v40 = vpop.eup %16049 }
 0x97f   :  { %v6365_v49 = vadd.f32 1.0, %v16050_v40 }
 0x980   :  { %v16052_v50 = vpop.eup %16051 }
 0x981   :  { %16055 = vrcp.f32 %v6365_v49  ;;  %v6366_v15 = vadd.f32 1.0, %v16052_v50  ;;  %v16054_v25 = vpop.eup %16053 }
 0x982   :  { %16057 = vtanh.f32 %v6355_v54  ;;  %v6367_v3 = vadd.f32 1.0, %v16054_v25  ;;  %v15066_v25 = vld [vmem:[#allocation8 + $0x2c8] ss:$16 sps:$4 sm:$0xff]  }
 0x983   :  { %16059 = vrcp.f32 %v6366_v15 }
 0x98a   :  { %v6619_v51 = vpop.f32.mrf.mxu0  ;;  %v6660_v52 = vpop.f32.mrf.mxu1 }
 0x98b   :  { %v6667_v53 = vadd.f32 %v6619_v51, %v6387_v6  ;;  %v6669_v18 = vadd.f32 %v6660_v52, %v6389_v11  ;;  %v15057_v51 = vld [vmem:[#allocation8 + $0x2e0] ss:$16 sps:$4 sm:$0xff]   ;;  %v15060_v52 = vld [vmem:[#allocation8 + $0x2e8] ss:$16 sps:$4 sm:$0xff]  }
 0x98c   :  { %v6621_v17 = vpop.f32.mrf.mxu0  ;;  %v6662_v24 = vpop.f32.mrf.mxu1  ;;  %v15090_v11 = vld [vmem:[#allocation8 + $0x248] ss:$16 sps:$4 sm:$0xff]  }
 0x98d   :  { %v13199_v2 = vmul.f32 -1.442695, %v6667_v53  ;;  %v6668_v59 = vadd.f32 %v6621_v17, %v6388_v10  ;;  %v13201_v26 = vmul.f32 -1.442695, %v6669_v18  ;;  %v6670_v46 = vadd.f32 %v6662_v24, %v6390_v19  ;;  %v15065_v10 = vld [vmem:[#allocation8 + $0x2c4] ss:$16 sps:$4 sm:$0xff]  }
 0x98e   :  { %v16056_v29 = vpop.eup %16055  ;;  %v6623_v23 = vpop.f32.mrf.mxu0  ;;  %v15068_v17 = vld [vmem:[#allocation8 + $0x2cc] ss:$16 sps:$4 sm:$0xff]   ;;  %v15063_v24 = vld [vmem:[#allocation8 + $0x2c0] ss:$16 sps:$4 sm:$0xff]   ;;  %v15095_v18 = vld [vmem:[#allocation8 + $0x224] ss:$16 sps:$4 sm:$0xff]  }
 0x98f   :  { %v6664_v60 = vpop.f32.mrf.mxu1  ;;  %v16058_v61 = vpop.eup %16057  ;;  %16061 = vpow2.f32 %v13199_v2  ;;  %v13200_v56 = vmul.f32 -1.442695, %v6668_v59  ;;  %v15071_v2 = vld [vmem:[#allocation8 + $0x2a4] ss:$16 sps:$4 sm:$0xff]   ;;  %v15074_v59 = vld [vmem:[#allocation8 + $0x2ac] ss:$16 sps:$4 sm:$0xff]  }
 0x990   :  { %v16060_v28 = vpop.eup %16059  ;;  %v6624_v5 = vpop.f32.mrf.mxu0  ;;  %v6377_v37 = vmul.f32 %v16058_v61, %v16056_v29  ;;  %v15069_v29 = vld [vmem:[#allocation8 + $0x2a0] ss:$16 sps:$4 sm:$0xff]   ;;  %v15072_v23 = vld [vmem:[#allocation8 + $0x2a8] ss:$16 sps:$4 sm:$0xff]   ;;  %v15077_v60 = vld [vmem:[#allocation8 + $0x284] ss:$16 sps:$4 sm:$0xff]  }
 0x991   :  { %v6665_v7 = vpop.f32.mrf.mxu1  ;;  %v6376_v8 = vmul.f32 %v16060_v28, %v6375_v4  ;;  %16063 = vpow2.f32 %v13200_v56  ;;  %v15080_v61 = vld [vmem:[#allocation8 + $0x28c] ss:$16 sps:$4 sm:$0xff]   ;;  %v15075_v56 = vld [vmem:[#allocation8 + $0x280] ss:$16 sps:$4 sm:$0xff]   ;;  %v15078_v28 = vld [vmem:[#allocation8 + $0x288] ss:$16 sps:$4 sm:$0xff]  }
 0x992   :  { %16065 = vrcp.f32 %v6367_v3  ;;  %v15083_v3 = vld [vmem:[#allocation8 + $0x264] ss:$16 sps:$4 sm:$0xff]   ;;  %v15086_v4 = vld [vmem:[#allocation8 + $0x26c] ss:$16 sps:$4 sm:$0xff]   ;;  %v15081_v5 = vld [vmem:[#allocation8 + $0x260] ss:$16 sps:$4 sm:$0xff]  }
 0x993   :  { %v6378_v9 = vadd.f32 %v6377_v37, %v6376_v8  ;;  %v15084_v7 = vld [vmem:[#allocation8 + $0x268] ss:$16 sps:$4 sm:$0xff]   ;;  %v15089_v8 = vld [vmem:[#allocation8 + $0x244] ss:$16 sps:$4 sm:$0xff]   ;;  %v15092_v37 = vld [vmem:[#allocation8 + $0x24c] ss:$16 sps:$4 sm:$0xff]  }
 0x994   :  { %v15093_v19 = vld [vmem:[#allocation8 + $0x220] ss:$16 sps:$4 sm:$0xff]  }
 0x995   :  { %16067 = vtanh.f32 %v6378_v9  ;;  %6386 = vst [vmem:[#allocation3 + $0x4] sm:$0x3] %v6378_v9  ;;  %v15087_v9 = vld [vmem:[#allocation8 + $0x240] ss:$16 sps:$4 sm:$0xff]  }
 0x996   :  { %16069 = vpow2.f32 %v13201_v26  ;;  %v15098_v26 = vld [vmem:[#allocation8 + $0x22c] ss:$16 sps:$4 sm:$0xff]  }
 0x99c   :  { %v16062_v12 = vpop.eup %16061 }
 0x99d   :  { %v6680_v20 = vadd.f32 1.0, %v16062_v12  ;;  %v15096_v12 = vld [vmem:[#allocation8 + $0x228] ss:$16 sps:$4 sm:$0xff]  }
 0x99e   :  { %v16064_v21 = vpop.eup %16063 }
 0x99f   :  { %16071 = vrcp.f32 %v6680_v20  ;;  %v6681_v13 = vadd.f32 1.0, %v16064_v21  ;;  %v16066_v30 = vpop.eup %16065  ;;  %v15104_v20 = vld [vmem:[#allocation8 + $0x20c] ss:$16 sps:$4 sm:$0xff]   ;;  %v15099_v21 = vld [vmem:[#allocation8 + $0x200] ss:$16 sps:$4 sm:$0xff]  }
 0x9a0   :  { %16073 = vtanh.f32 %v6670_v46  ;;  %v15101_v46 = vld [vmem:[#allocation8 + $0x204] ss:$16 sps:$4 sm:$0xff]  }
 0x9a1   :  { %16075 = vrcp.f32 %v6681_v13  ;;  %v15102_v13 = vld [vmem:[#allocation8 + $0x208] ss:$16 sps:$4 sm:$0xff]  }
 0x9a2   :  { %v16068_v31 = vpop.eup %16067 }
 0x9a3   :  { %v6380_v32 = vmul.f32 %v16068_v31, %v16066_v30  ;;  %v16070_v35 = vpop.eup %16069 }
 0x9a4   :  { %v6682_v58 = vadd.f32 1.0, %v16070_v35  ;;  %v15107_v35 = vld [vmem:[#allocation5 + $0x2e4] ss:$16 sps:$4 sm:$0xff]  }
 0x9a5   :  { %6385 = vst [vmem:[#allocation2 + $0x4] sm:$0x3] %v6380_v32  ;;  %v15105_v32 = vld [vmem:[#allocation5 + $0x2e0] ss:$16 sps:$4 sm:$0xff]  }
 0x9a6   :  { %16077 = vrcp.f32 %v6682_v58  ;;  %v15116_v58 = vld [vmem:[#allocation5 + $0x2cc] ss:$16 sps:$4 sm:$0xff]  }
 0x9aa   :  { %v16602_v33 = vpop.f32.mrf.mxu0  ;;  %v16604_v34 = vpop.f32.mrf.mxu1 }
 0x9ac   :  { %v16072_v47 = vpop.eup %16071  ;;  %v16606_v36 = vpop.f32.mrf.mxu0  ;;  %v7309_v30 = vld [vmem:[#allocation2 + $0x4] sm:$0x3] }
 0x9ad   :  { %v16608_v38 = vpop.f32.mrf.mxu1  ;;  %v16074_v41 = vpop.eup %16073  ;;  %v7310_v31 = vpack.c.bf16 %v7309_v30, %v7309_v30 }
 0x9ae   :  { %v16076_v48 = vpop.eup %16075  ;;  %v6961_v43 = vpop.f32.mrf.mxu0  ;;  %v6692_v45 = vmul.f32 %v16074_v41, %v16072_v47  ;;  %v15108_v47 = vld [vmem:[#allocation5 + $0x2e8] ss:$16 sps:$4 sm:$0xff]   ;;  %v15110_v41 = vld [vmem:[#allocation5 + $0x2ec] ss:$16 sps:$4 sm:$0xff]  }
 0x9af   :  { %v7002_v63 = vpop.f32.mrf.mxu1  ;;  %v6691_v62 = vmul.f32 %v16076_v48, %v6690_v14  ;;  %v15113_v48 = vld [vmem:[#allocation5 + $0x2c4] ss:$16 sps:$4 sm:$0xff]   ;;  %v15111_v14 = vld [vmem:[#allocation5 + $0x2c0] ss:$16 sps:$4 sm:$0xff]   ;;  %v15114_v43 = vld [vmem:[#allocation5 + $0x2c8] ss:$16 sps:$4 sm:$0xff]  }
 0x9b0   :  { %v6962_v40 = vpop.f32.mrf.mxu0  ;;  %v15119_v63 = vld [vmem:[#allocation5 + $0x2a4] ss:$16 sps:$4 sm:$0xff]  }
 0x9b1   :  { %v7003_v54 = vpop.f32.mrf.mxu1  ;;  %v6693_v49 = vadd.f32 %v6692_v45, %v6691_v62  ;;  %v15122_v62 = vld [vmem:[#allocation5 + $0x2ac] ss:$16 sps:$4 sm:$0xff]   ;;  %v15117_v45 = vld [vmem:[#allocation5 + $0x2a0] ss:$16 sps:$4 sm:$0xff]   ;;  %v15120_v40 = vld [vmem:[#allocation5 + $0x2a8] ss:$16 sps:$4 sm:$0xff]  }
 0x9b2   :  { %v15125_v54 = vld [vmem:[#allocation5 + $0x284] ss:$16 sps:$4 sm:$0xff]  }
 0x9b3   :  { %16079 = vtanh.f32 %v6693_v49  ;;  %7857 = vst [vmem:[#allocation3] sm:$0x3] %v6693_v49  ;;  %v16078_v50 = vpop.eup %16077  ;;  %v15128_v49 = vld [vmem:[#allocation5 + $0x28c] ss:$16 sps:$4 sm:$0xff]  }
 0x9c0   :  { %v16080_v15 = vpop.eup %16079 }
 0x9c1   :  { %v6695_v6 = vmul.f32 %v16080_v15, %v16078_v50  ;;  %v15123_v50 = vld [vmem:[#allocation5 + $0x280] ss:$16 sps:$4 sm:$0xff]   ;;  %v15126_v15 = vld [vmem:[#allocation5 + $0x288] ss:$16 sps:$4 sm:$0xff]  }
 0x9c3   :  { %v6696_v53 = vpack.c.bf16 %v6695_v6, %v6695_v6  ;;  %7856 = vst [vmem:[#allocation2] sm:$0x3] %v6695_v6  ;;  %v15131_v6 = vld [vmem:[#allocation5 + $0x264] ss:$16 sps:$4 sm:$0xff]  }
 0x9c5   :  { %7198 = vmatmul.mubr.bf16.vlgmr.msra.gmra.mxu0 %v6696_v53  ;;  %7239 = vmatmul.mubr.bf16.vlgmr.msra.gmra.mxu1 %v6696_v53  ;;  %v15132_v53 = vld [vmem:[#allocation5 + $0x268] ss:$16 sps:$4 sm:$0xff]  }
 0x9c6   :  { %7504 = vmatpush1.bf16.msra.mxu0 %v15057_v51  ;;  %7545 = vmatpush1.bf16.msra.mxu1 %v15060_v52  ;;  %v15134_v51 = vld [vmem:[#allocation5 + $0x26c] ss:$16 sps:$4 sm:$0xff]   ;;  %v15129_v52 = vld [vmem:[#allocation5 + $0x260] ss:$16 sps:$4 sm:$0xff]  }
 0x9c7   :  { %7505 = vmatprep.subr.bf16.mxu0 %v15065_v10  ;;  %7546 = vmatprep.subr.bf16.mxu1 %v15068_v17  ;;  %v15137_v10 = vld [vmem:[#allocation5 + $0x244] ss:$16 sps:$4 sm:$0xff]   ;;  %v15140_v17 = vld [vmem:[#allocation5 + $0x24c] ss:$16 sps:$4 sm:$0xff]  }
 0x9c8   :  { %7535 = vmatprep.mubr.bf16.mxu0 %v16327_v0  ;;  %7576 = vmatprep.mubr.bf16.mxu1 %v16327_v0 }
 0x9ca   :  { %7506 = vmatpush1.bf16.msra.mxu0 %v15063_v24  ;;  %7547 = vmatpush1.bf16.msra.mxu1 %v15066_v25  ;;  %v15135_v24 = vld [vmem:[#allocation5 + $0x240] ss:$16 sps:$4 sm:$0xff]   ;;  %v15138_v25 = vld [vmem:[#allocation5 + $0x248] ss:$16 sps:$4 sm:$0xff]  }
 0x9cb   :  { %7507 = vmatprep.subr.bf16.mxu0 %v15071_v2  ;;  %7548 = vmatprep.subr.bf16.mxu1 %v15074_v59  ;;  %v15143_v2 = vld [vmem:[#allocation5 + $0x224] ss:$16 sps:$4 sm:$0xff]   ;;  %v15146_v59 = vld [vmem:[#allocation5 + $0x22c] ss:$16 sps:$4 sm:$0xff]  }
 0x9ce   :  { %7508 = vmatpush1.bf16.msra.mxu0 %v15069_v29  ;;  %7549 = vmatpush1.bf16.msra.mxu1 %v15072_v23  ;;  %v15141_v29 = vld [vmem:[#allocation5 + $0x220] ss:$16 sps:$4 sm:$0xff]   ;;  %v15144_v23 = vld [vmem:[#allocation5 + $0x228] ss:$16 sps:$4 sm:$0xff]  }
 0x9cf   :  { %7509 = vmatprep.subr.bf16.mxu0 %v15077_v60  ;;  %7550 = vmatprep.subr.bf16.mxu1 %v15080_v61  ;;  %v15149_v60 = vld [vmem:[#allocation5 + $0x204] ss:$16 sps:$4 sm:$0xff]   ;;  %v15152_v61 = vld [vmem:[#allocation5 + $0x20c] ss:$16 sps:$4 sm:$0xff]  }
 0x9d2   :  { %7510 = vmatpush1.bf16.msra.mxu0 %v15075_v56  ;;  %7551 = vmatpush1.bf16.msra.mxu1 %v15078_v28  ;;  %v15147_v56 = vld [vmem:[#allocation5 + $0x200] ss:$16 sps:$4 sm:$0xff]   ;;  %v15150_v28 = vld [vmem:[#allocation5 + $0x208] ss:$16 sps:$4 sm:$0xff]  }
 0x9d3   :  { %7511 = vmatprep.subr.bf16.mxu0 %v15083_v3  ;;  %7552 = vmatprep.subr.bf16.mxu1 %v15086_v4  ;;  %v15155_v3 = vld [vmem:[#allocation8 + $0xe4] ss:$16 sps:$4 sm:$0xff]   ;;  %v15158_v4 = vld [vmem:[#allocation8 + $0xec] ss:$16 sps:$4 sm:$0xff]  }
 0x9d6   :  { %7512 = vmatpush1.bf16.msra.mxu0 %v15081_v5  ;;  %7553 = vmatpush1.bf16.msra.mxu1 %v15084_v7 }
 0x9d7   :  { %7513 = vmatprep.subr.bf16.mxu0 %v15089_v8  ;;  %7554 = vmatprep.subr.bf16.mxu1 %v15092_v37 }
 0x9da   :  { %7514 = vmatpush1.bf16.msra.mxu0 %v15087_v9  ;;  %7555 = vmatpush1.bf16.msra.mxu1 %v15090_v11 }
 0x9db   :  { %7515 = vmatprep.subr.bf16.mxu0 %v15095_v18  ;;  %7556 = vmatprep.subr.bf16.mxu1 %v15098_v26 }
 0x9de   :  { %7516 = vmatpush1.bf16.msra.mxu0 %v15093_v19  ;;  %7557 = vmatpush1.bf16.msra.mxu1 %v15096_v12 }
 0x9df   :  { %7517 = vmatprep.subr.bf16.mxu0 %v15101_v46  ;;  %7558 = vmatprep.subr.bf16.mxu1 %v15104_v20 }
 0x9e2   :  { %7518 = vmatpush1.bf16.msra.mxu0 %v15099_v21  ;;  %7559 = vmatpush1.bf16.msra.mxu1 %v15102_v13 }
 0x9e3   :  { %7745 = vmatprep.subr.bf16.mxu0 %v15107_v35  ;;  %7786 = vmatprep.subr.bf16.mxu1 %v15110_v41 }
 0x9e5   :  { %7536 = vmatmul.mubr.bf16.vlgmr.msra.gmra.mxu0 %v7310_v31  ;;  %7577 = vmatmul.mubr.bf16.vlgmr.msra.gmra.mxu1 %v7310_v31 }
 0x9e6   :  { %7777 = vmatprep.mubr.bf16.mxu0 %v16327_v0  ;;  %7818 = vmatprep.mubr.bf16.mxu1 %v16327_v0 }
 0x9e7   :  { %7746 = vmatpush1.bf16.msra.mxu0 %v15105_v32  ;;  %7787 = vmatpush1.bf16.msra.mxu1 %v15108_v47 }
 0x9e8   :  { %7747 = vmatprep.subr.bf16.mxu0 %v15113_v48  ;;  %7788 = vmatprep.subr.bf16.mxu1 %v15116_v58 }
 0x9eb   :  { %7748 = vmatpush1.bf16.msra.mxu0 %v15111_v14  ;;  %7789 = vmatpush1.bf16.msra.mxu1 %v15114_v43 }
 0x9ec   :  { %7749 = vmatprep.subr.bf16.mxu0 %v15119_v63  ;;  %7790 = vmatprep.subr.bf16.mxu1 %v15122_v62 }
 0x9ef   :  { %7750 = vmatpush1.bf16.msra.mxu0 %v15117_v45  ;;  %7791 = vmatpush1.bf16.msra.mxu1 %v15120_v40 }
 0x9f0   :  { %7751 = vmatprep.subr.bf16.mxu0 %v15125_v54  ;;  %7792 = vmatprep.subr.bf16.mxu1 %v15128_v49 }
 0x9f3   :  { %7752 = vmatpush1.bf16.msra.mxu0 %v15123_v50  ;;  %7793 = vmatpush1.bf16.msra.mxu1 %v15126_v15  ;;  %v7270_v50 = vld [vmem:[#allocation3 + $0x2] sm:$0x3] }
 0x9f4   :  { %7753 = vmatprep.subr.bf16.mxu0 %v15131_v6  ;;  %7794 = vmatprep.subr.bf16.mxu1 %v15134_v51 }
 0x9f7   :  { %7754 = vmatpush1.bf16.msra.mxu0 %v15129_v52  ;;  %7795 = vmatpush1.bf16.msra.mxu1 %v15132_v53 }
 0x9f8   :  { %7755 = vmatprep.subr.bf16.mxu0 %v15137_v10  ;;  %7796 = vmatprep.subr.bf16.mxu1 %v15140_v17 }
 0x9fb   :  { %7756 = vmatpush1.bf16.msra.mxu0 %v15135_v24  ;;  %7797 = vmatpush1.bf16.msra.mxu1 %v15138_v25  ;;  %v15153_v25 = vld [vmem:[#allocation8 + $0xe0] ss:$16 sps:$4 sm:$0xff]  }
 0x9fc   :  { %7757 = vmatprep.subr.bf16.mxu0 %v15143_v2  ;;  %7798 = vmatprep.subr.bf16.mxu1 %v15146_v59  ;;  %v15156_v2 = vld [vmem:[#allocation8 + $0xe8] ss:$16 sps:$4 sm:$0xff]  }
 0x9ff   :  { %7758 = vmatpush1.bf16.msra.mxu0 %v15141_v29  ;;  %7799 = vmatpush1.bf16.msra.mxu1 %v15144_v23  ;;  %v15161_v29 = vld [vmem:[#allocation8 + $0xc4] ss:$16 sps:$4 sm:$0xff]   ;;  %v15164_v23 = vld [vmem:[#allocation8 + $0xcc] ss:$16 sps:$4 sm:$0xff]  }
 0xa00   :  { %7759 = vmatprep.subr.bf16.mxu0 %v15149_v60  ;;  %7800 = vmatprep.subr.bf16.mxu1 %v15152_v61  ;;  %v15159_v60 = vld [vmem:[#allocation8 + $0xc0] ss:$16 sps:$4 sm:$0xff]   ;;  %v15162_v61 = vld [vmem:[#allocation8 + $0xc8] ss:$16 sps:$4 sm:$0xff]  }
 0xa03   :  { %7760 = vmatpush1.bf16.msra.mxu0 %v15147_v56  ;;  %7801 = vmatpush1.bf16.msra.mxu1 %v15150_v28  ;;  %v15167_v56 = vld [vmem:[#allocation8 + $0xa4] ss:$16 sps:$4 sm:$0xff]   ;;  %v15170_v28 = vld [vmem:[#allocation8 + $0xac] ss:$16 sps:$4 sm:$0xff]  }
 0xa04   :  { %8060 = vmatprep.subr.bf16.mxu0 %v15155_v3  ;;  %8101 = vmatprep.subr.bf16.mxu1 %v15158_v4  ;;  %v15165_v3 = vld [vmem:[#allocation8 + $0xa0] ss:$16 sps:$4 sm:$0xff]   ;;  %v15168_v4 = vld [vmem:[#allocation8 + $0xa8] ss:$16 sps:$4 sm:$0xff]  }
 0xa85   :  { %v7199_v5 = vpop.f32.mrf.mxu0  ;;  %v7240_v7 = vpop.f32.mrf.mxu1 }
 0xa86   :  { %v7200_v8 = vadd.f32 %v7199_v5, %v16602_v33  ;;  %v7241_v30 = vadd.f32 %v7240_v7, %v16604_v34  ;;  %v15173_v5 = vld [vmem:[#allocation8 + $0x84] ss:$16 sps:$4 sm:$0xff]   ;;  %v15176_v7 = vld [vmem:[#allocation8 + $0x8c] ss:$16 sps:$4 sm:$0xff]  }
 0xa87   :  { %v7201_v37 = vpop.f32.mrf.mxu0  ;;  %v7242_v9 = vpop.f32.mrf.mxu1 }
 0xa88   :  { %v7247_v11 = vadd.f32 %v7200_v8, %v16420_v39  ;;  %v7202_v18 = vadd.f32 %v7201_v37, %v16606_v36  ;;  %v7249_v33 = vadd.f32 %v7241_v30, %v16430_v55  ;;  %v7243_v31 = vadd.f32 %v7242_v9, %v16608_v38  ;;  %v15171_v8 = vld [vmem:[#allocation8 + $0x80] ss:$16 sps:$4 sm:$0xff]   ;;  %v15174_v37 = vld [vmem:[#allocation8 + $0x88] ss:$16 sps:$4 sm:$0xff]   ;;  %v15179_v9 = vld [vmem:[#allocation8 + $0x64] ss:$16 sps:$4 sm:$0xff]  }
 0xa89   :  { %v7203_v26 = vpop.f32.mrf.mxu0  ;;  %v7244_v19 = vpop.f32.mrf.mxu1  ;;  %v15189_v30 = vld [vmem:[#allocation8 + $0x20] ss:$16 sps:$4 sm:$0xff]  }
 0xa8a   :  { %v13266_v12 = vmul.f32 -1.442695, %v7247_v11  ;;  %v7248_v46 = vadd.f32 %v7202_v18, %v16423_v42  ;;  %v13268_v32 = vmul.f32 -1.442695, %v7249_v33  ;;  %v7250_v36 = vadd.f32 %v7243_v31, %v16435_v57  ;;  %v15182_v11 = vld [vmem:[#allocation8 + $0x6c] ss:$16 sps:$4 sm:$0xff]  }
 0xa8b   :  { %v7204_v20 = vpop.f32.mrf.mxu0  ;;  %v7245_v21 = vpop.f32.mrf.mxu1  ;;  %v15177_v18 = vld [vmem:[#allocation8 + $0x60] ss:$16 sps:$4 sm:$0xff]   ;;  %v15180_v26 = vld [vmem:[#allocation8 + $0x68] ss:$16 sps:$4 sm:$0xff]   ;;  %v15185_v19 = vld [vmem:[#allocation8 + $0x44] ss:$16 sps:$4 sm:$0xff]  }
 0xa8c   :  { %16081 = vpow2.f32 %v13266_v12  ;;  %v13267_v13 = vmul.f32 -1.442695, %v7248_v46  ;;  %v15188_v12 = vld [vmem:[#allocation8 + $0x4c] ss:$16 sps:$4 sm:$0xff]   ;;  %v15183_v46 = vld [vmem:[#allocation8 + $0x40] ss:$16 sps:$4 sm:$0xff]  }
 0xa8d   :  { %v15186_v20 = vld [vmem:[#allocation8 + $0x48] ss:$16 sps:$4 sm:$0xff]   ;;  %v15191_v21 = vld [vmem:[#allocation8 + $0x24] ss:$16 sps:$4 sm:$0xff]  }
 0xa8e   :  { %16083 = vpow2.f32 %v13267_v13  ;;  %v15194_v13 = vld [vmem:[#allocation8 + $0x2c] ss:$16 sps:$4 sm:$0xff]   ;;  %v15192_v33 = vld [vmem:[#allocation8 + $0x28] ss:$16 sps:$4 sm:$0xff]   ;;  %v15197_v31 = vld [vmem:[#allocation8 + $0x4] ss:$16 sps:$4 sm:$0xff]  }
 0xa8f   :  { %16085 = vpow2.f32 %v13268_v32  ;;  %v15200_v32 = vld [vmem:[#allocation8 + $0xc] ss:$16 sps:$4 sm:$0xff]  }
 0xa99   :  { %v16082_v35 = vpop.eup %16081 }
 0xa9a   :  { %v7260_v47 = vadd.f32 1.0, %v16082_v35  ;;  %v15195_v35 = vld [vmem:[#allocation8] ss:$16 sps:$4 sm:$0xff]  }
 0xa9b   :  { %v16084_v41 = vpop.eup %16083 }
 0xa9c   :  { %16087 = vrcp.f32 %v7260_v47  ;;  %v7261_v48 = vadd.f32 1.0, %v16084_v41  ;;  %v16086_v38 = vpop.eup %16085  ;;  %v15203_v47 = vld [vmem:[#allocation8 + $0x1e4] ss:$16 sps:$4 sm:$0xff]   ;;  %v15206_v41 = vld [vmem:[#allocation8 + $0x1ec] ss:$16 sps:$4 sm:$0xff]  }
 0xa9d   :  { %16089 = vtanh.f32 %v7250_v36  ;;  %v7262_v49 = vadd.f32 1.0, %v16086_v38  ;;  %v15198_v36 = vld [vmem:[#allocation8 + $0x8] ss:$16 sps:$4 sm:$0xff]   ;;  %v15201_v38 = vld [vmem:[#allocation8 + $0x1e0] ss:$16 sps:$4 sm:$0xff]  }
 0xa9e   :  { %16091 = vrcp.f32 %v7261_v48  ;;  %v7866_v48 = vld [vmem:[#allocation2] sm:$0x3] }
 0xa9f   :  { %16093 = vrcp.f32 %v7262_v49  ;;  %v15210_v49 = vld [vmem:[#allocation8 + $0x1c8] ss:$16 sps:$4 sm:$0xff]  }
 0xaa5   :  { %v16622_v58 = vpop.f32.mrf.mxu0  ;;  %v16624_v14 = vpop.f32.mrf.mxu1 }
 0xaa7   :  { %v16626_v34 = vpop.f32.mrf.mxu0  ;;  %v16628_v43 = vpop.f32.mrf.mxu1 }
 0xaa9   :  { %v16088_v63 = vpop.eup %16087  ;;  %v7541_v62 = vpop.f32.mrf.mxu0 }
 0xaaa   :  { %v7582_v45 = vpop.f32.mrf.mxu1  ;;  %v16090_v40 = vpop.eup %16089  ;;  %v7867_v62 = vpack.c.bf16 %v7866_v48, %v7866_v48  ;;  %v15275_v48 = vld [vmem:[#allocation5 + $0x164] ss:$16 sps:$4 sm:$0xff]  }
 0xaab   :  { %v16092_v54 = vpop.eup %16091  ;;  %v7542_v15 = vpop.f32.mrf.mxu0  ;;  %v7272_v52 = vmul.f32 %v16090_v40, %v16088_v63  ;;  %v15204_v63 = vld [vmem:[#allocation8 + $0x1e8] ss:$16 sps:$4 sm:$0xff]   ;;  %v15209_v45 = vld [vmem:[#allocation8 + $0x1c4] ss:$16 sps:$4 sm:$0xff]   ;;  %v15212_v40 = vld [vmem:[#allocation8 + $0x1cc] ss:$16 sps:$4 sm:$0xff]  }
 0xaac   :  { %v7583_v6 = vpop.f32.mrf.mxu1  ;;  %v7271_v51 = vmul.f32 %v16092_v54, %v7270_v50  ;;  %v16094_v10 = vpop.eup %16093  ;;  %v15207_v54 = vld [vmem:[#allocation8 + $0x1c0] ss:$16 sps:$4 sm:$0xff]   ;;  %v15215_v50 = vld [vmem:[#allocation8 + $0x1a4] ss:$16 sps:$4 sm:$0xff]   ;;  %v15218_v15 = vld [vmem:[#allocation8 + $0x1ac] ss:$16 sps:$4 sm:$0xff]  }
 0xaad   :  { %v15213_v6 = vld [vmem:[#allocation8 + $0x1a0] ss:$16 sps:$4 sm:$0xff]  }
 0xaae   :  { %v7273_v53 = vadd.f32 %v7272_v52, %v7271_v51  ;;  %v15216_v51 = vld [vmem:[#allocation8 + $0x1a8] ss:$16 sps:$4 sm:$0xff]   ;;  %v15221_v52 = vld [vmem:[#allocation8 + $0x184] ss:$16 sps:$4 sm:$0xff]  }
 0xab0   :  { %16095 = vtanh.f32 %v7273_v53  ;;  %7859 = vst [vmem:[#allocation3 + $0x2] sm:$0x3] %v7273_v53  ;;  %v15224_v53 = vld [vmem:[#allocation8 + $0x18c] ss:$16 sps:$4 sm:$0xff]  }
 0xabd   :  { %v16096_v17 = vpop.eup %16095 }
 0xabe   :  { %v7275_v24 = vmul.f32 %v16096_v17, %v16094_v10  ;;  %v15219_v10 = vld [vmem:[#allocation8 + $0x180] ss:$16 sps:$4 sm:$0xff]   ;;  %v15222_v17 = vld [vmem:[#allocation8 + $0x188] ss:$16 sps:$4 sm:$0xff]  }
 0xac0   :  { %v7276_v59 = vpack.c.bf16 %v7275_v24, %v7275_v24  ;;  %7858 = vst [vmem:[#allocation2 + $0x2] sm:$0x3] %v7275_v24  ;;  %v15227_v24 = vld [vmem:[#allocation8 + $0x164] ss:$16 sps:$4 sm:$0xff]  }
 0xac2   :  { %7778 = vmatmul.mubr.bf16.vlgmr.msra.gmra.mxu0 %v7276_v59  ;;  %7819 = vmatmul.mubr.bf16.vlgmr.msra.gmra.mxu1 %v7276_v59  ;;  %v15228_v59 = vld [vmem:[#allocation8 + $0x168] ss:$16 sps:$4 sm:$0xff]  }
 0xac3   :  { %8061 = vmatpush1.bf16.msra.mxu0 %v15153_v25  ;;  %8102 = vmatpush1.bf16.msra.mxu1 %v15156_v2  ;;  %v15230_v25 = vld [vmem:[#allocation8 + $0x16c] ss:$16 sps:$4 sm:$0xff]   ;;  %v15225_v2 = vld [vmem:[#allocation8 + $0x160] ss:$16 sps:$4 sm:$0xff]  }
 0xac4   :  { %8062 = vmatprep.subr.bf16.mxu0 %v15161_v29  ;;  %8103 = vmatprep.subr.bf16.mxu1 %v15164_v23  ;;  %v15233_v29 = vld [vmem:[#allocation8 + $0x144] ss:$16 sps:$4 sm:$0xff]   ;;  %v15236_v23 = vld [vmem:[#allocation8 + $0x14c] ss:$16 sps:$4 sm:$0xff]  }
 0xac5   :  { %8092 = vmatprep.mubr.bf16.mxu0 %v16327_v0  ;;  %8133 = vmatprep.mubr.bf16.mxu1 %v16327_v0 }
 0xac7   :  { %8063 = vmatpush1.bf16.msra.mxu0 %v15159_v60  ;;  %8104 = vmatpush1.bf16.msra.mxu1 %v15162_v61  ;;  %v15231_v60 = vld [vmem:[#allocation8 + $0x140] ss:$16 sps:$4 sm:$0xff]   ;;  %v15234_v61 = vld [vmem:[#allocation8 + $0x148] ss:$16 sps:$4 sm:$0xff]  }
 0xac8   :  { %8064 = vmatprep.subr.bf16.mxu0 %v15167_v56  ;;  %8105 = vmatprep.subr.bf16.mxu1 %v15170_v28  ;;  %v15239_v56 = vld [vmem:[#allocation8 + $0x124] ss:$16 sps:$4 sm:$0xff]   ;;  %v15242_v28 = vld [vmem:[#allocation8 + $0x12c] ss:$16 sps:$4 sm:$0xff]  }
 0xacb   :  { %8065 = vmatpush1.bf16.msra.mxu0 %v15165_v3  ;;  %8106 = vmatpush1.bf16.msra.mxu1 %v15168_v4  ;;  %v15237_v3 = vld [vmem:[#allocation8 + $0x120] ss:$16 sps:$4 sm:$0xff]   ;;  %v15240_v4 = vld [vmem:[#allocation8 + $0x128] ss:$16 sps:$4 sm:$0xff]  }
 0xacc   :  { %8066 = vmatprep.subr.bf16.mxu0 %v15173_v5  ;;  %8107 = vmatprep.subr.bf16.mxu1 %v15176_v7  ;;  %v15245_v5 = vld [vmem:[#allocation8 + $0x104] ss:$16 sps:$4 sm:$0xff]   ;;  %v15248_v7 = vld [vmem:[#allocation8 + $0x10c] ss:$16 sps:$4 sm:$0xff]  }
 0xacf   :  { %8067 = vmatpush1.bf16.msra.mxu0 %v15171_v8  ;;  %8108 = vmatpush1.bf16.msra.mxu1 %v15174_v37  ;;  %v15243_v8 = vld [vmem:[#allocation8 + $0x100] ss:$16 sps:$4 sm:$0xff]   ;;  %v15246_v37 = vld [vmem:[#allocation8 + $0x108] ss:$16 sps:$4 sm:$0xff]  }
 0xad0   :  { %8068 = vmatprep.subr.bf16.mxu0 %v15179_v9  ;;  %8109 = vmatprep.subr.bf16.mxu1 %v15182_v11  ;;  %v8219_v9 = vld [vmem:[#allocation2 + $0x2] sm:$0x3] }
 0xad1   :  { %v8220_v11 = vpack.c.bf16 %v8219_v9, %v8219_v9 }
 0xad3   :  { %8069 = vmatpush1.bf16.msra.mxu0 %v15177_v18  ;;  %8110 = vmatpush1.bf16.msra.mxu1 %v15180_v26  ;;  %v15249_v18 = vld [vmem:[#allocation5 + $0x1e0] ss:$16 sps:$4 sm:$0xff]   ;;  %v15251_v26 = vld [vmem:[#allocation5 + $0x1e4] ss:$16 sps:$4 sm:$0xff]  }
 0xad4   :  { %8070 = vmatprep.subr.bf16.mxu0 %v15185_v19  ;;  %8111 = vmatprep.subr.bf16.mxu1 %v15188_v12  ;;  %v15252_v19 = vld [vmem:[#allocation5 + $0x1e8] ss:$16 sps:$4 sm:$0xff]   ;;  %v15254_v12 = vld [vmem:[#allocation5 + $0x1ec] ss:$16 sps:$4 sm:$0xff]  }
 0xad7   :  { %8071 = vmatpush1.bf16.msra.mxu0 %v15183_v46  ;;  %8112 = vmatpush1.bf16.msra.mxu1 %v15186_v20  ;;  %v15257_v46 = vld [vmem:[#allocation5 + $0x1c4] ss:$16 sps:$4 sm:$0xff]   ;;  %v15260_v20 = vld [vmem:[#allocation5 + $0x1cc] ss:$16 sps:$4 sm:$0xff]  }
 0xad8   :  { %8072 = vmatprep.subr.bf16.mxu0 %v15191_v21  ;;  %8113 = vmatprep.subr.bf16.mxu1 %v15194_v13  ;;  %v15255_v21 = vld [vmem:[#allocation5 + $0x1c0] ss:$16 sps:$4 sm:$0xff]   ;;  %v15258_v13 = vld [vmem:[#allocation5 + $0x1c8] ss:$16 sps:$4 sm:$0xff]  }
 0xadb   :  { %8073 = vmatpush1.bf16.msra.mxu0 %v15189_v30  ;;  %8114 = vmatpush1.bf16.msra.mxu1 %v15192_v33  ;;  %v15263_v30 = vld [vmem:[#allocation5 + $0x1a4] ss:$16 sps:$4 sm:$0xff]   ;;  %v15266_v33 = vld [vmem:[#allocation5 + $0x1ac] ss:$16 sps:$4 sm:$0xff]  }
 0xadc   :  { %8074 = vmatprep.subr.bf16.mxu0 %v15197_v31  ;;  %8115 = vmatprep.subr.bf16.mxu1 %v15200_v32  ;;  %v15261_v31 = vld [vmem:[#allocation5 + $0x1a0] ss:$16 sps:$4 sm:$0xff]   ;;  %v15264_v32 = vld [vmem:[#allocation5 + $0x1a8] ss:$16 sps:$4 sm:$0xff]  }
 0xadf   :  { %8075 = vmatpush1.bf16.msra.mxu0 %v15195_v35  ;;  %8116 = vmatpush1.bf16.msra.mxu1 %v15198_v36  ;;  %v15269_v35 = vld [vmem:[#allocation5 + $0x184] ss:$16 sps:$4 sm:$0xff]   ;;  %v15272_v36 = vld [vmem:[#allocation5 + $0x18c] ss:$16 sps:$4 sm:$0xff]  }
 0xae0   :  { %8413 = vmatprep.subr.bf16.mxu0 %v15203_v47  ;;  %8454 = vmatprep.subr.bf16.mxu1 %v15206_v41  ;;  %v15267_v47 = vld [vmem:[#allocation5 + $0x180] ss:$16 sps:$4 sm:$0xff]   ;;  %v15270_v41 = vld [vmem:[#allocation5 + $0x188] ss:$16 sps:$4 sm:$0xff]  }
 0xae2   :  { %8093 = vmatmul.mubr.bf16.vlgmr.msra.gmra.mxu0 %v7867_v62  ;;  %8134 = vmatmul.mubr.bf16.vlgmr.msra.gmra.mxu1 %v7867_v62  ;;  %v15276_v62 = vld [vmem:[#allocation5 + $0x168] ss:$16 sps:$4 sm:$0xff]  }
 0xae3   :  { %8414 = vmatpush1.bf16.msra.mxu0 %v15201_v38  ;;  %8455 = vmatpush1.bf16.msra.mxu1 %v15204_v63  ;;  %v15278_v38 = vld [vmem:[#allocation5 + $0x16c] ss:$16 sps:$4 sm:$0xff]   ;;  %v15273_v63 = vld [vmem:[#allocation5 + $0x160] ss:$16 sps:$4 sm:$0xff]  }
 0xae4   :  { %8415 = vmatprep.subr.bf16.mxu0 %v15209_v45  ;;  %8456 = vmatprep.subr.bf16.mxu1 %v15212_v40  ;;  %v15281_v45 = vld [vmem:[#allocation5 + $0x144] ss:$16 sps:$4 sm:$0xff]   ;;  %v15284_v40 = vld [vmem:[#allocation5 + $0x14c] ss:$16 sps:$4 sm:$0xff]  }
 0xae5   :  { %8445 = vmatprep.mubr.bf16.mxu0 %v16327_v0  ;;  %8486 = vmatprep.mubr.bf16.mxu1 %v16327_v0 }
 0xae7   :  { %8416 = vmatpush1.bf16.msra.mxu0 %v15207_v54  ;;  %8457 = vmatpush1.bf16.msra.mxu1 %v15210_v49  ;;  %v15279_v54 = vld [vmem:[#allocation5 + $0x140] ss:$16 sps:$4 sm:$0xff]   ;;  %v15282_v49 = vld [vmem:[#allocation5 + $0x148] ss:$16 sps:$4 sm:$0xff]  }
 0xae8   :  { %8417 = vmatprep.subr.bf16.mxu0 %v15215_v50  ;;  %8458 = vmatprep.subr.bf16.mxu1 %v15218_v15  ;;  %v15287_v50 = vld [vmem:[#allocation5 + $0x124] ss:$16 sps:$4 sm:$0xff]   ;;  %v15290_v15 = vld [vmem:[#allocation5 + $0x12c] ss:$16 sps:$4 sm:$0xff]  }
 0xaeb   :  { %8418 = vmatpush1.bf16.msra.mxu0 %v15213_v6  ;;  %8459 = vmatpush1.bf16.msra.mxu1 %v15216_v51  ;;  %v15285_v6 = vld [vmem:[#allocation5 + $0x120] ss:$16 sps:$4 sm:$0xff]   ;;  %v15288_v51 = vld [vmem:[#allocation5 + $0x128] ss:$16 sps:$4 sm:$0xff]  }
 0xaec   :  { %8419 = vmatprep.subr.bf16.mxu0 %v15221_v52  ;;  %8460 = vmatprep.subr.bf16.mxu1 %v15224_v53  ;;  %v15293_v52 = vld [vmem:[#allocation5 + $0x104] ss:$16 sps:$4 sm:$0xff]   ;;  %v15296_v53 = vld [vmem:[#allocation5 + $0x10c] ss:$16 sps:$4 sm:$0xff]  }
 0xaef   :  { %8420 = vmatpush1.bf16.msra.mxu0 %v15219_v10  ;;  %8461 = vmatpush1.bf16.msra.mxu1 %v15222_v17  ;;  %v15291_v10 = vld [vmem:[#allocation5 + $0x100] ss:$16 sps:$4 sm:$0xff]   ;;  %v15294_v17 = vld [vmem:[#allocation5 + $0x108] ss:$16 sps:$4 sm:$0xff]  }
 0xaf0   :  { %8421 = vmatprep.subr.bf16.mxu0 %v15227_v24  ;;  %8462 = vmatprep.subr.bf16.mxu1 %v15230_v25  ;;  %v15299_v24 = vld [vmem:[#allocation8 + $0x2e4] ss:$16 sps:$4 sm:$0xff]   ;;  %v15302_v25 = vld [vmem:[#allocation8 + $0x2ec] ss:$16 sps:$4 sm:$0xff]  }
 0xaf3   :  { %8422 = vmatpush1.bf16.msra.mxu0 %v15225_v2  ;;  %8463 = vmatpush1.bf16.msra.mxu1 %v15228_v59 }
 0xaf4   :  { %8423 = vmatprep.subr.bf16.mxu0 %v15233_v29  ;;  %8464 = vmatprep.subr.bf16.mxu1 %v15236_v23 }
 0xaf7   :  { %8424 = vmatpush1.bf16.msra.mxu0 %v15231_v60  ;;  %8465 = vmatpush1.bf16.msra.mxu1 %v15234_v61 }
 0xaf8   :  { %8425 = vmatprep.subr.bf16.mxu0 %v15239_v56  ;;  %8466 = vmatprep.subr.bf16.mxu1 %v15242_v28 }
 0xafb   :  { %8426 = vmatpush1.bf16.msra.mxu0 %v15237_v3  ;;  %8467 = vmatpush1.bf16.msra.mxu1 %v15240_v4 }
 0xafc   :  { %8427 = vmatprep.subr.bf16.mxu0 %v15245_v5  ;;  %8468 = vmatprep.subr.bf16.mxu1 %v15248_v7 }
 0xaff   :  { %8428 = vmatpush1.bf16.msra.mxu0 %v15243_v8  ;;  %8469 = vmatpush1.bf16.msra.mxu1 %v15246_v37 }
 0xb00   :  { %8658 = vmatprep.subr.bf16.mxu0 %v15251_v26  ;;  %8699 = vmatprep.subr.bf16.mxu1 %v15254_v12 }
 0xb02   :  { %8446 = vmatmul.mubr.bf16.vlgmr.msra.gmra.mxu0 %v8220_v11  ;;  %8487 = vmatmul.mubr.bf16.vlgmr.msra.gmra.mxu1 %v8220_v11 }
 0xb03   :  { %8690 = vmatprep.mubr.bf16.mxu0 %v16327_v0  ;;  %8731 = vmatprep.mubr.bf16.mxu1 %v16327_v0 }
 0xb04   :  { %8659 = vmatpush1.bf16.msra.mxu0 %v15249_v18  ;;  %8700 = vmatpush1.bf16.msra.mxu1 %v15252_v19 }
 0xb05   :  { %8660 = vmatprep.subr.bf16.mxu0 %v15257_v46  ;;  %8701 = vmatprep.subr.bf16.mxu1 %v15260_v20 }
 0xb08   :  { %8661 = vmatpush1.bf16.msra.mxu0 %v15255_v21  ;;  %8702 = vmatpush1.bf16.msra.mxu1 %v15258_v13 }
 0xb09   :  { %8662 = vmatprep.subr.bf16.mxu0 %v15263_v30  ;;  %8703 = vmatprep.subr.bf16.mxu1 %v15266_v33  ;;  %v7862_v30 = vld [vmem:[#allocation4 + $0x8] sm:$0xc] }
 0xb0c   :  { %8663 = vmatpush1.bf16.msra.mxu0 %v15261_v31  ;;  %8704 = vmatpush1.bf16.msra.mxu1 %v15264_v32 }
 0xb0d   :  { %8664 = vmatprep.subr.bf16.mxu0 %v15269_v35  ;;  %8705 = vmatprep.subr.bf16.mxu1 %v15272_v36  ;;  %v7863_v36 = vld [vmem:[#allocation4 + $0x20] sm:$0xc] }
 0xb10   :  { %8665 = vmatpush1.bf16.msra.mxu0 %v15267_v47  ;;  %8706 = vmatpush1.bf16.msra.mxu1 %v15270_v41 }
 0xb11   :  { %8666 = vmatprep.subr.bf16.mxu0 %v15275_v48  ;;  %8707 = vmatprep.subr.bf16.mxu1 %v15278_v38 }
 0xb14   :  { %8667 = vmatpush1.bf16.msra.mxu0 %v15273_v63  ;;  %8708 = vmatpush1.bf16.msra.mxu1 %v15276_v62 }
 0xb15   :  { %8668 = vmatprep.subr.bf16.mxu0 %v15281_v45  ;;  %8709 = vmatprep.subr.bf16.mxu1 %v15284_v40  ;;  %v7850_v40 = vld [vmem:[#allocation3 + $0x4] sm:$0x3] }
 0xb18   :  { %8669 = vmatpush1.bf16.msra.mxu0 %v15279_v54  ;;  %8710 = vmatpush1.bf16.msra.mxu1 %v15282_v49 }
 0xb19   :  { %8670 = vmatprep.subr.bf16.mxu0 %v15287_v50  ;;  %8711 = vmatprep.subr.bf16.mxu1 %v15290_v15 }
 0xb1c   :  { %8671 = vmatpush1.bf16.msra.mxu0 %v15285_v6  ;;  %8712 = vmatpush1.bf16.msra.mxu1 %v15288_v51 }
 0xb1d   :  { %8672 = vmatprep.subr.bf16.mxu0 %v15293_v52  ;;  %8713 = vmatprep.subr.bf16.mxu1 %v15296_v53  ;;  %v7864_v53 = vld [vmem:[#allocation4 + $0x28] sm:$0xc] }
 0xb20   :  { %8673 = vmatpush1.bf16.msra.mxu0 %v15291_v10  ;;  %8714 = vmatpush1.bf16.msra.mxu1 %v15294_v17 }
 0xb21   :  { %8996 = vmatprep.subr.bf16.mxu0 %v15299_v24  ;;  %9037 = vmatprep.subr.bf16.mxu1 %v15302_v25  ;;  %v7865_v25 = vld [vmem:[#allocation4 + $0x38] sm:$0xc] }
 0xb82   :  { %v7779_v2 = vpop.f32.mrf.mxu0  ;;  %v7820_v59 = vpop.f32.mrf.mxu1 }
 0xb83   :  { %v7780_v29 = vadd.f32 %v7779_v2, %v16622_v58  ;;  %v7821_v9 = vadd.f32 %v7820_v59, %v16624_v14 }
 0xb84   :  { %v7781_v23 = vpop.f32.mrf.mxu0  ;;  %v7822_v60 = vpop.f32.mrf.mxu1 }
 0xb85   :  { %v7827_v61 = vadd.f32 %v7780_v29, %v16457_v22  ;;  %v7782_v56 = vadd.f32 %v7781_v23, %v16626_v34  ;;  %v7829_v58 = vadd.f32 %v7821_v9, %v16467_v16  ;;  %v7823_v11 = vadd.f32 %v7822_v60, %v16628_v43 }
 0xb86   :  { %v7783_v28 = vpop.f32.mrf.mxu0  ;;  %v7824_v3 = vpop.f32.mrf.mxu1 }
 0xb87   :  { %v13333_v4 = vmul.f32 -1.442695, %v7827_v61  ;;  %v7828_v5 = vadd.f32 %v7782_v56, %v16460_v27  ;;  %v13335_v18 = vmul.f32 -1.442695, %v7829_v58  ;;  %v7830_v34 = vadd.f32 %v7823_v11, %v16472_v44 }
 0xb88   :  { %v7784_v7 = vpop.f32.mrf.mxu0  ;;  %v7825_v8 = vpop.f32.mrf.mxu1 }
 0xb89   :  { %16097 = vpow2.f32 %v13333_v4  ;;  %v13334_v37 = vmul.f32 -1.442695, %v7828_v5  ;;  %v8177_v5 = vld [vmem:[#allocation3] sm:$0x3] }
 0xb8b   :  { %16099 = vpow2.f32 %v13334_v37 }
 0xb8c   :  { %16101 = vpow2.f32 %v13335_v18 }
 0xb96   :  { %v16098_v26 = vpop.eup %16097 }
 0xb97   :  { %v7840_v19 = vadd.f32 1.0, %v16098_v26  ;;  %v8179_v26 = vrot.slane %v8177_v5, 6 }
 0xb98   :  { %v16100_v12 = vpop.eup %16099 }
 0xb99   :  { %16103 = vrcp.f32 %v7840_v19  ;;  %v7841_v46 = vadd.f32 1.0, %v16100_v12  ;;  %v16102_v31 = vpop.eup %16101 }
 0xb9a   :  { %16105 = vtanh.f32 %v7830_v34  ;;  %v7842_v45 = vadd.f32 1.0, %v16102_v31 }
 0xb9b   :  { %16107 = vrcp.f32 %v7841_v46 }
 0xba2   :  { %v8094_v20 = vpop.f32.mrf.mxu0  ;;  %v8135_v21 = vpop.f32.mrf.mxu1 }
 0xba3   :  { %v8146_v13 = vrot.slane %v8094_v20, 6  ;;  %v8148_v52 = vrot.slane %v8135_v21, 6 }
 0xba4   :  { %v8096_v14 = vpop.f32.mrf.mxu0  ;;  %v8137_v33 = vpop.f32.mrf.mxu1 }
 0xba5   :  { %v8154_v32 = vadd.f32 %v8146_v13, %v7862_v30  ;;  %v8147_v43 = vrot.slane %v8096_v14, 6  ;;  %v8156_v10 = vadd.f32 %v8148_v52, %v7864_v53  ;;  %v8149_v17 = vrot.slane %v8137_v33, 6  ;;  %v15324_v52 = vld [vmem:[#allocation8 + $0x268] ss:$16 sps:$4 sm:$0xff]   ;;  %v15329_v53 = vld [vmem:[#allocation8 + $0x244] ss:$16 sps:$4 sm:$0xff]  }
 0xba6   :  { %v16104_v35 = vpop.eup %16103  ;;  %v8098_v47 = vpop.f32.mrf.mxu0 }
 0xba7   :  { %v8139_v41 = vpop.f32.mrf.mxu1  ;;  %v16106_v48 = vpop.eup %16105  ;;  %v13368_v38 = vmul.f32 -1.442695, %v8154_v32  ;;  %v8155_v63 = vadd.f32 %v8147_v43, %v7863_v36  ;;  %v13370_v24 = vmul.f32 -1.442695, %v8156_v10  ;;  %v8157_v59 = vadd.f32 %v8149_v17, %v7865_v25  ;;  %v15297_v32 = vld [vmem:[#allocation8 + $0x2e0] ss:$16 sps:$4 sm:$0xff]  }
 0xba8   :  { %v16108_v62 = vpop.eup %16107  ;;  %v8099_v54 = vpop.f32.mrf.mxu0  ;;  %v7852_v15 = vmul.f32 %v16106_v48, %v16104_v35  ;;  %v15300_v43 = vld [vmem:[#allocation8 + $0x2e8] ss:$16 sps:$4 sm:$0xff]   ;;  %v15305_v36 = vld [vmem:[#allocation8 + $0x2c4] ss:$16 sps:$4 sm:$0xff]   ;;  %v15308_v47 = vld [vmem:[#allocation8 + $0x2cc] ss:$16 sps:$4 sm:$0xff]  }
 0xba9   :  { %v8140_v49 = vpop.f32.mrf.mxu1  ;;  %v7851_v50 = vmul.f32 %v16108_v62, %v7850_v40  ;;  %16109 = vpow2.f32 %v13368_v38  ;;  %v13369_v6 = vmul.f32 -1.442695, %v8155_v63  ;;  %v15303_v41 = vld [vmem:[#allocation8 + $0x2c0] ss:$16 sps:$4 sm:$0xff]   ;;  %v15306_v48 = vld [vmem:[#allocation8 + $0x2c8] ss:$16 sps:$4 sm:$0xff]  }
 0xbaa   :  { %v15311_v38 = vld [vmem:[#allocation8 + $0x2a4] ss:$16 sps:$4 sm:$0xff]   ;;  %v15314_v63 = vld [vmem:[#allocation8 + $0x2ac] ss:$16 sps:$4 sm:$0xff]   ;;  %v15309_v62 = vld [vmem:[#allocation8 + $0x2a0] ss:$16 sps:$4 sm:$0xff]  }
 0xbab   :  { %v7853_v51 = vadd.f32 %v7852_v15, %v7851_v50  ;;  %16111 = vpow2.f32 %v13369_v6  ;;  %v15317_v40 = vld [vmem:[#allocation8 + $0x284] ss:$16 sps:$4 sm:$0xff]   ;;  %v15320_v54 = vld [vmem:[#allocation8 + $0x28c] ss:$16 sps:$4 sm:$0xff]   ;;  %v15315_v49 = vld [vmem:[#allocation8 + $0x280] ss:$16 sps:$4 sm:$0xff]  }
 0xbac   :  { %16113 = vrcp.f32 %v7842_v45  ;;  %v15312_v45 = vld [vmem:[#allocation8 + $0x2a8] ss:$16 sps:$4 sm:$0xff]   ;;  %v15323_v15 = vld [vmem:[#allocation8 + $0x264] ss:$16 sps:$4 sm:$0xff]   ;;  %v15326_v6 = vld [vmem:[#allocation8 + $0x26c] ss:$16 sps:$4 sm:$0xff]  }
 0xbad   :  { %16115 = vtanh.f32 %v7853_v51  ;;  %7861 = vst [vmem:[#allocation3 + $0x4] sm:$0x3] %v7853_v51  ;;  %v15318_v50 = vld [vmem:[#allocation8 + $0x288] ss:$16 sps:$4 sm:$0xff]   ;;  %v15321_v51 = vld [vmem:[#allocation8 + $0x260] ss:$16 sps:$4 sm:$0xff]  }
 0xbae   :  { %16117 = vpow2.f32 %v13370_v24  ;;  %v15332_v10 = vld [vmem:[#allocation8 + $0x24c] ss:$16 sps:$4 sm:$0xff]   ;;  %v15327_v17 = vld [vmem:[#allocation8 + $0x240] ss:$16 sps:$4 sm:$0xff]   ;;  %v15330_v24 = vld [vmem:[#allocation8 + $0x248] ss:$16 sps:$4 sm:$0xff]  }
 0xbaf   :  { %v15335_v25 = vld [vmem:[#allocation8 + $0x224] ss:$16 sps:$4 sm:$0xff]  }
 0xbb6   :  { %v16110_v2 = vpop.eup %16109 }
 0xbb7   :  { %v8167_v29 = vadd.f32 1.0, %v16110_v2  ;;  %v15338_v2 = vld [vmem:[#allocation8 + $0x22c] ss:$16 sps:$4 sm:$0xff]  }
 0xbb8   :  { %v16112_v23 = vpop.eup %16111 }
 0xbb9   :  { %v16114_v60 = vpop.eup %16113  ;;  %16119 = vrcp.f32 %v8167_v29  ;;  %v8168_v61 = vadd.f32 1.0, %v16112_v23  ;;  %v15336_v29 = vld [vmem:[#allocation8 + $0x228] ss:$16 sps:$4 sm:$0xff]   ;;  %v15341_v23 = vld [vmem:[#allocation8 + $0x204] ss:$16 sps:$4 sm:$0xff]  }
 0xbba   :  { %v16116_v56 = vpop.eup %16115  ;;  %16121 = vtanh.f32 %v8157_v59  ;;  %v15333_v59 = vld [vmem:[#allocation8 + $0x220] ss:$16 sps:$4 sm:$0xff]  }
 0xbbb   :  { %v7855_v28 = vmul.f32 %v16116_v56, %v16114_v60  ;;  %16123 = vrcp.f32 %v8168_v61  ;;  %v16118_v37 = vpop.eup %16117  ;;  %v15344_v60 = vld [vmem:[#allocation8 + $0x20c] ss:$16 sps:$4 sm:$0xff]   ;;  %v15339_v61 = vld [vmem:[#allocation8 + $0x200] ss:$16 sps:$4 sm:$0xff]   ;;  %v15342_v56 = vld [vmem:[#allocation8 + $0x208] ss:$16 sps:$4 sm:$0xff]  }
 0xbbc   :  { %v8169_v19 = vadd.f32 1.0, %v16118_v37  ;;  %v15345_v37 = vld [vmem:[#allocation5 + $0x2e0] ss:$16 sps:$4 sm:$0xff]  }
 0xbbd   :  { %7860 = vst [vmem:[#allocation2 + $0x4] sm:$0x3] %v7855_v28 }
 0xbbe   :  { %16125 = vrcp.f32 %v8169_v19  ;;  %v15354_v19 = vld [vmem:[#allocation5 + $0x2c8] ss:$16 sps:$4 sm:$0xff]  }
 0xbc2   :  { %v16644_v3 = vpop.f32.mrf.mxu0  ;;  %v16646_v4 = vpop.f32.mrf.mxu1 }
 0xbc4   :  { %v16648_v7 = vpop.f32.mrf.mxu0  ;;  %v16650_v8 = vpop.f32.mrf.mxu1  ;;  %v8802_v28 = vld [vmem:[#allocation2 + $0x4] sm:$0x3] }
 0xbc5   :  { %v8803_v5 = vpack.c.bf16 %v8802_v28, %v8802_v28 }
 0xbc6   :  { %v16120_v9 = vpop.eup %16119  ;;  %v8451_v58 = vpop.f32.mrf.mxu0 }
 0xbc7   :  { %v8492_v11 = vpop.f32.mrf.mxu1  ;;  %v16122_v18 = vpop.eup %16121  ;;  %v15348_v58 = vld [vmem:[#allocation5 + $0x2e8] ss:$16 sps:$4 sm:$0xff]  }
 0xbc8   :  { %v16124_v34 = vpop.eup %16123  ;;  %v8452_v12 = vpop.f32.mrf.mxu0  ;;  %v8182_v21 = vmul.f32 %v16122_v18, %v16120_v9  ;;  %v15347_v9 = vld [vmem:[#allocation5 + $0x2e4] ss:$16 sps:$4 sm:$0xff]   ;;  %v15350_v11 = vld [vmem:[#allocation5 + $0x2ec] ss:$16 sps:$4 sm:$0xff]  }
 0xbc9   :  { %v8493_v46 = vpop.f32.mrf.mxu1  ;;  %v8181_v20 = vmul.f32 %v16124_v34, %v8179_v26  ;;  %v15353_v18 = vld [vmem:[#allocation5 + $0x2c4] ss:$16 sps:$4 sm:$0xff]   ;;  %v15356_v26 = vld [vmem:[#allocation5 + $0x2cc] ss:$16 sps:$4 sm:$0xff]   ;;  %v15351_v34 = vld [vmem:[#allocation5 + $0x2c0] ss:$16 sps:$4 sm:$0xff]  }
 0xbca   :  { %v15359_v12 = vld [vmem:[#allocation5 + $0x2a4] ss:$16 sps:$4 sm:$0xff]   ;;  %v15362_v46 = vld [vmem:[#allocation5 + $0x2ac] ss:$16 sps:$4 sm:$0xff]  }
 0xbcb   :  { %v8183_v13 = vadd.f32 %v8182_v21, %v8181_v20  ;;  %v16126_v30 = vpop.eup %16125  ;;  %v15357_v20 = vld [vmem:[#allocation5 + $0x2a0] ss:$16 sps:$4 sm:$0xff]   ;;  %v15360_v21 = vld [vmem:[#allocation5 + $0x2a8] ss:$16 sps:$4 sm:$0xff]  }
 0xbcd   :  { %16127 = vtanh.f32 %v8183_v13  ;;  %9350 = vst [vmem:[#allocation3 - $0x2] sm:$0xc] %v8183_v13  ;;  %v15365_v13 = vld [vmem:[#allocation5 + $0x284] ss:$16 sps:$4 sm:$0xff]  }
 0xbda   :  { %v16128_v14 = vpop.eup %16127 }
 0xbdb   :  { %v8185_v33 = vmul.f32 %v16128_v14, %v16126_v30  ;;  %v15368_v30 = vld [vmem:[#allocation5 + $0x28c] ss:$16 sps:$4 sm:$0xff]   ;;  %v15363_v14 = vld [vmem:[#allocation5 + $0x280] ss:$16 sps:$4 sm:$0xff]  }
 0xbdd   :  { %v8186_v31 = vpack.c.bf16 %v8185_v33, %v8185_v33  ;;  %9349 = vst [vmem:[#allocation2 - $0x2] sm:$0xc] %v8185_v33  ;;  %v15366_v33 = vld [vmem:[#allocation5 + $0x288] ss:$16 sps:$4 sm:$0xff]  }
 0xbdf   :  { %v8496_v35 = vrot.slane %v8186_v31, 1  ;;  %v15371_v31 = vld [vmem:[#allocation5 + $0x264] ss:$16 sps:$4 sm:$0xff]  }
 0xbe1   :  { %8691 = vmatmul.mubr.bf16.vlgmr.msra.gmra.mxu0 %v8496_v35  ;;  %8732 = vmatmul.mubr.bf16.vlgmr.msra.gmra.mxu1 %v8496_v35  ;;  %v15372_v35 = vld [vmem:[#allocation5 + $0x268] ss:$16 sps:$4 sm:$0xff]  }
 0xbe2   :  { %8997 = vmatpush1.bf16.msra.mxu0 %v15297_v32  ;;  %9038 = vmatpush1.bf16.msra.mxu1 %v15300_v43  ;;  %v15374_v32 = vld [vmem:[#allocation5 + $0x26c] ss:$16 sps:$4 sm:$0xff]   ;;  %v15369_v43 = vld [vmem:[#allocation5 + $0x260] ss:$16 sps:$4 sm:$0xff]  }
 0xbe3   :  { %8998 = vmatprep.subr.bf16.mxu0 %v15305_v36  ;;  %9039 = vmatprep.subr.bf16.mxu1 %v15308_v47  ;;  %v15377_v36 = vld [vmem:[#allocation5 + $0x244] ss:$16 sps:$4 sm:$0xff]   ;;  %v15380_v47 = vld [vmem:[#allocation5 + $0x24c] ss:$16 sps:$4 sm:$0xff]  }
 0xbe4   :  { %9028 = vmatprep.mubr.bf16.mxu0 %v16327_v0  ;;  %9069 = vmatprep.mubr.bf16.mxu1 %v16327_v0 }
 0xbe6   :  { %8999 = vmatpush1.bf16.msra.mxu0 %v15303_v41  ;;  %9040 = vmatpush1.bf16.msra.mxu1 %v15306_v48  ;;  %v15375_v41 = vld [vmem:[#allocation5 + $0x240] ss:$16 sps:$4 sm:$0xff]   ;;  %v15378_v48 = vld [vmem:[#allocation5 + $0x248] ss:$16 sps:$4 sm:$0xff]  }
 0xbe7   :  { %9000 = vmatprep.subr.bf16.mxu0 %v15311_v38  ;;  %9041 = vmatprep.subr.bf16.mxu1 %v15314_v63  ;;  %v15383_v38 = vld [vmem:[#allocation5 + $0x224] ss:$16 sps:$4 sm:$0xff]   ;;  %v15386_v63 = vld [vmem:[#allocation5 + $0x22c] ss:$16 sps:$4 sm:$0xff]  }
 0xbea   :  { %9001 = vmatpush1.bf16.msra.mxu0 %v15309_v62  ;;  %9042 = vmatpush1.bf16.msra.mxu1 %v15312_v45  ;;  %v15381_v62 = vld [vmem:[#allocation5 + $0x220] ss:$16 sps:$4 sm:$0xff]   ;;  %v15384_v45 = vld [vmem:[#allocation5 + $0x228] ss:$16 sps:$4 sm:$0xff]  }
 0xbeb   :  { %9002 = vmatprep.subr.bf16.mxu0 %v15317_v40  ;;  %9043 = vmatprep.subr.bf16.mxu1 %v15320_v54  ;;  %v15389_v40 = vld [vmem:[#allocation5 + $0x204] ss:$16 sps:$4 sm:$0xff]   ;;  %v15392_v54 = vld [vmem:[#allocation5 + $0x20c] ss:$16 sps:$4 sm:$0xff]  }
 0xbee   :  { %9003 = vmatpush1.bf16.msra.mxu0 %v15315_v49  ;;  %9044 = vmatpush1.bf16.msra.mxu1 %v15318_v50  ;;  %v15387_v49 = vld [vmem:[#allocation5 + $0x200] ss:$16 sps:$4 sm:$0xff]   ;;  %v15390_v50 = vld [vmem:[#allocation5 + $0x208] ss:$16 sps:$4 sm:$0xff]  }
 0xbef   :  { %9004 = vmatprep.subr.bf16.mxu0 %v15323_v15  ;;  %9045 = vmatprep.subr.bf16.mxu1 %v15326_v6  ;;  %v15395_v15 = vld [vmem:[#allocation8 + $0xe4] ss:$16 sps:$4 sm:$0xff]   ;;  %v15398_v6 = vld [vmem:[#allocation8 + $0xec] ss:$16 sps:$4 sm:$0xff]  }
 0xbf2   :  { %9005 = vmatpush1.bf16.msra.mxu0 %v15321_v51  ;;  %9046 = vmatpush1.bf16.msra.mxu1 %v15324_v52 }
 0xbf3   :  { %9006 = vmatprep.subr.bf16.mxu0 %v15329_v53  ;;  %9047 = vmatprep.subr.bf16.mxu1 %v15332_v10 }
 0xbf6   :  { %9007 = vmatpush1.bf16.msra.mxu0 %v15327_v17  ;;  %9048 = vmatpush1.bf16.msra.mxu1 %v15330_v24 }
 0xbf7   :  { %9008 = vmatprep.subr.bf16.mxu0 %v15335_v25  ;;  %9049 = vmatprep.subr.bf16.mxu1 %v15338_v2 }
 0xbfa   :  { %9009 = vmatpush1.bf16.msra.mxu0 %v15333_v59  ;;  %9050 = vmatpush1.bf16.msra.mxu1 %v15336_v29 }
 0xbfb   :  { %9010 = vmatprep.subr.bf16.mxu0 %v15341_v23  ;;  %9051 = vmatprep.subr.bf16.mxu1 %v15344_v60 }
 0xbfe   :  { %9011 = vmatpush1.bf16.msra.mxu0 %v15339_v61  ;;  %9052 = vmatpush1.bf16.msra.mxu1 %v15342_v56 }
 0xbff   :  { %9238 = vmatprep.subr.bf16.mxu0 %v15347_v9  ;;  %9279 = vmatprep.subr.bf16.mxu1 %v15350_v11 }
 0xc01   :  { %9029 = vmatmul.mubr.bf16.vlgmr.msra.gmra.mxu0 %v8803_v5  ;;  %9070 = vmatmul.mubr.bf16.vlgmr.msra.gmra.mxu1 %v8803_v5 }
 0xc02   :  { %9270 = vmatprep.mubr.bf16.mxu0 %v16327_v0  ;;  %9311 = vmatprep.mubr.bf16.mxu1 %v16327_v0 }
 0xc03   :  { %9239 = vmatpush1.bf16.msra.mxu0 %v15345_v37  ;;  %9280 = vmatpush1.bf16.msra.mxu1 %v15348_v58 }
 0xc04   :  { %9240 = vmatprep.subr.bf16.mxu0 %v15353_v18  ;;  %9281 = vmatprep.subr.bf16.mxu1 %v15356_v26 }
 0xc07   :  { %9241 = vmatpush1.bf16.msra.mxu0 %v15351_v34  ;;  %9282 = vmatpush1.bf16.msra.mxu1 %v15354_v19 }
 0xc08   :  { %9242 = vmatprep.subr.bf16.mxu0 %v15359_v12  ;;  %9283 = vmatprep.subr.bf16.mxu1 %v15362_v46 }
 0xc0b   :  { %9243 = vmatpush1.bf16.msra.mxu0 %v15357_v20  ;;  %9284 = vmatpush1.bf16.msra.mxu1 %v15360_v21 }
 0xc0c   :  { %9244 = vmatprep.subr.bf16.mxu0 %v15365_v13  ;;  %9285 = vmatprep.subr.bf16.mxu1 %v15368_v30 }
 0xc0f   :  { %9245 = vmatpush1.bf16.msra.mxu0 %v15363_v14  ;;  %9286 = vmatpush1.bf16.msra.mxu1 %v15366_v33  ;;  %v8763_v14 = vld [vmem:[#allocation3 + $0x2] sm:$0x3] }
 0xc10   :  { %9246 = vmatprep.subr.bf16.mxu0 %v15371_v31  ;;  %9287 = vmatprep.subr.bf16.mxu1 %v15374_v32 }
 0xc13   :  { %9247 = vmatpush1.bf16.msra.mxu0 %v15369_v43  ;;  %9288 = vmatpush1.bf16.msra.mxu1 %v15372_v35 }
 0xc14   :  { %9248 = vmatprep.subr.bf16.mxu0 %v15377_v36  ;;  %9289 = vmatprep.subr.bf16.mxu1 %v15380_v47 }
 0xc17   :  { %9249 = vmatpush1.bf16.msra.mxu0 %v15375_v41  ;;  %9290 = vmatpush1.bf16.msra.mxu1 %v15378_v48  ;;  %v15393_v48 = vld [vmem:[#allocation8 + $0xe0] ss:$16 sps:$4 sm:$0xff]  }
 0xc18   :  { %9250 = vmatprep.subr.bf16.mxu0 %v15383_v38  ;;  %9291 = vmatprep.subr.bf16.mxu1 %v15386_v63  ;;  %v15396_v38 = vld [vmem:[#allocation8 + $0xe8] ss:$16 sps:$4 sm:$0xff]  }
 0xc1b   :  { %9251 = vmatpush1.bf16.msra.mxu0 %v15381_v62  ;;  %9292 = vmatpush1.bf16.msra.mxu1 %v15384_v45  ;;  %v15401_v62 = vld [vmem:[#allocation8 + $0xc4] ss:$16 sps:$4 sm:$0xff]   ;;  %v15404_v45 = vld [vmem:[#allocation8 + $0xcc] ss:$16 sps:$4 sm:$0xff]  }
 0xc1c   :  { %9252 = vmatprep.subr.bf16.mxu0 %v15389_v40  ;;  %9293 = vmatprep.subr.bf16.mxu1 %v15392_v54  ;;  %v15399_v40 = vld [vmem:[#allocation8 + $0xc0] ss:$16 sps:$4 sm:$0xff]   ;;  %v15402_v54 = vld [vmem:[#allocation8 + $0xc8] ss:$16 sps:$4 sm:$0xff]  }
 0xc1f   :  { %9253 = vmatpush1.bf16.msra.mxu0 %v15387_v49  ;;  %9294 = vmatpush1.bf16.msra.mxu1 %v15390_v50  ;;  %v15407_v49 = vld [vmem:[#allocation8 + $0xa4] ss:$16 sps:$4 sm:$0xff]   ;;  %v15410_v50 = vld [vmem:[#allocation8 + $0xac] ss:$16 sps:$4 sm:$0xff]  }
 0xc20   :  { %9553 = vmatprep.subr.bf16.mxu0 %v15395_v15  ;;  %9594 = vmatprep.subr.bf16.mxu1 %v15398_v6  ;;  %v15405_v15 = vld [vmem:[#allocation8 + $0xa0] ss:$16 sps:$4 sm:$0xff]   ;;  %v15408_v6 = vld [vmem:[#allocation8 + $0xa8] ss:$16 sps:$4 sm:$0xff]  }
 0xca1   :  { %v8692_v51 = vpop.f32.mrf.mxu0  ;;  %v8733_v52 = vpop.f32.mrf.mxu1 }
 0xca2   :  { %v8693_v53 = vadd.f32 %v8692_v51, %v16644_v3  ;;  %v8734_v28 = vadd.f32 %v8733_v52, %v16646_v4  ;;  %v15413_v51 = vld [vmem:[#allocation8 + $0x84] ss:$16 sps:$4 sm:$0xff]   ;;  %v15416_v52 = vld [vmem:[#allocation8 + $0x8c] ss:$16 sps:$4 sm:$0xff]  }
 0xca3   :  { %v8694_v10 = vpop.f32.mrf.mxu0  ;;  %v8735_v17 = vpop.f32.mrf.mxu1 }
 0xca4   :  { %v8740_v24 = vadd.f32 %v8693_v53, %v16420_v39  ;;  %v8695_v25 = vadd.f32 %v8694_v10, %v16648_v7  ;;  %v8742_v3 = vadd.f32 %v8734_v28, %v16430_v55  ;;  %v8736_v5 = vadd.f32 %v8735_v17, %v16650_v8  ;;  %v15411_v53 = vld [vmem:[#allocation8 + $0x80] ss:$16 sps:$4 sm:$0xff]   ;;  %v15414_v10 = vld [vmem:[#allocation8 + $0x88] ss:$16 sps:$4 sm:$0xff]   ;;  %v15419_v17 = vld [vmem:[#allocation8 + $0x64] ss:$16 sps:$4 sm:$0xff]  }
 0xca5   :  { %v8696_v2 = vpop.f32.mrf.mxu0  ;;  %v8737_v59 = vpop.f32.mrf.mxu1  ;;  %v15429_v28 = vld [vmem:[#allocation8 + $0x20] ss:$16 sps:$4 sm:$0xff]  }
 0xca6   :  { %v13435_v29 = vmul.f32 -1.442695, %v8740_v24  ;;  %v8741_v23 = vadd.f32 %v8695_v25, %v16423_v42  ;;  %v13437_v37 = vmul.f32 -1.442695, %v8742_v3  ;;  %v8743_v7 = vadd.f32 %v8736_v5, %v16435_v57  ;;  %v15422_v24 = vld [vmem:[#allocation8 + $0x6c] ss:$16 sps:$4 sm:$0xff]  }
 0xca7   :  { %v8697_v60 = vpop.f32.mrf.mxu0  ;;  %v8738_v61 = vpop.f32.mrf.mxu1  ;;  %v15417_v25 = vld [vmem:[#allocation8 + $0x60] ss:$16 sps:$4 sm:$0xff]   ;;  %v15420_v2 = vld [vmem:[#allocation8 + $0x68] ss:$16 sps:$4 sm:$0xff]   ;;  %v15425_v59 = vld [vmem:[#allocation8 + $0x44] ss:$16 sps:$4 sm:$0xff]  }
 0xca8   :  { %16129 = vpow2.f32 %v13435_v29  ;;  %v13436_v56 = vmul.f32 -1.442695, %v8741_v23  ;;  %v15428_v29 = vld [vmem:[#allocation8 + $0x4c] ss:$16 sps:$4 sm:$0xff]   ;;  %v15423_v23 = vld [vmem:[#allocation8 + $0x40] ss:$16 sps:$4 sm:$0xff]  }
 0xca9   :  { %v15426_v60 = vld [vmem:[#allocation8 + $0x48] ss:$16 sps:$4 sm:$0xff]   ;;  %v15431_v61 = vld [vmem:[#allocation8 + $0x24] ss:$16 sps:$4 sm:$0xff]  }
 0xcaa   :  { %16131 = vpow2.f32 %v13436_v56  ;;  %v15434_v56 = vld [vmem:[#allocation8 + $0x2c] ss:$16 sps:$4 sm:$0xff]   ;;  %v15432_v3 = vld [vmem:[#allocation8 + $0x28] ss:$16 sps:$4 sm:$0xff]   ;;  %v15437_v5 = vld [vmem:[#allocation8 + $0x4] ss:$16 sps:$4 sm:$0xff]  }
 0xcab   :  { %16133 = vpow2.f32 %v13437_v37  ;;  %v15440_v37 = vld [vmem:[#allocation8 + $0xc] ss:$16 sps:$4 sm:$0xff]  }
 0xcb5   :  { %v16130_v9 = vpop.eup %16129 }
 0xcb6   :  { %v8753_v58 = vadd.f32 1.0, %v16130_v9  ;;  %v15435_v9 = vld [vmem:[#allocation8] ss:$16 sps:$4 sm:$0xff]  }
 0xcb7   :  { %v16132_v11 = vpop.eup %16131 }
 0xcb8   :  { %16135 = vrcp.f32 %v8753_v58  ;;  %v8754_v18 = vadd.f32 1.0, %v16132_v11  ;;  %v16134_v8 = vpop.eup %16133  ;;  %v15443_v58 = vld [vmem:[#allocation8 + $0x1e4] ss:$16 sps:$4 sm:$0xff]   ;;  %v15446_v11 = vld [vmem:[#allocation8 + $0x1ec] ss:$16 sps:$4 sm:$0xff]  }
 0xcb9   :  { %16137 = vtanh.f32 %v8743_v7  ;;  %v8755_v30 = vadd.f32 1.0, %v16134_v8  ;;  %v15438_v7 = vld [vmem:[#allocation8 + $0x8] ss:$16 sps:$4 sm:$0xff]   ;;  %v15441_v8 = vld [vmem:[#allocation8 + $0x1e0] ss:$16 sps:$4 sm:$0xff]  }
 0xcba   :  { %16139 = vrcp.f32 %v8754_v18  ;;  %v9359_v18 = vld [vmem:[#allocation2] sm:$0x3] }
 0xcbb   :  { %16141 = vrcp.f32 %v8755_v30  ;;  %v15450_v30 = vld [vmem:[#allocation8 + $0x1c8] ss:$16 sps:$4 sm:$0xff]  }
 0xcc1   :  { %v16664_v26 = vpop.f32.mrf.mxu0  ;;  %v16666_v34 = vpop.f32.mrf.mxu1 }
 0xcc3   :  { %v16668_v4 = vpop.f32.mrf.mxu0  ;;  %v16670_v19 = vpop.f32.mrf.mxu1 }
 0xcc5   :  { %v16136_v12 = vpop.eup %16135  ;;  %v9034_v46 = vpop.f32.mrf.mxu0 }
 0xcc6   :  { %v9075_v20 = vpop.f32.mrf.mxu1  ;;  %v16138_v21 = vpop.eup %16137  ;;  %v9360_v46 = vpack.c.bf16 %v9359_v18, %v9359_v18  ;;  %v15515_v18 = vld [vmem:[#allocation5 + $0x164] ss:$16 sps:$4 sm:$0xff]  }
 0xcc7   :  { %v16140_v13 = vpop.eup %16139  ;;  %v9035_v33 = vpop.f32.mrf.mxu0  ;;  %v8765_v43 = vmul.f32 %v16138_v21, %v16136_v12  ;;  %v15444_v12 = vld [vmem:[#allocation8 + $0x1e8] ss:$16 sps:$4 sm:$0xff]   ;;  %v15449_v20 = vld [vmem:[#allocation8 + $0x1c4] ss:$16 sps:$4 sm:$0xff]   ;;  %v15452_v21 = vld [vmem:[#allocation8 + $0x1cc] ss:$16 sps:$4 sm:$0xff]  }
 0xcc8   :  { %v9076_v31 = vpop.f32.mrf.mxu1  ;;  %v8764_v32 = vmul.f32 %v16140_v13, %v8763_v14  ;;  %v16142_v36 = vpop.eup %16141  ;;  %v15447_v13 = vld [vmem:[#allocation8 + $0x1c0] ss:$16 sps:$4 sm:$0xff]   ;;  %v15455_v14 = vld [vmem:[#allocation8 + $0x1a4] ss:$16 sps:$4 sm:$0xff]   ;;  %v15458_v33 = vld [vmem:[#allocation8 + $0x1ac] ss:$16 sps:$4 sm:$0xff]  }
 0xcc9   :  { %v15453_v31 = vld [vmem:[#allocation8 + $0x1a0] ss:$16 sps:$4 sm:$0xff]  }
 0xcca   :  { %v8766_v35 = vadd.f32 %v8765_v43, %v8764_v32  ;;  %v15456_v32 = vld [vmem:[#allocation8 + $0x1a8] ss:$16 sps:$4 sm:$0xff]   ;;  %v15461_v43 = vld [vmem:[#allocation8 + $0x184] ss:$16 sps:$4 sm:$0xff]  }
 0xccc   :  { %16143 = vtanh.f32 %v8766_v35  ;;  %9352 = vst [vmem:[#allocation3 + $0x2] sm:$0x3] %v8766_v35  ;;  %v15464_v35 = vld [vmem:[#allocation8 + $0x18c] ss:$16 sps:$4 sm:$0xff]  }
 0xcd9   :  { %v16144_v47 = vpop.eup %16143 }
 0xcda   :  { %v8768_v41 = vmul.f32 %v16144_v47, %v16142_v36  ;;  %v15459_v36 = vld [vmem:[#allocation8 + $0x180] ss:$16 sps:$4 sm:$0xff]   ;;  %v15462_v47 = vld [vmem:[#allocation8 + $0x188] ss:$16 sps:$4 sm:$0xff]  }
 0xcdc   :  { %v8769_v63 = vpack.c.bf16 %v8768_v41, %v8768_v41  ;;  %9351 = vst [vmem:[#allocation2 + $0x2] sm:$0x3] %v8768_v41  ;;  %v15467_v41 = vld [vmem:[#allocation8 + $0x164] ss:$16 sps:$4 sm:$0xff]  }
 0xcde   :  { %9271 = vmatmul.mubr.bf16.vlgmr.msra.gmra.mxu0 %v8769_v63  ;;  %9312 = vmatmul.mubr.bf16.vlgmr.msra.gmra.mxu1 %v8769_v63  ;;  %v15468_v63 = vld [vmem:[#allocation8 + $0x168] ss:$16 sps:$4 sm:$0xff]  }
 0xcdf   :  { %9554 = vmatpush1.bf16.msra.mxu0 %v15393_v48  ;;  %9595 = vmatpush1.bf16.msra.mxu1 %v15396_v38  ;;  %v15470_v48 = vld [vmem:[#allocation8 + $0x16c] ss:$16 sps:$4 sm:$0xff]   ;;  %v15465_v38 = vld [vmem:[#allocation8 + $0x160] ss:$16 sps:$4 sm:$0xff]  }
 0xce0   :  { %9555 = vmatprep.subr.bf16.mxu0 %v15401_v62  ;;  %9596 = vmatprep.subr.bf16.mxu1 %v15404_v45  ;;  %v15473_v62 = vld [vmem:[#allocation8 + $0x144] ss:$16 sps:$4 sm:$0xff]   ;;  %v15476_v45 = vld [vmem:[#allocation8 + $0x14c] ss:$16 sps:$4 sm:$0xff]  }
 0xce1   :  { %9585 = vmatprep.mubr.bf16.mxu0 %v16327_v0  ;;  %9626 = vmatprep.mubr.bf16.mxu1 %v16327_v0 }
 0xce3   :  { %9556 = vmatpush1.bf16.msra.mxu0 %v15399_v40  ;;  %9597 = vmatpush1.bf16.msra.mxu1 %v15402_v54  ;;  %v15471_v40 = vld [vmem:[#allocation8 + $0x140] ss:$16 sps:$4 sm:$0xff]   ;;  %v15474_v54 = vld [vmem:[#allocation8 + $0x148] ss:$16 sps:$4 sm:$0xff]  }
 0xce4   :  { %9557 = vmatprep.subr.bf16.mxu0 %v15407_v49  ;;  %9598 = vmatprep.subr.bf16.mxu1 %v15410_v50  ;;  %v15479_v49 = vld [vmem:[#allocation8 + $0x124] ss:$16 sps:$4 sm:$0xff]   ;;  %v15482_v50 = vld [vmem:[#allocation8 + $0x12c] ss:$16 sps:$4 sm:$0xff]  }
 0xce7   :  { %9558 = vmatpush1.bf16.msra.mxu0 %v15405_v15  ;;  %9599 = vmatpush1.bf16.msra.mxu1 %v15408_v6  ;;  %v15477_v15 = vld [vmem:[#allocation8 + $0x120] ss:$16 sps:$4 sm:$0xff]   ;;  %v15480_v6 = vld [vmem:[#allocation8 + $0x128] ss:$16 sps:$4 sm:$0xff]  }
 0xce8   :  { %9559 = vmatprep.subr.bf16.mxu0 %v15413_v51  ;;  %9600 = vmatprep.subr.bf16.mxu1 %v15416_v52  ;;  %v15485_v51 = vld [vmem:[#allocation8 + $0x104] ss:$16 sps:$4 sm:$0xff]   ;;  %v15488_v52 = vld [vmem:[#allocation8 + $0x10c] ss:$16 sps:$4 sm:$0xff]  }
 0xceb   :  { %9560 = vmatpush1.bf16.msra.mxu0 %v15411_v53  ;;  %9601 = vmatpush1.bf16.msra.mxu1 %v15414_v10  ;;  %v15483_v53 = vld [vmem:[#allocation8 + $0x100] ss:$16 sps:$4 sm:$0xff]   ;;  %v15486_v10 = vld [vmem:[#allocation8 + $0x108] ss:$16 sps:$4 sm:$0xff]  }
 0xcec   :  { %9561 = vmatprep.subr.bf16.mxu0 %v15419_v17  ;;  %9602 = vmatprep.subr.bf16.mxu1 %v15422_v24  ;;  %v9712_v17 = vld [vmem:[#allocation2 + $0x2] sm:$0x3] }
 0xced   :  { %v9713_v24 = vpack.c.bf16 %v9712_v17, %v9712_v17 }
 0xcef   :  { %9562 = vmatpush1.bf16.msra.mxu0 %v15417_v25  ;;  %9603 = vmatpush1.bf16.msra.mxu1 %v15420_v2  ;;  %v15489_v25 = vld [vmem:[#allocation5 + $0x1e0] ss:$16 sps:$4 sm:$0xff]   ;;  %v15491_v2 = vld [vmem:[#allocation5 + $0x1e4] ss:$16 sps:$4 sm:$0xff]  }
 0xcf0   :  { %9563 = vmatprep.subr.bf16.mxu0 %v15425_v59  ;;  %9604 = vmatprep.subr.bf16.mxu1 %v15428_v29  ;;  %v15492_v59 = vld [vmem:[#allocation5 + $0x1e8] ss:$16 sps:$4 sm:$0xff]   ;;  %v15494_v29 = vld [vmem:[#allocation5 + $0x1ec] ss:$16 sps:$4 sm:$0xff]  }
 0xcf3   :  { %9564 = vmatpush1.bf16.msra.mxu0 %v15423_v23  ;;  %9605 = vmatpush1.bf16.msra.mxu1 %v15426_v60  ;;  %v15497_v23 = vld [vmem:[#allocation5 + $0x1c4] ss:$16 sps:$4 sm:$0xff]   ;;  %v15500_v60 = vld [vmem:[#allocation5 + $0x1cc] ss:$16 sps:$4 sm:$0xff]  }
 0xcf4   :  { %9565 = vmatprep.subr.bf16.mxu0 %v15431_v61  ;;  %9606 = vmatprep.subr.bf16.mxu1 %v15434_v56  ;;  %v15495_v61 = vld [vmem:[#allocation5 + $0x1c0] ss:$16 sps:$4 sm:$0xff]   ;;  %v15498_v56 = vld [vmem:[#allocation5 + $0x1c8] ss:$16 sps:$4 sm:$0xff]  }
 0xcf7   :  { %9566 = vmatpush1.bf16.msra.mxu0 %v15429_v28  ;;  %9607 = vmatpush1.bf16.msra.mxu1 %v15432_v3  ;;  %v15503_v28 = vld [vmem:[#allocation5 + $0x1a4] ss:$16 sps:$4 sm:$0xff]   ;;  %v15506_v3 = vld [vmem:[#allocation5 + $0x1ac] ss:$16 sps:$4 sm:$0xff]  }
 0xcf8   :  { %9567 = vmatprep.subr.bf16.mxu0 %v15437_v5  ;;  %9608 = vmatprep.subr.bf16.mxu1 %v15440_v37  ;;  %v15501_v5 = vld [vmem:[#allocation5 + $0x1a0] ss:$16 sps:$4 sm:$0xff]   ;;  %v15504_v37 = vld [vmem:[#allocation5 + $0x1a8] ss:$16 sps:$4 sm:$0xff]  }
 0xcfb   :  { %9568 = vmatpush1.bf16.msra.mxu0 %v15435_v9  ;;  %9609 = vmatpush1.bf16.msra.mxu1 %v15438_v7  ;;  %v15509_v9 = vld [vmem:[#allocation5 + $0x184] ss:$16 sps:$4 sm:$0xff]   ;;  %v15512_v7 = vld [vmem:[#allocation5 + $0x18c] ss:$16 sps:$4 sm:$0xff]  }
 0xcfc   :  { %9906 = vmatprep.subr.bf16.mxu0 %v15443_v58  ;;  %9947 = vmatprep.subr.bf16.mxu1 %v15446_v11  ;;  %v15507_v58 = vld [vmem:[#allocation5 + $0x180] ss:$16 sps:$4 sm:$0xff]   ;;  %v15510_v11 = vld [vmem:[#allocation5 + $0x188] ss:$16 sps:$4 sm:$0xff]  }
 0xcfe   :  { %9586 = vmatmul.mubr.bf16.vlgmr.msra.gmra.mxu0 %v9360_v46  ;;  %9627 = vmatmul.mubr.bf16.vlgmr.msra.gmra.mxu1 %v9360_v46  ;;  %v15516_v46 = vld [vmem:[#allocation5 + $0x168] ss:$16 sps:$4 sm:$0xff]  }
 0xcff   :  { %9907 = vmatpush1.bf16.msra.mxu0 %v15441_v8  ;;  %9948 = vmatpush1.bf16.msra.mxu1 %v15444_v12  ;;  %v15518_v8 = vld [vmem:[#allocation5 + $0x16c] ss:$16 sps:$4 sm:$0xff]   ;;  %v15513_v12 = vld [vmem:[#allocation5 + $0x160] ss:$16 sps:$4 sm:$0xff]  }
 0xd00   :  { %9908 = vmatprep.subr.bf16.mxu0 %v15449_v20  ;;  %9949 = vmatprep.subr.bf16.mxu1 %v15452_v21  ;;  %v15521_v20 = vld [vmem:[#allocation5 + $0x144] ss:$16 sps:$4 sm:$0xff]   ;;  %v15524_v21 = vld [vmem:[#allocation5 + $0x14c] ss:$16 sps:$4 sm:$0xff]  }
 0xd01   :  { %9938 = vmatprep.mubr.bf16.mxu0 %v16327_v0  ;;  %9979 = vmatprep.mubr.bf16.mxu1 %v16327_v0 }
 0xd03   :  { %9909 = vmatpush1.bf16.msra.mxu0 %v15447_v13  ;;  %9950 = vmatpush1.bf16.msra.mxu1 %v15450_v30  ;;  %v15519_v13 = vld [vmem:[#allocation5 + $0x140] ss:$16 sps:$4 sm:$0xff]   ;;  %v15522_v30 = vld [vmem:[#allocation5 + $0x148] ss:$16 sps:$4 sm:$0xff]  }
 0xd04   :  { %9910 = vmatprep.subr.bf16.mxu0 %v15455_v14  ;;  %9951 = vmatprep.subr.bf16.mxu1 %v15458_v33  ;;  %v15527_v14 = vld [vmem:[#allocation5 + $0x124] ss:$16 sps:$4 sm:$0xff]   ;;  %v15530_v33 = vld [vmem:[#allocation5 + $0x12c] ss:$16 sps:$4 sm:$0xff]  }
 0xd07   :  { %9911 = vmatpush1.bf16.msra.mxu0 %v15453_v31  ;;  %9952 = vmatpush1.bf16.msra.mxu1 %v15456_v32  ;;  %v15525_v31 = vld [vmem:[#allocation5 + $0x120] ss:$16 sps:$4 sm:$0xff]   ;;  %v15528_v32 = vld [vmem:[#allocation5 + $0x128] ss:$16 sps:$4 sm:$0xff]  }
 0xd08   :  { %9912 = vmatprep.subr.bf16.mxu0 %v15461_v43  ;;  %9953 = vmatprep.subr.bf16.mxu1 %v15464_v35  ;;  %v15533_v43 = vld [vmem:[#allocation5 + $0x104] ss:$16 sps:$4 sm:$0xff]   ;;  %v15536_v35 = vld [vmem:[#allocation5 + $0x10c] ss:$16 sps:$4 sm:$0xff]  }
 0xd0b   :  { %9913 = vmatpush1.bf16.msra.mxu0 %v15459_v36  ;;  %9954 = vmatpush1.bf16.msra.mxu1 %v15462_v47  ;;  %v15531_v36 = vld [vmem:[#allocation5 + $0x100] ss:$16 sps:$4 sm:$0xff]   ;;  %v15534_v47 = vld [vmem:[#allocation5 + $0x108] ss:$16 sps:$4 sm:$0xff]  }
 0xd0c   :  { %9914 = vmatprep.subr.bf16.mxu0 %v15467_v41  ;;  %9955 = vmatprep.subr.bf16.mxu1 %v15470_v48  ;;  %v15539_v41 = vld [vmem:[#allocation8 + $0x2e4] ss:$16 sps:$4 sm:$0xff]   ;;  %v15542_v48 = vld [vmem:[#allocation8 + $0x2ec] ss:$16 sps:$4 sm:$0xff]  }
 0xd0f   :  { %9915 = vmatpush1.bf16.msra.mxu0 %v15465_v38  ;;  %9956 = vmatpush1.bf16.msra.mxu1 %v15468_v63 }
 0xd10   :  { %9916 = vmatprep.subr.bf16.mxu0 %v15473_v62  ;;  %9957 = vmatprep.subr.bf16.mxu1 %v15476_v45 }
 0xd13   :  { %9917 = vmatpush1.bf16.msra.mxu0 %v15471_v40  ;;  %9958 = vmatpush1.bf16.msra.mxu1 %v15474_v54 }
 0xd14   :  { %9918 = vmatprep.subr.bf16.mxu0 %v15479_v49  ;;  %9959 = vmatprep.subr.bf16.mxu1 %v15482_v50 }
 0xd17   :  { %9919 = vmatpush1.bf16.msra.mxu0 %v15477_v15  ;;  %9960 = vmatpush1.bf16.msra.mxu1 %v15480_v6 }
 0xd18   :  { %9920 = vmatprep.subr.bf16.mxu0 %v15485_v51  ;;  %9961 = vmatprep.subr.bf16.mxu1 %v15488_v52 }
 0xd1b   :  { %9921 = vmatpush1.bf16.msra.mxu0 %v15483_v53  ;;  %9962 = vmatpush1.bf16.msra.mxu1 %v15486_v10 }
 0xd1c   :  { %10151 = vmatprep.subr.bf16.mxu0 %v15491_v2  ;;  %10192 = vmatprep.subr.bf16.mxu1 %v15494_v29 }
 0xd1e   :  { %9939 = vmatmul.mubr.bf16.vlgmr.msra.gmra.mxu0 %v9713_v24  ;;  %9980 = vmatmul.mubr.bf16.vlgmr.msra.gmra.mxu1 %v9713_v24 }
 0xd1f   :  { %10183 = vmatprep.mubr.bf16.mxu0 %v16327_v0  ;;  %10224 = vmatprep.mubr.bf16.mxu1 %v16327_v0 }
 0xd20   :  { %10152 = vmatpush1.bf16.msra.mxu0 %v15489_v25  ;;  %10193 = vmatpush1.bf16.msra.mxu1 %v15492_v59 }
 0xd21   :  { %10153 = vmatprep.subr.bf16.mxu0 %v15497_v23  ;;  %10194 = vmatprep.subr.bf16.mxu1 %v15500_v60 }
 0xd24   :  { %10154 = vmatpush1.bf16.msra.mxu0 %v15495_v61  ;;  %10195 = vmatpush1.bf16.msra.mxu1 %v15498_v56 }
 0xd25   :  { %10155 = vmatprep.subr.bf16.mxu0 %v15503_v28  ;;  %10196 = vmatprep.subr.bf16.mxu1 %v15506_v3  ;;  %v9355_v28 = vld [vmem:[#allocation4 + $0x8] sm:$0x30] }
 0xd28   :  { %10156 = vmatpush1.bf16.msra.mxu0 %v15501_v5  ;;  %10197 = vmatpush1.bf16.msra.mxu1 %v15504_v37 }
 0xd29   :  { %10157 = vmatprep.subr.bf16.mxu0 %v15509_v9  ;;  %10198 = vmatprep.subr.bf16.mxu1 %v15512_v7  ;;  %v9356_v7 = vld [vmem:[#allocation4 + $0x20] sm:$0x30] }
 0xd2c   :  { %10158 = vmatpush1.bf16.msra.mxu0 %v15507_v58  ;;  %10199 = vmatpush1.bf16.msra.mxu1 %v15510_v11 }
 0xd2d   :  { %10159 = vmatprep.subr.bf16.mxu0 %v15515_v18  ;;  %10200 = vmatprep.subr.bf16.mxu1 %v15518_v8 }
 0xd30   :  { %10160 = vmatpush1.bf16.msra.mxu0 %v15513_v12  ;;  %10201 = vmatpush1.bf16.msra.mxu1 %v15516_v46 }
 0xd31   :  { %10161 = vmatprep.subr.bf16.mxu0 %v15521_v20  ;;  %10202 = vmatprep.subr.bf16.mxu1 %v15524_v21  ;;  %v9343_v21 = vld [vmem:[#allocation3 + $0x4] sm:$0x3] }
 0xd34   :  { %10162 = vmatpush1.bf16.msra.mxu0 %v15519_v13  ;;  %10203 = vmatpush1.bf16.msra.mxu1 %v15522_v30 }
 0xd35   :  { %10163 = vmatprep.subr.bf16.mxu0 %v15527_v14  ;;  %10204 = vmatprep.subr.bf16.mxu1 %v15530_v33 }
 0xd38   :  { %10164 = vmatpush1.bf16.msra.mxu0 %v15525_v31  ;;  %10205 = vmatpush1.bf16.msra.mxu1 %v15528_v32 }
 0xd39   :  { %10165 = vmatprep.subr.bf16.mxu0 %v15533_v43  ;;  %10206 = vmatprep.subr.bf16.mxu1 %v15536_v35  ;;  %v9357_v35 = vld [vmem:[#allocation4 + $0x28] sm:$0x30] }
 0xd3c   :  { %10166 = vmatpush1.bf16.msra.mxu0 %v15531_v36  ;;  %10207 = vmatpush1.bf16.msra.mxu1 %v15534_v47 }
 0xd3d   :  { %10489 = vmatprep.subr.bf16.mxu0 %v15539_v41  ;;  %10530 = vmatprep.subr.bf16.mxu1 %v15542_v48  ;;  %v9358_v48 = vld [vmem:[#allocation4 + $0x38] sm:$0x30] }
 0xd9e   :  { %v9272_v38 = vpop.f32.mrf.mxu0  ;;  %v9313_v63 = vpop.f32.mrf.mxu1 }
 0xd9f   :  { %v9273_v62 = vadd.f32 %v9272_v38, %v16664_v26  ;;  %v9314_v17 = vadd.f32 %v9313_v63, %v16666_v34 }
 0xda0   :  { %v9274_v45 = vpop.f32.mrf.mxu0  ;;  %v9315_v40 = vpop.f32.mrf.mxu1 }
 0xda1   :  { %v9320_v54 = vadd.f32 %v9273_v62, %v16457_v22  ;;  %v9275_v49 = vadd.f32 %v9274_v45, %v16668_v4  ;;  %v9322_v26 = vadd.f32 %v9314_v17, %v16467_v16  ;;  %v9316_v24 = vadd.f32 %v9315_v40, %v16670_v19 }
 0xda2   :  { %v9276_v50 = vpop.f32.mrf.mxu0  ;;  %v9317_v15 = vpop.f32.mrf.mxu1 }
 0xda3   :  { %v13502_v6 = vmul.f32 -1.442695, %v9320_v54  ;;  %v9321_v51 = vadd.f32 %v9275_v49, %v16460_v27  ;;  %v13504_v25 = vmul.f32 -1.442695, %v9322_v26  ;;  %v9323_v4 = vadd.f32 %v9316_v24, %v16472_v44 }
 0xda4   :  { %v9277_v52 = vpop.f32.mrf.mxu0  ;;  %v9318_v53 = vpop.f32.mrf.mxu1 }
 0xda5   :  { %16145 = vpow2.f32 %v13502_v6  ;;  %v13503_v10 = vmul.f32 -1.442695, %v9321_v51  ;;  %v9670_v51 = vld [vmem:[#allocation3] sm:$0x3] }
 0xda7   :  { %16147 = vpow2.f32 %v13503_v10 }
 0xda8   :  { %16149 = vpow2.f32 %v13504_v25 }
 0xdb2   :  { %v16146_v2 = vpop.eup %16145 }
 0xdb3   :  { %v9333_v59 = vadd.f32 1.0, %v16146_v2  ;;  %v9672_v2 = vrot.slane %v9670_v51, 4 }
 0xdb4   :  { %v16148_v29 = vpop.eup %16147 }
 0xdb5   :  { %16151 = vrcp.f32 %v9333_v59  ;;  %v9334_v23 = vadd.f32 1.0, %v16148_v29  ;;  %v16150_v5 = vpop.eup %16149 }
 0xdb6   :  { %16153 = vtanh.f32 %v9323_v4  ;;  %v9335_v20 = vadd.f32 1.0, %v16150_v5 }
 0xdb7   :  { %16155 = vrcp.f32 %v9334_v23 }
 0xdbe   :  { %v9587_v60 = vpop.f32.mrf.mxu0  ;;  %v9628_v61 = vpop.f32.mrf.mxu1 }
 0xdbf   :  { %v9639_v56 = vrot.slane %v9587_v60, 4  ;;  %v9641_v43 = vrot.slane %v9628_v61, 4 }
 0xdc0   :  { %v9589_v34 = vpop.f32.mrf.mxu0  ;;  %v9630_v3 = vpop.f32.mrf.mxu1 }
 0xdc1   :  { %v9647_v37 = vadd.f32 %v9639_v56, %v9355_v28  ;;  %v9640_v19 = vrot.slane %v9589_v34, 4  ;;  %v9649_v36 = vadd.f32 %v9641_v43, %v9357_v35  ;;  %v9642_v47 = vrot.slane %v9630_v3, 4  ;;  %v15564_v43 = vld [vmem:[#allocation8 + $0x268] ss:$16 sps:$4 sm:$0xff]   ;;  %v15569_v35 = vld [vmem:[#allocation8 + $0x244] ss:$16 sps:$4 sm:$0xff]  }
 0xdc2   :  { %v16152_v9 = vpop.eup %16151  ;;  %v9591_v58 = vpop.f32.mrf.mxu0 }
 0xdc3   :  { %v9632_v11 = vpop.f32.mrf.mxu1  ;;  %v16154_v18 = vpop.eup %16153  ;;  %v13537_v8 = vmul.f32 -1.442695, %v9647_v37  ;;  %v9648_v12 = vadd.f32 %v9640_v19, %v9356_v7  ;;  %v13539_v41 = vmul.f32 -1.442695, %v9649_v36  ;;  %v9650_v63 = vadd.f32 %v9642_v47, %v9358_v48  ;;  %v15537_v37 = vld [vmem:[#allocation8 + $0x2e0] ss:$16 sps:$4 sm:$0xff]  }
 0xdc4   :  { %v16156_v46 = vpop.eup %16155  ;;  %v9592_v13 = vpop.f32.mrf.mxu0  ;;  %v9345_v33 = vmul.f32 %v16154_v18, %v16152_v9  ;;  %v15540_v19 = vld [vmem:[#allocation8 + $0x2e8] ss:$16 sps:$4 sm:$0xff]   ;;  %v15545_v7 = vld [vmem:[#allocation8 + $0x2c4] ss:$16 sps:$4 sm:$0xff]   ;;  %v15548_v58 = vld [vmem:[#allocation8 + $0x2cc] ss:$16 sps:$4 sm:$0xff]  }
 0xdc5   :  { %v9633_v30 = vpop.f32.mrf.mxu1  ;;  %v9344_v14 = vmul.f32 %v16156_v46, %v9343_v21  ;;  %16157 = vpow2.f32 %v13537_v8  ;;  %v13538_v31 = vmul.f32 -1.442695, %v9648_v12  ;;  %v15543_v11 = vld [vmem:[#allocation8 + $0x2c0] ss:$16 sps:$4 sm:$0xff]   ;;  %v15546_v18 = vld [vmem:[#allocation8 + $0x2c8] ss:$16 sps:$4 sm:$0xff]  }
 0xdc6   :  { %v15551_v8 = vld [vmem:[#allocation8 + $0x2a4] ss:$16 sps:$4 sm:$0xff]   ;;  %v15554_v12 = vld [vmem:[#allocation8 + $0x2ac] ss:$16 sps:$4 sm:$0xff]   ;;  %v15549_v46 = vld [vmem:[#allocation8 + $0x2a0] ss:$16 sps:$4 sm:$0xff]  }
 0xdc7   :  { %v9346_v32 = vadd.f32 %v9345_v33, %v9344_v14  ;;  %16159 = vpow2.f32 %v13538_v31  ;;  %v15557_v21 = vld [vmem:[#allocation8 + $0x284] ss:$16 sps:$4 sm:$0xff]   ;;  %v15560_v13 = vld [vmem:[#allocation8 + $0x28c] ss:$16 sps:$4 sm:$0xff]   ;;  %v15555_v30 = vld [vmem:[#allocation8 + $0x280] ss:$16 sps:$4 sm:$0xff]  }
 0xdc8   :  { %16161 = vrcp.f32 %v9335_v20  ;;  %v15552_v20 = vld [vmem:[#allocation8 + $0x2a8] ss:$16 sps:$4 sm:$0xff]   ;;  %v15563_v33 = vld [vmem:[#allocation8 + $0x264] ss:$16 sps:$4 sm:$0xff]   ;;  %v15566_v31 = vld [vmem:[#allocation8 + $0x26c] ss:$16 sps:$4 sm:$0xff]  }
 0xdc9   :  { %16163 = vtanh.f32 %v9346_v32  ;;  %9354 = vst [vmem:[#allocation3 + $0x4] sm:$0x3] %v9346_v32  ;;  %v15558_v14 = vld [vmem:[#allocation8 + $0x288] ss:$16 sps:$4 sm:$0xff]   ;;  %v15561_v32 = vld [vmem:[#allocation8 + $0x260] ss:$16 sps:$4 sm:$0xff]  }
 0xdca   :  { %16165 = vpow2.f32 %v13539_v41  ;;  %v15572_v36 = vld [vmem:[#allocation8 + $0x24c] ss:$16 sps:$4 sm:$0xff]   ;;  %v15567_v47 = vld [vmem:[#allocation8 + $0x240] ss:$16 sps:$4 sm:$0xff]   ;;  %v15570_v41 = vld [vmem:[#allocation8 + $0x248] ss:$16 sps:$4 sm:$0xff]  }
 0xdcb   :  { %v15575_v48 = vld [vmem:[#allocation8 + $0x224] ss:$16 sps:$4 sm:$0xff]  }
 0xdd2   :  { %v16158_v38 = vpop.eup %16157 }
 0xdd3   :  { %v9660_v62 = vadd.f32 1.0, %v16158_v38  ;;  %v15578_v38 = vld [vmem:[#allocation8 + $0x22c] ss:$16 sps:$4 sm:$0xff]  }
 0xdd4   :  { %v16160_v45 = vpop.eup %16159 }
 0xdd5   :  { %v16162_v40 = vpop.eup %16161  ;;  %16167 = vrcp.f32 %v9660_v62  ;;  %v9661_v54 = vadd.f32 1.0, %v16160_v45  ;;  %v15576_v62 = vld [vmem:[#allocation8 + $0x228] ss:$16 sps:$4 sm:$0xff]   ;;  %v15581_v45 = vld [vmem:[#allocation8 + $0x204] ss:$16 sps:$4 sm:$0xff]  }
 0xdd6   :  { %v16164_v49 = vpop.eup %16163  ;;  %16169 = vtanh.f32 %v9650_v63  ;;  %v15573_v63 = vld [vmem:[#allocation8 + $0x220] ss:$16 sps:$4 sm:$0xff]  }
 0xdd7   :  { %v9348_v50 = vmul.f32 %v16164_v49, %v16162_v40  ;;  %16171 = vrcp.f32 %v9661_v54  ;;  %v16166_v10 = vpop.eup %16165  ;;  %v15584_v40 = vld [vmem:[#allocation8 + $0x20c] ss:$16 sps:$4 sm:$0xff]   ;;  %v15579_v54 = vld [vmem:[#allocation8 + $0x200] ss:$16 sps:$4 sm:$0xff]   ;;  %v15582_v49 = vld [vmem:[#allocation8 + $0x208] ss:$16 sps:$4 sm:$0xff]  }
 0xdd8   :  { %v9662_v59 = vadd.f32 1.0, %v16166_v10  ;;  %v15585_v10 = vld [vmem:[#allocation5 + $0x2e0] ss:$16 sps:$4 sm:$0xff]  }
 0xdd9   :  { %9353 = vst [vmem:[#allocation2 + $0x4] sm:$0x3] %v9348_v50 }
 0xdda   :  { %16173 = vrcp.f32 %v9662_v59  ;;  %v15594_v59 = vld [vmem:[#allocation5 + $0x2c8] ss:$16 sps:$4 sm:$0xff]  }
 0xdde   :  { %v16686_v15 = vpop.f32.mrf.mxu0  ;;  %v16688_v6 = vpop.f32.mrf.mxu1 }
 0xde0   :  { %v16690_v52 = vpop.f32.mrf.mxu0  ;;  %v16692_v53 = vpop.f32.mrf.mxu1  ;;  %v10295_v50 = vld [vmem:[#allocation2 + $0x4] sm:$0x3] }
 0xde1   :  { %v10296_v51 = vpack.c.bf16 %v10295_v50, %v10295_v50 }
 0xde2   :  { %v16168_v17 = vpop.eup %16167  ;;  %v9944_v26 = vpop.f32.mrf.mxu0 }
 0xde3   :  { %v9985_v24 = vpop.f32.mrf.mxu1  ;;  %v16170_v25 = vpop.eup %16169  ;;  %v15588_v26 = vld [vmem:[#allocation5 + $0x2e8] ss:$16 sps:$4 sm:$0xff]  }
 0xde4   :  { %v16172_v4 = vpop.eup %16171  ;;  %v9945_v29 = vpop.f32.mrf.mxu0  ;;  %v9675_v61 = vmul.f32 %v16170_v25, %v16168_v17  ;;  %v15587_v17 = vld [vmem:[#allocation5 + $0x2e4] ss:$16 sps:$4 sm:$0xff]   ;;  %v15590_v24 = vld [vmem:[#allocation5 + $0x2ec] ss:$16 sps:$4 sm:$0xff]  }
 0xde5   :  { %v9986_v23 = vpop.f32.mrf.mxu1  ;;  %v9674_v60 = vmul.f32 %v16172_v4, %v9672_v2  ;;  %v15593_v25 = vld [vmem:[#allocation5 + $0x2c4] ss:$16 sps:$4 sm:$0xff]   ;;  %v15596_v2 = vld [vmem:[#allocation5 + $0x2cc] ss:$16 sps:$4 sm:$0xff]   ;;  %v15591_v4 = vld [vmem:[#allocation5 + $0x2c0] ss:$16 sps:$4 sm:$0xff]  }
 0xde6   :  { %v15599_v29 = vld [vmem:[#allocation5 + $0x2a4] ss:$16 sps:$4 sm:$0xff]   ;;  %v15602_v23 = vld [vmem:[#allocation5 + $0x2ac] ss:$16 sps:$4 sm:$0xff]  }
 0xde7   :  { %v9676_v56 = vadd.f32 %v9675_v61, %v9674_v60  ;;  %v16174_v28 = vpop.eup %16173  ;;  %v15597_v60 = vld [vmem:[#allocation5 + $0x2a0] ss:$16 sps:$4 sm:$0xff]   ;;  %v15600_v61 = vld [vmem:[#allocation5 + $0x2a8] ss:$16 sps:$4 sm:$0xff]  }
 0xde9   :  { %16175 = vtanh.f32 %v9676_v56  ;;  %10843 = vst [vmem:[#allocation3 - $0x4] sm:$0x30] %v9676_v56  ;;  %v15605_v56 = vld [vmem:[#allocation5 + $0x284] ss:$16 sps:$4 sm:$0xff]  }
 0xdf6   :  { %v16176_v34 = vpop.eup %16175 }
 0xdf7   :  { %v9678_v3 = vmul.f32 %v16176_v34, %v16174_v28  ;;  %v15608_v28 = vld [vmem:[#allocation5 + $0x28c] ss:$16 sps:$4 sm:$0xff]   ;;  %v15603_v34 = vld [vmem:[#allocation5 + $0x280] ss:$16 sps:$4 sm:$0xff]  }
 0xdf9   :  { %v9679_v5 = vpack.c.bf16 %v9678_v3, %v9678_v3  ;;  %10842 = vst [vmem:[#allocation2 - $0x4] sm:$0x30] %v9678_v3  ;;  %v15606_v3 = vld [vmem:[#allocation5 + $0x288] ss:$16 sps:$4 sm:$0xff]  }
 0xdfb   :  { %v9989_v9 = vrot.slane %v9679_v5, 2  ;;  %v15611_v5 = vld [vmem:[#allocation5 + $0x264] ss:$16 sps:$4 sm:$0xff]  }
 0xdfd   :  { %10184 = vmatmul.mubr.bf16.vlgmr.msra.gmra.mxu0 %v9989_v9  ;;  %10225 = vmatmul.mubr.bf16.vlgmr.msra.gmra.mxu1 %v9989_v9  ;;  %v15612_v9 = vld [vmem:[#allocation5 + $0x268] ss:$16 sps:$4 sm:$0xff]  }
 0xdfe   :  { %10490 = vmatpush1.bf16.msra.mxu0 %v15537_v37  ;;  %10531 = vmatpush1.bf16.msra.mxu1 %v15540_v19  ;;  %v15614_v37 = vld [vmem:[#allocation5 + $0x26c] ss:$16 sps:$4 sm:$0xff]   ;;  %v15609_v19 = vld [vmem:[#allocation5 + $0x260] ss:$16 sps:$4 sm:$0xff]  }
 0xdff   :  { %10491 = vmatprep.subr.bf16.mxu0 %v15545_v7  ;;  %10532 = vmatprep.subr.bf16.mxu1 %v15548_v58  ;;  %v15617_v7 = vld [vmem:[#allocation5 + $0x244] ss:$16 sps:$4 sm:$0xff]   ;;  %v15620_v58 = vld [vmem:[#allocation5 + $0x24c] ss:$16 sps:$4 sm:$0xff]  }
 0xe00   :  { %10521 = vmatprep.mubr.bf16.mxu0 %v16327_v0  ;;  %10562 = vmatprep.mubr.bf16.mxu1 %v16327_v0 }
 0xe02   :  { %10492 = vmatpush1.bf16.msra.mxu0 %v15543_v11  ;;  %10533 = vmatpush1.bf16.msra.mxu1 %v15546_v18  ;;  %v15615_v11 = vld [vmem:[#allocation5 + $0x240] ss:$16 sps:$4 sm:$0xff]   ;;  %v15618_v18 = vld [vmem:[#allocation5 + $0x248] ss:$16 sps:$4 sm:$0xff]  }
 0xe03   :  { %10493 = vmatprep.subr.bf16.mxu0 %v15551_v8  ;;  %10534 = vmatprep.subr.bf16.mxu1 %v15554_v12  ;;  %v15623_v8 = vld [vmem:[#allocation5 + $0x224] ss:$16 sps:$4 sm:$0xff]   ;;  %v15626_v12 = vld [vmem:[#allocation5 + $0x22c] ss:$16 sps:$4 sm:$0xff]  }
 0xe06   :  { %10494 = vmatpush1.bf16.msra.mxu0 %v15549_v46  ;;  %10535 = vmatpush1.bf16.msra.mxu1 %v15552_v20  ;;  %v15621_v46 = vld [vmem:[#allocation5 + $0x220] ss:$16 sps:$4 sm:$0xff]   ;;  %v15624_v20 = vld [vmem:[#allocation5 + $0x228] ss:$16 sps:$4 sm:$0xff]  }
 0xe07   :  { %10495 = vmatprep.subr.bf16.mxu0 %v15557_v21  ;;  %10536 = vmatprep.subr.bf16.mxu1 %v15560_v13  ;;  %v15629_v21 = vld [vmem:[#allocation5 + $0x204] ss:$16 sps:$4 sm:$0xff]   ;;  %v15632_v13 = vld [vmem:[#allocation5 + $0x20c] ss:$16 sps:$4 sm:$0xff]  }
 0xe0a   :  { %10496 = vmatpush1.bf16.msra.mxu0 %v15555_v30  ;;  %10537 = vmatpush1.bf16.msra.mxu1 %v15558_v14  ;;  %v15627_v30 = vld [vmem:[#allocation5 + $0x200] ss:$16 sps:$4 sm:$0xff]   ;;  %v15630_v14 = vld [vmem:[#allocation5 + $0x208] ss:$16 sps:$4 sm:$0xff]  }
 0xe0b   :  { %10497 = vmatprep.subr.bf16.mxu0 %v15563_v33  ;;  %10538 = vmatprep.subr.bf16.mxu1 %v15566_v31  ;;  %v15635_v33 = vld [vmem:[#allocation8 + $0xe4] ss:$16 sps:$4 sm:$0xff]   ;;  %v15638_v31 = vld [vmem:[#allocation8 + $0xec] ss:$16 sps:$4 sm:$0xff]  }
 0xe0e   :  { %10498 = vmatpush1.bf16.msra.mxu0 %v15561_v32  ;;  %10539 = vmatpush1.bf16.msra.mxu1 %v15564_v43 }
 0xe0f   :  { %10499 = vmatprep.subr.bf16.mxu0 %v15569_v35  ;;  %10540 = vmatprep.subr.bf16.mxu1 %v15572_v36 }
 0xe12   :  { %10500 = vmatpush1.bf16.msra.mxu0 %v15567_v47  ;;  %10541 = vmatpush1.bf16.msra.mxu1 %v15570_v41 }
 0xe13   :  { %10501 = vmatprep.subr.bf16.mxu0 %v15575_v48  ;;  %10542 = vmatprep.subr.bf16.mxu1 %v15578_v38 }
 0xe16   :  { %10502 = vmatpush1.bf16.msra.mxu0 %v15573_v63  ;;  %10543 = vmatpush1.bf16.msra.mxu1 %v15576_v62 }
 0xe17   :  { %10503 = vmatprep.subr.bf16.mxu0 %v15581_v45  ;;  %10544 = vmatprep.subr.bf16.mxu1 %v15584_v40 }
 0xe1a   :  { %10504 = vmatpush1.bf16.msra.mxu0 %v15579_v54  ;;  %10545 = vmatpush1.bf16.msra.mxu1 %v15582_v49 }
 0xe1b   :  { %10731 = vmatprep.subr.bf16.mxu0 %v15587_v17  ;;  %10772 = vmatprep.subr.bf16.mxu1 %v15590_v24 }
 0xe1d   :  { %10522 = vmatmul.mubr.bf16.vlgmr.msra.gmra.mxu0 %v10296_v51  ;;  %10563 = vmatmul.mubr.bf16.vlgmr.msra.gmra.mxu1 %v10296_v51 }
 0xe1e   :  { %10763 = vmatprep.mubr.bf16.mxu0 %v16327_v0  ;;  %10804 = vmatprep.mubr.bf16.mxu1 %v16327_v0 }
 0xe1f   :  { %10732 = vmatpush1.bf16.msra.mxu0 %v15585_v10  ;;  %10773 = vmatpush1.bf16.msra.mxu1 %v15588_v26 }
 0xe20   :  { %10733 = vmatprep.subr.bf16.mxu0 %v15593_v25  ;;  %10774 = vmatprep.subr.bf16.mxu1 %v15596_v2 }
 0xe23   :  { %10734 = vmatpush1.bf16.msra.mxu0 %v15591_v4  ;;  %10775 = vmatpush1.bf16.msra.mxu1 %v15594_v59 }
 0xe24   :  { %10735 = vmatprep.subr.bf16.mxu0 %v15599_v29  ;;  %10776 = vmatprep.subr.bf16.mxu1 %v15602_v23 }
 0xe27   :  { %10736 = vmatpush1.bf16.msra.mxu0 %v15597_v60  ;;  %10777 = vmatpush1.bf16.msra.mxu1 %v15600_v61 }
 0xe28   :  { %10737 = vmatprep.subr.bf16.mxu0 %v15605_v56  ;;  %10778 = vmatprep.subr.bf16.mxu1 %v15608_v28 }
 0xe2b   :  { %10738 = vmatpush1.bf16.msra.mxu0 %v15603_v34  ;;  %10779 = vmatpush1.bf16.msra.mxu1 %v15606_v3  ;;  %v10256_v34 = vld [vmem:[#allocation3 + $0x2] sm:$0x3] }
 0xe2c   :  { %10739 = vmatprep.subr.bf16.mxu0 %v15611_v5  ;;  %10780 = vmatprep.subr.bf16.mxu1 %v15614_v37 }
 0xe2f   :  { %10740 = vmatpush1.bf16.msra.mxu0 %v15609_v19  ;;  %10781 = vmatpush1.bf16.msra.mxu1 %v15612_v9 }
 0xe30   :  { %10741 = vmatprep.subr.bf16.mxu0 %v15617_v7  ;;  %10782 = vmatprep.subr.bf16.mxu1 %v15620_v58 }
 0xe33   :  { %10742 = vmatpush1.bf16.msra.mxu0 %v15615_v11  ;;  %10783 = vmatpush1.bf16.msra.mxu1 %v15618_v18  ;;  %v15633_v18 = vld [vmem:[#allocation8 + $0xe0] ss:$16 sps:$4 sm:$0xff]  }
 0xe34   :  { %10743 = vmatprep.subr.bf16.mxu0 %v15623_v8  ;;  %10784 = vmatprep.subr.bf16.mxu1 %v15626_v12  ;;  %v15636_v8 = vld [vmem:[#allocation8 + $0xe8] ss:$16 sps:$4 sm:$0xff]  }
 0xe37   :  { %10744 = vmatpush1.bf16.msra.mxu0 %v15621_v46  ;;  %10785 = vmatpush1.bf16.msra.mxu1 %v15624_v20  ;;  %v15641_v46 = vld [vmem:[#allocation8 + $0xc4] ss:$16 sps:$4 sm:$0xff]   ;;  %v15644_v20 = vld [vmem:[#allocation8 + $0xcc] ss:$16 sps:$4 sm:$0xff]  }
 0xe38   :  { %10745 = vmatprep.subr.bf16.mxu0 %v15629_v21  ;;  %10786 = vmatprep.subr.bf16.mxu1 %v15632_v13  ;;  %v15639_v21 = vld [vmem:[#allocation8 + $0xc0] ss:$16 sps:$4 sm:$0xff]   ;;  %v15642_v13 = vld [vmem:[#allocation8 + $0xc8] ss:$16 sps:$4 sm:$0xff]  }
 0xe3b   :  { %10746 = vmatpush1.bf16.msra.mxu0 %v15627_v30  ;;  %10787 = vmatpush1.bf16.msra.mxu1 %v15630_v14  ;;  %v15647_v30 = vld [vmem:[#allocation8 + $0xa4] ss:$16 sps:$4 sm:$0xff]   ;;  %v15650_v14 = vld [vmem:[#allocation8 + $0xac] ss:$16 sps:$4 sm:$0xff]  }
 0xe3c   :  { %11046 = vmatprep.subr.bf16.mxu0 %v15635_v33  ;;  %11087 = vmatprep.subr.bf16.mxu1 %v15638_v31  ;;  %v15645_v33 = vld [vmem:[#allocation8 + $0xa0] ss:$16 sps:$4 sm:$0xff]   ;;  %v15648_v31 = vld [vmem:[#allocation8 + $0xa8] ss:$16 sps:$4 sm:$0xff]  }
 0xebd   :  { %v10185_v32 = vpop.f32.mrf.mxu0  ;;  %v10226_v43 = vpop.f32.mrf.mxu1 }
 0xebe   :  { %v10186_v35 = vadd.f32 %v10185_v32, %v16686_v15  ;;  %v10227_v50 = vadd.f32 %v10226_v43, %v16688_v6  ;;  %v15653_v32 = vld [vmem:[#allocation8 + $0x84] ss:$16 sps:$4 sm:$0xff]   ;;  %v15656_v43 = vld [vmem:[#allocation8 + $0x8c] ss:$16 sps:$4 sm:$0xff]  }
 0xebf   :  { %v10187_v36 = vpop.f32.mrf.mxu0  ;;  %v10228_v47 = vpop.f32.mrf.mxu1 }
 0xec0   :  { %v10233_v41 = vadd.f32 %v10186_v35, %v16420_v39  ;;  %v10188_v48 = vadd.f32 %v10187_v36, %v16690_v52  ;;  %v10235_v15 = vadd.f32 %v10227_v50, %v16430_v55  ;;  %v10229_v51 = vadd.f32 %v10228_v47, %v16692_v53  ;;  %v15651_v35 = vld [vmem:[#allocation8 + $0x80] ss:$16 sps:$4 sm:$0xff]   ;;  %v15654_v36 = vld [vmem:[#allocation8 + $0x88] ss:$16 sps:$4 sm:$0xff]   ;;  %v15659_v47 = vld [vmem:[#allocation8 + $0x64] ss:$16 sps:$4 sm:$0xff]  }
 0xec1   :  { %v10189_v38 = vpop.f32.mrf.mxu0  ;;  %v10230_v63 = vpop.f32.mrf.mxu1  ;;  %v15669_v50 = vld [vmem:[#allocation8 + $0x20] ss:$16 sps:$4 sm:$0xff]  }
 0xec2   :  { %v13604_v62 = vmul.f32 -1.442695, %v10233_v41  ;;  %v10234_v45 = vadd.f32 %v10188_v48, %v16423_v42  ;;  %v13606_v10 = vmul.f32 -1.442695, %v10235_v15  ;;  %v10236_v52 = vadd.f32 %v10229_v51, %v16435_v57  ;;  %v15662_v41 = vld [vmem:[#allocation8 + $0x6c] ss:$16 sps:$4 sm:$0xff]  }
 0xec3   :  { %v10190_v40 = vpop.f32.mrf.mxu0  ;;  %v10231_v54 = vpop.f32.mrf.mxu1  ;;  %v15657_v48 = vld [vmem:[#allocation8 + $0x60] ss:$16 sps:$4 sm:$0xff]   ;;  %v15660_v38 = vld [vmem:[#allocation8 + $0x68] ss:$16 sps:$4 sm:$0xff]   ;;  %v15665_v63 = vld [vmem:[#allocation8 + $0x44] ss:$16 sps:$4 sm:$0xff]  }
 0xec4   :  { %16177 = vpow2.f32 %v13604_v62  ;;  %v13605_v49 = vmul.f32 -1.442695, %v10234_v45  ;;  %v15668_v62 = vld [vmem:[#allocation8 + $0x4c] ss:$16 sps:$4 sm:$0xff]   ;;  %v15663_v45 = vld [vmem:[#allocation8 + $0x40] ss:$16 sps:$4 sm:$0xff]  }
 0xec5   :  { %v15666_v40 = vld [vmem:[#allocation8 + $0x48] ss:$16 sps:$4 sm:$0xff]   ;;  %v15671_v54 = vld [vmem:[#allocation8 + $0x24] ss:$16 sps:$4 sm:$0xff]  }
 0xec6   :  { %16179 = vpow2.f32 %v13605_v49  ;;  %v15674_v49 = vld [vmem:[#allocation8 + $0x2c] ss:$16 sps:$4 sm:$0xff]   ;;  %v15672_v15 = vld [vmem:[#allocation8 + $0x28] ss:$16 sps:$4 sm:$0xff]   ;;  %v15677_v51 = vld [vmem:[#allocation8 + $0x4] ss:$16 sps:$4 sm:$0xff]  }
 0xec7   :  { %16181 = vpow2.f32 %v13606_v10  ;;  %v15680_v10 = vld [vmem:[#allocation8 + $0xc] ss:$16 sps:$4 sm:$0xff]  }
 0xed1   :  { %v16178_v17 = vpop.eup %16177 }
 0xed2   :  { %v10246_v26 = vadd.f32 1.0, %v16178_v17  ;;  %v15675_v17 = vld [vmem:[#allocation8] ss:$16 sps:$4 sm:$0xff]  }
 0xed3   :  { %v16180_v24 = vpop.eup %16179 }
 0xed4   :  { %16183 = vrcp.f32 %v10246_v26  ;;  %v10247_v25 = vadd.f32 1.0, %v16180_v24  ;;  %v16182_v53 = vpop.eup %16181  ;;  %v15683_v26 = vld [vmem:[#allocation8 + $0x1e4] ss:$16 sps:$4 sm:$0xff]   ;;  %v15686_v24 = vld [vmem:[#allocation8 + $0x1ec] ss:$16 sps:$4 sm:$0xff]  }
 0xed5   :  { %16185 = vtanh.f32 %v10236_v52  ;;  %v10248_v28 = vadd.f32 1.0, %v16182_v53  ;;  %v15678_v52 = vld [vmem:[#allocation8 + $0x8] ss:$16 sps:$4 sm:$0xff]   ;;  %v15681_v53 = vld [vmem:[#allocation8 + $0x1e0] ss:$16 sps:$4 sm:$0xff]  }
 0xed6   :  { %16187 = vrcp.f32 %v10247_v25  ;;  %v10852_v25 = vld [vmem:[#allocation2] sm:$0x3] }
 0xed7   :  { %16189 = vrcp.f32 %v10248_v28  ;;  %v15690_v28 = vld [vmem:[#allocation8 + $0x1c8] ss:$16 sps:$4 sm:$0xff]  }
 0xedd   :  { %v16706_v2 = vpop.f32.mrf.mxu0  ;;  %v16708_v4 = vpop.f32.mrf.mxu1 }
 0xedf   :  { %v16710_v6 = vpop.f32.mrf.mxu0  ;;  %v16712_v59 = vpop.f32.mrf.mxu1 }
 0xee1   :  { %v16184_v29 = vpop.eup %16183  ;;  %v10527_v23 = vpop.f32.mrf.mxu0 }
 0xee2   :  { %v10568_v60 = vpop.f32.mrf.mxu1  ;;  %v16186_v61 = vpop.eup %16185  ;;  %v10853_v23 = vpack.c.bf16 %v10852_v25, %v10852_v25  ;;  %v15755_v25 = vld [vmem:[#allocation5 + $0x164] ss:$16 sps:$4 sm:$0xff]  }
 0xee3   :  { %v16188_v56 = vpop.eup %16187  ;;  %v10528_v3 = vpop.f32.mrf.mxu0  ;;  %v10258_v19 = vmul.f32 %v16186_v61, %v16184_v29  ;;  %v15684_v29 = vld [vmem:[#allocation8 + $0x1e8] ss:$16 sps:$4 sm:$0xff]   ;;  %v15689_v60 = vld [vmem:[#allocation8 + $0x1c4] ss:$16 sps:$4 sm:$0xff]   ;;  %v15692_v61 = vld [vmem:[#allocation8 + $0x1cc] ss:$16 sps:$4 sm:$0xff]  }
 0xee4   :  { %v10569_v5 = vpop.f32.mrf.mxu1  ;;  %v10257_v37 = vmul.f32 %v16188_v56, %v10256_v34  ;;  %v16190_v7 = vpop.eup %16189  ;;  %v15687_v56 = vld [vmem:[#allocation8 + $0x1c0] ss:$16 sps:$4 sm:$0xff]   ;;  %v15695_v34 = vld [vmem:[#allocation8 + $0x1a4] ss:$16 sps:$4 sm:$0xff]   ;;  %v15698_v3 = vld [vmem:[#allocation8 + $0x1ac] ss:$16 sps:$4 sm:$0xff]  }
 0xee5   :  { %v15693_v5 = vld [vmem:[#allocation8 + $0x1a0] ss:$16 sps:$4 sm:$0xff]  }
 0xee6   :  { %v10259_v9 = vadd.f32 %v10258_v19, %v10257_v37  ;;  %v15696_v37 = vld [vmem:[#allocation8 + $0x1a8] ss:$16 sps:$4 sm:$0xff]   ;;  %v15701_v19 = vld [vmem:[#allocation8 + $0x184] ss:$16 sps:$4 sm:$0xff]  }
 0xee8   :  { %16191 = vtanh.f32 %v10259_v9  ;;  %10845 = vst [vmem:[#allocation3 + $0x2] sm:$0x3] %v10259_v9  ;;  %v15704_v9 = vld [vmem:[#allocation8 + $0x18c] ss:$16 sps:$4 sm:$0xff]  }
 0xef5   :  { %v16192_v58 = vpop.eup %16191 }
 0xef6   :  { %v10261_v11 = vmul.f32 %v16192_v58, %v16190_v7  ;;  %v15699_v7 = vld [vmem:[#allocation8 + $0x180] ss:$16 sps:$4 sm:$0xff]   ;;  %v15702_v58 = vld [vmem:[#allocation8 + $0x188] ss:$16 sps:$4 sm:$0xff]  }
 0xef8   :  { %v10262_v12 = vpack.c.bf16 %v10261_v11, %v10261_v11  ;;  %10844 = vst [vmem:[#allocation2 + $0x2] sm:$0x3] %v10261_v11  ;;  %v15707_v11 = vld [vmem:[#allocation8 + $0x164] ss:$16 sps:$4 sm:$0xff]  }
 0xefa   :  { %10764 = vmatmul.mubr.bf16.vlgmr.msra.gmra.mxu0 %v10262_v12  ;;  %10805 = vmatmul.mubr.bf16.vlgmr.msra.gmra.mxu1 %v10262_v12  ;;  %v15708_v12 = vld [vmem:[#allocation8 + $0x168] ss:$16 sps:$4 sm:$0xff]  }
 0xefb   :  { %11047 = vmatpush1.bf16.msra.mxu0 %v15633_v18  ;;  %11088 = vmatpush1.bf16.msra.mxu1 %v15636_v8  ;;  %v15710_v18 = vld [vmem:[#allocation8 + $0x16c] ss:$16 sps:$4 sm:$0xff]   ;;  %v15705_v8 = vld [vmem:[#allocation8 + $0x160] ss:$16 sps:$4 sm:$0xff]  }
 0xefc   :  { %11048 = vmatprep.subr.bf16.mxu0 %v15641_v46  ;;  %11089 = vmatprep.subr.bf16.mxu1 %v15644_v20  ;;  %v15713_v46 = vld [vmem:[#allocation8 + $0x144] ss:$16 sps:$4 sm:$0xff]   ;;  %v15716_v20 = vld [vmem:[#allocation8 + $0x14c] ss:$16 sps:$4 sm:$0xff]  }
 0xefd   :  { %11078 = vmatprep.mubr.bf16.mxu0 %v16327_v0  ;;  %11119 = vmatprep.mubr.bf16.mxu1 %v16327_v0 }
 0xeff   :  { %11049 = vmatpush1.bf16.msra.mxu0 %v15639_v21  ;;  %11090 = vmatpush1.bf16.msra.mxu1 %v15642_v13  ;;  %v15711_v21 = vld [vmem:[#allocation8 + $0x140] ss:$16 sps:$4 sm:$0xff]   ;;  %v15714_v13 = vld [vmem:[#allocation8 + $0x148] ss:$16 sps:$4 sm:$0xff]  }
 0xf00   :  { %11050 = vmatprep.subr.bf16.mxu0 %v15647_v30  ;;  %11091 = vmatprep.subr.bf16.mxu1 %v15650_v14  ;;  %v15719_v30 = vld [vmem:[#allocation8 + $0x124] ss:$16 sps:$4 sm:$0xff]   ;;  %v15722_v14 = vld [vmem:[#allocation8 + $0x12c] ss:$16 sps:$4 sm:$0xff]  }
 0xf03   :  { %11051 = vmatpush1.bf16.msra.mxu0 %v15645_v33  ;;  %11092 = vmatpush1.bf16.msra.mxu1 %v15648_v31  ;;  %v15717_v33 = vld [vmem:[#allocation8 + $0x120] ss:$16 sps:$4 sm:$0xff]   ;;  %v15720_v31 = vld [vmem:[#allocation8 + $0x128] ss:$16 sps:$4 sm:$0xff]  }
 0xf04   :  { %11052 = vmatprep.subr.bf16.mxu0 %v15653_v32  ;;  %11093 = vmatprep.subr.bf16.mxu1 %v15656_v43  ;;  %v15725_v32 = vld [vmem:[#allocation8 + $0x104] ss:$16 sps:$4 sm:$0xff]   ;;  %v15728_v43 = vld [vmem:[#allocation8 + $0x10c] ss:$16 sps:$4 sm:$0xff]  }
 0xf07   :  { %11053 = vmatpush1.bf16.msra.mxu0 %v15651_v35  ;;  %11094 = vmatpush1.bf16.msra.mxu1 %v15654_v36  ;;  %v15723_v35 = vld [vmem:[#allocation8 + $0x100] ss:$16 sps:$4 sm:$0xff]   ;;  %v15726_v36 = vld [vmem:[#allocation8 + $0x108] ss:$16 sps:$4 sm:$0xff]  }
 0xf08   :  { %11054 = vmatprep.subr.bf16.mxu0 %v15659_v47  ;;  %11095 = vmatprep.subr.bf16.mxu1 %v15662_v41  ;;  %v11205_v47 = vld [vmem:[#allocation2 + $0x2] sm:$0x3] }
 0xf09   :  { %v11206_v41 = vpack.c.bf16 %v11205_v47, %v11205_v47 }
 0xf0b   :  { %11055 = vmatpush1.bf16.msra.mxu0 %v15657_v48  ;;  %11096 = vmatpush1.bf16.msra.mxu1 %v15660_v38  ;;  %v15729_v48 = vld [vmem:[#allocation5 + $0x1e0] ss:$16 sps:$4 sm:$0xff]   ;;  %v15731_v38 = vld [vmem:[#allocation5 + $0x1e4] ss:$16 sps:$4 sm:$0xff]  }
 0xf0c   :  { %11056 = vmatprep.subr.bf16.mxu0 %v15665_v63  ;;  %11097 = vmatprep.subr.bf16.mxu1 %v15668_v62  ;;  %v15732_v63 = vld [vmem:[#allocation5 + $0x1e8] ss:$16 sps:$4 sm:$0xff]   ;;  %v15734_v62 = vld [vmem:[#allocation5 + $0x1ec] ss:$16 sps:$4 sm:$0xff]  }
 0xf0f   :  { %11057 = vmatpush1.bf16.msra.mxu0 %v15663_v45  ;;  %11098 = vmatpush1.bf16.msra.mxu1 %v15666_v40  ;;  %v15737_v45 = vld [vmem:[#allocation5 + $0x1c4] ss:$16 sps:$4 sm:$0xff]   ;;  %v15740_v40 = vld [vmem:[#allocation5 + $0x1cc] ss:$16 sps:$4 sm:$0xff]  }
 0xf10   :  { %11058 = vmatprep.subr.bf16.mxu0 %v15671_v54  ;;  %11099 = vmatprep.subr.bf16.mxu1 %v15674_v49  ;;  %v15735_v54 = vld [vmem:[#allocation5 + $0x1c0] ss:$16 sps:$4 sm:$0xff]   ;;  %v15738_v49 = vld [vmem:[#allocation5 + $0x1c8] ss:$16 sps:$4 sm:$0xff]  }
 0xf13   :  { %11059 = vmatpush1.bf16.msra.mxu0 %v15669_v50  ;;  %11100 = vmatpush1.bf16.msra.mxu1 %v15672_v15  ;;  %v15743_v50 = vld [vmem:[#allocation5 + $0x1a4] ss:$16 sps:$4 sm:$0xff]   ;;  %v15746_v15 = vld [vmem:[#allocation5 + $0x1ac] ss:$16 sps:$4 sm:$0xff]  }
 0xf14   :  { %11060 = vmatprep.subr.bf16.mxu0 %v15677_v51  ;;  %11101 = vmatprep.subr.bf16.mxu1 %v15680_v10  ;;  %v15741_v51 = vld [vmem:[#allocation5 + $0x1a0] ss:$16 sps:$4 sm:$0xff]   ;;  %v15744_v10 = vld [vmem:[#allocation5 + $0x1a8] ss:$16 sps:$4 sm:$0xff]  }
 0xf17   :  { %11061 = vmatpush1.bf16.msra.mxu0 %v15675_v17  ;;  %11102 = vmatpush1.bf16.msra.mxu1 %v15678_v52  ;;  %v15749_v17 = vld [vmem:[#allocation5 + $0x184] ss:$16 sps:$4 sm:$0xff]   ;;  %v15752_v52 = vld [vmem:[#allocation5 + $0x18c] ss:$16 sps:$4 sm:$0xff]  }
 0xf18   :  { %11399 = vmatprep.subr.bf16.mxu0 %v15683_v26  ;;  %11440 = vmatprep.subr.bf16.mxu1 %v15686_v24  ;;  %v15747_v26 = vld [vmem:[#allocation5 + $0x180] ss:$16 sps:$4 sm:$0xff]   ;;  %v15750_v24 = vld [vmem:[#allocation5 + $0x188] ss:$16 sps:$4 sm:$0xff]  }
 0xf1a   :  { %11079 = vmatmul.mubr.bf16.vlgmr.msra.gmra.mxu0 %v10853_v23  ;;  %11120 = vmatmul.mubr.bf16.vlgmr.msra.gmra.mxu1 %v10853_v23  ;;  %v15756_v23 = vld [vmem:[#allocation5 + $0x168] ss:$16 sps:$4 sm:$0xff]  }
 0xf1b   :  { %11400 = vmatpush1.bf16.msra.mxu0 %v15681_v53  ;;  %11441 = vmatpush1.bf16.msra.mxu1 %v15684_v29  ;;  %v15758_v53 = vld [vmem:[#allocation5 + $0x16c] ss:$16 sps:$4 sm:$0xff]   ;;  %v15753_v29 = vld [vmem:[#allocation5 + $0x160] ss:$16 sps:$4 sm:$0xff]  }
 0xf1c   :  { %11401 = vmatprep.subr.bf16.mxu0 %v15689_v60  ;;  %11442 = vmatprep.subr.bf16.mxu1 %v15692_v61  ;;  %v15761_v60 = vld [vmem:[#allocation5 + $0x144] ss:$16 sps:$4 sm:$0xff]   ;;  %v15764_v61 = vld [vmem:[#allocation5 + $0x14c] ss:$16 sps:$4 sm:$0xff]  }
 0xf1d   :  { %11431 = vmatprep.mubr.bf16.mxu0 %v16327_v0  ;;  %11472 = vmatprep.mubr.bf16.mxu1 %v16327_v0 }
 0xf1f   :  { %11402 = vmatpush1.bf16.msra.mxu0 %v15687_v56  ;;  %11443 = vmatpush1.bf16.msra.mxu1 %v15690_v28  ;;  %v15759_v56 = vld [vmem:[#allocation5 + $0x140] ss:$16 sps:$4 sm:$0xff]   ;;  %v15762_v28 = vld [vmem:[#allocation5 + $0x148] ss:$16 sps:$4 sm:$0xff]  }
 0xf20   :  { %11403 = vmatprep.subr.bf16.mxu0 %v15695_v34  ;;  %11444 = vmatprep.subr.bf16.mxu1 %v15698_v3  ;;  %v15767_v34 = vld [vmem:[#allocation5 + $0x124] ss:$16 sps:$4 sm:$0xff]   ;;  %v15770_v3 = vld [vmem:[#allocation5 + $0x12c] ss:$16 sps:$4 sm:$0xff]  }
 0xf23   :  { %11404 = vmatpush1.bf16.msra.mxu0 %v15693_v5  ;;  %11445 = vmatpush1.bf16.msra.mxu1 %v15696_v37  ;;  %v15765_v5 = vld [vmem:[#allocation5 + $0x120] ss:$16 sps:$4 sm:$0xff]   ;;  %v15768_v37 = vld [vmem:[#allocation5 + $0x128] ss:$16 sps:$4 sm:$0xff]  }
 0xf24   :  { %11405 = vmatprep.subr.bf16.mxu0 %v15701_v19  ;;  %11446 = vmatprep.subr.bf16.mxu1 %v15704_v9  ;;  %v15773_v19 = vld [vmem:[#allocation5 + $0x104] ss:$16 sps:$4 sm:$0xff]   ;;  %v15776_v9 = vld [vmem:[#allocation5 + $0x10c] ss:$16 sps:$4 sm:$0xff]  }
 0xf27   :  { %11406 = vmatpush1.bf16.msra.mxu0 %v15699_v7  ;;  %11447 = vmatpush1.bf16.msra.mxu1 %v15702_v58  ;;  %v15771_v7 = vld [vmem:[#allocation5 + $0x100] ss:$16 sps:$4 sm:$0xff]   ;;  %v15774_v58 = vld [vmem:[#allocation5 + $0x108] ss:$16 sps:$4 sm:$0xff]  }
 0xf28   :  { %11407 = vmatprep.subr.bf16.mxu0 %v15707_v11  ;;  %11448 = vmatprep.subr.bf16.mxu1 %v15710_v18  ;;  %v15779_v11 = vld [vmem:[#allocation8 + $0x2e4] ss:$16 sps:$4 sm:$0xff]   ;;  %v15782_v18 = vld [vmem:[#allocation8 + $0x2ec] ss:$16 sps:$4 sm:$0xff]  }
 0xf2b   :  { %11408 = vmatpush1.bf16.msra.mxu0 %v15705_v8  ;;  %11449 = vmatpush1.bf16.msra.mxu1 %v15708_v12 }
 0xf2c   :  { %11409 = vmatprep.subr.bf16.mxu0 %v15713_v46  ;;  %11450 = vmatprep.subr.bf16.mxu1 %v15716_v20 }
 0xf2f   :  { %11410 = vmatpush1.bf16.msra.mxu0 %v15711_v21  ;;  %11451 = vmatpush1.bf16.msra.mxu1 %v15714_v13 }
 0xf30   :  { %11411 = vmatprep.subr.bf16.mxu0 %v15719_v30  ;;  %11452 = vmatprep.subr.bf16.mxu1 %v15722_v14 }
 0xf33   :  { %11412 = vmatpush1.bf16.msra.mxu0 %v15717_v33  ;;  %11453 = vmatpush1.bf16.msra.mxu1 %v15720_v31 }
 0xf34   :  { %11413 = vmatprep.subr.bf16.mxu0 %v15725_v32  ;;  %11454 = vmatprep.subr.bf16.mxu1 %v15728_v43 }
 0xf37   :  { %11414 = vmatpush1.bf16.msra.mxu0 %v15723_v35  ;;  %11455 = vmatpush1.bf16.msra.mxu1 %v15726_v36 }
 0xf38   :  { %11644 = vmatprep.subr.bf16.mxu0 %v15731_v38  ;;  %11685 = vmatprep.subr.bf16.mxu1 %v15734_v62 }
 0xf3a   :  { %11432 = vmatmul.mubr.bf16.vlgmr.msra.gmra.mxu0 %v11206_v41  ;;  %11473 = vmatmul.mubr.bf16.vlgmr.msra.gmra.mxu1 %v11206_v41 }
 0xf3b   :  { %11676 = vmatprep.mubr.bf16.mxu0 %v16327_v0  ;;  %11717 = vmatprep.mubr.bf16.mxu1 %v16327_v0 }
 0xf3c   :  { %11645 = vmatpush1.bf16.msra.mxu0 %v15729_v48  ;;  %11686 = vmatpush1.bf16.msra.mxu1 %v15732_v63 }
 0xf3d   :  { %11646 = vmatprep.subr.bf16.mxu0 %v15737_v45  ;;  %11687 = vmatprep.subr.bf16.mxu1 %v15740_v40 }
 0xf40   :  { %11647 = vmatpush1.bf16.msra.mxu0 %v15735_v54  ;;  %11688 = vmatpush1.bf16.msra.mxu1 %v15738_v49 }
 0xf41   :  { %11648 = vmatprep.subr.bf16.mxu0 %v15743_v50  ;;  %11689 = vmatprep.subr.bf16.mxu1 %v15746_v15  ;;  %v10848_v50 = vld [vmem:[#allocation4 + $0x8] sm:$0xc0] }
 0xf44   :  { %11649 = vmatpush1.bf16.msra.mxu0 %v15741_v51  ;;  %11690 = vmatpush1.bf16.msra.mxu1 %v15744_v10 }
 0xf45   :  { %11650 = vmatprep.subr.bf16.mxu0 %v15749_v17  ;;  %11691 = vmatprep.subr.bf16.mxu1 %v15752_v52  ;;  %v10849_v52 = vld [vmem:[#allocation4 + $0x20] sm:$0xc0] }
 0xf48   :  { %11651 = vmatpush1.bf16.msra.mxu0 %v15747_v26  ;;  %11692 = vmatpush1.bf16.msra.mxu1 %v15750_v24 }
 0xf49   :  { %11652 = vmatprep.subr.bf16.mxu0 %v15755_v25  ;;  %11693 = vmatprep.subr.bf16.mxu1 %v15758_v53 }
 0xf4c   :  { %11653 = vmatpush1.bf16.msra.mxu0 %v15753_v29  ;;  %11694 = vmatpush1.bf16.msra.mxu1 %v15756_v23 }
 0xf4d   :  { %11654 = vmatprep.subr.bf16.mxu0 %v15761_v60  ;;  %11695 = vmatprep.subr.bf16.mxu1 %v15764_v61  ;;  %v10836_v61 = vld [vmem:[#allocation3 + $0x4] sm:$0x3] }
 0xf50   :  { %11655 = vmatpush1.bf16.msra.mxu0 %v15759_v56  ;;  %11696 = vmatpush1.bf16.msra.mxu1 %v15762_v28 }
 0xf51   :  { %11656 = vmatprep.subr.bf16.mxu0 %v15767_v34  ;;  %11697 = vmatprep.subr.bf16.mxu1 %v15770_v3 }
 0xf54   :  { %11657 = vmatpush1.bf16.msra.mxu0 %v15765_v5  ;;  %11698 = vmatpush1.bf16.msra.mxu1 %v15768_v37 }
 0xf55   :  { %11658 = vmatprep.subr.bf16.mxu0 %v15773_v19  ;;  %11699 = vmatprep.subr.bf16.mxu1 %v15776_v9  ;;  %v10850_v9 = vld [vmem:[#allocation4 + $0x28] sm:$0xc0] }
 0xf58   :  { %11659 = vmatpush1.bf16.msra.mxu0 %v15771_v7  ;;  %11700 = vmatpush1.bf16.msra.mxu1 %v15774_v58 }
 0xf59   :  { %11982 = vmatprep.subr.bf16.mxu0 %v15779_v11  ;;  %12023 = vmatprep.subr.bf16.mxu1 %v15782_v18  ;;  %v10851_v18 = vld [vmem:[#allocation4 + $0x38] sm:$0xc0] }
 0xfba   :  { %v10765_v8 = vpop.f32.mrf.mxu0  ;;  %v10806_v12 = vpop.f32.mrf.mxu1 }
 0xfbb   :  { %v10766_v46 = vadd.f32 %v10765_v8, %v16706_v2  ;;  %v10807_v47 = vadd.f32 %v10806_v12, %v16708_v4 }
 0xfbc   :  { %v10767_v20 = vpop.f32.mrf.mxu0  ;;  %v10808_v21 = vpop.f32.mrf.mxu1 }
 0xfbd   :  { %v10813_v13 = vadd.f32 %v10766_v46, %v16457_v22  ;;  %v10768_v30 = vadd.f32 %v10767_v20, %v16710_v6  ;;  %v10815_v2 = vadd.f32 %v10807_v47, %v16467_v16  ;;  %v10809_v41 = vadd.f32 %v10808_v21, %v16712_v59 }
 0xfbe   :  { %v10769_v14 = vpop.f32.mrf.mxu0  ;;  %v10810_v33 = vpop.f32.mrf.mxu1 }
 0xfbf   :  { %v13671_v31 = vmul.f32 -1.442695, %v10813_v13  ;;  %v10814_v32 = vadd.f32 %v10768_v30, %v16460_v27  ;;  %v13673_v48 = vmul.f32 -1.442695, %v10815_v2  ;;  %v10816_v6 = vadd.f32 %v10809_v41, %v16472_v44 }
 0xfc0   :  { %v10770_v43 = vpop.f32.mrf.mxu0  ;;  %v10811_v35 = vpop.f32.mrf.mxu1 }
 0xfc1   :  { %16193 = vpow2.f32 %v13671_v31  ;;  %v13672_v36 = vmul.f32 -1.442695, %v10814_v32  ;;  %v11163_v32 = vld [vmem:[#allocation3] sm:$0x3] }
 0xfc3   :  { %16195 = vpow2.f32 %v13672_v36 }
 0xfc4   :  { %16197 = vpow2.f32 %v13673_v48 }
 0xfce   :  { %v16194_v38 = vpop.eup %16193 }
 0xfcf   :  { %v10826_v63 = vadd.f32 1.0, %v16194_v38  ;;  %v11165_v38 = vrot.slane %v11163_v32, 2 }
 0xfd0   :  { %v16196_v62 = vpop.eup %16195 }
 0xfd1   :  { %16199 = vrcp.f32 %v10826_v63  ;;  %v10827_v45 = vadd.f32 1.0, %v16196_v62  ;;  %v16198_v51 = vpop.eup %16197 }
 0xfd2   :  { %16201 = vtanh.f32 %v10816_v6  ;;  %v10828_v60 = vadd.f32 1.0, %v16198_v51 }
 0xfd3   :  { %16203 = vrcp.f32 %v10827_v45 }
 0xfda   :  { %v11080_v40 = vpop.f32.mrf.mxu0  ;;  %v11121_v54 = vpop.f32.mrf.mxu1 }
 0xfdb   :  { %v11132_v49 = vrot.slane %v11080_v40, 2  ;;  %v11134_v19 = vrot.slane %v11121_v54, 2 }
 0xfdc   :  { %v11082_v4 = vpop.f32.mrf.mxu0  ;;  %v11123_v15 = vpop.f32.mrf.mxu1 }
 0xfdd   :  { %v11140_v10 = vadd.f32 %v11132_v49, %v10848_v50  ;;  %v11133_v59 = vrot.slane %v11082_v4, 2  ;;  %v11142_v7 = vadd.f32 %v11134_v19, %v10850_v9  ;;  %v11135_v58 = vrot.slane %v11123_v15, 2  ;;  %v15804_v19 = vld [vmem:[#allocation8 + $0x268] ss:$16 sps:$4 sm:$0xff]   ;;  %v15809_v9 = vld [vmem:[#allocation8 + $0x244] ss:$16 sps:$4 sm:$0xff]  }
 0xfde   :  { %v16200_v17 = vpop.eup %16199  ;;  %v11084_v26 = vpop.f32.mrf.mxu0 }
 0xfdf   :  { %v11125_v24 = vpop.f32.mrf.mxu1  ;;  %v16202_v25 = vpop.eup %16201  ;;  %v13706_v53 = vmul.f32 -1.442695, %v11140_v10  ;;  %v11141_v29 = vadd.f32 %v11133_v59, %v10849_v52  ;;  %v13708_v11 = vmul.f32 -1.442695, %v11142_v7  ;;  %v11143_v12 = vadd.f32 %v11135_v58, %v10851_v18  ;;  %v15777_v10 = vld [vmem:[#allocation8 + $0x2e0] ss:$16 sps:$4 sm:$0xff]  }
 0xfe0   :  { %v16204_v23 = vpop.eup %16203  ;;  %v11085_v56 = vpop.f32.mrf.mxu0  ;;  %v10838_v3 = vmul.f32 %v16202_v25, %v16200_v17  ;;  %v15780_v59 = vld [vmem:[#allocation8 + $0x2e8] ss:$16 sps:$4 sm:$0xff]   ;;  %v15785_v52 = vld [vmem:[#allocation8 + $0x2c4] ss:$16 sps:$4 sm:$0xff]   ;;  %v15788_v26 = vld [vmem:[#allocation8 + $0x2cc] ss:$16 sps:$4 sm:$0xff]  }
 0xfe1   :  { %v11126_v28 = vpop.f32.mrf.mxu1  ;;  %v10837_v34 = vmul.f32 %v16204_v23, %v10836_v61  ;;  %16205 = vpow2.f32 %v13706_v53  ;;  %v13707_v5 = vmul.f32 -1.442695, %v11141_v29  ;;  %v15783_v24 = vld [vmem:[#allocation8 + $0x2c0] ss:$16 sps:$4 sm:$0xff]   ;;  %v15786_v25 = vld [vmem:[#allocation8 + $0x2c8] ss:$16 sps:$4 sm:$0xff]  }
 0xfe2   :  { %v15791_v53 = vld [vmem:[#allocation8 + $0x2a4] ss:$16 sps:$4 sm:$0xff]   ;;  %v15794_v29 = vld [vmem:[#allocation8 + $0x2ac] ss:$16 sps:$4 sm:$0xff]   ;;  %v15789_v23 = vld [vmem:[#allocation8 + $0x2a0] ss:$16 sps:$4 sm:$0xff]  }
 0xfe3   :  { %v10839_v37 = vadd.f32 %v10838_v3, %v10837_v34  ;;  %16207 = vpow2.f32 %v13707_v5  ;;  %v15797_v61 = vld [vmem:[#allocation8 + $0x284] ss:$16 sps:$4 sm:$0xff]   ;;  %v15800_v56 = vld [vmem:[#allocation8 + $0x28c] ss:$16 sps:$4 sm:$0xff]   ;;  %v15795_v28 = vld [vmem:[#allocation8 + $0x280] ss:$16 sps:$4 sm:$0xff]  }
 0xfe4   :  { %16209 = vrcp.f32 %v10828_v60  ;;  %v15792_v60 = vld [vmem:[#allocation8 + $0x2a8] ss:$16 sps:$4 sm:$0xff]   ;;  %v15803_v3 = vld [vmem:[#allocation8 + $0x264] ss:$16 sps:$4 sm:$0xff]   ;;  %v15806_v5 = vld [vmem:[#allocation8 + $0x26c] ss:$16 sps:$4 sm:$0xff]  }
 0xfe5   :  { %16211 = vtanh.f32 %v10839_v37  ;;  %10847 = vst [vmem:[#allocation3 + $0x4] sm:$0x3] %v10839_v37  ;;  %v15798_v34 = vld [vmem:[#allocation8 + $0x288] ss:$16 sps:$4 sm:$0xff]   ;;  %v15801_v37 = vld [vmem:[#allocation8 + $0x260] ss:$16 sps:$4 sm:$0xff]  }
 0xfe6   :  { %16213 = vpow2.f32 %v13708_v11  ;;  %v15812_v7 = vld [vmem:[#allocation8 + $0x24c] ss:$16 sps:$4 sm:$0xff]   ;;  %v15807_v58 = vld [vmem:[#allocation8 + $0x240] ss:$16 sps:$4 sm:$0xff]   ;;  %v15810_v11 = vld [vmem:[#allocation8 + $0x248] ss:$16 sps:$4 sm:$0xff]  }
 0xfe7   :  { %v15815_v18 = vld [vmem:[#allocation8 + $0x224] ss:$16 sps:$4 sm:$0xff]  }
 0xfee   :  { %v16206_v8 = vpop.eup %16205 }
 0xfef   :  { %v11153_v46 = vadd.f32 1.0, %v16206_v8  ;;  %v15818_v8 = vld [vmem:[#allocation8 + $0x22c] ss:$16 sps:$4 sm:$0xff]  }
 0xff0   :  { %v16208_v20 = vpop.eup %16207 }
 0xff1   :  { %v16210_v21 = vpop.eup %16209  ;;  %16215 = vrcp.f32 %v11153_v46  ;;  %v11154_v13 = vadd.f32 1.0, %v16208_v20  ;;  %v15816_v46 = vld [vmem:[#allocation8 + $0x228] ss:$16 sps:$4 sm:$0xff]   ;;  %v15821_v20 = vld [vmem:[#allocation8 + $0x204] ss:$16 sps:$4 sm:$0xff]  }
 0xff2   :  { %v16212_v30 = vpop.eup %16211  ;;  %16217 = vtanh.f32 %v11143_v12  ;;  %v15813_v12 = vld [vmem:[#allocation8 + $0x220] ss:$16 sps:$4 sm:$0xff]  }
 0xff3   :  { %v10841_v14 = vmul.f32 %v16212_v30, %v16210_v21  ;;  %16219 = vrcp.f32 %v11154_v13  ;;  %v16214_v36 = vpop.eup %16213  ;;  %v15824_v21 = vld [vmem:[#allocation8 + $0x20c] ss:$16 sps:$4 sm:$0xff]   ;;  %v15819_v13 = vld [vmem:[#allocation8 + $0x200] ss:$16 sps:$4 sm:$0xff]   ;;  %v15822_v30 = vld [vmem:[#allocation8 + $0x208] ss:$16 sps:$4 sm:$0xff]  }
 0xff4   :  { %v11155_v63 = vadd.f32 1.0, %v16214_v36  ;;  %v15825_v36 = vld [vmem:[#allocation5 + $0x2e0] ss:$16 sps:$4 sm:$0xff]  }
 0xff5   :  { %10846 = vst [vmem:[#allocation2 + $0x4] sm:$0x3] %v10841_v14 }
 0xff6   :  { %16221 = vrcp.f32 %v11155_v63  ;;  %v15834_v63 = vld [vmem:[#allocation5 + $0x2c8] ss:$16 sps:$4 sm:$0xff]  }
 0xffa   :  { %v16728_v33 = vpop.f32.mrf.mxu0  ;;  %v16730_v31 = vpop.f32.mrf.mxu1 }
 0xffc   :  { %v16732_v43 = vpop.f32.mrf.mxu0  ;;  %v16734_v35 = vpop.f32.mrf.mxu1  ;;  %v11788_v14 = vld [vmem:[#allocation2 + $0x4] sm:$0x3] }
 0xffd   :  { %v11789_v32 = vpack.c.bf16 %v11788_v14, %v11788_v14 }
 0xffe   :  { %v16216_v47 = vpop.eup %16215  ;;  %v11437_v2 = vpop.f32.mrf.mxu0 }
 0xfff   :  { %v11478_v41 = vpop.f32.mrf.mxu1  ;;  %v16218_v48 = vpop.eup %16217  ;;  %v15828_v2 = vld [vmem:[#allocation5 + $0x2e8] ss:$16 sps:$4 sm:$0xff]  }
0x1000   :  { %v16220_v6 = vpop.eup %16219  ;;  %v11438_v62 = vpop.f32.mrf.mxu0  ;;  %v11168_v54 = vmul.f32 %v16218_v48, %v16216_v47  ;;  %v15827_v47 = vld [vmem:[#allocation5 + $0x2e4] ss:$16 sps:$4 sm:$0xff]   ;;  %v15830_v41 = vld [vmem:[#allocation5 + $0x2ec] ss:$16 sps:$4 sm:$0xff]  }
0x1001   :  { %v11479_v45 = vpop.f32.mrf.mxu1  ;;  %v11167_v40 = vmul.f32 %v16220_v6, %v11165_v38  ;;  %v15833_v48 = vld [vmem:[#allocation5 + $0x2c4] ss:$16 sps:$4 sm:$0xff]   ;;  %v15836_v38 = vld [vmem:[#allocation5 + $0x2cc] ss:$16 sps:$4 sm:$0xff]   ;;  %v15831_v6 = vld [vmem:[#allocation5 + $0x2c0] ss:$16 sps:$4 sm:$0xff]  }
0x1002   :  { %v15839_v62 = vld [vmem:[#allocation5 + $0x2a4] ss:$16 sps:$4 sm:$0xff]   ;;  %v15842_v45 = vld [vmem:[#allocation5 + $0x2ac] ss:$16 sps:$4 sm:$0xff]  }
0x1003   :  { %v11169_v49 = vadd.f32 %v11168_v54, %v11167_v40  ;;  %v16222_v50 = vpop.eup %16221  ;;  %v15837_v40 = vld [vmem:[#allocation5 + $0x2a0] ss:$16 sps:$4 sm:$0xff]   ;;  %v15845_v54 = vld [vmem:[#allocation5 + $0x284] ss:$16 sps:$4 sm:$0xff]  }
0x1005   :  { %16223 = vtanh.f32 %v11169_v49  ;;  %12336 = vst [vmem:[#allocation3 - $0x6] sm:$0xc0] %v11169_v49  ;;  %v15848_v49 = vld [vmem:[#allocation5 + $0x28c] ss:$16 sps:$4 sm:$0xff]  }
0x1012   :  { %v16224_v4 = vpop.eup %16223 }
0x1013   :  { %v11171_v15 = vmul.f32 %v16224_v4, %v16222_v50  ;;  %v15843_v50 = vld [vmem:[#allocation5 + $0x280] ss:$16 sps:$4 sm:$0xff]   ;;  %v15846_v4 = vld [vmem:[#allocation5 + $0x288] ss:$16 sps:$4 sm:$0xff]  }
0x1015   :  { %v11172_v51 = vpack.c.bf16 %v11171_v15, %v11171_v15  ;;  %12335 = vst [vmem:[#allocation2 - $0x6] sm:$0xc0] %v11171_v15  ;;  %v15851_v15 = vld [vmem:[#allocation5 + $0x264] ss:$16 sps:$4 sm:$0xff]  }
0x1017   :  { %v11482_v17 = vrot.slane %v11172_v51, 3  ;;  %v15854_v51 = vld [vmem:[#allocation5 + $0x26c] ss:$16 sps:$4 sm:$0xff]  }
0x1019   :  { %11677 = vmatmul.mubr.bf16.vlgmr.msra.gmra.mxu0 %v11482_v17  ;;  %11718 = vmatmul.mubr.bf16.vlgmr.msra.gmra.mxu1 %v11482_v17  ;;  %v15857_v17 = vld [vmem:[#allocation5 + $0x244] ss:$16 sps:$4 sm:$0xff]  }
0x101a   :  { %11983 = vmatpush1.bf16.msra.mxu0 %v15777_v10  ;;  %12024 = vmatpush1.bf16.msra.mxu1 %v15780_v59  ;;  %v15849_v10 = vld [vmem:[#allocation5 + $0x260] ss:$16 sps:$4 sm:$0xff]   ;;  %v15852_v59 = vld [vmem:[#allocation5 + $0x268] ss:$16 sps:$4 sm:$0xff]  }
0x101b   :  { %11984 = vmatprep.subr.bf16.mxu0 %v15785_v52  ;;  %12025 = vmatprep.subr.bf16.mxu1 %v15788_v26  ;;  %v15860_v52 = vld [vmem:[#allocation5 + $0x24c] ss:$16 sps:$4 sm:$0xff]   ;;  %v15855_v26 = vld [vmem:[#allocation5 + $0x240] ss:$16 sps:$4 sm:$0xff]  }
0x101c   :  { %12014 = vmatprep.mubr.bf16.mxu0 %v16327_v0  ;;  %12055 = vmatprep.mubr.bf16.mxu1 %v16327_v0 }
0x101e   :  { %11985 = vmatpush1.bf16.msra.mxu0 %v15783_v24  ;;  %12026 = vmatpush1.bf16.msra.mxu1 %v15786_v25  ;;  %v15858_v24 = vld [vmem:[#allocation5 + $0x248] ss:$16 sps:$4 sm:$0xff]   ;;  %v15863_v25 = vld [vmem:[#allocation5 + $0x224] ss:$16 sps:$4 sm:$0xff]  }
0x101f   :  { %11986 = vmatprep.subr.bf16.mxu0 %v15791_v53  ;;  %12027 = vmatprep.subr.bf16.mxu1 %v15794_v29  ;;  %v15866_v53 = vld [vmem:[#allocation5 + $0x22c] ss:$16 sps:$4 sm:$0xff]   ;;  %v15861_v29 = vld [vmem:[#allocation5 + $0x220] ss:$16 sps:$4 sm:$0xff]  }
0x1022   :  { %11987 = vmatpush1.bf16.msra.mxu0 %v15789_v23  ;;  %12028 = vmatpush1.bf16.msra.mxu1 %v15792_v60  ;;  %v15864_v23 = vld [vmem:[#allocation5 + $0x228] ss:$16 sps:$4 sm:$0xff]   ;;  %v15869_v60 = vld [vmem:[#allocation5 + $0x204] ss:$16 sps:$4 sm:$0xff]  }
0x1023   :  { %11988 = vmatprep.subr.bf16.mxu0 %v15797_v61  ;;  %12029 = vmatprep.subr.bf16.mxu1 %v15800_v56  ;;  %v15872_v61 = vld [vmem:[#allocation5 + $0x20c] ss:$16 sps:$4 sm:$0xff]   ;;  %v15867_v56 = vld [vmem:[#allocation5 + $0x200] ss:$16 sps:$4 sm:$0xff]  }
0x1026   :  { %11989 = vmatpush1.bf16.msra.mxu0 %v15795_v28  ;;  %12030 = vmatpush1.bf16.msra.mxu1 %v15798_v34  ;;  %v15870_v28 = vld [vmem:[#allocation5 + $0x208] ss:$16 sps:$4 sm:$0xff]  }
0x1027   :  { %11990 = vmatprep.subr.bf16.mxu0 %v15803_v3  ;;  %12031 = vmatprep.subr.bf16.mxu1 %v15806_v5 }
0x102a   :  { %11991 = vmatpush1.bf16.msra.mxu0 %v15801_v37  ;;  %12032 = vmatpush1.bf16.msra.mxu1 %v15804_v19 }
0x102b   :  { %11992 = vmatprep.subr.bf16.mxu0 %v15809_v9  ;;  %12033 = vmatprep.subr.bf16.mxu1 %v15812_v7 }
0x102e   :  { %11993 = vmatpush1.bf16.msra.mxu0 %v15807_v58  ;;  %12034 = vmatpush1.bf16.msra.mxu1 %v15810_v11 }
0x102f   :  { %11994 = vmatprep.subr.bf16.mxu0 %v15815_v18  ;;  %12035 = vmatprep.subr.bf16.mxu1 %v15818_v8 }
0x1032   :  { %11995 = vmatpush1.bf16.msra.mxu0 %v15813_v12  ;;  %12036 = vmatpush1.bf16.msra.mxu1 %v15816_v46 }
0x1033   :  { %11996 = vmatprep.subr.bf16.mxu0 %v15821_v20  ;;  %12037 = vmatprep.subr.bf16.mxu1 %v15824_v21 }
0x1036   :  { %11997 = vmatpush1.bf16.msra.mxu0 %v15819_v13  ;;  %12038 = vmatpush1.bf16.msra.mxu1 %v15822_v30 }
0x1037   :  { %12224 = vmatprep.subr.bf16.mxu0 %v15827_v47  ;;  %12265 = vmatprep.subr.bf16.mxu1 %v15830_v41 }
0x1039   :  { %12015 = vmatmul.mubr.bf16.vlgmr.msra.gmra.mxu0 %v11789_v32  ;;  %12056 = vmatmul.mubr.bf16.vlgmr.msra.gmra.mxu1 %v11789_v32 }
0x103a   :  { %12256 = vmatprep.mubr.bf16.mxu0 %v16327_v0  ;;  %12297 = vmatprep.mubr.bf16.mxu1 %v16327_v0  ;;  %v15840_v0 = vld [vmem:[#allocation5 + $0x2a8] ss:$16 sps:$4 sm:$0xff]  }
0x103b   :  { %12225 = vmatpush1.bf16.msra.mxu0 %v15825_v36  ;;  %12266 = vmatpush1.bf16.msra.mxu1 %v15828_v2 }
0x103c   :  { %12226 = vmatprep.subr.bf16.mxu0 %v15833_v48  ;;  %12267 = vmatprep.subr.bf16.mxu1 %v15836_v38 }
0x103f   :  { %12227 = vmatpush1.bf16.msra.mxu0 %v15831_v6  ;;  %12268 = vmatpush1.bf16.msra.mxu1 %v15834_v63  ;;  %v11749_v63 = vld [vmem:[#allocation3 + $0x2] sm:$0x3] }
0x1040   :  { %12228 = vmatprep.subr.bf16.mxu0 %v15839_v62  ;;  %12269 = vmatprep.subr.bf16.mxu1 %v15842_v45 }
0x1043   :  { %12229 = vmatpush1.bf16.msra.mxu0 %v15837_v40  ;;  %12270 = vmatpush1.bf16.msra.mxu1 %v15840_v0 }
0x1044   :  { %12230 = vmatprep.subr.bf16.mxu0 %v15845_v54  ;;  %12271 = vmatprep.subr.bf16.mxu1 %v15848_v49 }
0x1047   :  { %12231 = vmatpush1.bf16.msra.mxu0 %v15843_v50  ;;  %12272 = vmatpush1.bf16.msra.mxu1 %v15846_v4 }
0x1048   :  { %12232 = vmatprep.subr.bf16.mxu0 %v15851_v15  ;;  %12273 = vmatprep.subr.bf16.mxu1 %v15854_v51  ;;  %v12360_v51 = vld [vmem:[%s16839_s4 + $0x78] sm:$0xff] }
0x104b   :  { %12233 = vmatpush1.bf16.msra.mxu0 %v15849_v10  ;;  %12274 = vmatpush1.bf16.msra.mxu1 %v15852_v59  ;;  %v12359_v10 = vld [vmem:[%s16839_s4 + $0x70] sm:$0xff]  ;;  %v12358_v59 = vld [vmem:[%s16839_s4 + $0x68] sm:$0xff] }
0x104c   :  { %12234 = vmatprep.subr.bf16.mxu0 %v15857_v17  ;;  %12275 = vmatprep.subr.bf16.mxu1 %v15860_v52  ;;  %v12357_v17 = vld [vmem:[%s16839_s4 + $0x60] sm:$0xff]  ;;  %v12356_v52 = vld [vmem:[%s16839_s4 + $0x58] sm:$0xff] }
0x104f   :  { %12235 = vmatpush1.bf16.msra.mxu0 %v15855_v26  ;;  %12276 = vmatpush1.bf16.msra.mxu1 %v15858_v24  ;;  %v12355_v26 = vld [vmem:[%s16839_s4 + $0x50] sm:$0xff]  ;;  %v12354_v24 = vld [vmem:[%s16839_s4 + $0x48] sm:$0xff] }
0x1050   :  { %12236 = vmatprep.subr.bf16.mxu0 %v15863_v25  ;;  %12277 = vmatprep.subr.bf16.mxu1 %v15866_v53  ;;  %v12353_v25 = vld [vmem:[%s16839_s4 + $0x40] sm:$0xff]  ;;  %v12352_v53 = vld [vmem:[%s16839_s4 + $0x38] sm:$0xff] }
0x1053   :  { %12237 = vmatpush1.bf16.msra.mxu0 %v15861_v29  ;;  %12278 = vmatpush1.bf16.msra.mxu1 %v15864_v23  ;;  %v12351_v29 = vld [vmem:[%s16839_s4 + $0x30] sm:$0xff]  ;;  %v12350_v23 = vld [vmem:[%s16839_s4 + $0x28] sm:$0xff] }
0x1054   :  { %12238 = vmatprep.subr.bf16.mxu0 %v15869_v60  ;;  %12279 = vmatprep.subr.bf16.mxu1 %v15872_v61  ;;  %v12349_v60 = vld [vmem:[%s16839_s4 + $0x20] sm:$0xff]  ;;  %v12348_v61 = vld [vmem:[%s16839_s4 + $0x18] sm:$0xff] }
0x1057   :  { %12239 = vmatpush1.bf16.msra.mxu0 %v15867_v56  ;;  %12280 = vmatpush1.bf16.msra.mxu1 %v15870_v28  ;;  %v12347_v56 = vld [vmem:[%s16839_s4 + $0x10] sm:$0xff]  ;;  %v12346_v28 = vld [vmem:[%s16839_s4 + $0x8] sm:$0xff] }
0x1058   :  { %13861 = vmatprep.subr.mxu0 %v16328_v1 }
0x10d9   :  { %v11678_v34 = vpop.f32.mrf.mxu0  ;;  %v11719_v3 = vpop.f32.mrf.mxu1 }
0x10da   :  { %v11679_v5 = vadd.f32 %v11678_v34, %v16728_v33  ;;  %v11720_v21 = vadd.f32 %v11719_v3, %v16730_v31  ;;  %v12345_v34 = vld [vmem:[%s16839_s4] sm:$0xff] }
0x10db   :  { %v11680_v37 = vpop.f32.mrf.mxu0  ;;  %v11721_v19 = vpop.f32.mrf.mxu1 }
0x10dc   :  { %v11726_v9 = vadd.f32 %v11679_v5, %v16420_v39  ;;  %v11681_v7 = vadd.f32 %v11680_v37, %v16732_v43  ;;  %v11728_v33 = vadd.f32 %v11720_v21, %v16430_v55  ;;  %v11722_v13 = vadd.f32 %v11721_v19, %v16734_v35 }
0x10dd   :  { %v11682_v58 = vpop.f32.mrf.mxu0  ;;  %v11723_v11 = vpop.f32.mrf.mxu1 }
0x10de   :  { %v13773_v18 = vmul.f32 -1.442695, %v11726_v9  ;;  %v11727_v8 = vadd.f32 %v11681_v7, %v16423_v42  ;;  %v13775_v30 = vmul.f32 -1.442695, %v11728_v33  ;;  %v11729_v43 = vadd.f32 %v11722_v13, %v16435_v57 }
0x10df   :  { %v11683_v12 = vpop.f32.mrf.mxu0  ;;  %v11724_v46 = vpop.f32.mrf.mxu1 }
0x10e0   :  { %16225 = vpow2.f32 %v13773_v18  ;;  %v13774_v20 = vmul.f32 -1.442695, %v11727_v8 }
0x10e2   :  { %16227 = vpow2.f32 %v13774_v20 }
0x10e3   :  { %16229 = vpow2.f32 %v13775_v30 }
0x10ed   :  { %v16226_v39 = vpop.eup %16225 }
0x10ee   :  { %v11739_v14 = vadd.f32 1.0, %v16226_v39 }
0x10ef   :  { %v16228_v32 = vpop.eup %16227 }
0x10f0   :  { %16231 = vrcp.f32 %v11739_v14  ;;  %v11740_v42 = vadd.f32 1.0, %v16228_v32  ;;  %v16230_v35 = vpop.eup %16229 }
0x10f1   :  { %16233 = vtanh.f32 %v11729_v43  ;;  %v11741_v6 = vadd.f32 1.0, %v16230_v35  ;;  %v12329_v35 = vld [vmem:[#allocation3 + $0x4] sm:$0x3] }
0x10f2   :  { %16235 = vrcp.f32 %v11740_v42 }
0x10f3   :  { %16237 = vrcp.f32 %v11741_v6 }
0x10f9   :  { %v16749_v36 = vpop.f32.mrf.mxu0  ;;  %v16751_v47 = vpop.f32.mrf.mxu1 }
0x10fb   :  { %v16753_v31 = vpop.f32.mrf.mxu0  ;;  %v16755_v55 = vpop.f32.mrf.mxu1 }
0x10fd   :  { %v16232_v2 = vpop.eup %16231  ;;  %v12020_v41 = vpop.f32.mrf.mxu0 }
0x10fe   :  { %v12061_v48 = vpop.f32.mrf.mxu1  ;;  %v16234_v57 = vpop.eup %16233 }
0x10ff   :  { %v16236_v38 = vpop.eup %16235  ;;  %v12021_v62 = vpop.f32.mrf.mxu0  ;;  %v11751_v0 = vmul.f32 %v16234_v57, %v16232_v2 }
0x1100   :  { %v12062_v45 = vpop.f32.mrf.mxu1  ;;  %v11750_v40 = vmul.f32 %v16236_v38, %v11749_v63  ;;  %v16238_v49 = vpop.eup %16237  ;;  %v13843_v38 = vld [vmem:[%s16840_s5] ss:$0 sm:$0xff] }
0x1102   :  { %v11752_v54 = vadd.f32 %v11751_v0, %v11750_v40 }
0x1104   :  { %16239 = vtanh.f32 %v11752_v54  ;;  %12338 = vst [vmem:[#allocation3 + $0x2] sm:$0x3] %v11752_v54 }
0x1111   :  { %v16240_v50 = vpop.eup %16239 }
0x1112   :  { %v11754_v4 = vmul.f32 %v16240_v50, %v16238_v49 }
0x1114   :  { %v11755_v15 = vpack.c.bf16 %v11754_v4, %v11754_v4  ;;  %12337 = vst [vmem:[#allocation2 + $0x2] sm:$0x3] %v11754_v4 }
0x1116   :  { %12257 = vmatmul.mubr.bf16.vlgmr.msra.gmra.mxu0 %v11755_v15  ;;  %12298 = vmatmul.mubr.bf16.vlgmr.msra.gmra.mxu1 %v11755_v15 }
0x1117   :  { %13862 = vmatpush3.msra.mxu0 %v12360_v51  ;;  %13893 = vmatprep.mubr.msk.f32.mxu0 %vm16329_vm0, %v16328_v1 }
0x1118   :  { %13863 = vmatprep.subr.mxu0 %v16328_v1 }
0x1119   :  { %13864 = vmatpush3.msra.mxu0 %v12359_v10 }
0x111a   :  { %13865 = vmatprep.subr.mxu0 %v16328_v1 }
0x111b   :  { %13866 = vmatpush3.msra.mxu0 %v12358_v59 }
0x111c   :  { %13867 = vmatprep.subr.mxu0 %v16328_v1 }
0x111d   :  { %13868 = vmatpush3.msra.mxu0 %v12357_v17 }
0x111e   :  { %13869 = vmatprep.subr.mxu0 %v16328_v1 }
0x111f   :  { %13870 = vmatpush3.msra.mxu0 %v12356_v52 }
0x1120   :  { %13871 = vmatprep.subr.mxu0 %v16328_v1 }
0x1121   :  { %13872 = vmatpush3.msra.mxu0 %v12355_v26 }
0x1122   :  { %13873 = vmatprep.subr.mxu0 %v16328_v1 }
0x1123   :  { %13874 = vmatpush3.msra.mxu0 %v12354_v24 }
0x1124   :  { %13875 = vmatprep.subr.mxu0 %v16328_v1 }
0x1125   :  { %13876 = vmatpush3.msra.mxu0 %v12353_v25 }
0x1126   :  { %13877 = vmatprep.subr.mxu0 %v16328_v1 }
0x1127   :  { %13878 = vmatpush3.msra.mxu0 %v12352_v53 }
0x1128   :  { %13879 = vmatprep.subr.mxu0 %v16328_v1 }
0x1129   :  { %13880 = vmatpush3.msra.mxu0 %v12351_v29 }
0x112a   :  { %13881 = vmatprep.subr.mxu0 %v16328_v1 }
0x112b   :  { %13882 = vmatpush3.msra.mxu0 %v12350_v23 }
0x112c   :  { %13883 = vmatprep.subr.mxu0 %v16328_v1 }
0x112d   :  { %13884 = vmatpush3.msra.mxu0 %v12349_v60 }
0x112e   :  { %13885 = vmatprep.subr.mxu0 %v16328_v1 }
0x112f   :  { %13886 = vmatpush3.msra.mxu0 %v12348_v61 }
0x1130   :  { %13887 = vmatprep.subr.mxu0 %v16328_v1 }
0x1131   :  { %13888 = vmatpush3.msra.mxu0 %v12347_v56 }
0x1132   :  { %13889 = vmatprep.subr.mxu0 %v16328_v1 }
0x1133   :  { %13890 = vmatpush3.msra.mxu0 %v12346_v28 }
0x1134   :  { %13891 = vmatprep.subr.mxu0 %v16328_v1 }
0x1135   :  { %13892 = vmatpush3.msra.mxu0 %v12345_v34 }
0x11d6   :  { %v12258_v3 = vpop.f32.mrf.mxu0  ;;  %v12299_v5 = vpop.f32.mrf.mxu1 }
0x11d7   :  { %v12259_v37 = vadd.f32 %v12258_v3, %v16749_v36  ;;  %v12300_v21 = vadd.f32 %v12299_v5, %v16751_v47 }
0x11d8   :  { %v12260_v19 = vpop.f32.mrf.mxu0  ;;  %v12301_v9 = vpop.f32.mrf.mxu1 }
0x11d9   :  { %v12306_v7 = vadd.f32 %v12259_v37, %v16457_v22  ;;  %v12261_v58 = vadd.f32 %v12260_v19, %v16753_v31  ;;  %v12308_v33 = vadd.f32 %v12300_v21, %v16467_v16  ;;  %v12302_v13 = vadd.f32 %v12301_v9, %v16755_v55 }
0x11da   :  { %v12262_v11 = vpop.f32.mrf.mxu0  ;;  %v12303_v18 = vpop.f32.mrf.mxu1 }
0x11db   :  { %v13840_v8 = vmul.f32 -1.442695, %v12306_v7  ;;  %v12307_v12 = vadd.f32 %v12261_v58, %v16460_v27  ;;  %v13842_v30 = vmul.f32 -1.442695, %v12308_v33  ;;  %v12309_v39 = vadd.f32 %v12302_v13, %v16472_v44 }
0x11dc   :  { %v12263_v46 = vpop.f32.mrf.mxu0  ;;  %v12304_v20 = vpop.f32.mrf.mxu1 }
0x11dd   :  { %16241 = vpow2.f32 %v13840_v8  ;;  %v13841_v1 = vmul.f32 -1.442695, %v12307_v12 }
0x11df   :  { %16243 = vpow2.f32 %v13841_v1 }
0x11e0   :  { %16245 = vpow2.f32 %v13842_v30 }
0x11ea   :  { %v16242_v22 = vpop.eup %16241 }
0x11eb   :  { %v12319_v43 = vadd.f32 1.0, %v16242_v22 }
0x11ec   :  { %v16244_v14 = vpop.eup %16243 }
0x11ed   :  { %16247 = vrcp.f32 %v12319_v43  ;;  %v12320_v27 = vadd.f32 1.0, %v16244_v14  ;;  %v16246_v32 = vpop.eup %16245 }
0x11ee   :  { %16249 = vtanh.f32 %v12309_v39  ;;  %v12321_v47 = vadd.f32 1.0, %v16246_v32 }
0x11ef   :  { %16251 = vrcp.f32 %v12320_v27 }
0x11f0   :  { %16253 = vrcp.f32 %v12321_v47 }
0x11fa   :  { %v16248_v42 = vpop.eup %16247 }
0x11fb   :  { %v16250_v36 = vpop.eup %16249 }
0x11fc   :  { %v16252_v31 = vpop.eup %16251  ;;  %v12331_v2 = vmul.f32 %v16250_v36, %v16248_v42 }
0x11fd   :  { %v12330_v16 = vmul.f32 %v16252_v31, %v12329_v35  ;;  %v16254_v44 = vpop.eup %16253 }
0x11ff   :  { %v12332_v55 = vadd.f32 %v12331_v2, %v12330_v16 }
0x1201   :  { %16255 = vtanh.f32 %v12332_v55  ;;  %12340 = vst [vmem:[#allocation3 + $0x4] sm:$0x3] %v12332_v55 }
0x120e   :  { %v16256_v41 = vpop.eup %16255 }
0x120f   :  { %v12334_v48 = vmul.f32 %v16256_v41, %v16254_v44 }
0x1211   :  { %12339 = vst [vmem:[#allocation2 + $0x4] sm:$0x3] %v12334_v48 }
0x1218   :  { %v12344_v57 = vld [vmem:[#allocation2 + $0x4] sm:$0x3] }
0x1219   :  { %13894 = vmatmul.mubr.f32.vlgmr.msra.gmra.mxu0 %v12344_v57 }
0x12d9   :  { %v12434_v6 = vpop.f32.mrf.mxu0 }
0x12da   :  { %v12435_v63 = vadd.f32 %v13843_v38, %v12434_v6 }
0x12db   :  { %v13895_v62 = vpop.f32.mrf.mxu0 }
0x12dc   :  { %12439 = vst.msk [vmem:[#allocation10] sm:$0x3] %vm12438_vm1, %v12435_v63 }
0x12dd   :  { %16308 = shalt.err (!%p16305_p0)
}
0x12de   :  { %12449 = dma.vmem_to_hbm [thread:$0]  %s12447_s19, 32, %s16841_s6, [#allocation7]  }
0x12df   :  { %16321 = dma.done.wait [#allocation7], 32  }
0x12e0   :  { %16322 = vsyncadd [#allocation7], 4294967264 }
0x12e1   :  { %12453 = vsyncpa [#allocation6], 1 }
0x12e2   :  { %12454 = vsyncpa [#allocation9], 1 }
0x12e3   :  { %12455 = vsyncpa [#allocation7], 1 }

</bundles_post_ra>
